<compile_context>
chip_gen: v7x
topology: tpu7x:2x2x1
jax: 0.10.0
libtpu: 0.0.40
codegen_flags: <defaults>
</compile_context>

<pallas_src>
import functools

import numpy as np
import jax
import jax.numpy as jnp
from jax import lax
from jax.experimental import pallas as pl
from jax.experimental.pallas import tpu as pltpu


# ------------------------------ fused kernel --------------------------------


def _cnn_lstm_fused_kernel(
    x_ref, wb1_ref, bt1_ref, wb2_ref, bt2_ref, wb3_ref, bt3_ref,
    fcw_ref, fcb_ref, lng_ref, lnb_ref, wx_ref, bx_ref, wh_ref,
    pw_ref, pb_ref, h0_ref, c0_ref,
    state_ref, hn_ref, cn_ref,
    s1a, s1b, s1c, y1_ref, s2a, s2b, s2c, y2_ref, s3a, s3b, s3c,
    *, N, B, T, Hd, img_h, img_w, eps, pretrain):
    """Whole CNNLSTM forward in one grid step; all intermediates stay in VMEM.

    x_ref : (H, N, (W+2)*C)  w-padded input rows, frame index n = t*B + b.
    wb*   : (3, (Win+2)*Cin, Wo*Cout) banded conv weights (per kh), columns
            ordered [even w | odd w] so the 2x2 pool partners are the halves.
    """

    def scatter_rows(read_row, slabs, hin, kdim):
        """Distribute w-padded input rows into the three per-kh matmul slabs.

        Slab kh layout (rows): [0, M)  = even conv rows, slot (m, n) -> m*N + n,
                                         holding padded input row 4m + kh;
                               [M, 2M) = odd  conv rows, holding row 4m + 2 + kh.
        Only the top-pad block (even half, kh=0, m=0) is never written -> zero it.
        """
        hh = hin // 4
        slabs[0][pl.ds(0, N), :] = jnp.zeros((N, kdim), jnp.float32)
        for h in range(hin):
            row = read_row(h)                      # (N, kdim), all frames at once
            q = h + 1                              # padded row index (1 top pad)
            r, m = q % 4, q // 4
            if r == 0:
                if m < hh:
                    slabs[0][pl.ds(m * N, N), :] = row              # even, kh=0
                slabs[2][pl.ds((hh + m - 1) * N, N), :] = row       # odd,  kh=2
            elif r == 1:
                slabs[1][pl.ds(m * N, N), :] = row                  # even, kh=1
            elif r == 2:
                slabs[2][pl.ds(m * N, N), :] = row                  # even, kh=2
                slabs[0][pl.ds((hh + m) * N, N), :] = row           # odd,  kh=0
            else:
                slabs[1][pl.ds((hh + m) * N, N), :] = row           # odd,  kh=1

    def conv_pool_relu(slabs, wb_ref, bt_ref, hin, win, cout):
        """Conv(k3,s2,p1) as 3 banded matmuls over merged [even|odd] parities,
        then 2x2 max-pool (h: max of the two M-halves, w: max of the contiguous
        column halves), bias and ReLU (both commute with the pooling max)."""
        m = N * (hin // 4)
        acc = jnp.dot(slabs[0][...], wb_ref[0],
                      preferred_element_type=jnp.float32)
        acc += jnp.dot(slabs[1][...], wb_ref[1],
                       preferred_element_type=jnp.float32)
        acc += jnp.dot(slabs[2][...], wb_ref[2],
                       preferred_element_type=jnp.float32)
        y = jnp.maximum(acc[:m], acc[m:])                       # pool over h
        half = (win // 4) * cout
        y = jnp.maximum(y[:, :half], y[:, half:])               # pool over w
        return jnp.maximum(y + bt_ref[...], 0.0)                # bias + ReLU

    def park_padded(dst_ref, y, cout):
        """w-pad (one zero pixel each side) and park in VMEM for the next layer."""
        zc = jnp.zeros((y.shape[0], cout), jnp.float32)
        dst_ref[...] = jnp.concatenate([zc, y, zc], axis=-1)

    # ---- conv layer 1:  (H, W, 3) -> (H/4, W/4, 16) ----
    k1 = (img_w + 2) * 3
    scatter_rows(lambda h: x_ref[h], (s1a, s1b, s1c), img_h, k1)
    y = conv_pool_relu((s1a, s1b, s1c), wb1_ref, bt1_ref, img_h, img_w, 16)
    park_padded(y1_ref, y, 16)

    # ---- conv layer 2:  (H/4, W/4, 16) -> (H/16, W/16, 32) ----
    h2, w2 = img_h // 4, img_w // 4
    k2 = (w2 + 2) * 16
    scatter_rows(lambda h: y1_ref[pl.ds(h * N, N), :], (s2a, s2b, s2c), h2, k2)
    y = conv_pool_relu((s2a, s2b, s2c), wb2_ref, bt2_ref, h2, w2, 32)
    park_padded(y2_ref, y, 32)

    # ---- conv layer 3:  (H/16, W/16, 32) -> (H/64, W/64, 32) ----
    h3, w3 = img_h // 16, img_w // 16
    k3 = (w3 + 2) * 32
    scatter_rows(lambda h: y2_ref[pl.ds(h * N, N), :], (s3a, s3b, s3c), h3, k3)
    flat = conv_pool_relu((s3a, s3b, s3c), wb3_ref, bt3_ref, h3, w3, 32)

    # rows of `flat` are (pooled_row, frame); with img_h == 64 there is a single
    # pooled row, so rows are already the frame index n = t*B + b.  For larger
    # H, fold the extra pooled rows onto the lane axis in (hq, wq, c) order.
    hq3 = img_h // 64
    if hq3 > 1:
        flat = jnp.concatenate(
            [flat[i * N:(i + 1) * N, :] for i in range(hq3)], axis=-1)

    # ---- fc -> LayerNorm -> LSTM input projection (gate order i|f|g|o) ----
    f = (jnp.dot(flat, fcw_ref[...], preferred_element_type=jnp.float32)
         + fcb_ref[...])
    mu = jnp.mean(f, axis=-1, keepdims=True)
    var = jnp.mean(jnp.square(f - mu), axis=-1, keepdims=True)
    f = (f - mu) * lax.rsqrt(var + eps) * lng_ref[...] + lnb_ref[...]
    xg = (jnp.dot(f, wx_ref[...], preferred_element_type=jnp.float32)
          + bx_ref[...])                                   # (N, 4H), rows t*B+b

    # ---- LSTM recurrence (static unroll over T) + projection epilogue ----
    h = h0_ref[...].astype(jnp.float32)
    c = c0_ref[...].astype(jnp.float32)
    wh = wh_ref[...]
    for t in range(T):
        pre = xg[t * B:(t + 1) * B, :] + jnp.dot(
            h, wh, preferred_element_type=jnp.float32)
        s = jax.nn.sigmoid(pre)                 # one full-(B,4H) EUP pass
        i_g = s[:, 0 * Hd:1 * Hd]
        f_g = s[:, 1 * Hd:2 * Hd]
        g_g = 2.0 * s[:, 2 * Hd:3 * Hd] - 1.0   # tanh via sigmoid (cols pre-scaled x2)
        o_g = s[:, 3 * Hd:4 * Hd]
        c = f_g * c + i_g * g_g
        h = o_g * jnp.tanh(c)

    hn_ref[...] = h.astype(hn_ref.dtype)
    cn_ref[...] = c.astype(cn_ref.dtype)
    if pretrain:
        state_ref[...] = (jnp.dot(h, pw_ref[...],
                                  preferred_element_type=jnp.float32)
                          + pb_ref[...]).astype(state_ref.dtype)
    else:
        state_ref[...] = h.astype(state_ref.dtype)


# --------------------------------- forward -----------------------------------


def cnn_lstm_forward(packed, seq, h0, c0, pretrain=True):
    """seq: (B, T, C, H, W) NCHW frames, as in the PyTorch module."""
    B, T, C, H, W = seq.shape
    N = B * T
    assert H % 64 == 0 and W % 64 == 0, "conv-stack kernel assumes /64 sizes"

    # The ONLY host-side layout work: one transpose (+pad) producing
    # (row h, frame n=t*B+b, w-padded lanes).  Everything else is in-kernel.
    x = seq.transpose(3, 1, 0, 4, 2).reshape(H, N, W, C)
    x = jnp.pad(x, ((0, 0), (0, 0), (1, 1), (0, 0))).reshape(H, N, (W + 2) * C)

    Hd = packed["wh_cat"].shape[0]
    out_dim = packed["proj_w"].shape[1] if pretrain else Hd
    f32 = jnp.float32

    scratch = [
        pltpu.VMEM((2 * N * (H // 4), (W + 2) * 3), f32),           # layer-1 slabs
        pltpu.VMEM((2 * N * (H // 4), (W + 2) * 3), f32),
        pltpu.VMEM((2 * N * (H // 4), (W + 2) * 3), f32),
        pltpu.VMEM((N * (H // 4), (W // 4 + 2) * 16), f32),         # layer-1 out (w-padded)
        pltpu.VMEM((2 * N * (H // 16), (W // 4 + 2) * 16), f32),    # layer-2 slabs
        pltpu.VMEM((2 * N * (H // 16), (W // 4 + 2) * 16), f32),
        pltpu.VMEM((2 * N * (H // 16), (W // 4 + 2) * 16), f32),
        pltpu.VMEM((N * (H // 16), (W // 16 + 2) * 32), f32),       # layer-2 out (w-padded)
        pltpu.VMEM((2 * N * (H // 64), (W // 16 + 2) * 32), f32),   # layer-3 slabs
        pltpu.VMEM((2 * N * (H // 64), (W // 16 + 2) * 32), f32),
        pltpu.VMEM((2 * N * (H // 64), (W // 16 + 2) * 32), f32),
    ]

    kernel = functools.partial(
        _cnn_lstm_fused_kernel, N=N, B=B, T=T, Hd=Hd,
        img_h=H, img_w=W, eps=1e-5, pretrain=pretrain)

    state, h_n, c_n = pl.pallas_call(
        kernel,
        out_shape=(jax.ShapeDtypeStruct((B, out_dim), f32),
                   jax.ShapeDtypeStruct((B, Hd), f32),
                   jax.ShapeDtypeStruct((B, Hd), f32)),
        scratch_shapes=scratch,
    )(x, packed["wb1"], packed["bt1"], packed["wb2"], packed["bt2"],
      packed["wb3"], packed["bt3"], packed["fc_w"], packed["fc_b"],
      packed["ln_g"], packed["ln_b"], packed["wx_cat"], packed["b_cat"],
      packed["wh_cat"], packed["proj_w"], packed["proj_b"], h0, c0)
    return state, (h_n[None], c_n[None])                            # (1, B, H)


# --------------------------- weight repacking --------------------------------


def make_banded_conv_weight(w, w_in):
    """(3,3,Cin,Cout) conv weight -> (3, (w_in+2)*Cin, Wo*Cout) banded matmul
    weight for a stride-2 conv over a w-padded row; output columns permuted to
    [even w | odd w] so the 2x2 max-pool partners are the contiguous halves."""
    w = np.asarray(w, np.float32)
    _, _, cin, cout = w.shape
    wo = w_in // 2
    wb = np.zeros((3, (w_in + 2) * cin, wo * cout), np.float32)
    for kh in range(3):
        for kw in range(3):
            for j in range(wo):
                col = j // 2 if j % 2 == 0 else wo // 2 + j // 2
                r0 = (2 * j + kw) * cin
                wb[kh, r0:r0 + cin, col * cout:(col + 1) * cout] = w[kh, kw]
    return jnp.asarray(wb)


def pack_params(p, img_hw):
    """One-time host-side repacking of the raw parameters for the fused kernel."""
    H, W = img_hw
    assert H % 64 == 0 and W % 64 == 0, "conv-stack kernel assumes /64 sizes"
    Hd = p["lstm_wh"].shape[-1]
    wx = jnp.concatenate([p["lstm_wx"][k] for k in range(4)], axis=1)
    wh = jnp.concatenate([p["lstm_wh"][k] for k in range(4)], axis=1)
    bb = jnp.concatenate([p["lstm_b"][k] for k in range(4)], axis=1)
    # tanh(x) = 2*sigmoid(2x) - 1: pre-scale the g-gate columns by 2 so the
    # kernel needs a single full-vreg sigmoid per step.
    gscale = jnp.concatenate(
        [jnp.ones((1, 2 * Hd), jnp.float32),
         jnp.full((1, Hd), 2.0, jnp.float32),
         jnp.ones((1, Hd), jnp.float32)], axis=1)
    return {
        "wb1": make_banded_conv_weight(p["w1"], W),
        "bt1": jnp.tile(p["b1"], (1, W // 4)),
        "wb2": make_banded_conv_weight(p["w2"], W // 4),
        "bt2": jnp.tile(p["b2"], (1, W // 16)),
        "wb3": make_banded_conv_weight(p["w3"], W // 16),
        "bt3": jnp.tile(p["b3"], (1, W // 64)),
        "fc_w": p["fc_w"], "fc_b": p["fc_b"],
        "ln_g": p["ln_g"], "ln_b": p["ln_b"],
        # PyTorch gate order (i, f, g, o); b_ih + b_hh folded into one bias.
        "wx_cat": wx * gscale, "wh_cat": wh * gscale, "b_cat": bb * gscale,
        "proj_w": p["proj_w"], "proj_b": p["proj_b"],
    }


def init_params(key, feature_dim=32, hidden_dim=32, state_dim=16, flat_dim=32):
    keys = jax.random.split(key, 13)

    def dense(k, shape, fan_in):
        return jax.random.normal(k, shape, jnp.float32) / jnp.sqrt(float(fan_in))

    return {
        "w1": dense(keys[0], (3, 3, 3, 16), 27),
        "b1": dense(keys[1], (1, 16), 27),
        "w2": dense(keys[2], (3, 3, 16, 32), 144),
        "b2": dense(keys[3], (1, 32), 144),
        "w3": dense(keys[4], (3, 3, 32, 32), 288),
        "b3": dense(keys[5], (1, 32), 288),
        "fc_w": dense(keys[6], (flat_dim, feature_dim), flat_dim),
        "fc_b": dense(keys[7], (1, feature_dim), flat_dim),
        "ln_g": jnp.ones((1, feature_dim), jnp.float32),
        "ln_b": jnp.zeros((1, feature_dim), jnp.float32),
        "lstm_wx": dense(keys[8], (4, feature_dim, hidden_dim), feature_dim),
        "lstm_wh": dense(keys[9], (4, hidden_dim, hidden_dim), hidden_dim),
        "lstm_b": dense(keys[10], (4, 1, hidden_dim), hidden_dim),
        "proj_w": dense(keys[11], (hidden_dim, state_dim), hidden_dim),
        "proj_b": dense(keys[12], (1, state_dim), hidden_dim),
    }


# --------------------------- pure-JAX reference ------------------------------


def reference_forward(params, seq, h0, c0, pretrain=True):
    B, T, C, H, W = seq.shape
    hp = lax.Precision.HIGHEST
    x = seq.reshape(B * T, C, H, W).transpose(0, 2, 3, 1)
    for wk, bk in (("w1", "b1"), ("w2", "b2"), ("w3", "b3")):
        x = lax.conv_general_dilated(
            x, params[wk], window_strides=(2, 2), padding=((1, 1), (1, 1)),
            dimension_numbers=("NHWC", "HWIO", "NHWC"), precision=hp)
        x = jnp.maximum(x + params[bk].reshape(1, 1, 1, -1), 0.0)
        x = lax.reduce_window(x, -jnp.inf, lax.max,
                              (1, 2, 2, 1), (1, 2, 2, 1), "VALID")
    x = x.reshape(B * T, -1)
    feat = jnp.dot(x, params["fc_w"], precision=hp) + params["fc_b"]
    mu = feat.mean(-1, keepdims=True)
    var = jnp.square(feat - mu).mean(-1, keepdims=True)
    feat = (feat - mu) / jnp.sqrt(var + 1e-5) * params["ln_g"] + params["ln_b"]
    feat = feat.reshape(B, T, -1)
    h, c = h0.astype(jnp.float32), c0.astype(jnp.float32)
    for t in range(T):
        xt = feat[:, t]

        def g(k):
            return (jnp.dot(xt, params["lstm_wx"][k], precision=hp)
                    + jnp.dot(h, params["lstm_wh"][k], precision=hp)
                    + params["lstm_b"][k])

        i, f = jax.nn.sigmoid(g(0)), jax.nn.sigmoid(g(1))
        gg, o = jnp.tanh(g(2)), jax.nn.sigmoid(g(3))
        c = f * c + i * gg
        h = o * jnp.tanh(c)
    state = h
    if pretrain:
        state = jnp.dot(h, params["proj_w"], precision=hp) + params["proj_b"]
    return state, (h[None], c[None])


# ----------------------------------- main ------------------------------------

if __name__ == "__main__":
    key = jax.random.PRNGKey(0)
    pkey, xkey, hkey, ckey = jax.random.split(key, 4)

    B, T, C, H, W = 2, 4, 3, 64, 64
    feature_dim, hidden_dim, state_dim = 32, 32, 16

    params = init_params(pkey, feature_dim, hidden_dim, state_dim,
                         flat_dim=(H // 64) * (W // 64) * 32)
    packed = pack_params(params, (H, W))
    seq = jax.random.normal(xkey, (B, T, C, H, W), jnp.float32)

    fwd = jax.jit(functools.partial(cnn_lstm_forward, pretrain=True))

    # default call (hidden=None in PyTorch -> zero initial state)
    h0 = jnp.zeros((B, hidden_dim), jnp.float32)
    c0 = jnp.zeros((B, hidden_dim), jnp.float32)
    state, (h_n, c_n) = fwd(packed, seq, h0, c0)
    jax.block_until_ready((state, h_n, c_n))

    ref_state, (ref_h, ref_c) = reference_forward(params, seq, h0, c0, True)
    assert state.shape == (B, state_dim)
    assert h_n.shape == c_n.shape == (1, B, hidden_dim)
    assert jnp.allclose(state, ref_state, atol=2e-3, rtol=2e-3)
    assert jnp.allclose(h_n, ref_h, atol=2e-3, rtol=2e-3)
    assert jnp.allclose(c_n, ref_c, atol=2e-3, rtol=2e-3)

    # externally supplied initial LSTM hidden state (hidden != None path)
    h0r = 0.1 * jax.random.normal(hkey, (B, hidden_dim), jnp.float32)
    c0r = 0.1 * jax.random.normal(ckey, (B, hidden_dim), jnp.float32)
    state2, (h_n2, c_n2) = fwd(packed, seq, h0r, c0r)
    jax.block_until_ready((state2, h_n2, c_n2))
    ref2, (rh2, rc2) = reference_forward(params, seq, h0r, c0r, True)
    assert jnp.allclose(state2, ref2, atol=2e-3, rtol=2e-3)
    assert jnp.allclose(h_n2, rh2, atol=2e-3, rtol=2e-3)
    assert jnp.allclose(c_n2, rc2, atol=2e-3, rtol=2e-3)

    print("KERNEL_OK")
</pallas_src>

<mosaic_0001>
module attributes {stable_mosaic.version = 11 : i64} {
  func.func @_cnn_lstm_fused_kernel(%arg0: memref<64x8x198xf32, #tpu.memory_space<vmem>>, %arg1: memref<3x198x512xf32, #tpu.memory_space<vmem>>, %arg2: memref<1x256xf32, #tpu.memory_space<vmem>>, %arg3: memref<3x288x256xf32, #tpu.memory_space<vmem>>, %arg4: memref<1x128xf32, #tpu.memory_space<vmem>>, %arg5: memref<3x192x64xf32, #tpu.memory_space<vmem>>, %arg6: memref<1x32xf32, #tpu.memory_space<vmem>>, %arg7: memref<32x32xf32, #tpu.memory_space<vmem>>, %arg8: memref<1x32xf32, #tpu.memory_space<vmem>>, %arg9: memref<1x32xf32, #tpu.memory_space<vmem>>, %arg10: memref<1x32xf32, #tpu.memory_space<vmem>>, %arg11: memref<32x128xf32, #tpu.memory_space<vmem>>, %arg12: memref<1x128xf32, #tpu.memory_space<vmem>>, %arg13: memref<32x128xf32, #tpu.memory_space<vmem>>, %arg14: memref<32x16xf32, #tpu.memory_space<vmem>>, %arg15: memref<1x16xf32, #tpu.memory_space<vmem>>, %arg16: memref<2x32xf32, #tpu.memory_space<vmem>>, %arg17: memref<2x32xf32, #tpu.memory_space<vmem>>, %arg18: memref<2x16xf32, #tpu.memory_space<vmem>>, %arg19: memref<2x32xf32, #tpu.memory_space<vmem>>, %arg20: memref<2x32xf32, #tpu.memory_space<vmem>>, %arg21: memref<256x198xf32, #tpu.memory_space<vmem>>, %arg22: memref<256x198xf32, #tpu.memory_space<vmem>>, %arg23: memref<256x198xf32, #tpu.memory_space<vmem>>, %arg24: memref<128x288xf32, #tpu.memory_space<vmem>>, %arg25: memref<64x288xf32, #tpu.memory_space<vmem>>, %arg26: memref<64x288xf32, #tpu.memory_space<vmem>>, %arg27: memref<64x288xf32, #tpu.memory_space<vmem>>, %arg28: memref<32x192xf32, #tpu.memory_space<vmem>>, %arg29: memref<16x192xf32, #tpu.memory_space<vmem>>, %arg30: memref<16x192xf32, #tpu.memory_space<vmem>>, %arg31: memref<16x192xf32, #tpu.memory_space<vmem>>) attributes {dimension_semantics = [], scalar_prefetch = 0 : i64, scratch_operands = 11 : i64, tpu.core_type = #tpu.core_type<tc>} {
    %cst = arith.constant 0.000000e+00 : f32
    %0 = vector.broadcast %cst : f32 to vector<8x198xf32>
    %c0 = arith.constant 0 : index
    %c0_0 = arith.constant 0 : index
    %1 = vector.load %arg21[%c0, %c0_0] : memref<256x198xf32, #tpu.memory_space<vmem>>, vector<8x198xf32>
    tpu.vector_store %arg21[%c0, %c0_0], %0 {strides = array<i32>} : memref<256x198xf32, #tpu.memory_space<vmem>>, vector<8x198xf32>,
    %c0_1 = arith.constant 0 : index
    %c0_2 = arith.constant 0 : index
    %c0_3 = arith.constant 0 : index
    %2 = vector.load %arg0[%c0_1, %c0_2, %c0_3] : memref<64x8x198xf32, #tpu.memory_space<vmem>>, vector<1x8x198xf32>
    %3 = vector.shape_cast %2 : vector<1x8x198xf32> to vector<8x198xf32>
    %c0_4 = arith.constant 0 : index
    %c0_5 = arith.constant 0 : index
    %4 = vector.load %arg22[%c0_4, %c0_5] : memref<256x198xf32, #tpu.memory_space<vmem>>, vector<8x198xf32>
    tpu.vector_store %arg22[%c0_4, %c0_5], %3 {strides = array<i32>} : memref<256x198xf32, #tpu.memory_space<vmem>>, vector<8x198xf32>,
    %c1 = arith.constant 1 : index
    %c0_6 = arith.constant 0 : index
    %c0_7 = arith.constant 0 : index
    %5 = vector.load %arg0[%c1, %c0_6, %c0_7] : memref<64x8x198xf32, #tpu.memory_space<vmem>>, vector<1x8x198xf32>
    %6 = vector.shape_cast %5 : vector<1x8x198xf32> to vector<8x198xf32>
    %c0_8 = arith.constant 0 : index
    %c0_9 = arith.constant 0 : index
    %7 = vector.load %arg23[%c0_8, %c0_9] : memref<256x198xf32, #tpu.memory_space<vmem>>, vector<8x198xf32>
    tpu.vector_store %arg23[%c0_8, %c0_9], %6 {strides = array<i32>} : memref<256x198xf32, #tpu.memory_space<vmem>>, vector<8x198xf32>,
    %c128 = arith.constant 128 : index
    %c0_10 = arith.constant 0 : index
    %8 = vector.load %arg21[%c128, %c0_10] : memref<256x198xf32, #tpu.memory_space<vmem>>, vector<8x198xf32>
    tpu.vector_store %arg21[%c128, %c0_10], %6 {strides = array<i32>} : memref<256x198xf32, #tpu.memory_space<vmem>>, vector<8x198xf32>,
    %c2 = arith.constant 2 : index
    %c0_11 = arith.constant 0 : index
    %c0_12 = arith.constant 0 : index
    %9 = vector.load %arg0[%c2, %c0_11, %c0_12] : memref<64x8x198xf32, #tpu.memory_space<vmem>>, vector<1x8x198xf32>
    %10 = vector.shape_cast %9 : vector<1x8x198xf32> to vector<8x198xf32>
    %c128_13 = arith.constant 128 : index
    %c0_14 = arith.constant 0 : index
    %11 = vector.load %arg22[%c128_13, %c0_14] : memref<256x198xf32, #tpu.memory_space<vmem>>, vector<8x198xf32>
    tpu.vector_store %arg22[%c128_13, %c0_14], %10 {strides = array<i32>} : memref<256x198xf32, #tpu.memory_space<vmem>>, vector<8x198xf32>,
    %c3 = arith.constant 3 : index
    %c0_15 = arith.constant 0 : index
    %c0_16 = arith.constant 0 : index
    %12 = vector.load %arg0[%c3, %c0_15, %c0_16] : memref<64x8x198xf32, #tpu.memory_space<vmem>>, vector<1x8x198xf32>
    %13 = vector.shape_cast %12 : vector<1x8x198xf32> to vector<8x198xf32>
    %c8 = arith.constant 8 : index
    %c0_17 = arith.constant 0 : index
    %14 = vector.load %arg21[%c8, %c0_17] : memref<256x198xf32, #tpu.memory_space<vmem>>, vector<8x198xf32>
    tpu.vector_store %arg21[%c8, %c0_17], %13 {strides = array<i32>} : memref<256x198xf32, #tpu.memory_space<vmem>>, vector<8x198xf32>,
    %c128_18 = arith.constant 128 : index
    %c0_19 = arith.constant 0 : index
    %15 = vector.load %arg23[%c128_18, %c0_19] : memref<256x198xf32, #tpu.memory_space<vmem>>, vector<8x198xf32>
    tpu.vector_store %arg23[%c128_18, %c0_19], %13 {strides = array<i32>} : memref<256x198xf32, #tpu.memory_space<vmem>>, vector<8x198xf32>,
    %c4 = arith.constant 4 : index
    %c0_20 = arith.constant 0 : index
    %c0_21 = arith.constant 0 : index
    %16 = vector.load %arg0[%c4, %c0_20, %c0_21] : memref<64x8x198xf32, #tpu.memory_space<vmem>>, vector<1x8x198xf32>
    %17 = vector.shape_cast %16 : vector<1x8x198xf32> to vector<8x198xf32>
    %c8_22 = arith.constant 8 : index
    %c0_23 = arith.constant 0 : index
    %18 = vector.load %arg22[%c8_22, %c0_23] : memref<256x198xf32, #tpu.memory_space<vmem>>, vector<8x198xf32>
    tpu.vector_store %arg22[%c8_22, %c0_23], %17 {strides = array<i32>} : memref<256x198xf32, #tpu.memory_space<vmem>>, vector<8x198xf32>,
    %c5 = arith.constant 5 : index
    %c0_24 = arith.constant 0 : index
    %c0_25 = arith.constant 0 : index
    %19 = vector.load %arg0[%c5, %c0_24, %c0_25] : memref<64x8x198xf32, #tpu.memory_space<vmem>>, vector<1x8x198xf32>
    %20 = vector.shape_cast %19 : vector<1x8x198xf32> to vector<8x198xf32>
    %c8_26 = arith.constant 8 : index
    %c0_27 = arith.constant 0 : index
    %21 = vector.load %arg23[%c8_26, %c0_27] : memref<256x198xf32, #tpu.memory_space<vmem>>, vector<8x198xf32>
    tpu.vector_store %arg23[%c8_26, %c0_27], %20 {strides = array<i32>} : memref<256x198xf32, #tpu.memory_space<vmem>>, vector<8x198xf32>,
    %c136 = arith.constant 136 : index
    %c0_28 = arith.constant 0 : index
    %22 = vector.load %arg21[%c136, %c0_28] : memref<256x198xf32, #tpu.memory_space<vmem>>, vector<8x198xf32>
    tpu.vector_store %arg21[%c136, %c0_28], %20 {strides = array<i32>} : memref<256x198xf32, #tpu.memory_space<vmem>>, vector<8x198xf32>,
    %c6 = arith.constant 6 : index
    %c0_29 = arith.constant 0 : index
    %c0_30 = arith.constant 0 : index
    %23 = vector.load %arg0[%c6, %c0_29, %c0_30] : memref<64x8x198xf32, #tpu.memory_space<vmem>>, vector<1x8x198xf32>
    %24 = vector.shape_cast %23 : vector<1x8x198xf32> to vector<8x198xf32>
    %c136_31 = arith.constant 136 : index
    %c0_32 = arith.constant 0 : index
    %25 = vector.load %arg22[%c136_31, %c0_32] : memref<256x198xf32, #tpu.memory_space<vmem>>, vector<8x198xf32>
    tpu.vector_store %arg22[%c136_31, %c0_32], %24 {strides = array<i32>} : memref<256x198xf32, #tpu.memory_space<vmem>>, vector<8x198xf32>,
    %c7 = arith.constant 7 : index
    %c0_33 = arith.constant 0 : index
    %c0_34 = arith.constant 0 : index
    %26 = vector.load %arg0[%c7, %c0_33, %c0_34] : memref<64x8x198xf32, #tpu.memory_space<vmem>>, vector<1x8x198xf32>
    %27 = vector.shape_cast %26 : vector<1x8x198xf32> to vector<8x198xf32>
    %c16 = arith.constant 16 : index
    %c0_35 = arith.constant 0 : index
    %28 = vector.load %arg21[%c16, %c0_35] : memref<256x198xf32, #tpu.memory_space<vmem>>, vector<8x198xf32>
    tpu.vector_store %arg21[%c16, %c0_35], %27 {strides = array<i32>} : memref<256x198xf32, #tpu.memory_space<vmem>>, vector<8x198xf32>,
    %c136_36 = arith.constant 136 : index
    %c0_37 = arith.constant 0 : index
    %29 = vector.load %arg23[%c136_36, %c0_37] : memref<256x198xf32, #tpu.memory_space<vmem>>, vector<8x198xf32>
    tpu.vector_store %arg23[%c136_36, %c0_37], %27 {strides = array<i32>} : memref<256x198xf32, #tpu.memory_space<vmem>>, vector<8x198xf32>,
    %c8_38 = arith.constant 8 : index
    %c0_39 = arith.constant 0 : index
    %c0_40 = arith.constant 0 : index
    %30 = vector.load %arg0[%c8_38, %c0_39, %c0_40] : memref<64x8x198xf32, #tpu.memory_space<vmem>>, vector<1x8x198xf32>
    %31 = vector.shape_cast %30 : vector<1x8x198xf32> to vector<8x198xf32>
    %c16_41 = arith.constant 16 : index
    %c0_42 = arith.constant 0 : index
    %32 = vector.load %arg22[%c16_41, %c0_42] : memref<256x198xf32, #tpu.memory_space<vmem>>, vector<8x198xf32>
    tpu.vector_store %arg22[%c16_41, %c0_42], %31 {strides = array<i32>} : memref<256x198xf32, #tpu.memory_space<vmem>>, vector<8x198xf32>,
    %c9 = arith.constant 9 : index
    %c0_43 = arith.constant 0 : index
    %c0_44 = arith.constant 0 : index
    %33 = vector.load %arg0[%c9, %c0_43, %c0_44] : memref<64x8x198xf32, #tpu.memory_space<vmem>>, vector<1x8x198xf32>
    %34 = vector.shape_cast %33 : vector<1x8x198xf32> to vector<8x198xf32>
    %c16_45 = arith.constant 16 : index
    %c0_46 = arith.constant 0 : index
    %35 = vector.load %arg23[%c16_45, %c0_46] : memref<256x198xf32, #tpu.memory_space<vmem>>, vector<8x198xf32>
    tpu.vector_store %arg23[%c16_45, %c0_46], %34 {strides = array<i32>} : memref<256x198xf32, #tpu.memory_space<vmem>>, vector<8x198xf32>,
    %c144 = arith.constant 144 : index
    %c0_47 = arith.constant 0 : index
    %36 = vector.load %arg21[%c144, %c0_47] : memref<256x198xf32, #tpu.memory_space<vmem>>, vector<8x198xf32>
    tpu.vector_store %arg21[%c144, %c0_47], %34 {strides = array<i32>} : memref<256x198xf32, #tpu.memory_space<vmem>>, vector<8x198xf32>,
    %c10 = arith.constant 10 : index
    %c0_48 = arith.constant 0 : index
    %c0_49 = arith.constant 0 : index
    %37 = vector.load %arg0[%c10, %c0_48, %c0_49] : memref<64x8x198xf32, #tpu.memory_space<vmem>>, vector<1x8x198xf32>
    %38 = vector.shape_cast %37 : vector<1x8x198xf32> to vector<8x198xf32>
    %c144_50 = arith.constant 144 : index
    %c0_51 = arith.constant 0 : index
    %39 = vector.load %arg22[%c144_50, %c0_51] : memref<256x198xf32, #tpu.memory_space<vmem>>, vector<8x198xf32>
    tpu.vector_store %arg22[%c144_50, %c0_51], %38 {strides = array<i32>} : memref<256x198xf32, #tpu.memory_space<vmem>>, vector<8x198xf32>,
    %c11 = arith.constant 11 : index
    %c0_52 = arith.constant 0 : index
    %c0_53 = arith.constant 0 : index
    %40 = vector.load %arg0[%c11, %c0_52, %c0_53] : memref<64x8x198xf32, #tpu.memory_space<vmem>>, vector<1x8x198xf32>
    %41 = vector.shape_cast %40 : vector<1x8x198xf32> to vector<8x198xf32>
    %c24 = arith.constant 24 : index
    %c0_54 = arith.constant 0 : index
    %42 = vector.load %arg21[%c24, %c0_54] : memref<256x198xf32, #tpu.memory_space<vmem>>, vector<8x198xf32>
    tpu.vector_store %arg21[%c24, %c0_54], %41 {strides = array<i32>} : memref<256x198xf32, #tpu.memory_space<vmem>>, vector<8x198xf32>,
    %c144_55 = arith.constant 144 : index
    %c0_56 = arith.constant 0 : index
    %43 = vector.load %arg23[%c144_55, %c0_56] : memref<256x198xf32, #tpu.memory_space<vmem>>, vector<8x198xf32>
    tpu.vector_store %arg23[%c144_55, %c0_56], %41 {strides = array<i32>} : memref<256x198xf32, #tpu.memory_space<vmem>>, vector<8x198xf32>,
    %c12 = arith.constant 12 : index
    %c0_57 = arith.constant 0 : index
    %c0_58 = arith.constant 0 : index
    %44 = vector.load %arg0[%c12, %c0_57, %c0_58] : memref<64x8x198xf32, #tpu.memory_space<vmem>>, vector<1x8x198xf32>
    %45 = vector.shape_cast %44 : vector<1x8x198xf32> to vector<8x198xf32>
    %c24_59 = arith.constant 24 : index
    %c0_60 = arith.constant 0 : index
    %46 = vector.load %arg22[%c24_59, %c0_60] : memref<256x198xf32, #tpu.memory_space<vmem>>, vector<8x198xf32>
    tpu.vector_store %arg22[%c24_59, %c0_60], %45 {strides = array<i32>} : memref<256x198xf32, #tpu.memory_space<vmem>>, vector<8x198xf32>,
    %c13 = arith.constant 13 : index
    %c0_61 = arith.constant 0 : index
    %c0_62 = arith.constant 0 : index
    %47 = vector.load %arg0[%c13, %c0_61, %c0_62] : memref<64x8x198xf32, #tpu.memory_space<vmem>>, vector<1x8x198xf32>
    %48 = vector.shape_cast %47 : vector<1x8x198xf32> to vector<8x198xf32>
    %c24_63 = arith.constant 24 : index
    %c0_64 = arith.constant 0 : index
    %49 = vector.load %arg23[%c24_63, %c0_64] : memref<256x198xf32, #tpu.memory_space<vmem>>, vector<8x198xf32>
    tpu.vector_store %arg23[%c24_63, %c0_64], %48 {strides = array<i32>} : memref<256x198xf32, #tpu.memory_space<vmem>>, vector<8x198xf32>,
    %c152 = arith.constant 152 : index
    %c0_65 = arith.constant 0 : index
    %50 = vector.load %arg21[%c152, %c0_65] : memref<256x198xf32, #tpu.memory_space<vmem>>, vector<8x198xf32>
    tpu.vector_store %arg21[%c152, %c0_65], %48 {strides = array<i32>} : memref<256x198xf32, #tpu.memory_space<vmem>>, vector<8x198xf32>,
    %c14 = arith.constant 14 : index
    %c0_66 = arith.constant 0 : index
    %c0_67 = arith.constant 0 : index
    %51 = vector.load %arg0[%c14, %c0_66, %c0_67] : memref<64x8x198xf32, #tpu.memory_space<vmem>>, vector<1x8x198xf32>
    %52 = vector.shape_cast %51 : vector<1x8x198xf32> to vector<8x198xf32>
    %c152_68 = arith.constant 152 : index
    %c0_69 = arith.constant 0 : index
    %53 = vector.load %arg22[%c152_68, %c0_69] : memref<256x198xf32, #tpu.memory_space<vmem>>, vector<8x198xf32>
    tpu.vector_store %arg22[%c152_68, %c0_69], %52 {strides = array<i32>} : memref<256x198xf32, #tpu.memory_space<vmem>>, vector<8x198xf32>,
    %c15 = arith.constant 15 : index
    %c0_70 = arith.constant 0 : index
    %c0_71 = arith.constant 0 : index
    %54 = vector.load %arg0[%c15, %c0_70, %c0_71] : memref<64x8x198xf32, #tpu.memory_space<vmem>>, vector<1x8x198xf32>
    %55 = vector.shape_cast %54 : vector<1x8x198xf32> to vector<8x198xf32>
    %c32 = arith.constant 32 : index
    %c0_72 = arith.constant 0 : index
    %56 = vector.load %arg21[%c32, %c0_72] : memref<256x198xf32, #tpu.memory_space<vmem>>, vector<8x198xf32>
    tpu.vector_store %arg21[%c32, %c0_72], %55 {strides = array<i32>} : memref<256x198xf32, #tpu.memory_space<vmem>>, vector<8x198xf32>,
    %c152_73 = arith.constant 152 : index
    %c0_74 = arith.constant 0 : index
    %57 = vector.load %arg23[%c152_73, %c0_74] : memref<256x198xf32, #tpu.memory_space<vmem>>, vector<8x198xf32>
    tpu.vector_store %arg23[%c152_73, %c0_74], %55 {strides = array<i32>} : memref<256x198xf32, #tpu.memory_space<vmem>>, vector<8x198xf32>,
    %c16_75 = arith.constant 16 : index
    %c0_76 = arith.constant 0 : index
    %c0_77 = arith.constant 0 : index
    %58 = vector.load %arg0[%c16_75, %c0_76, %c0_77] : memref<64x8x198xf32, #tpu.memory_space<vmem>>, vector<1x8x198xf32>
    %59 = vector.shape_cast %58 : vector<1x8x198xf32> to vector<8x198xf32>
    %c32_78 = arith.constant 32 : index
    %c0_79 = arith.constant 0 : index
    %60 = vector.load %arg22[%c32_78, %c0_79] : memref<256x198xf32, #tpu.memory_space<vmem>>, vector<8x198xf32>
    tpu.vector_store %arg22[%c32_78, %c0_79], %59 {strides = array<i32>} : memref<256x198xf32, #tpu.memory_space<vmem>>, vector<8x198xf32>,
    %c17 = arith.constant 17 : index
    %c0_80 = arith.constant 0 : index
    %c0_81 = arith.constant 0 : index
    %61 = vector.load %arg0[%c17, %c0_80, %c0_81] : memref<64x8x198xf32, #tpu.memory_space<vmem>>, vector<1x8x198xf32>
    %62 = vector.shape_cast %61 : vector<1x8x198xf32> to vector<8x198xf32>
    %c32_82 = arith.constant 32 : index
    %c0_83 = arith.constant 0 : index
    %63 = vector.load %arg23[%c32_82, %c0_83] : memref<256x198xf32, #tpu.memory_space<vmem>>, vector<8x198xf32>
    tpu.vector_store %arg23[%c32_82, %c0_83], %62 {strides = array<i32>} : memref<256x198xf32, #tpu.memory_space<vmem>>, vector<8x198xf32>,
    %c160 = arith.constant 160 : index
    %c0_84 = arith.constant 0 : index
    %64 = vector.load %arg21[%c160, %c0_84] : memref<256x198xf32, #tpu.memory_space<vmem>>, vector<8x198xf32>
    tpu.vector_store %arg21[%c160, %c0_84], %62 {strides = array<i32>} : memref<256x198xf32, #tpu.memory_space<vmem>>, vector<8x198xf32>,
    %c18 = arith.constant 18 : index
    %c0_85 = arith.constant 0 : index
    %c0_86 = arith.constant 0 : index
    %65 = vector.load %arg0[%c18, %c0_85, %c0_86] : memref<64x8x198xf32, #tpu.memory_space<vmem>>, vector<1x8x198xf32>
    %66 = vector.shape_cast %65 : vector<1x8x198xf32> to vector<8x198xf32>
    %c160_87 = arith.constant 160 : index
    %c0_88 = arith.constant 0 : index
    %67 = vector.load %arg22[%c160_87, %c0_88] : memref<256x198xf32, #tpu.memory_space<vmem>>, vector<8x198xf32>
    tpu.vector_store %arg22[%c160_87, %c0_88], %66 {strides = array<i32>} : memref<256x198xf32, #tpu.memory_space<vmem>>, vector<8x198xf32>,
    %c19 = arith.constant 19 : index
    %c0_89 = arith.constant 0 : index
    %c0_90 = arith.constant 0 : index
    %68 = vector.load %arg0[%c19, %c0_89, %c0_90] : memref<64x8x198xf32, #tpu.memory_space<vmem>>, vector<1x8x198xf32>
    %69 = vector.shape_cast %68 : vector<1x8x198xf32> to vector<8x198xf32>
    %c40 = arith.constant 40 : index
    %c0_91 = arith.constant 0 : index
    %70 = vector.load %arg21[%c40, %c0_91] : memref<256x198xf32, #tpu.memory_space<vmem>>, vector<8x198xf32>
    tpu.vector_store %arg21[%c40, %c0_91], %69 {strides = array<i32>} : memref<256x198xf32, #tpu.memory_space<vmem>>, vector<8x198xf32>,
    %c160_92 = arith.constant 160 : index
    %c0_93 = arith.constant 0 : index
    %71 = vector.load %arg23[%c160_92, %c0_93] : memref<256x198xf32, #tpu.memory_space<vmem>>, vector<8x198xf32>
    tpu.vector_store %arg23[%c160_92, %c0_93], %69 {strides = array<i32>} : memref<256x198xf32, #tpu.memory_space<vmem>>, vector<8x198xf32>,
    %c20 = arith.constant 20 : index
    %c0_94 = arith.constant 0 : index
    %c0_95 = arith.constant 0 : index
    %72 = vector.load %arg0[%c20, %c0_94, %c0_95] : memref<64x8x198xf32, #tpu.memory_space<vmem>>, vector<1x8x198xf32>
    %73 = vector.shape_cast %72 : vector<1x8x198xf32> to vector<8x198xf32>
    %c40_96 = arith.constant 40 : index
    %c0_97 = arith.constant 0 : index
    %74 = vector.load %arg22[%c40_96, %c0_97] : memref<256x198xf32, #tpu.memory_space<vmem>>, vector<8x198xf32>
    tpu.vector_store %arg22[%c40_96, %c0_97], %73 {strides = array<i32>} : memref<256x198xf32, #tpu.memory_space<vmem>>, vector<8x198xf32>,
    %c21 = arith.constant 21 : index
    %c0_98 = arith.constant 0 : index
    %c0_99 = arith.constant 0 : index
    %75 = vector.load %arg0[%c21, %c0_98, %c0_99] : memref<64x8x198xf32, #tpu.memory_space<vmem>>, vector<1x8x198xf32>
    %76 = vector.shape_cast %75 : vector<1x8x198xf32> to vector<8x198xf32>
    %c40_100 = arith.constant 40 : index
    %c0_101 = arith.constant 0 : index
    %77 = vector.load %arg23[%c40_100, %c0_101] : memref<256x198xf32, #tpu.memory_space<vmem>>, vector<8x198xf32>
    tpu.vector_store %arg23[%c40_100, %c0_101], %76 {strides = array<i32>} : memref<256x198xf32, #tpu.memory_space<vmem>>, vector<8x198xf32>,
    %c168 = arith.constant 168 : index
    %c0_102 = arith.constant 0 : index
    %78 = vector.load %arg21[%c168, %c0_102] : memref<256x198xf32, #tpu.memory_space<vmem>>, vector<8x198xf32>
    tpu.vector_store %arg21[%c168, %c0_102], %76 {strides = array<i32>} : memref<256x198xf32, #tpu.memory_space<vmem>>, vector<8x198xf32>,
    %c22 = arith.constant 22 : index
    %c0_103 = arith.constant 0 : index
    %c0_104 = arith.constant 0 : index
    %79 = vector.load %arg0[%c22, %c0_103, %c0_104] : memref<64x8x198xf32, #tpu.memory_space<vmem>>, vector<1x8x198xf32>
    %80 = vector.shape_cast %79 : vector<1x8x198xf32> to vector<8x198xf32>
    %c168_105 = arith.constant 168 : index
    %c0_106 = arith.constant 0 : index
    %81 = vector.load %arg22[%c168_105, %c0_106] : memref<256x198xf32, #tpu.memory_space<vmem>>, vector<8x198xf32>
    tpu.vector_store %arg22[%c168_105, %c0_106], %80 {strides = array<i32>} : memref<256x198xf32, #tpu.memory_space<vmem>>, vector<8x198xf32>,
    %c23 = arith.constant 23 : index
    %c0_107 = arith.constant 0 : index
    %c0_108 = arith.constant 0 : index
    %82 = vector.load %arg0[%c23, %c0_107, %c0_108] : memref<64x8x198xf32, #tpu.memory_space<vmem>>, vector<1x8x198xf32>
    %83 = vector.shape_cast %82 : vector<1x8x198xf32> to vector<8x198xf32>
    %c48 = arith.constant 48 : index
    %c0_109 = arith.constant 0 : index
    %84 = vector.load %arg21[%c48, %c0_109] : memref<256x198xf32, #tpu.memory_space<vmem>>, vector<8x198xf32>
    tpu.vector_store %arg21[%c48, %c0_109], %83 {strides = array<i32>} : memref<256x198xf32, #tpu.memory_space<vmem>>, vector<8x198xf32>,
    %c168_110 = arith.constant 168 : index
    %c0_111 = arith.constant 0 : index
    %85 = vector.load %arg23[%c168_110, %c0_111] : memref<256x198xf32, #tpu.memory_space<vmem>>, vector<8x198xf32>
    tpu.vector_store %arg23[%c168_110, %c0_111], %83 {strides = array<i32>} : memref<256x198xf32, #tpu.memory_space<vmem>>, vector<8x198xf32>,
    %c24_112 = arith.constant 24 : index
    %c0_113 = arith.constant 0 : index
    %c0_114 = arith.constant 0 : index
    %86 = vector.load %arg0[%c24_112, %c0_113, %c0_114] : memref<64x8x198xf32, #tpu.memory_space<vmem>>, vector<1x8x198xf32>
    %87 = vector.shape_cast %86 : vector<1x8x198xf32> to vector<8x198xf32>
    %c48_115 = arith.constant 48 : index
    %c0_116 = arith.constant 0 : index
    %88 = vector.load %arg22[%c48_115, %c0_116] : memref<256x198xf32, #tpu.memory_space<vmem>>, vector<8x198xf32>
    tpu.vector_store %arg22[%c48_115, %c0_116], %87 {strides = array<i32>} : memref<256x198xf32, #tpu.memory_space<vmem>>, vector<8x198xf32>,
    %c25 = arith.constant 25 : index
    %c0_117 = arith.constant 0 : index
    %c0_118 = arith.constant 0 : index
    %89 = vector.load %arg0[%c25, %c0_117, %c0_118] : memref<64x8x198xf32, #tpu.memory_space<vmem>>, vector<1x8x198xf32>
    %90 = vector.shape_cast %89 : vector<1x8x198xf32> to vector<8x198xf32>
    %c48_119 = arith.constant 48 : index
    %c0_120 = arith.constant 0 : index
    %91 = vector.load %arg23[%c48_119, %c0_120] : memref<256x198xf32, #tpu.memory_space<vmem>>, vector<8x198xf32>
    tpu.vector_store %arg23[%c48_119, %c0_120], %90 {strides = array<i32>} : memref<256x198xf32, #tpu.memory_space<vmem>>, vector<8x198xf32>,
    %c176 = arith.constant 176 : index
    %c0_121 = arith.constant 0 : index
    %92 = vector.load %arg21[%c176, %c0_121] : memref<256x198xf32, #tpu.memory_space<vmem>>, vector<8x198xf32>
    tpu.vector_store %arg21[%c176, %c0_121], %90 {strides = array<i32>} : memref<256x198xf32, #tpu.memory_space<vmem>>, vector<8x198xf32>,
    %c26 = arith.constant 26 : index
    %c0_122 = arith.constant 0 : index
    %c0_123 = arith.constant 0 : index
    %93 = vector.load %arg0[%c26, %c0_122, %c0_123] : memref<64x8x198xf32, #tpu.memory_space<vmem>>, vector<1x8x198xf32>
    %94 = vector.shape_cast %93 : vector<1x8x198xf32> to vector<8x198xf32>
    %c176_124 = arith.constant 176 : index
    %c0_125 = arith.constant 0 : index
    %95 = vector.load %arg22[%c176_124, %c0_125] : memref<256x198xf32, #tpu.memory_space<vmem>>, vector<8x198xf32>
    tpu.vector_store %arg22[%c176_124, %c0_125], %94 {strides = array<i32>} : memref<256x198xf32, #tpu.memory_space<vmem>>, vector<8x198xf32>,
    %c27 = arith.constant 27 : index
    %c0_126 = arith.constant 0 : index
    %c0_127 = arith.constant 0 : index
    %96 = vector.load %arg0[%c27, %c0_126, %c0_127] : memref<64x8x198xf32, #tpu.memory_space<vmem>>, vector<1x8x198xf32>
    %97 = vector.shape_cast %96 : vector<1x8x198xf32> to vector<8x198xf32>
    %c56 = arith.constant 56 : index
    %c0_128 = arith.constant 0 : index
    %98 = vector.load %arg21[%c56, %c0_128] : memref<256x198xf32, #tpu.memory_space<vmem>>, vector<8x198xf32>
    tpu.vector_store %arg21[%c56, %c0_128], %97 {strides = array<i32>} : memref<256x198xf32, #tpu.memory_space<vmem>>, vector<8x198xf32>,
    %c176_129 = arith.constant 176 : index
    %c0_130 = arith.constant 0 : index
    %99 = vector.load %arg23[%c176_129, %c0_130] : memref<256x198xf32, #tpu.memory_space<vmem>>, vector<8x198xf32>
    tpu.vector_store %arg23[%c176_129, %c0_130], %97 {strides = array<i32>} : memref<256x198xf32, #tpu.memory_space<vmem>>, vector<8x198xf32>,
    %c28 = arith.constant 28 : index
    %c0_131 = arith.constant 0 : index
    %c0_132 = arith.constant 0 : index
    %100 = vector.load %arg0[%c28, %c0_131, %c0_132] : memref<64x8x198xf32, #tpu.memory_space<vmem>>, vector<1x8x198xf32>
    %101 = vector.shape_cast %100 : vector<1x8x198xf32> to vector<8x198xf32>
    %c56_133 = arith.constant 56 : index
    %c0_134 = arith.constant 0 : index
    %102 = vector.load %arg22[%c56_133, %c0_134] : memref<256x198xf32, #tpu.memory_space<vmem>>, vector<8x198xf32>
    tpu.vector_store %arg22[%c56_133, %c0_134], %101 {strides = array<i32>} : memref<256x198xf32, #tpu.memory_space<vmem>>, vector<8x198xf32>,
    %c29 = arith.constant 29 : index
    %c0_135 = arith.constant 0 : index
    %c0_136 = arith.constant 0 : index
    %103 = vector.load %arg0[%c29, %c0_135, %c0_136] : memref<64x8x198xf32, #tpu.memory_space<vmem>>, vector<1x8x198xf32>
    %104 = vector.shape_cast %103 : vector<1x8x198xf32> to vector<8x198xf32>
    %c56_137 = arith.constant 56 : index
    %c0_138 = arith.constant 0 : index
    %105 = vector.load %arg23[%c56_137, %c0_138] : memref<256x198xf32, #tpu.memory_space<vmem>>, vector<8x198xf32>
    tpu.vector_store %arg23[%c56_137, %c0_138], %104 {strides = array<i32>} : memref<256x198xf32, #tpu.memory_space<vmem>>, vector<8x198xf32>,
    %c184 = arith.constant 184 : index
    %c0_139 = arith.constant 0 : index
    %106 = vector.load %arg21[%c184, %c0_139] : memref<256x198xf32, #tpu.memory_space<vmem>>, vector<8x198xf32>
    tpu.vector_store %arg21[%c184, %c0_139], %104 {strides = array<i32>} : memref<256x198xf32, #tpu.memory_space<vmem>>, vector<8x198xf32>,
    %c30 = arith.constant 30 : index
    %c0_140 = arith.constant 0 : index
    %c0_141 = arith.constant 0 : index
    %107 = vector.load %arg0[%c30, %c0_140, %c0_141] : memref<64x8x198xf32, #tpu.memory_space<vmem>>, vector<1x8x198xf32>
    %108 = vector.shape_cast %107 : vector<1x8x198xf32> to vector<8x198xf32>
    %c184_142 = arith.constant 184 : index
    %c0_143 = arith.constant 0 : index
    %109 = vector.load %arg22[%c184_142, %c0_143] : memref<256x198xf32, #tpu.memory_space<vmem>>, vector<8x198xf32>
    tpu.vector_store %arg22[%c184_142, %c0_143], %108 {strides = array<i32>} : memref<256x198xf32, #tpu.memory_space<vmem>>, vector<8x198xf32>,
    %c31 = arith.constant 31 : index
    %c0_144 = arith.constant 0 : index
    %c0_145 = arith.constant 0 : index
    %110 = vector.load %arg0[%c31, %c0_144, %c0_145] : memref<64x8x198xf32, #tpu.memory_space<vmem>>, vector<1x8x198xf32>
    %111 = vector.shape_cast %110 : vector<1x8x198xf32> to vector<8x198xf32>
    %c64 = arith.constant 64 : index
    %c0_146 = arith.constant 0 : index
    %112 = vector.load %arg21[%c64, %c0_146] : memref<256x198xf32, #tpu.memory_space<vmem>>, vector<8x198xf32>
    tpu.vector_store %arg21[%c64, %c0_146], %111 {strides = array<i32>} : memref<256x198xf32, #tpu.memory_space<vmem>>, vector<8x198xf32>,
    %c184_147 = arith.constant 184 : index
    %c0_148 = arith.constant 0 : index
    %113 = vector.load %arg23[%c184_147, %c0_148] : memref<256x198xf32, #tpu.memory_space<vmem>>, vector<8x198xf32>
    tpu.vector_store %arg23[%c184_147, %c0_148], %111 {strides = array<i32>} : memref<256x198xf32, #tpu.memory_space<vmem>>, vector<8x198xf32>,
    %c32_149 = arith.constant 32 : index
    %c0_150 = arith.constant 0 : index
    %c0_151 = arith.constant 0 : index
    %114 = vector.load %arg0[%c32_149, %c0_150, %c0_151] : memref<64x8x198xf32, #tpu.memory_space<vmem>>, vector<1x8x198xf32>
    %115 = vector.shape_cast %114 : vector<1x8x198xf32> to vector<8x198xf32>
    %c64_152 = arith.constant 64 : index
    %c0_153 = arith.constant 0 : index
    %116 = vector.load %arg22[%c64_152, %c0_153] : memref<256x198xf32, #tpu.memory_space<vmem>>, vector<8x198xf32>
    tpu.vector_store %arg22[%c64_152, %c0_153], %115 {strides = array<i32>} : memref<256x198xf32, #tpu.memory_space<vmem>>, vector<8x198xf32>,
    %c33 = arith.constant 33 : index
    %c0_154 = arith.constant 0 : index
    %c0_155 = arith.constant 0 : index
    %117 = vector.load %arg0[%c33, %c0_154, %c0_155] : memref<64x8x198xf32, #tpu.memory_space<vmem>>, vector<1x8x198xf32>
    %118 = vector.shape_cast %117 : vector<1x8x198xf32> to vector<8x198xf32>
    %c64_156 = arith.constant 64 : index
    %c0_157 = arith.constant 0 : index
    %119 = vector.load %arg23[%c64_156, %c0_157] : memref<256x198xf32, #tpu.memory_space<vmem>>, vector<8x198xf32>
    tpu.vector_store %arg23[%c64_156, %c0_157], %118 {strides = array<i32>} : memref<256x198xf32, #tpu.memory_space<vmem>>, vector<8x198xf32>,
    %c192 = arith.constant 192 : index
    %c0_158 = arith.constant 0 : index
    %120 = vector.load %arg21[%c192, %c0_158] : memref<256x198xf32, #tpu.memory_space<vmem>>, vector<8x198xf32>
    tpu.vector_store %arg21[%c192, %c0_158], %118 {strides = array<i32>} : memref<256x198xf32, #tpu.memory_space<vmem>>, vector<8x198xf32>,
    %c34 = arith.constant 34 : index
    %c0_159 = arith.constant 0 : index
    %c0_160 = arith.constant 0 : index
    %121 = vector.load %arg0[%c34, %c0_159, %c0_160] : memref<64x8x198xf32, #tpu.memory_space<vmem>>, vector<1x8x198xf32>
    %122 = vector.shape_cast %121 : vector<1x8x198xf32> to vector<8x198xf32>
    %c192_161 = arith.constant 192 : index
    %c0_162 = arith.constant 0 : index
    %123 = vector.load %arg22[%c192_161, %c0_162] : memref<256x198xf32, #tpu.memory_space<vmem>>, vector<8x198xf32>
    tpu.vector_store %arg22[%c192_161, %c0_162], %122 {strides = array<i32>} : memref<256x198xf32, #tpu.memory_space<vmem>>, vector<8x198xf32>,
    %c35 = arith.constant 35 : index
    %c0_163 = arith.constant 0 : index
    %c0_164 = arith.constant 0 : index
    %124 = vector.load %arg0[%c35, %c0_163, %c0_164] : memref<64x8x198xf32, #tpu.memory_space<vmem>>, vector<1x8x198xf32>
    %125 = vector.shape_cast %124 : vector<1x8x198xf32> to vector<8x198xf32>
    %c72 = arith.constant 72 : index
    %c0_165 = arith.constant 0 : index
    %126 = vector.load %arg21[%c72, %c0_165] : memref<256x198xf32, #tpu.memory_space<vmem>>, vector<8x198xf32>
    tpu.vector_store %arg21[%c72, %c0_165], %125 {strides = array<i32>} : memref<256x198xf32, #tpu.memory_space<vmem>>, vector<8x198xf32>,
    %c192_166 = arith.constant 192 : index
    %c0_167 = arith.constant 0 : index
    %127 = vector.load %arg23[%c192_166, %c0_167] : memref<256x198xf32, #tpu.memory_space<vmem>>, vector<8x198xf32>
    tpu.vector_store %arg23[%c192_166, %c0_167], %125 {strides = array<i32>} : memref<256x198xf32, #tpu.memory_space<vmem>>, vector<8x198xf32>,
    %c36 = arith.constant 36 : index
    %c0_168 = arith.constant 0 : index
    %c0_169 = arith.constant 0 : index
    %128 = vector.load %arg0[%c36, %c0_168, %c0_169] : memref<64x8x198xf32, #tpu.memory_space<vmem>>, vector<1x8x198xf32>
    %129 = vector.shape_cast %128 : vector<1x8x198xf32> to vector<8x198xf32>
    %c72_170 = arith.constant 72 : index
    %c0_171 = arith.constant 0 : index
    %130 = vector.load %arg22[%c72_170, %c0_171] : memref<256x198xf32, #tpu.memory_space<vmem>>, vector<8x198xf32>
    tpu.vector_store %arg22[%c72_170, %c0_171], %129 {strides = array<i32>} : memref<256x198xf32, #tpu.memory_space<vmem>>, vector<8x198xf32>,
    %c37 = arith.constant 37 : index
    %c0_172 = arith.constant 0 : index
    %c0_173 = arith.constant 0 : index
    %131 = vector.load %arg0[%c37, %c0_172, %c0_173] : memref<64x8x198xf32, #tpu.memory_space<vmem>>, vector<1x8x198xf32>
    %132 = vector.shape_cast %131 : vector<1x8x198xf32> to vector<8x198xf32>
    %c72_174 = arith.constant 72 : index
    %c0_175 = arith.constant 0 : index
    %133 = vector.load %arg23[%c72_174, %c0_175] : memref<256x198xf32, #tpu.memory_space<vmem>>, vector<8x198xf32>
    tpu.vector_store %arg23[%c72_174, %c0_175], %132 {strides = array<i32>} : memref<256x198xf32, #tpu.memory_space<vmem>>, vector<8x198xf32>,
    %c200 = arith.constant 200 : index
    %c0_176 = arith.constant 0 : index
    %134 = vector.load %arg21[%c200, %c0_176] : memref<256x198xf32, #tpu.memory_space<vmem>>, vector<8x198xf32>
    tpu.vector_store %arg21[%c200, %c0_176], %132 {strides = array<i32>} : memref<256x198xf32, #tpu.memory_space<vmem>>, vector<8x198xf32>,
    %c38 = arith.constant 38 : index
    %c0_177 = arith.constant 0 : index
    %c0_178 = arith.constant 0 : index
    %135 = vector.load %arg0[%c38, %c0_177, %c0_178] : memref<64x8x198xf32, #tpu.memory_space<vmem>>, vector<1x8x198xf32>
    %136 = vector.shape_cast %135 : vector<1x8x198xf32> to vector<8x198xf32>
    %c200_179 = arith.constant 200 : index
    %c0_180 = arith.constant 0 : index
    %137 = vector.load %arg22[%c200_179, %c0_180] : memref<256x198xf32, #tpu.memory_space<vmem>>, vector<8x198xf32>
    tpu.vector_store %arg22[%c200_179, %c0_180], %136 {strides = array<i32>} : memref<256x198xf32, #tpu.memory_space<vmem>>, vector<8x198xf32>,
    %c39 = arith.constant 39 : index
    %c0_181 = arith.constant 0 : index
    %c0_182 = arith.constant 0 : index
    %138 = vector.load %arg0[%c39, %c0_181, %c0_182] : memref<64x8x198xf32, #tpu.memory_space<vmem>>, vector<1x8x198xf32>
    %139 = vector.shape_cast %138 : vector<1x8x198xf32> to vector<8x198xf32>
    %c80 = arith.constant 80 : index
    %c0_183 = arith.constant 0 : index
    %140 = vector.load %arg21[%c80, %c0_183] : memref<256x198xf32, #tpu.memory_space<vmem>>, vector<8x198xf32>
    tpu.vector_store %arg21[%c80, %c0_183], %139 {strides = array<i32>} : memref<256x198xf32, #tpu.memory_space<vmem>>, vector<8x198xf32>,
    %c200_184 = arith.constant 200 : index
    %c0_185 = arith.constant 0 : index
    %141 = vector.load %arg23[%c200_184, %c0_185] : memref<256x198xf32, #tpu.memory_space<vmem>>, vector<8x198xf32>
    tpu.vector_store %arg23[%c200_184, %c0_185], %139 {strides = array<i32>} : memref<256x198xf32, #tpu.memory_space<vmem>>, vector<8x198xf32>,
    %c40_186 = arith.constant 40 : index
    %c0_187 = arith.constant 0 : index
    %c0_188 = arith.constant 0 : index
    %142 = vector.load %arg0[%c40_186, %c0_187, %c0_188] : memref<64x8x198xf32, #tpu.memory_space<vmem>>, vector<1x8x198xf32>
    %143 = vector.shape_cast %142 : vector<1x8x198xf32> to vector<8x198xf32>
    %c80_189 = arith.constant 80 : index
    %c0_190 = arith.constant 0 : index
    %144 = vector.load %arg22[%c80_189, %c0_190] : memref<256x198xf32, #tpu.memory_space<vmem>>, vector<8x198xf32>
    tpu.vector_store %arg22[%c80_189, %c0_190], %143 {strides = array<i32>} : memref<256x198xf32, #tpu.memory_space<vmem>>, vector<8x198xf32>,
    %c41 = arith.constant 41 : index
    %c0_191 = arith.constant 0 : index
    %c0_192 = arith.constant 0 : index
    %145 = vector.load %arg0[%c41, %c0_191, %c0_192] : memref<64x8x198xf32, #tpu.memory_space<vmem>>, vector<1x8x198xf32>
    %146 = vector.shape_cast %145 : vector<1x8x198xf32> to vector<8x198xf32>
    %c80_193 = arith.constant 80 : index
    %c0_194 = arith.constant 0 : index
    %147 = vector.load %arg23[%c80_193, %c0_194] : memref<256x198xf32, #tpu.memory_space<vmem>>, vector<8x198xf32>
    tpu.vector_store %arg23[%c80_193, %c0_194], %146 {strides = array<i32>} : memref<256x198xf32, #tpu.memory_space<vmem>>, vector<8x198xf32>,
    %c208 = arith.constant 208 : index
    %c0_195 = arith.constant 0 : index
    %148 = vector.load %arg21[%c208, %c0_195] : memref<256x198xf32, #tpu.memory_space<vmem>>, vector<8x198xf32>
    tpu.vector_store %arg21[%c208, %c0_195], %146 {strides = array<i32>} : memref<256x198xf32, #tpu.memory_space<vmem>>, vector<8x198xf32>,
    %c42 = arith.constant 42 : index
    %c0_196 = arith.constant 0 : index
    %c0_197 = arith.constant 0 : index
    %149 = vector.load %arg0[%c42, %c0_196, %c0_197] : memref<64x8x198xf32, #tpu.memory_space<vmem>>, vector<1x8x198xf32>
    %150 = vector.shape_cast %149 : vector<1x8x198xf32> to vector<8x198xf32>
    %c208_198 = arith.constant 208 : index
    %c0_199 = arith.constant 0 : index
    %151 = vector.load %arg22[%c208_198, %c0_199] : memref<256x198xf32, #tpu.memory_space<vmem>>, vector<8x198xf32>
    tpu.vector_store %arg22[%c208_198, %c0_199], %150 {strides = array<i32>} : memref<256x198xf32, #tpu.memory_space<vmem>>, vector<8x198xf32>,
    %c43 = arith.constant 43 : index
    %c0_200 = arith.constant 0 : index
    %c0_201 = arith.constant 0 : index
    %152 = vector.load %arg0[%c43, %c0_200, %c0_201] : memref<64x8x198xf32, #tpu.memory_space<vmem>>, vector<1x8x198xf32>
    %153 = vector.shape_cast %152 : vector<1x8x198xf32> to vector<8x198xf32>
    %c88 = arith.constant 88 : index
    %c0_202 = arith.constant 0 : index
    %154 = vector.load %arg21[%c88, %c0_202] : memref<256x198xf32, #tpu.memory_space<vmem>>, vector<8x198xf32>
    tpu.vector_store %arg21[%c88, %c0_202], %153 {strides = array<i32>} : memref<256x198xf32, #tpu.memory_space<vmem>>, vector<8x198xf32>,
    %c208_203 = arith.constant 208 : index
    %c0_204 = arith.constant 0 : index
    %155 = vector.load %arg23[%c208_203, %c0_204] : memref<256x198xf32, #tpu.memory_space<vmem>>, vector<8x198xf32>
    tpu.vector_store %arg23[%c208_203, %c0_204], %153 {strides = array<i32>} : memref<256x198xf32, #tpu.memory_space<vmem>>, vector<8x198xf32>,
    %c44 = arith.constant 44 : index
    %c0_205 = arith.constant 0 : index
    %c0_206 = arith.constant 0 : index
    %156 = vector.load %arg0[%c44, %c0_205, %c0_206] : memref<64x8x198xf32, #tpu.memory_space<vmem>>, vector<1x8x198xf32>
    %157 = vector.shape_cast %156 : vector<1x8x198xf32> to vector<8x198xf32>
    %c88_207 = arith.constant 88 : index
    %c0_208 = arith.constant 0 : index
    %158 = vector.load %arg22[%c88_207, %c0_208] : memref<256x198xf32, #tpu.memory_space<vmem>>, vector<8x198xf32>
    tpu.vector_store %arg22[%c88_207, %c0_208], %157 {strides = array<i32>} : memref<256x198xf32, #tpu.memory_space<vmem>>, vector<8x198xf32>,
    %c45 = arith.constant 45 : index
    %c0_209 = arith.constant 0 : index
    %c0_210 = arith.constant 0 : index
    %159 = vector.load %arg0[%c45, %c0_209, %c0_210] : memref<64x8x198xf32, #tpu.memory_space<vmem>>, vector<1x8x198xf32>
    %160 = vector.shape_cast %159 : vector<1x8x198xf32> to vector<8x198xf32>
    %c88_211 = arith.constant 88 : index
    %c0_212 = arith.constant 0 : index
    %161 = vector.load %arg23[%c88_211, %c0_212] : memref<256x198xf32, #tpu.memory_space<vmem>>, vector<8x198xf32>
    tpu.vector_store %arg23[%c88_211, %c0_212], %160 {strides = array<i32>} : memref<256x198xf32, #tpu.memory_space<vmem>>, vector<8x198xf32>,
    %c216 = arith.constant 216 : index
    %c0_213 = arith.constant 0 : index
    %162 = vector.load %arg21[%c216, %c0_213] : memref<256x198xf32, #tpu.memory_space<vmem>>, vector<8x198xf32>
    tpu.vector_store %arg21[%c216, %c0_213], %160 {strides = array<i32>} : memref<256x198xf32, #tpu.memory_space<vmem>>, vector<8x198xf32>,
    %c46 = arith.constant 46 : index
    %c0_214 = arith.constant 0 : index
    %c0_215 = arith.constant 0 : index
    %163 = vector.load %arg0[%c46, %c0_214, %c0_215] : memref<64x8x198xf32, #tpu.memory_space<vmem>>, vector<1x8x198xf32>
    %164 = vector.shape_cast %163 : vector<1x8x198xf32> to vector<8x198xf32>
    %c216_216 = arith.constant 216 : index
    %c0_217 = arith.constant 0 : index
    %165 = vector.load %arg22[%c216_216, %c0_217] : memref<256x198xf32, #tpu.memory_space<vmem>>, vector<8x198xf32>
    tpu.vector_store %arg22[%c216_216, %c0_217], %164 {strides = array<i32>} : memref<256x198xf32, #tpu.memory_space<vmem>>, vector<8x198xf32>,
    %c47 = arith.constant 47 : index
    %c0_218 = arith.constant 0 : index
    %c0_219 = arith.constant 0 : index
    %166 = vector.load %arg0[%c47, %c0_218, %c0_219] : memref<64x8x198xf32, #tpu.memory_space<vmem>>, vector<1x8x198xf32>
    %167 = vector.shape_cast %166 : vector<1x8x198xf32> to vector<8x198xf32>
    %c96 = arith.constant 96 : index
    %c0_220 = arith.constant 0 : index
    %168 = vector.load %arg21[%c96, %c0_220] : memref<256x198xf32, #tpu.memory_space<vmem>>, vector<8x198xf32>
    tpu.vector_store %arg21[%c96, %c0_220], %167 {strides = array<i32>} : memref<256x198xf32, #tpu.memory_space<vmem>>, vector<8x198xf32>,
    %c216_221 = arith.constant 216 : index
    %c0_222 = arith.constant 0 : index
    %169 = vector.load %arg23[%c216_221, %c0_222] : memref<256x198xf32, #tpu.memory_space<vmem>>, vector<8x198xf32>
    tpu.vector_store %arg23[%c216_221, %c0_222], %167 {strides = array<i32>} : memref<256x198xf32, #tpu.memory_space<vmem>>, vector<8x198xf32>,
    %c48_223 = arith.constant 48 : index
    %c0_224 = arith.constant 0 : index
    %c0_225 = arith.constant 0 : index
    %170 = vector.load %arg0[%c48_223, %c0_224, %c0_225] : memref<64x8x198xf32, #tpu.memory_space<vmem>>, vector<1x8x198xf32>
    %171 = vector.shape_cast %170 : vector<1x8x198xf32> to vector<8x198xf32>
    %c96_226 = arith.constant 96 : index
    %c0_227 = arith.constant 0 : index
    %172 = vector.load %arg22[%c96_226, %c0_227] : memref<256x198xf32, #tpu.memory_space<vmem>>, vector<8x198xf32>
    tpu.vector_store %arg22[%c96_226, %c0_227], %171 {strides = array<i32>} : memref<256x198xf32, #tpu.memory_space<vmem>>, vector<8x198xf32>,
    %c49 = arith.constant 49 : index
    %c0_228 = arith.constant 0 : index
    %c0_229 = arith.constant 0 : index
    %173 = vector.load %arg0[%c49, %c0_228, %c0_229] : memref<64x8x198xf32, #tpu.memory_space<vmem>>, vector<1x8x198xf32>
    %174 = vector.shape_cast %173 : vector<1x8x198xf32> to vector<8x198xf32>
    %c96_230 = arith.constant 96 : index
    %c0_231 = arith.constant 0 : index
    %175 = vector.load %arg23[%c96_230, %c0_231] : memref<256x198xf32, #tpu.memory_space<vmem>>, vector<8x198xf32>
    tpu.vector_store %arg23[%c96_230, %c0_231], %174 {strides = array<i32>} : memref<256x198xf32, #tpu.memory_space<vmem>>, vector<8x198xf32>,
    %c224 = arith.constant 224 : index
    %c0_232 = arith.constant 0 : index
    %176 = vector.load %arg21[%c224, %c0_232] : memref<256x198xf32, #tpu.memory_space<vmem>>, vector<8x198xf32>
    tpu.vector_store %arg21[%c224, %c0_232], %174 {strides = array<i32>} : memref<256x198xf32, #tpu.memory_space<vmem>>, vector<8x198xf32>,
    %c50 = arith.constant 50 : index
    %c0_233 = arith.constant 0 : index
    %c0_234 = arith.constant 0 : index
    %177 = vector.load %arg0[%c50, %c0_233, %c0_234] : memref<64x8x198xf32, #tpu.memory_space<vmem>>, vector<1x8x198xf32>
    %178 = vector.shape_cast %177 : vector<1x8x198xf32> to vector<8x198xf32>
    %c224_235 = arith.constant 224 : index
    %c0_236 = arith.constant 0 : index
    %179 = vector.load %arg22[%c224_235, %c0_236] : memref<256x198xf32, #tpu.memory_space<vmem>>, vector<8x198xf32>
    tpu.vector_store %arg22[%c224_235, %c0_236], %178 {strides = array<i32>} : memref<256x198xf32, #tpu.memory_space<vmem>>, vector<8x198xf32>,
    %c51 = arith.constant 51 : index
    %c0_237 = arith.constant 0 : index
    %c0_238 = arith.constant 0 : index
    %180 = vector.load %arg0[%c51, %c0_237, %c0_238] : memref<64x8x198xf32, #tpu.memory_space<vmem>>, vector<1x8x198xf32>
    %181 = vector.shape_cast %180 : vector<1x8x198xf32> to vector<8x198xf32>
    %c104 = arith.constant 104 : index
    %c0_239 = arith.constant 0 : index
    %182 = vector.load %arg21[%c104, %c0_239] : memref<256x198xf32, #tpu.memory_space<vmem>>, vector<8x198xf32>
    tpu.vector_store %arg21[%c104, %c0_239], %181 {strides = array<i32>} : memref<256x198xf32, #tpu.memory_space<vmem>>, vector<8x198xf32>,
    %c224_240 = arith.constant 224 : index
    %c0_241 = arith.constant 0 : index
    %183 = vector.load %arg23[%c224_240, %c0_241] : memref<256x198xf32, #tpu.memory_space<vmem>>, vector<8x198xf32>
    tpu.vector_store %arg23[%c224_240, %c0_241], %181 {strides = array<i32>} : memref<256x198xf32, #tpu.memory_space<vmem>>, vector<8x198xf32>,
    %c52 = arith.constant 52 : index
    %c0_242 = arith.constant 0 : index
    %c0_243 = arith.constant 0 : index
    %184 = vector.load %arg0[%c52, %c0_242, %c0_243] : memref<64x8x198xf32, #tpu.memory_space<vmem>>, vector<1x8x198xf32>
    %185 = vector.shape_cast %184 : vector<1x8x198xf32> to vector<8x198xf32>
    %c104_244 = arith.constant 104 : index
    %c0_245 = arith.constant 0 : index
    %186 = vector.load %arg22[%c104_244, %c0_245] : memref<256x198xf32, #tpu.memory_space<vmem>>, vector<8x198xf32>
    tpu.vector_store %arg22[%c104_244, %c0_245], %185 {strides = array<i32>} : memref<256x198xf32, #tpu.memory_space<vmem>>, vector<8x198xf32>,
    %c53 = arith.constant 53 : index
    %c0_246 = arith.constant 0 : index
    %c0_247 = arith.constant 0 : index
    %187 = vector.load %arg0[%c53, %c0_246, %c0_247] : memref<64x8x198xf32, #tpu.memory_space<vmem>>, vector<1x8x198xf32>
    %188 = vector.shape_cast %187 : vector<1x8x198xf32> to vector<8x198xf32>
    %c104_248 = arith.constant 104 : index
    %c0_249 = arith.constant 0 : index
    %189 = vector.load %arg23[%c104_248, %c0_249] : memref<256x198xf32, #tpu.memory_space<vmem>>, vector<8x198xf32>
    tpu.vector_store %arg23[%c104_248, %c0_249], %188 {strides = array<i32>} : memref<256x198xf32, #tpu.memory_space<vmem>>, vector<8x198xf32>,
    %c232 = arith.constant 232 : index
    %c0_250 = arith.constant 0 : index
    %190 = vector.load %arg21[%c232, %c0_250] : memref<256x198xf32, #tpu.memory_space<vmem>>, vector<8x198xf32>
    tpu.vector_store %arg21[%c232, %c0_250], %188 {strides = array<i32>} : memref<256x198xf32, #tpu.memory_space<vmem>>, vector<8x198xf32>,
    %c54 = arith.constant 54 : index
    %c0_251 = arith.constant 0 : index
    %c0_252 = arith.constant 0 : index
    %191 = vector.load %arg0[%c54, %c0_251, %c0_252] : memref<64x8x198xf32, #tpu.memory_space<vmem>>, vector<1x8x198xf32>
    %192 = vector.shape_cast %191 : vector<1x8x198xf32> to vector<8x198xf32>
    %c232_253 = arith.constant 232 : index
    %c0_254 = arith.constant 0 : index
    %193 = vector.load %arg22[%c232_253, %c0_254] : memref<256x198xf32, #tpu.memory_space<vmem>>, vector<8x198xf32>
    tpu.vector_store %arg22[%c232_253, %c0_254], %192 {strides = array<i32>} : memref<256x198xf32, #tpu.memory_space<vmem>>, vector<8x198xf32>,
    %c55 = arith.constant 55 : index
    %c0_255 = arith.constant 0 : index
    %c0_256 = arith.constant 0 : index
    %194 = vector.load %arg0[%c55, %c0_255, %c0_256] : memref<64x8x198xf32, #tpu.memory_space<vmem>>, vector<1x8x198xf32>
    %195 = vector.shape_cast %194 : vector<1x8x198xf32> to vector<8x198xf32>
    %c112 = arith.constant 112 : index
    %c0_257 = arith.constant 0 : index
    %196 = vector.load %arg21[%c112, %c0_257] : memref<256x198xf32, #tpu.memory_space<vmem>>, vector<8x198xf32>
    tpu.vector_store %arg21[%c112, %c0_257], %195 {strides = array<i32>} : memref<256x198xf32, #tpu.memory_space<vmem>>, vector<8x198xf32>,
    %c232_258 = arith.constant 232 : index
    %c0_259 = arith.constant 0 : index
    %197 = vector.load %arg23[%c232_258, %c0_259] : memref<256x198xf32, #tpu.memory_space<vmem>>, vector<8x198xf32>
    tpu.vector_store %arg23[%c232_258, %c0_259], %195 {strides = array<i32>} : memref<256x198xf32, #tpu.memory_space<vmem>>, vector<8x198xf32>,
    %c56_260 = arith.constant 56 : index
    %c0_261 = arith.constant 0 : index
    %c0_262 = arith.constant 0 : index
    %198 = vector.load %arg0[%c56_260, %c0_261, %c0_262] : memref<64x8x198xf32, #tpu.memory_space<vmem>>, vector<1x8x198xf32>
    %199 = vector.shape_cast %198 : vector<1x8x198xf32> to vector<8x198xf32>
    %c112_263 = arith.constant 112 : index
    %c0_264 = arith.constant 0 : index
    %200 = vector.load %arg22[%c112_263, %c0_264] : memref<256x198xf32, #tpu.memory_space<vmem>>, vector<8x198xf32>
    tpu.vector_store %arg22[%c112_263, %c0_264], %199 {strides = array<i32>} : memref<256x198xf32, #tpu.memory_space<vmem>>, vector<8x198xf32>,
    %c57 = arith.constant 57 : index
    %c0_265 = arith.constant 0 : index
    %c0_266 = arith.constant 0 : index
    %201 = vector.load %arg0[%c57, %c0_265, %c0_266] : memref<64x8x198xf32, #tpu.memory_space<vmem>>, vector<1x8x198xf32>
    %202 = vector.shape_cast %201 : vector<1x8x198xf32> to vector<8x198xf32>
    %c112_267 = arith.constant 112 : index
    %c0_268 = arith.constant 0 : index
    %203 = vector.load %arg23[%c112_267, %c0_268] : memref<256x198xf32, #tpu.memory_space<vmem>>, vector<8x198xf32>
    tpu.vector_store %arg23[%c112_267, %c0_268], %202 {strides = array<i32>} : memref<256x198xf32, #tpu.memory_space<vmem>>, vector<8x198xf32>,
    %c240 = arith.constant 240 : index
    %c0_269 = arith.constant 0 : index
    %204 = vector.load %arg21[%c240, %c0_269] : memref<256x198xf32, #tpu.memory_space<vmem>>, vector<8x198xf32>
    tpu.vector_store %arg21[%c240, %c0_269], %202 {strides = array<i32>} : memref<256x198xf32, #tpu.memory_space<vmem>>, vector<8x198xf32>,
    %c58 = arith.constant 58 : index
    %c0_270 = arith.constant 0 : index
    %c0_271 = arith.constant 0 : index
    %205 = vector.load %arg0[%c58, %c0_270, %c0_271] : memref<64x8x198xf32, #tpu.memory_space<vmem>>, vector<1x8x198xf32>
    %206 = vector.shape_cast %205 : vector<1x8x198xf32> to vector<8x198xf32>
    %c240_272 = arith.constant 240 : index
    %c0_273 = arith.constant 0 : index
    %207 = vector.load %arg22[%c240_272, %c0_273] : memref<256x198xf32, #tpu.memory_space<vmem>>, vector<8x198xf32>
    tpu.vector_store %arg22[%c240_272, %c0_273], %206 {strides = array<i32>} : memref<256x198xf32, #tpu.memory_space<vmem>>, vector<8x198xf32>,
    %c59 = arith.constant 59 : index
    %c0_274 = arith.constant 0 : index
    %c0_275 = arith.constant 0 : index
    %208 = vector.load %arg0[%c59, %c0_274, %c0_275] : memref<64x8x198xf32, #tpu.memory_space<vmem>>, vector<1x8x198xf32>
    %209 = vector.shape_cast %208 : vector<1x8x198xf32> to vector<8x198xf32>
    %c120 = arith.constant 120 : index
    %c0_276 = arith.constant 0 : index
    %210 = vector.load %arg21[%c120, %c0_276] : memref<256x198xf32, #tpu.memory_space<vmem>>, vector<8x198xf32>
    tpu.vector_store %arg21[%c120, %c0_276], %209 {strides = array<i32>} : memref<256x198xf32, #tpu.memory_space<vmem>>, vector<8x198xf32>,
    %c240_277 = arith.constant 240 : index
    %c0_278 = arith.constant 0 : index
    %211 = vector.load %arg23[%c240_277, %c0_278] : memref<256x198xf32, #tpu.memory_space<vmem>>, vector<8x198xf32>
    tpu.vector_store %arg23[%c240_277, %c0_278], %209 {strides = array<i32>} : memref<256x198xf32, #tpu.memory_space<vmem>>, vector<8x198xf32>,
    %c60 = arith.constant 60 : index
    %c0_279 = arith.constant 0 : index
    %c0_280 = arith.constant 0 : index
    %212 = vector.load %arg0[%c60, %c0_279, %c0_280] : memref<64x8x198xf32, #tpu.memory_space<vmem>>, vector<1x8x198xf32>
    %213 = vector.shape_cast %212 : vector<1x8x198xf32> to vector<8x198xf32>
    %c120_281 = arith.constant 120 : index
    %c0_282 = arith.constant 0 : index
    %214 = vector.load %arg22[%c120_281, %c0_282] : memref<256x198xf32, #tpu.memory_space<vmem>>, vector<8x198xf32>
    tpu.vector_store %arg22[%c120_281, %c0_282], %213 {strides = array<i32>} : memref<256x198xf32, #tpu.memory_space<vmem>>, vector<8x198xf32>,
    %c61 = arith.constant 61 : index
    %c0_283 = arith.constant 0 : index
    %c0_284 = arith.constant 0 : index
    %215 = vector.load %arg0[%c61, %c0_283, %c0_284] : memref<64x8x198xf32, #tpu.memory_space<vmem>>, vector<1x8x198xf32>
    %216 = vector.shape_cast %215 : vector<1x8x198xf32> to vector<8x198xf32>
    %c120_285 = arith.constant 120 : index
    %c0_286 = arith.constant 0 : index
    %217 = vector.load %arg23[%c120_285, %c0_286] : memref<256x198xf32, #tpu.memory_space<vmem>>, vector<8x198xf32>
    tpu.vector_store %arg23[%c120_285, %c0_286], %216 {strides = array<i32>} : memref<256x198xf32, #tpu.memory_space<vmem>>, vector<8x198xf32>,
    %c248 = arith.constant 248 : index
    %c0_287 = arith.constant 0 : index
    %218 = vector.load %arg21[%c248, %c0_287] : memref<256x198xf32, #tpu.memory_space<vmem>>, vector<8x198xf32>
    tpu.vector_store %arg21[%c248, %c0_287], %216 {strides = array<i32>} : memref<256x198xf32, #tpu.memory_space<vmem>>, vector<8x198xf32>,
    %c62 = arith.constant 62 : index
    %c0_288 = arith.constant 0 : index
    %c0_289 = arith.constant 0 : index
    %219 = vector.load %arg0[%c62, %c0_288, %c0_289] : memref<64x8x198xf32, #tpu.memory_space<vmem>>, vector<1x8x198xf32>
    %220 = vector.shape_cast %219 : vector<1x8x198xf32> to vector<8x198xf32>
    %c248_290 = arith.constant 248 : index
    %c0_291 = arith.constant 0 : index
    %221 = vector.load %arg22[%c248_290, %c0_291] : memref<256x198xf32, #tpu.memory_space<vmem>>, vector<8x198xf32>
    tpu.vector_store %arg22[%c248_290, %c0_291], %220 {strides = array<i32>} : memref<256x198xf32, #tpu.memory_space<vmem>>, vector<8x198xf32>,
    %c63 = arith.constant 63 : index
    %c0_292 = arith.constant 0 : index
    %c0_293 = arith.constant 0 : index
    %222 = vector.load %arg0[%c63, %c0_292, %c0_293] : memref<64x8x198xf32, #tpu.memory_space<vmem>>, vector<1x8x198xf32>
    %223 = vector.shape_cast %222 : vector<1x8x198xf32> to vector<8x198xf32>
    %c248_294 = arith.constant 248 : index
    %c0_295 = arith.constant 0 : index
    %224 = vector.load %arg23[%c248_294, %c0_295] : memref<256x198xf32, #tpu.memory_space<vmem>>, vector<8x198xf32>
    tpu.vector_store %arg23[%c248_294, %c0_295], %223 {strides = array<i32>} : memref<256x198xf32, #tpu.memory_space<vmem>>, vector<8x198xf32>,
    %c0_296 = arith.constant 0 : index
    %c0_297 = arith.constant 0 : index
    %225 = vector.load %arg21[%c0_296, %c0_297] : memref<256x198xf32, #tpu.memory_space<vmem>>, vector<256x198xf32>
    %c0_298 = arith.constant 0 : index
    %c0_299 = arith.constant 0 : index
    %c0_300 = arith.constant 0 : index
    %226 = vector.load %arg1[%c0_298, %c0_299, %c0_300] : memref<3x198x512xf32, #tpu.memory_space<vmem>>, vector<1x198x512xf32>
    %227 = vector.shape_cast %226 : vector<1x198x512xf32> to vector<198x512xf32>
    %cst_301 = arith.constant dense<0.000000e+00> : vector<256x512xf32>
    %228 = tpu.matmul %225, %227, %cst_301 {dimension_numbers = #tpu.dot_dimension_numbers<[1], [0], [0], [1], [0, 0, 1, 1], [], []>} : vector<256x198xf32>, vector<198x512xf32>, vector<256x512xf32> -> vector<256x512xf32>
    %c0_302 = arith.constant 0 : index
    %c0_303 = arith.constant 0 : index
    %229 = vector.load %arg22[%c0_302, %c0_303] : memref<256x198xf32, #tpu.memory_space<vmem>>, vector<256x198xf32>
    %c1_304 = arith.constant 1 : index
    %c0_305 = arith.constant 0 : index
    %c0_306 = arith.constant 0 : index
    %230 = vector.load %arg1[%c1_304, %c0_305, %c0_306] : memref<3x198x512xf32, #tpu.memory_space<vmem>>, vector<1x198x512xf32>
    %231 = vector.shape_cast %230 : vector<1x198x512xf32> to vector<198x512xf32>
    %cst_307 = arith.constant dense<0.000000e+00> : vector<256x512xf32>
    %232 = tpu.matmul %229, %231, %cst_307 {dimension_numbers = #tpu.dot_dimension_numbers<[1], [0], [0], [1], [0, 0, 1, 1], [], []>} : vector<256x198xf32>, vector<198x512xf32>, vector<256x512xf32> -> vector<256x512xf32>
    %233 = arith.addf %228, %232 : vector<256x512xf32>
    %c0_308 = arith.constant 0 : index
    %c0_309 = arith.constant 0 : index
    %234 = vector.load %arg23[%c0_308, %c0_309] : memref<256x198xf32, #tpu.memory_space<vmem>>, vector<256x198xf32>
    %c2_310 = arith.constant 2 : index
    %c0_311 = arith.constant 0 : index
    %c0_312 = arith.constant 0 : index
    %235 = vector.load %arg1[%c2_310, %c0_311, %c0_312] : memref<3x198x512xf32, #tpu.memory_space<vmem>>, vector<1x198x512xf32>
    %236 = vector.shape_cast %235 : vector<1x198x512xf32> to vector<198x512xf32>
    %cst_313 = arith.constant dense<0.000000e+00> : vector<256x512xf32>
    %237 = tpu.matmul %234, %236, %cst_313 {dimension_numbers = #tpu.dot_dimension_numbers<[1], [0], [0], [1], [0, 0, 1, 1], [], []>} : vector<256x198xf32>, vector<198x512xf32>, vector<256x512xf32> -> vector<256x512xf32>
    %238 = arith.addf %233, %237 : vector<256x512xf32>
    %239 = vector.extract_strided_slice %238 {offsets = [0, 0], sizes = [128, 512], strides = [1, 1]} : vector<256x512xf32> to vector<128x512xf32>
    %240 = vector.extract_strided_slice %238 {offsets = [128, 0], sizes = [128, 512], strides = [1, 1]} : vector<256x512xf32> to vector<128x512xf32>
    %241 = arith.maximumf %239, %240 : vector<128x512xf32>
    %242 = vector.extract_strided_slice %241 {offsets = [0, 0], sizes = [128, 256], strides = [1, 1]} : vector<128x512xf32> to vector<128x256xf32>
    %243 = vector.extract_strided_slice %241 {offsets = [0, 256], sizes = [128, 256], strides = [1, 1]} : vector<128x512xf32> to vector<128x256xf32>
    %244 = arith.maximumf %242, %243 : vector<128x256xf32>
    %c0_314 = arith.constant 0 : index
    %c0_315 = arith.constant 0 : index
    %245 = vector.load %arg2[%c0_314, %c0_315] : memref<1x256xf32, #tpu.memory_space<vmem>>, vector<1x256xf32>
    %246 = vector.broadcast %245 : vector<1x256xf32> to vector<128x256xf32>
    %247 = arith.addf %244, %246 : vector<128x256xf32>
    %cst_316 = arith.constant 0.000000e+00 : f32
    %248 = vector.broadcast %cst_316 : f32 to vector<128x256xf32>
    %249 = arith.maximumf %247, %248 : vector<128x256xf32>
    %cst_317 = arith.constant 0.000000e+00 : f32
    %250 = vector.broadcast %cst_317 : f32 to vector<128x16xf32>
    %251 = tpu.concatenate %250, %249, %250 in 1 : vector<128x16xf32>, vector<128x256xf32>, vector<128x16xf32> -> vector<128x288xf32>
    %c0_318 = arith.constant 0 : index
    %c0_319 = arith.constant 0 : index
    %252 = vector.load %arg24[%c0_318, %c0_319] : memref<128x288xf32, #tpu.memory_space<vmem>>, vector<128x288xf32>
    tpu.vector_store %arg24[%c0_318, %c0_319], %251 {strides = array<i32>} : memref<128x288xf32, #tpu.memory_space<vmem>>, vector<128x288xf32>,
    %cst_320 = arith.constant 0.000000e+00 : f32
    %253 = vector.broadcast %cst_320 : f32 to vector<8x288xf32>
    %c0_321 = arith.constant 0 : index
    %c0_322 = arith.constant 0 : index
    %254 = vector.load %arg25[%c0_321, %c0_322] : memref<64x288xf32, #tpu.memory_space<vmem>>, vector<8x288xf32>
    tpu.vector_store %arg25[%c0_321, %c0_322], %253 {strides = array<i32>} : memref<64x288xf32, #tpu.memory_space<vmem>>, vector<8x288xf32>,
    %c0_323 = arith.constant 0 : index
    %c0_324 = arith.constant 0 : index
    %255 = vector.load %arg24[%c0_323, %c0_324] : memref<128x288xf32, #tpu.memory_space<vmem>>, vector<8x288xf32>
    %c0_325 = arith.constant 0 : index
    %c0_326 = arith.constant 0 : index
    %256 = vector.load %arg26[%c0_325, %c0_326] : memref<64x288xf32, #tpu.memory_space<vmem>>, vector<8x288xf32>
    tpu.vector_store %arg26[%c0_325, %c0_326], %255 {strides = array<i32>} : memref<64x288xf32, #tpu.memory_space<vmem>>, vector<8x288xf32>,
    %c8_327 = arith.constant 8 : index
    %c0_328 = arith.constant 0 : index
    %257 = vector.load %arg24[%c8_327, %c0_328] : memref<128x288xf32, #tpu.memory_space<vmem>>, vector<8x288xf32>
    %c0_329 = arith.constant 0 : index
    %c0_330 = arith.constant 0 : index
    %258 = vector.load %arg27[%c0_329, %c0_330] : memref<64x288xf32, #tpu.memory_space<vmem>>, vector<8x288xf32>
    tpu.vector_store %arg27[%c0_329, %c0_330], %257 {strides = array<i32>} : memref<64x288xf32, #tpu.memory_space<vmem>>, vector<8x288xf32>,
    %c32_331 = arith.constant 32 : index
    %c0_332 = arith.constant 0 : index
    %259 = vector.load %arg25[%c32_331, %c0_332] : memref<64x288xf32, #tpu.memory_space<vmem>>, vector<8x288xf32>
    tpu.vector_store %arg25[%c32_331, %c0_332], %257 {strides = array<i32>} : memref<64x288xf32, #tpu.memory_space<vmem>>, vector<8x288xf32>,
    %c16_333 = arith.constant 16 : index
    %c0_334 = arith.constant 0 : index
    %260 = vector.load %arg24[%c16_333, %c0_334] : memref<128x288xf32, #tpu.memory_space<vmem>>, vector<8x288xf32>
    %c32_335 = arith.constant 32 : index
    %c0_336 = arith.constant 0 : index
    %261 = vector.load %arg26[%c32_335, %c0_336] : memref<64x288xf32, #tpu.memory_space<vmem>>, vector<8x288xf32>
    tpu.vector_store %arg26[%c32_335, %c0_336], %260 {strides = array<i32>} : memref<64x288xf32, #tpu.memory_space<vmem>>, vector<8x288xf32>,
    %c24_337 = arith.constant 24 : index
    %c0_338 = arith.constant 0 : index
    %262 = vector.load %arg24[%c24_337, %c0_338] : memref<128x288xf32, #tpu.memory_space<vmem>>, vector<8x288xf32>
    %c8_339 = arith.constant 8 : index
    %c0_340 = arith.constant 0 : index
    %263 = vector.load %arg25[%c8_339, %c0_340] : memref<64x288xf32, #tpu.memory_space<vmem>>, vector<8x288xf32>
    tpu.vector_store %arg25[%c8_339, %c0_340], %262 {strides = array<i32>} : memref<64x288xf32, #tpu.memory_space<vmem>>, vector<8x288xf32>,
    %c32_341 = arith.constant 32 : index
    %c0_342 = arith.constant 0 : index
    %264 = vector.load %arg27[%c32_341, %c0_342] : memref<64x288xf32, #tpu.memory_space<vmem>>, vector<8x288xf32>
    tpu.vector_store %arg27[%c32_341, %c0_342], %262 {strides = array<i32>} : memref<64x288xf32, #tpu.memory_space<vmem>>, vector<8x288xf32>,
    %c32_343 = arith.constant 32 : index
    %c0_344 = arith.constant 0 : index
    %265 = vector.load %arg24[%c32_343, %c0_344] : memref<128x288xf32, #tpu.memory_space<vmem>>, vector<8x288xf32>
    %c8_345 = arith.constant 8 : index
    %c0_346 = arith.constant 0 : index
    %266 = vector.load %arg26[%c8_345, %c0_346] : memref<64x288xf32, #tpu.memory_space<vmem>>, vector<8x288xf32>
    tpu.vector_store %arg26[%c8_345, %c0_346], %265 {strides = array<i32>} : memref<64x288xf32, #tpu.memory_space<vmem>>, vector<8x288xf32>,
    %c40_347 = arith.constant 40 : index
    %c0_348 = arith.constant 0 : index
    %267 = vector.load %arg24[%c40_347, %c0_348] : memref<128x288xf32, #tpu.memory_space<vmem>>, vector<8x288xf32>
    %c8_349 = arith.constant 8 : index
    %c0_350 = arith.constant 0 : index
    %268 = vector.load %arg27[%c8_349, %c0_350] : memref<64x288xf32, #tpu.memory_space<vmem>>, vector<8x288xf32>
    tpu.vector_store %arg27[%c8_349, %c0_350], %267 {strides = array<i32>} : memref<64x288xf32, #tpu.memory_space<vmem>>, vector<8x288xf32>,
    %c40_351 = arith.constant 40 : index
    %c0_352 = arith.constant 0 : index
    %269 = vector.load %arg25[%c40_351, %c0_352] : memref<64x288xf32, #tpu.memory_space<vmem>>, vector<8x288xf32>
    tpu.vector_store %arg25[%c40_351, %c0_352], %267 {strides = array<i32>} : memref<64x288xf32, #tpu.memory_space<vmem>>, vector<8x288xf32>,
    %c48_353 = arith.constant 48 : index
    %c0_354 = arith.constant 0 : index
    %270 = vector.load %arg24[%c48_353, %c0_354] : memref<128x288xf32, #tpu.memory_space<vmem>>, vector<8x288xf32>
    %c40_355 = arith.constant 40 : index
    %c0_356 = arith.constant 0 : index
    %271 = vector.load %arg26[%c40_355, %c0_356] : memref<64x288xf32, #tpu.memory_space<vmem>>, vector<8x288xf32>
    tpu.vector_store %arg26[%c40_355, %c0_356], %270 {strides = array<i32>} : memref<64x288xf32, #tpu.memory_space<vmem>>, vector<8x288xf32>,
    %c56_357 = arith.constant 56 : index
    %c0_358 = arith.constant 0 : index
    %272 = vector.load %arg24[%c56_357, %c0_358] : memref<128x288xf32, #tpu.memory_space<vmem>>, vector<8x288xf32>
    %c16_359 = arith.constant 16 : index
    %c0_360 = arith.constant 0 : index
    %273 = vector.load %arg25[%c16_359, %c0_360] : memref<64x288xf32, #tpu.memory_space<vmem>>, vector<8x288xf32>
    tpu.vector_store %arg25[%c16_359, %c0_360], %272 {strides = array<i32>} : memref<64x288xf32, #tpu.memory_space<vmem>>, vector<8x288xf32>,
    %c40_361 = arith.constant 40 : index
    %c0_362 = arith.constant 0 : index
    %274 = vector.load %arg27[%c40_361, %c0_362] : memref<64x288xf32, #tpu.memory_space<vmem>>, vector<8x288xf32>
    tpu.vector_store %arg27[%c40_361, %c0_362], %272 {strides = array<i32>} : memref<64x288xf32, #tpu.memory_space<vmem>>, vector<8x288xf32>,
    %c64_363 = arith.constant 64 : index
    %c0_364 = arith.constant 0 : index
    %275 = vector.load %arg24[%c64_363, %c0_364] : memref<128x288xf32, #tpu.memory_space<vmem>>, vector<8x288xf32>
    %c16_365 = arith.constant 16 : index
    %c0_366 = arith.constant 0 : index
    %276 = vector.load %arg26[%c16_365, %c0_366] : memref<64x288xf32, #tpu.memory_space<vmem>>, vector<8x288xf32>
    tpu.vector_store %arg26[%c16_365, %c0_366], %275 {strides = array<i32>} : memref<64x288xf32, #tpu.memory_space<vmem>>, vector<8x288xf32>,
    %c72_367 = arith.constant 72 : index
    %c0_368 = arith.constant 0 : index
    %277 = vector.load %arg24[%c72_367, %c0_368] : memref<128x288xf32, #tpu.memory_space<vmem>>, vector<8x288xf32>
    %c16_369 = arith.constant 16 : index
    %c0_370 = arith.constant 0 : index
    %278 = vector.load %arg27[%c16_369, %c0_370] : memref<64x288xf32, #tpu.memory_space<vmem>>, vector<8x288xf32>
    tpu.vector_store %arg27[%c16_369, %c0_370], %277 {strides = array<i32>} : memref<64x288xf32, #tpu.memory_space<vmem>>, vector<8x288xf32>,
    %c48_371 = arith.constant 48 : index
    %c0_372 = arith.constant 0 : index
    %279 = vector.load %arg25[%c48_371, %c0_372] : memref<64x288xf32, #tpu.memory_space<vmem>>, vector<8x288xf32>
    tpu.vector_store %arg25[%c48_371, %c0_372], %277 {strides = array<i32>} : memref<64x288xf32, #tpu.memory_space<vmem>>, vector<8x288xf32>,
    %c80_373 = arith.constant 80 : index
    %c0_374 = arith.constant 0 : index
    %280 = vector.load %arg24[%c80_373, %c0_374] : memref<128x288xf32, #tpu.memory_space<vmem>>, vector<8x288xf32>
    %c48_375 = arith.constant 48 : index
    %c0_376 = arith.constant 0 : index
    %281 = vector.load %arg26[%c48_375, %c0_376] : memref<64x288xf32, #tpu.memory_space<vmem>>, vector<8x288xf32>
    tpu.vector_store %arg26[%c48_375, %c0_376], %280 {strides = array<i32>} : memref<64x288xf32, #tpu.memory_space<vmem>>, vector<8x288xf32>,
    %c88_377 = arith.constant 88 : index
    %c0_378 = arith.constant 0 : index
    %282 = vector.load %arg24[%c88_377, %c0_378] : memref<128x288xf32, #tpu.memory_space<vmem>>, vector<8x288xf32>
    %c24_379 = arith.constant 24 : index
    %c0_380 = arith.constant 0 : index
    %283 = vector.load %arg25[%c24_379, %c0_380] : memref<64x288xf32, #tpu.memory_space<vmem>>, vector<8x288xf32>
    tpu.vector_store %arg25[%c24_379, %c0_380], %282 {strides = array<i32>} : memref<64x288xf32, #tpu.memory_space<vmem>>, vector<8x288xf32>,
    %c48_381 = arith.constant 48 : index
    %c0_382 = arith.constant 0 : index
    %284 = vector.load %arg27[%c48_381, %c0_382] : memref<64x288xf32, #tpu.memory_space<vmem>>, vector<8x288xf32>
    tpu.vector_store %arg27[%c48_381, %c0_382], %282 {strides = array<i32>} : memref<64x288xf32, #tpu.memory_space<vmem>>, vector<8x288xf32>,
    %c96_383 = arith.constant 96 : index
    %c0_384 = arith.constant 0 : index
    %285 = vector.load %arg24[%c96_383, %c0_384] : memref<128x288xf32, #tpu.memory_space<vmem>>, vector<8x288xf32>
    %c24_385 = arith.constant 24 : index
    %c0_386 = arith.constant 0 : index
    %286 = vector.load %arg26[%c24_385, %c0_386] : memref<64x288xf32, #tpu.memory_space<vmem>>, vector<8x288xf32>
    tpu.vector_store %arg26[%c24_385, %c0_386], %285 {strides = array<i32>} : memref<64x288xf32, #tpu.memory_space<vmem>>, vector<8x288xf32>,
    %c104_387 = arith.constant 104 : index
    %c0_388 = arith.constant 0 : index
    %287 = vector.load %arg24[%c104_387, %c0_388] : memref<128x288xf32, #tpu.memory_space<vmem>>, vector<8x288xf32>
    %c24_389 = arith.constant 24 : index
    %c0_390 = arith.constant 0 : index
    %288 = vector.load %arg27[%c24_389, %c0_390] : memref<64x288xf32, #tpu.memory_space<vmem>>, vector<8x288xf32>
    tpu.vector_store %arg27[%c24_389, %c0_390], %287 {strides = array<i32>} : memref<64x288xf32, #tpu.memory_space<vmem>>, vector<8x288xf32>,
    %c56_391 = arith.constant 56 : index
    %c0_392 = arith.constant 0 : index
    %289 = vector.load %arg25[%c56_391, %c0_392] : memref<64x288xf32, #tpu.memory_space<vmem>>, vector<8x288xf32>
    tpu.vector_store %arg25[%c56_391, %c0_392], %287 {strides = array<i32>} : memref<64x288xf32, #tpu.memory_space<vmem>>, vector<8x288xf32>,
    %c112_393 = arith.constant 112 : index
    %c0_394 = arith.constant 0 : index
    %290 = vector.load %arg24[%c112_393, %c0_394] : memref<128x288xf32, #tpu.memory_space<vmem>>, vector<8x288xf32>
    %c56_395 = arith.constant 56 : index
    %c0_396 = arith.constant 0 : index
    %291 = vector.load %arg26[%c56_395, %c0_396] : memref<64x288xf32, #tpu.memory_space<vmem>>, vector<8x288xf32>
    tpu.vector_store %arg26[%c56_395, %c0_396], %290 {strides = array<i32>} : memref<64x288xf32, #tpu.memory_space<vmem>>, vector<8x288xf32>,
    %c120_397 = arith.constant 120 : index
    %c0_398 = arith.constant 0 : index
    %292 = vector.load %arg24[%c120_397, %c0_398] : memref<128x288xf32, #tpu.memory_space<vmem>>, vector<8x288xf32>
    %c56_399 = arith.constant 56 : index
    %c0_400 = arith.constant 0 : index
    %293 = vector.load %arg27[%c56_399, %c0_400] : memref<64x288xf32, #tpu.memory_space<vmem>>, vector<8x288xf32>
    tpu.vector_store %arg27[%c56_399, %c0_400], %292 {strides = array<i32>} : memref<64x288xf32, #tpu.memory_space<vmem>>, vector<8x288xf32>,
    %c0_401 = arith.constant 0 : index
    %c0_402 = arith.constant 0 : index
    %294 = vector.load %arg25[%c0_401, %c0_402] : memref<64x288xf32, #tpu.memory_space<vmem>>, vector<64x288xf32>
    %c0_403 = arith.constant 0 : index
    %c0_404 = arith.constant 0 : index
    %c0_405 = arith.constant 0 : index
    %295 = vector.load %arg3[%c0_403, %c0_404, %c0_405] : memref<3x288x256xf32, #tpu.memory_space<vmem>>, vector<1x288x256xf32>
    %296 = vector.shape_cast %295 : vector<1x288x256xf32> to vector<288x256xf32>
    %cst_406 = arith.constant dense<0.000000e+00> : vector<64x256xf32>
    %297 = tpu.matmul %294, %296, %cst_406 {dimension_numbers = #tpu.dot_dimension_numbers<[1], [0], [0], [1], [0, 0, 1, 1], [], []>} : vector<64x288xf32>, vector<288x256xf32>, vector<64x256xf32> -> vector<64x256xf32>
    %c0_407 = arith.constant 0 : index
    %c0_408 = arith.constant 0 : index
    %298 = vector.load %arg26[%c0_407, %c0_408] : memref<64x288xf32, #tpu.memory_space<vmem>>, vector<64x288xf32>
    %c1_409 = arith.constant 1 : index
    %c0_410 = arith.constant 0 : index
    %c0_411 = arith.constant 0 : index
    %299 = vector.load %arg3[%c1_409, %c0_410, %c0_411] : memref<3x288x256xf32, #tpu.memory_space<vmem>>, vector<1x288x256xf32>
    %300 = vector.shape_cast %299 : vector<1x288x256xf32> to vector<288x256xf32>
    %cst_412 = arith.constant dense<0.000000e+00> : vector<64x256xf32>
    %301 = tpu.matmul %298, %300, %cst_412 {dimension_numbers = #tpu.dot_dimension_numbers<[1], [0], [0], [1], [0, 0, 1, 1], [], []>} : vector<64x288xf32>, vector<288x256xf32>, vector<64x256xf32> -> vector<64x256xf32>
    %302 = arith.addf %297, %301 : vector<64x256xf32>
    %c0_413 = arith.constant 0 : index
    %c0_414 = arith.constant 0 : index
    %303 = vector.load %arg27[%c0_413, %c0_414] : memref<64x288xf32, #tpu.memory_space<vmem>>, vector<64x288xf32>
    %c2_415 = arith.constant 2 : index
    %c0_416 = arith.constant 0 : index
    %c0_417 = arith.constant 0 : index
    %304 = vector.load %arg3[%c2_415, %c0_416, %c0_417] : memref<3x288x256xf32, #tpu.memory_space<vmem>>, vector<1x288x256xf32>
    %305 = vector.shape_cast %304 : vector<1x288x256xf32> to vector<288x256xf32>
    %cst_418 = arith.constant dense<0.000000e+00> : vector<64x256xf32>
    %306 = tpu.matmul %303, %305, %cst_418 {dimension_numbers = #tpu.dot_dimension_numbers<[1], [0], [0], [1], [0, 0, 1, 1], [], []>} : vector<64x288xf32>, vector<288x256xf32>, vector<64x256xf32> -> vector<64x256xf32>
    %307 = arith.addf %302, %306 : vector<64x256xf32>
    %308 = vector.extract_strided_slice %307 {offsets = [0, 0], sizes = [32, 256], strides = [1, 1]} : vector<64x256xf32> to vector<32x256xf32>
    %309 = vector.extract_strided_slice %307 {offsets = [32, 0], sizes = [32, 256], strides = [1, 1]} : vector<64x256xf32> to vector<32x256xf32>
    %310 = arith.maximumf %308, %309 : vector<32x256xf32>
    %311 = vector.extract_strided_slice %310 {offsets = [0, 0], sizes = [32, 128], strides = [1, 1]} : vector<32x256xf32> to vector<32x128xf32>
    %312 = vector.extract_strided_slice %310 {offsets = [0, 128], sizes = [32, 128], strides = [1, 1]} : vector<32x256xf32> to vector<32x128xf32>
    %313 = arith.maximumf %311, %312 : vector<32x128xf32>
    %c0_419 = arith.constant 0 : index
    %c0_420 = arith.constant 0 : index
    %314 = vector.load %arg4[%c0_419, %c0_420] : memref<1x128xf32, #tpu.memory_space<vmem>>, vector<1x128xf32>
    %315 = vector.broadcast %314 : vector<1x128xf32> to vector<32x128xf32>
    %316 = arith.addf %313, %315 : vector<32x128xf32>
    %cst_421 = arith.constant 0.000000e+00 : f32
    %317 = vector.broadcast %cst_421 : f32 to vector<32x128xf32>
    %318 = arith.maximumf %316, %317 : vector<32x128xf32>
    %cst_422 = arith.constant 0.000000e+00 : f32
    %319 = vector.broadcast %cst_422 : f32 to vector<32x32xf32>
    %320 = tpu.concatenate %319, %318, %319 in 1 : vector<32x32xf32>, vector<32x128xf32>, vector<32x32xf32> -> vector<32x192xf32>
    %c0_423 = arith.constant 0 : index
    %c0_424 = arith.constant 0 : index
    %321 = vector.load %arg28[%c0_423, %c0_424] : memref<32x192xf32, #tpu.memory_space<vmem>>, vector<32x192xf32>
    tpu.vector_store %arg28[%c0_423, %c0_424], %320 {strides = array<i32>} : memref<32x192xf32, #tpu.memory_space<vmem>>, vector<32x192xf32>,
    %cst_425 = arith.constant 0.000000e+00 : f32
    %322 = vector.broadcast %cst_425 : f32 to vector<8x192xf32>
    %c0_426 = arith.constant 0 : index
    %c0_427 = arith.constant 0 : index
    %323 = vector.load %arg29[%c0_426, %c0_427] : memref<16x192xf32, #tpu.memory_space<vmem>>, vector<8x192xf32>
    tpu.vector_store %arg29[%c0_426, %c0_427], %322 {strides = array<i32>} : memref<16x192xf32, #tpu.memory_space<vmem>>, vector<8x192xf32>,
    %c0_428 = arith.constant 0 : index
    %c0_429 = arith.constant 0 : index
    %324 = vector.load %arg28[%c0_428, %c0_429] : memref<32x192xf32, #tpu.memory_space<vmem>>, vector<8x192xf32>
    %c0_430 = arith.constant 0 : index
    %c0_431 = arith.constant 0 : index
    %325 = vector.load %arg30[%c0_430, %c0_431] : memref<16x192xf32, #tpu.memory_space<vmem>>, vector<8x192xf32>
    tpu.vector_store %arg30[%c0_430, %c0_431], %324 {strides = array<i32>} : memref<16x192xf32, #tpu.memory_space<vmem>>, vector<8x192xf32>,
    %c8_432 = arith.constant 8 : index
    %c0_433 = arith.constant 0 : index
    %326 = vector.load %arg28[%c8_432, %c0_433] : memref<32x192xf32, #tpu.memory_space<vmem>>, vector<8x192xf32>
    %c0_434 = arith.constant 0 : index
    %c0_435 = arith.constant 0 : index
    %327 = vector.load %arg31[%c0_434, %c0_435] : memref<16x192xf32, #tpu.memory_space<vmem>>, vector<8x192xf32>
    tpu.vector_store %arg31[%c0_434, %c0_435], %326 {strides = array<i32>} : memref<16x192xf32, #tpu.memory_space<vmem>>, vector<8x192xf32>,
    %c8_436 = arith.constant 8 : index
    %c0_437 = arith.constant 0 : index
    %328 = vector.load %arg29[%c8_436, %c0_437] : memref<16x192xf32, #tpu.memory_space<vmem>>, vector<8x192xf32>
    tpu.vector_store %arg29[%c8_436, %c0_437], %326 {strides = array<i32>} : memref<16x192xf32, #tpu.memory_space<vmem>>, vector<8x192xf32>,
    %c16_438 = arith.constant 16 : index
    %c0_439 = arith.constant 0 : index
    %329 = vector.load %arg28[%c16_438, %c0_439] : memref<32x192xf32, #tpu.memory_space<vmem>>, vector<8x192xf32>
    %c8_440 = arith.constant 8 : index
    %c0_441 = arith.constant 0 : index
    %330 = vector.load %arg30[%c8_440, %c0_441] : memref<16x192xf32, #tpu.memory_space<vmem>>, vector<8x192xf32>
    tpu.vector_store %arg30[%c8_440, %c0_441], %329 {strides = array<i32>} : memref<16x192xf32, #tpu.memory_space<vmem>>, vector<8x192xf32>,
    %c24_442 = arith.constant 24 : index
    %c0_443 = arith.constant 0 : index
    %331 = vector.load %arg28[%c24_442, %c0_443] : memref<32x192xf32, #tpu.memory_space<vmem>>, vector<8x192xf32>
    %c8_444 = arith.constant 8 : index
    %c0_445 = arith.constant 0 : index
    %332 = vector.load %arg31[%c8_444, %c0_445] : memref<16x192xf32, #tpu.memory_space<vmem>>, vector<8x192xf32>
    tpu.vector_store %arg31[%c8_444, %c0_445], %331 {strides = array<i32>} : memref<16x192xf32, #tpu.memory_space<vmem>>, vector<8x192xf32>,
    %c0_446 = arith.constant 0 : index
    %c0_447 = arith.constant 0 : index
    %333 = vector.load %arg29[%c0_446, %c0_447] : memref<16x192xf32, #tpu.memory_space<vmem>>, vector<16x192xf32>
    %c0_448 = arith.constant 0 : index
    %c0_449 = arith.constant 0 : index
    %c0_450 = arith.constant 0 : index
    %334 = vector.load %arg5[%c0_448, %c0_449, %c0_450] : memref<3x192x64xf32, #tpu.memory_space<vmem>>, vector<1x192x64xf32>
    %335 = vector.shape_cast %334 : vector<1x192x64xf32> to vector<192x64xf32>
    %cst_451 = arith.constant dense<0.000000e+00> : vector<16x64xf32>
    %336 = tpu.matmul %333, %335, %cst_451 {dimension_numbers = #tpu.dot_dimension_numbers<[1], [0], [0], [1], [0, 0, 1, 1], [], []>} : vector<16x192xf32>, vector<192x64xf32>, vector<16x64xf32> -> vector<16x64xf32>
    %c0_452 = arith.constant 0 : index
    %c0_453 = arith.constant 0 : index
    %337 = vector.load %arg30[%c0_452, %c0_453] : memref<16x192xf32, #tpu.memory_space<vmem>>, vector<16x192xf32>
    %c1_454 = arith.constant 1 : index
    %c0_455 = arith.constant 0 : index
    %c0_456 = arith.constant 0 : index
    %338 = vector.load %arg5[%c1_454, %c0_455, %c0_456] : memref<3x192x64xf32, #tpu.memory_space<vmem>>, vector<1x192x64xf32>
    %339 = vector.shape_cast %338 : vector<1x192x64xf32> to vector<192x64xf32>
    %cst_457 = arith.constant dense<0.000000e+00> : vector<16x64xf32>
    %340 = tpu.matmul %337, %339, %cst_457 {dimension_numbers = #tpu.dot_dimension_numbers<[1], [0], [0], [1], [0, 0, 1, 1], [], []>} : vector<16x192xf32>, vector<192x64xf32>, vector<16x64xf32> -> vector<16x64xf32>
    %341 = arith.addf %336, %340 : vector<16x64xf32>
    %c0_458 = arith.constant 0 : index
    %c0_459 = arith.constant 0 : index
    %342 = vector.load %arg31[%c0_458, %c0_459] : memref<16x192xf32, #tpu.memory_space<vmem>>, vector<16x192xf32>
    %c2_460 = arith.constant 2 : index
    %c0_461 = arith.constant 0 : index
    %c0_462 = arith.constant 0 : index
    %343 = vector.load %arg5[%c2_460, %c0_461, %c0_462] : memref<3x192x64xf32, #tpu.memory_space<vmem>>, vector<1x192x64xf32>
    %344 = vector.shape_cast %343 : vector<1x192x64xf32> to vector<192x64xf32>
    %cst_463 = arith.constant dense<0.000000e+00> : vector<16x64xf32>
    %345 = tpu.matmul %342, %344, %cst_463 {dimension_numbers = #tpu.dot_dimension_numbers<[1], [0], [0], [1], [0, 0, 1, 1], [], []>} : vector<16x192xf32>, vector<192x64xf32>, vector<16x64xf32> -> vector<16x64xf32>
    %346 = arith.addf %341, %345 : vector<16x64xf32>
    %347 = vector.extract_strided_slice %346 {offsets = [0, 0], sizes = [8, 64], strides = [1, 1]} : vector<16x64xf32> to vector<8x64xf32>
    %348 = vector.extract_strided_slice %346 {offsets = [8, 0], sizes = [8, 64], strides = [1, 1]} : vector<16x64xf32> to vector<8x64xf32>
    %349 = arith.maximumf %347, %348 : vector<8x64xf32>
    %350 = vector.extract_strided_slice %349 {offsets = [0, 0], sizes = [8, 32], strides = [1, 1]} : vector<8x64xf32> to vector<8x32xf32>
    %351 = vector.extract_strided_slice %349 {offsets = [0, 32], sizes = [8, 32], strides = [1, 1]} : vector<8x64xf32> to vector<8x32xf32>
    %352 = arith.maximumf %350, %351 : vector<8x32xf32>
    %c0_464 = arith.constant 0 : index
    %c0_465 = arith.constant 0 : index
    %353 = vector.load %arg6[%c0_464, %c0_465] : memref<1x32xf32, #tpu.memory_space<vmem>>, vector<1x32xf32>
    %354 = vector.broadcast %353 : vector<1x32xf32> to vector<8x32xf32>
    %355 = arith.addf %352, %354 : vector<8x32xf32>
    %cst_466 = arith.constant 0.000000e+00 : f32
    %356 = vector.broadcast %cst_466 : f32 to vector<8x32xf32>
    %357 = arith.maximumf %355, %356 : vector<8x32xf32>
    %c0_467 = arith.constant 0 : index
    %c0_468 = arith.constant 0 : index
    %358 = vector.load %arg7[%c0_467, %c0_468] : memref<32x32xf32, #tpu.memory_space<vmem>>, vector<32x32xf32>
    %cst_469 = arith.constant dense<0.000000e+00> : vector<8x32xf32>
    %359 = tpu.matmul %357, %358, %cst_469 {dimension_numbers = #tpu.dot_dimension_numbers<[1], [0], [0], [1], [0, 0, 1, 1], [], []>} : vector<8x32xf32>, vector<32x32xf32>, vector<8x32xf32> -> vector<8x32xf32>
    %c0_470 = arith.constant 0 : index
    %c0_471 = arith.constant 0 : index
    %360 = vector.load %arg8[%c0_470, %c0_471] : memref<1x32xf32, #tpu.memory_space<vmem>>, vector<1x32xf32>
    %361 = vector.broadcast %360 : vector<1x32xf32> to vector<8x32xf32>
    %362 = arith.addf %359, %361 : vector<8x32xf32>
    %cst_472 = arith.constant dense<0.000000e+00> : vector<8xf32>
    %363 = vector.multi_reduction <add>, %362, %cst_472 [1] : vector<8x32xf32> to vector<8xf32>
    %364 = vector.shape_cast %363 : vector<8xf32> to vector<8x1xf32>
    %cst_473 = arith.constant 3.200000e+01 : f32
    %365 = vector.broadcast %cst_473 : f32 to vector<8x1xf32>
    %366 = arith.divf %364, %365 : vector<8x1xf32>
    %367 = vector.broadcast %366 : vector<8x1xf32> to vector<8x32xf32>
    %368 = arith.subf %362, %367 : vector<8x32xf32>
    %369 = arith.mulf %368, %368 : vector<8x32xf32>
    %cst_474 = arith.constant dense<0.000000e+00> : vector<8xf32>
    %370 = vector.multi_reduction <add>, %369, %cst_474 [1] : vector<8x32xf32> to vector<8xf32>
    %371 = vector.shape_cast %370 : vector<8xf32> to vector<8x1xf32>
    %cst_475 = arith.constant 3.200000e+01 : f32
    %372 = vector.broadcast %cst_475 : f32 to vector<8x1xf32>
    %373 = arith.divf %371, %372 : vector<8x1xf32>
    %374 = vector.broadcast %366 : vector<8x1xf32> to vector<8x32xf32>
    %375 = arith.subf %362, %374 : vector<8x32xf32>
    %cst_476 = arith.constant 9.99999974E-6 : f32
    %376 = vector.broadcast %cst_476 : f32 to vector<8x1xf32>
    %377 = arith.addf %373, %376 : vector<8x1xf32>
    %378 = math.rsqrt %377 : vector<8x1xf32>
    %379 = vector.broadcast %378 : vector<8x1xf32> to vector<8x32xf32>
    %380 = arith.mulf %375, %379 : vector<8x32xf32>
    %c0_477 = arith.constant 0 : index
    %c0_478 = arith.constant 0 : index
    %381 = vector.load %arg9[%c0_477, %c0_478] : memref<1x32xf32, #tpu.memory_space<vmem>>, vector<1x32xf32>
    %382 = vector.broadcast %381 : vector<1x32xf32> to vector<8x32xf32>
    %383 = arith.mulf %380, %382 : vector<8x32xf32>
    %c0_479 = arith.constant 0 : index
    %c0_480 = arith.constant 0 : index
    %384 = vector.load %arg10[%c0_479, %c0_480] : memref<1x32xf32, #tpu.memory_space<vmem>>, vector<1x32xf32>
    %385 = vector.broadcast %384 : vector<1x32xf32> to vector<8x32xf32>
    %386 = arith.addf %383, %385 : vector<8x32xf32>
    %c0_481 = arith.constant 0 : index
    %c0_482 = arith.constant 0 : index
    %387 = vector.load %arg11[%c0_481, %c0_482] : memref<32x128xf32, #tpu.memory_space<vmem>>, vector<32x128xf32>
    %cst_483 = arith.constant dense<0.000000e+00> : vector<8x128xf32>
    %388 = tpu.matmul %386, %387, %cst_483 {dimension_numbers = #tpu.dot_dimension_numbers<[1], [0], [0], [1], [0, 0, 1, 1], [], []>} : vector<8x32xf32>, vector<32x128xf32>, vector<8x128xf32> -> vector<8x128xf32>
    %c0_484 = arith.constant 0 : index
    %c0_485 = arith.constant 0 : index
    %389 = vector.load %arg12[%c0_484, %c0_485] : memref<1x128xf32, #tpu.memory_space<vmem>>, vector<1x128xf32>
    %390 = vector.broadcast %389 : vector<1x128xf32> to vector<8x128xf32>
    %391 = arith.addf %388, %390 : vector<8x128xf32>
    %c0_486 = arith.constant 0 : index
    %c0_487 = arith.constant 0 : index
    %392 = vector.load %arg16[%c0_486, %c0_487] : memref<2x32xf32, #tpu.memory_space<vmem>>, vector<2x32xf32>
    %c0_488 = arith.constant 0 : index
    %c0_489 = arith.constant 0 : index
    %393 = vector.load %arg17[%c0_488, %c0_489] : memref<2x32xf32, #tpu.memory_space<vmem>>, vector<2x32xf32>
    %c0_490 = arith.constant 0 : index
    %c0_491 = arith.constant 0 : index
    %394 = vector.load %arg13[%c0_490, %c0_491] : memref<32x128xf32, #tpu.memory_space<vmem>>, vector<32x128xf32>
    %395 = vector.extract_strided_slice %391 {offsets = [0, 0], sizes = [2, 128], strides = [1, 1]} : vector<8x128xf32> to vector<2x128xf32>
    %cst_492 = arith.constant dense<0.000000e+00> : vector<2x128xf32>
    %396 = tpu.matmul %392, %394, %cst_492 {dimension_numbers = #tpu.dot_dimension_numbers<[1], [0], [0], [1], [0, 0, 1, 1], [], []>} : vector<2x32xf32>, vector<32x128xf32>, vector<2x128xf32> -> vector<2x128xf32>
    %397 = arith.addf %395, %396 : vector<2x128xf32>
    %398 = arith.negf %397 : vector<2x128xf32>
    %399 = math.exp %398 : vector<2x128xf32>
    %cst_493 = arith.constant 1.000000e+00 : f32
    %400 = vector.broadcast %cst_493 : f32 to vector<2x128xf32>
    %401 = arith.addf %400, %399 : vector<2x128xf32>
    %402 = arith.divf %400, %401 : vector<2x128xf32>
    %403 = vector.extract_strided_slice %402 {offsets = [0, 0], sizes = [2, 32], strides = [1, 1]} : vector<2x128xf32> to vector<2x32xf32>
    %404 = vector.extract_strided_slice %402 {offsets = [0, 32], sizes = [2, 32], strides = [1, 1]} : vector<2x128xf32> to vector<2x32xf32>
    %405 = vector.extract_strided_slice %402 {offsets = [0, 64], sizes = [2, 32], strides = [1, 1]} : vector<2x128xf32> to vector<2x32xf32>
    %cst_494 = arith.constant 2.000000e+00 : f32
    %406 = vector.broadcast %cst_494 : f32 to vector<2x32xf32>
    %407 = arith.mulf %406, %405 : vector<2x32xf32>
    %cst_495 = arith.constant 1.000000e+00 : f32
    %408 = vector.broadcast %cst_495 : f32 to vector<2x32xf32>
    %409 = arith.subf %407, %408 : vector<2x32xf32>
    %410 = vector.extract_strided_slice %402 {offsets = [0, 96], sizes = [2, 32], strides = [1, 1]} : vector<2x128xf32> to vector<2x32xf32>
    %411 = arith.mulf %404, %393 : vector<2x32xf32>
    %412 = arith.mulf %403, %409 : vector<2x32xf32>
    %413 = arith.addf %411, %412 : vector<2x32xf32>
    %414 = math.tanh %413 : vector<2x32xf32>
    %415 = arith.mulf %410, %414 : vector<2x32xf32>
    %416 = vector.extract_strided_slice %391 {offsets = [2, 0], sizes = [2, 128], strides = [1, 1]} : vector<8x128xf32> to vector<2x128xf32>
    %cst_496 = arith.constant dense<0.000000e+00> : vector<2x128xf32>
    %417 = tpu.matmul %415, %394, %cst_496 {dimension_numbers = #tpu.dot_dimension_numbers<[1], [0], [0], [1], [0, 0, 1, 1], [], []>} : vector<2x32xf32>, vector<32x128xf32>, vector<2x128xf32> -> vector<2x128xf32>
    %418 = arith.addf %416, %417 : vector<2x128xf32>
    %419 = arith.negf %418 : vector<2x128xf32>
    %420 = math.exp %419 : vector<2x128xf32>
    %cst_497 = arith.constant 1.000000e+00 : f32
    %421 = vector.broadcast %cst_497 : f32 to vector<2x128xf32>
    %422 = arith.addf %421, %420 : vector<2x128xf32>
    %423 = arith.divf %421, %422 : vector<2x128xf32>
    %424 = vector.extract_strided_slice %423 {offsets = [0, 0], sizes = [2, 32], strides = [1, 1]} : vector<2x128xf32> to vector<2x32xf32>
    %425 = vector.extract_strided_slice %423 {offsets = [0, 32], sizes = [2, 32], strides = [1, 1]} : vector<2x128xf32> to vector<2x32xf32>
    %426 = vector.extract_strided_slice %423 {offsets = [0, 64], sizes = [2, 32], strides = [1, 1]} : vector<2x128xf32> to vector<2x32xf32>
    %cst_498 = arith.constant 2.000000e+00 : f32
    %427 = vector.broadcast %cst_498 : f32 to vector<2x32xf32>
    %428 = arith.mulf %427, %426 : vector<2x32xf32>
    %cst_499 = arith.constant 1.000000e+00 : f32
    %429 = vector.broadcast %cst_499 : f32 to vector<2x32xf32>
    %430 = arith.subf %428, %429 : vector<2x32xf32>
    %431 = vector.extract_strided_slice %423 {offsets = [0, 96], sizes = [2, 32], strides = [1, 1]} : vector<2x128xf32> to vector<2x32xf32>
    %432 = arith.mulf %425, %413 : vector<2x32xf32>
    %433 = arith.mulf %424, %430 : vector<2x32xf32>
    %434 = arith.addf %432, %433 : vector<2x32xf32>
    %435 = math.tanh %434 : vector<2x32xf32>
    %436 = arith.mulf %431, %435 : vector<2x32xf32>
    %437 = vector.extract_strided_slice %391 {offsets = [4, 0], sizes = [2, 128], strides = [1, 1]} : vector<8x128xf32> to vector<2x128xf32>
    %cst_500 = arith.constant dense<0.000000e+00> : vector<2x128xf32>
    %438 = tpu.matmul %436, %394, %cst_500 {dimension_numbers = #tpu.dot_dimension_numbers<[1], [0], [0], [1], [0, 0, 1, 1], [], []>} : vector<2x32xf32>, vector<32x128xf32>, vector<2x128xf32> -> vector<2x128xf32>
    %439 = arith.addf %437, %438 : vector<2x128xf32>
    %440 = arith.negf %439 : vector<2x128xf32>
    %441 = math.exp %440 : vector<2x128xf32>
    %cst_501 = arith.constant 1.000000e+00 : f32
    %442 = vector.broadcast %cst_501 : f32 to vector<2x128xf32>
    %443 = arith.addf %442, %441 : vector<2x128xf32>
    %444 = arith.divf %442, %443 : vector<2x128xf32>
    %445 = vector.extract_strided_slice %444 {offsets = [0, 0], sizes = [2, 32], strides = [1, 1]} : vector<2x128xf32> to vector<2x32xf32>
    %446 = vector.extract_strided_slice %444 {offsets = [0, 32], sizes = [2, 32], strides = [1, 1]} : vector<2x128xf32> to vector<2x32xf32>
    %447 = vector.extract_strided_slice %444 {offsets = [0, 64], sizes = [2, 32], strides = [1, 1]} : vector<2x128xf32> to vector<2x32xf32>
    %cst_502 = arith.constant 2.000000e+00 : f32
    %448 = vector.broadcast %cst_502 : f32 to vector<2x32xf32>
    %449 = arith.mulf %448, %447 : vector<2x32xf32>
    %cst_503 = arith.constant 1.000000e+00 : f32
    %450 = vector.broadcast %cst_503 : f32 to vector<2x32xf32>
    %451 = arith.subf %449, %450 : vector<2x32xf32>
    %452 = vector.extract_strided_slice %444 {offsets = [0, 96], sizes = [2, 32], strides = [1, 1]} : vector<2x128xf32> to vector<2x32xf32>
    %453 = arith.mulf %446, %434 : vector<2x32xf32>
    %454 = arith.mulf %445, %451 : vector<2x32xf32>
    %455 = arith.addf %453, %454 : vector<2x32xf32>
    %456 = math.tanh %455 : vector<2x32xf32>
    %457 = arith.mulf %452, %456 : vector<2x32xf32>
    %458 = vector.extract_strided_slice %391 {offsets = [6, 0], sizes = [2, 128], strides = [1, 1]} : vector<8x128xf32> to vector<2x128xf32>
    %cst_504 = arith.constant dense<0.000000e+00> : vector<2x128xf32>
    %459 = tpu.matmul %457, %394, %cst_504 {dimension_numbers = #tpu.dot_dimension_numbers<[1], [0], [0], [1], [0, 0, 1, 1], [], []>} : vector<2x32xf32>, vector<32x128xf32>, vector<2x128xf32> -> vector<2x128xf32>
    %460 = arith.addf %458, %459 : vector<2x128xf32>
    %461 = arith.negf %460 : vector<2x128xf32>
    %462 = math.exp %461 : vector<2x128xf32>
    %cst_505 = arith.constant 1.000000e+00 : f32
    %463 = vector.broadcast %cst_505 : f32 to vector<2x128xf32>
    %464 = arith.addf %463, %462 : vector<2x128xf32>
    %465 = arith.divf %463, %464 : vector<2x128xf32>
    %466 = vector.extract_strided_slice %465 {offsets = [0, 0], sizes = [2, 32], strides = [1, 1]} : vector<2x128xf32> to vector<2x32xf32>
    %467 = vector.extract_strided_slice %465 {offsets = [0, 32], sizes = [2, 32], strides = [1, 1]} : vector<2x128xf32> to vector<2x32xf32>
    %468 = vector.extract_strided_slice %465 {offsets = [0, 64], sizes = [2, 32], strides = [1, 1]} : vector<2x128xf32> to vector<2x32xf32>
    %cst_506 = arith.constant 2.000000e+00 : f32
    %469 = vector.broadcast %cst_506 : f32 to vector<2x32xf32>
    %470 = arith.mulf %469, %468 : vector<2x32xf32>
    %cst_507 = arith.constant 1.000000e+00 : f32
    %471 = vector.broadcast %cst_507 : f32 to vector<2x32xf32>
    %472 = arith.subf %470, %471 : vector<2x32xf32>
    %473 = vector.extract_strided_slice %465 {offsets = [0, 96], sizes = [2, 32], strides = [1, 1]} : vector<2x128xf32> to vector<2x32xf32>
    %474 = arith.mulf %467, %455 : vector<2x32xf32>
    %475 = arith.mulf %466, %472 : vector<2x32xf32>
    %476 = arith.addf %474, %475 : vector<2x32xf32>
    %477 = math.tanh %476 : vector<2x32xf32>
    %478 = arith.mulf %473, %477 : vector<2x32xf32>
    %c0_508 = arith.constant 0 : index
    %c0_509 = arith.constant 0 : index
    %479 = vector.load %arg19[%c0_508, %c0_509] : memref<2x32xf32, #tpu.memory_space<vmem>>, vector<2x32xf32>
    tpu.vector_store %arg19[%c0_508, %c0_509], %478 {strides = array<i32>} : memref<2x32xf32, #tpu.memory_space<vmem>>, vector<2x32xf32>,
    %c0_510 = arith.constant 0 : index
    %c0_511 = arith.constant 0 : index
    %480 = vector.load %arg20[%c0_510, %c0_511] : memref<2x32xf32, #tpu.memory_space<vmem>>, vector<2x32xf32>
    tpu.vector_store %arg20[%c0_510, %c0_511], %476 {strides = array<i32>} : memref<2x32xf32, #tpu.memory_space<vmem>>, vector<2x32xf32>,
    %c0_512 = arith.constant 0 : index
    %c0_513 = arith.constant 0 : index
    %481 = vector.load %arg14[%c0_512, %c0_513] : memref<32x16xf32, #tpu.memory_space<vmem>>, vector<32x16xf32>
    %cst_514 = arith.constant dense<0.000000e+00> : vector<2x16xf32>
    %482 = tpu.matmul %478, %481, %cst_514 {dimension_numbers = #tpu.dot_dimension_numbers<[1], [0], [0], [1], [0, 0, 1, 1], [], []>} : vector<2x32xf32>, vector<32x16xf32>, vector<2x16xf32> -> vector<2x16xf32>
    %c0_515 = arith.constant 0 : index
    %c0_516 = arith.constant 0 : index
    %483 = vector.load %arg15[%c0_515, %c0_516] : memref<1x16xf32, #tpu.memory_space<vmem>>, vector<1x16xf32>
    %484 = vector.broadcast %483 : vector<1x16xf32> to vector<2x16xf32>
    %485 = arith.addf %482, %484 : vector<2x16xf32>
    %c0_517 = arith.constant 0 : index
    %c0_518 = arith.constant 0 : index
    %486 = vector.load %arg18[%c0_517, %c0_518] : memref<2x16xf32, #tpu.memory_space<vmem>>, vector<2x16xf32>
    tpu.vector_store %arg18[%c0_517, %c0_518], %485 {strides = array<i32>} : memref<2x16xf32, #tpu.memory_space<vmem>>, vector<2x16xf32>,
    return
  }
}

</mosaic_0001>

<bundles_post_ra>
// kernel: cnn_lstm_forward.1
= control target key start
LH: loop header
LB: loop body
LE: loop exit
PB: predicated region body
PF: predicated region fallthrough
CT: control target
= control target key end

     0   :  { %s11557_s0 = inlined_call_operand.vmem [shape: f32[64,8,198], index: 0, kind: input, shape index: {}]   ;;  %s11558_s1 = inlined_call_operand.vmem [shape: f32[3,198,512], index: 1, kind: input, shape index: {}]   ;;  %s11559_s2 = inlined_call_operand.vmem [shape: f32[1,256], index: 2, kind: input, shape index: {}]   ;;  %s11560_s3 = inlined_call_operand.vmem [shape: f32[3,288,256], index: 3, kind: input, shape index: {}]   ;;  %s11561_s4 = inlined_call_operand.vmem [shape: f32[1,128], index: 4, kind: input, shape index: {}]   ;;  %s11562_s5 = inlined_call_operand.vmem [shape: f32[3,192,64], index: 5, kind: input, shape index: {}]   ;;  %s11563_s6 = inlined_call_operand.vmem [shape: f32[1,32], index: 6, kind: input, shape index: {}]   ;;  %s11564_s7 = inlined_call_operand.vmem [shape: f32[32,32], index: 7, kind: input, shape index: {}]   ;;  %s11565_s8 = inlined_call_operand.vmem [shape: f32[1,32], index: 8, kind: input, shape index: {}]   ;;  %s11566_s9 = inlined_call_operand.vmem [shape: f32[1,32], index: 9, kind: input, shape index: {}]   ;;  %s11567_s10 = inlined_call_operand.vmem [shape: f32[1,32], index: 10, kind: input, shape index: {}]   ;;  %s11568_s11 = inlined_call_operand.vmem [shape: f32[32,128], index: 11, kind: input, shape index: {}]   ;;  %s11569_s12 = inlined_call_operand.vmem [shape: f32[1,128], index: 12, kind: input, shape index: {}]   ;;  %s11570_s13 = inlined_call_operand.vmem [shape: f32[32,128], index: 13, kind: input, shape index: {}]   ;;  %s11571_s14 = inlined_call_operand.vmem [shape: f32[32,16], index: 14, kind: input, shape index: {}]   ;;  %s11572_s15 = inlined_call_operand.vmem [shape: f32[1,16], index: 15, kind: input, shape index: {}]   ;;  %s11573_s16 = inlined_call_operand.vmem [shape: f32[2,32], index: 16, kind: input, shape index: {}]   ;;  %s11574_s17 = inlined_call_operand.vmem [shape: f32[2,32], index: 17, kind: input, shape index: {}]   ;;  %s11575_s18 = inlined_call_operand.hbm [shape: f32[2,16], index: 18, kind: output, shape index: {0}]   ;;  %s11576_s19 = inlined_call_operand.hbm [shape: f32[2,32], index: 19, kind: output, shape index: {1}]   ;;  %s11577_s20 = inlined_call_operand.hbm [shape: f32[2,32], index: 20, kind: output, shape index: {2}]  }
   0x1   :  { %11582 = sst [smem:[#allocation39_spill]] %s11557_s0 }
   0x2   :  { %11583 = sst [smem:[#allocation40_spill]] %s11558_s1 }
   0x3   :  { %11584 = sst [smem:[#allocation41_spill]] %s11559_s2 }
   0x4   :  { %11585 = sst [smem:[#allocation42_spill]] %s11560_s3 }
   0x5   :  { %11586 = sst [smem:[#allocation43_spill]] %s11561_s4 }
   0x6   :  { %26 = vsyncpa [#allocation14], 0  ;;  %s11587_s23 = sld [smem:[#allocation40_spill]]  ;;  %vm65_vm0 = vcmask 572416   ;;  %s11588_s28 = sld [smem:[#allocation39_spill]]  ;;  %vm873_vm1 = vcmask 1045504  }
   0xc   :  { %v5850_v0 = vld [vmem:[%s11587_s23 + $0x328] sm:$0xff]  ;;  %v5852_v2 = vld [vmem:[%s11587_s23 + $0x338] sm:$0xff]  ;;  %v5849_v5 = vld [vmem:[%s11587_s23 + $0x320] sm:$0xff] }
   0xd   :  { %v5854_v1 = vld [vmem:[%s11587_s23 + $0x348] sm:$0xff]  ;;  %v5856_v4 = vld [vmem:[%s11587_s23 + $0x358] sm:$0xff]  ;;  %v5853_v6 = vld [vmem:[%s11587_s23 + $0x340] sm:$0xff] }
   0xe   :  { %v6609_v3 = vpack.c.bf16 %v5854_v1, %v5850_v0  ;;  %v6657_v7 = vpack.c.bf16 %v5856_v4, %v5852_v2  ;;  %v6611_v8 = vpack.c.bf16 %v5853_v6, %v5849_v5  ;;  %v5851_v9 = vld [vmem:[%s11587_s23 + $0x330] sm:$0xff]  ;;  %v5858_v11 = vld [vmem:[%s11587_s23 + $0x368] sm:$0xff]  ;;  %v5860_v14 = vld [vmem:[%s11587_s23 + $0x378] sm:$0xff] }
   0xf   :  { %v5855_v10 = vld [vmem:[%s11587_s23 + $0x350] sm:$0xff]  ;;  %v5862_v13 = vld [vmem:[%s11587_s23 + $0x388] sm:$0xff]  ;;  %v5864_v15 = vld [vmem:[%s11587_s23 + $0x398] sm:$0xff] }
  0x10   :  { %6610 = vmatprep.subr.bf16.mxu0 %v6609_v3  ;;  %v6659_v12 = vpack.c.bf16 %v5855_v10, %v5851_v9  ;;  %6658 = vmatprep.subr.bf16.mxu1 %v6657_v7  ;;  %v6613_v16 = vpack.c.bf16 %v5862_v13, %v5858_v11  ;;  %v6661_v17 = vpack.c.bf16 %v5864_v15, %v5860_v14  ;;  %v5857_v18 = vld [vmem:[%s11587_s23 + $0x360] sm:$0xff]  ;;  %v5859_v20 = vld [vmem:[%s11587_s23 + $0x370] sm:$0xff]  ;;  %v5866_v23 = vld [vmem:[%s11587_s23 + $0x3a8] sm:$0xff] }
  0x11   :  { %6612 = vmatpush1.bf16.msra.mxu0 %v6611_v8  ;;  %v5861_v19 = vld [vmem:[%s11587_s23 + $0x380] sm:$0xff]  ;;  %v5863_v22 = vld [vmem:[%s11587_s23 + $0x390] sm:$0xff]  ;;  %v5870_v24 = vld [vmem:[%s11587_s23 + $0x3c8] sm:$0xff] }
  0x12   :  { %6660 = vmatpush1.bf16.msra.mxu1 %v6659_v12  ;;  %v6615_v21 = vpack.c.bf16 %v5861_v19, %v5857_v18  ;;  %6614 = vmatprep.subr.bf16.mxu0 %v6613_v16  ;;  %v6663_v25 = vpack.c.bf16 %v5863_v22, %v5859_v20  ;;  %v6617_v26 = vpack.c.bf16 %v5870_v24, %v5866_v23  ;;  %v5868_v27 = vld [vmem:[%s11587_s23 + $0x3b8] sm:$0xff]  ;;  %v5865_v29 = vld [vmem:[%s11587_s23 + $0x3a0] sm:$0xff]  ;;  %v5867_v32 = vld [vmem:[%s11587_s23 + $0x3b0] sm:$0xff] }
  0x13   :  { %6662 = vmatprep.subr.bf16.mxu1 %v6661_v17  ;;  %v5872_v28 = vld [vmem:[%s11587_s23 + $0x3d8] sm:$0xff]  ;;  %v5869_v31 = vld [vmem:[%s11587_s23 + $0x3c0] sm:$0xff]  ;;  %v5871_v33 = vld [vmem:[%s11587_s23 + $0x3d0] sm:$0xff] }
  0x14   :  { %v6665_v30 = vpack.c.bf16 %v5872_v28, %v5868_v27  ;;  %v6619_v34 = vpack.c.bf16 %v5869_v31, %v5865_v29  ;;  %v5874_v35 = vld [vmem:[%s11587_s23 + $0x3e8] sm:$0xff]  ;;  %v5876_v37 = vld [vmem:[%s11587_s23 + $0x3f8] sm:$0xff]  ;;  %v6667_v38 = vpack.c.bf16 %v5871_v33, %v5867_v32  ;;  %v5873_v41 = vld [vmem:[%s11587_s23 + $0x3e0] sm:$0xff] }
  0x15   :  { %6616 = vmatpush1.bf16.msra.mxu0 %v6615_v21  ;;  %v5878_v36 = vld [vmem:[%s11587_s23 + $0x408] sm:$0xff]  ;;  %v5880_v40 = vld [vmem:[%s11587_s23 + $0x418] sm:$0xff]  ;;  %v5877_v42 = vld [vmem:[%s11587_s23 + $0x400] sm:$0xff] }
  0x16   :  { %6664 = vmatpush1.bf16.msra.mxu1 %v6663_v25  ;;  %6618 = vmatprep.subr.bf16.mxu0 %v6617_v26  ;;  %v6621_v39 = vpack.c.bf16 %v5878_v36, %v5874_v35  ;;  %v6669_v43 = vpack.c.bf16 %v5880_v40, %v5876_v37  ;;  %v5875_v44 = vld [vmem:[%s11587_s23 + $0x3f0] sm:$0xff]  ;;  %v5882_v46 = vld [vmem:[%s11587_s23 + $0x428] sm:$0xff]  ;;  %v5884_v48 = vld [vmem:[%s11587_s23 + $0x438] sm:$0xff]  ;;  %v6623_v50 = vpack.c.bf16 %v5877_v42, %v5873_v41 }
  0x17   :  { %6666 = vmatprep.subr.bf16.mxu1 %v6665_v30  ;;  %v5879_v45 = vld [vmem:[%s11587_s23 + $0x410] sm:$0xff]  ;;  %v5886_v47 = vld [vmem:[%s11587_s23 + $0x448] sm:$0xff]  ;;  %v5888_v49 = vld [vmem:[%s11587_s23 + $0x458] sm:$0xff] }
  0x18   :  { %v6671_v51 = vpack.c.bf16 %v5879_v45, %v5875_v44  ;;  %v6625_v52 = vpack.c.bf16 %v5886_v47, %v5882_v46  ;;  %v5881_v53 = vld [vmem:[%s11587_s23 + $0x420] sm:$0xff]  ;;  %v5883_v55 = vld [vmem:[%s11587_s23 + $0x430] sm:$0xff]  ;;  %v6673_v56 = vpack.c.bf16 %v5888_v49, %v5884_v48  ;;  %v5890_v58 = vld [vmem:[%s11587_s23 + $0x468] sm:$0xff] }
  0x19   :  { %6620 = vmatpush1.bf16.msra.mxu0 %v6619_v34  ;;  %v5885_v54 = vld [vmem:[%s11587_s23 + $0x440] sm:$0xff]  ;;  %v5887_v57 = vld [vmem:[%s11587_s23 + $0x450] sm:$0xff]  ;;  %v5894_v59 = vld [vmem:[%s11587_s23 + $0x488] sm:$0xff] }
  0x1a   :  { %6668 = vmatpush1.bf16.msra.mxu1 %v6667_v38  ;;  %6622 = vmatprep.subr.bf16.mxu0 %v6621_v39  ;;  %v5892_v60 = vld [vmem:[%s11587_s23 + $0x478] sm:$0xff]  ;;  %v6627_v62 = vpack.c.bf16 %v5885_v54, %v5881_v53  ;;  %v6675_v63 = vpack.c.bf16 %v5887_v57, %v5883_v55  ;;  %v6629_v0 = vpack.c.bf16 %v5894_v59, %v5890_v58  ;;  %v5889_v1 = vld [vmem:[%s11587_s23 + $0x460] sm:$0xff]  ;;  %v5891_v3 = vld [vmem:[%s11587_s23 + $0x470] sm:$0xff] }
  0x1b   :  { %6670 = vmatprep.subr.bf16.mxu1 %v6669_v43  ;;  %v5896_v61 = vld [vmem:[%s11587_s23 + $0x498] sm:$0xff]  ;;  %v5893_v2 = vld [vmem:[%s11587_s23 + $0x480] sm:$0xff]  ;;  %v5895_v5 = vld [vmem:[%s11587_s23 + $0x490] sm:$0xff] }
  0x1c   :  { %v6677_v4 = vpack.c.bf16 %v5896_v61, %v5892_v60  ;;  %v5898_v6 = vld [vmem:[%s11587_s23 + $0x4a8] sm:$0xff]  ;;  %v5900_v8 = vld [vmem:[%s11587_s23 + $0x4b8] sm:$0xff]  ;;  %v6631_v10 = vpack.c.bf16 %v5893_v2, %v5889_v1  ;;  %v6679_v11 = vpack.c.bf16 %v5895_v5, %v5891_v3  ;;  %v5897_v13 = vld [vmem:[%s11587_s23 + $0x4a0] sm:$0xff] }
  0x1d   :  { %6624 = vmatpush1.bf16.msra.mxu0 %v6623_v50  ;;  %v5902_v7 = vld [vmem:[%s11587_s23 + $0x4c8] sm:$0xff]  ;;  %v5904_v9 = vld [vmem:[%s11587_s23 + $0x4d8] sm:$0xff]  ;;  %v5901_v14 = vld [vmem:[%s11587_s23 + $0x4c0] sm:$0xff] }
  0x1e   :  { %6672 = vmatpush1.bf16.msra.mxu1 %v6671_v51  ;;  %6626 = vmatprep.subr.bf16.mxu0 %v6625_v52  ;;  %v6633_v12 = vpack.c.bf16 %v5902_v7, %v5898_v6  ;;  %v5899_v15 = vld [vmem:[%s11587_s23 + $0x4b0] sm:$0xff]  ;;  %v6681_v16 = vpack.c.bf16 %v5904_v9, %v5900_v8  ;;  %v5906_v18 = vld [vmem:[%s11587_s23 + $0x4e8] sm:$0xff]  ;;  %v5908_v20 = vld [vmem:[%s11587_s23 + $0x4f8] sm:$0xff]  ;;  %v6635_v22 = vpack.c.bf16 %v5901_v14, %v5897_v13 }
  0x1f   :  { %6674 = vmatprep.subr.bf16.mxu1 %v6673_v56  ;;  %v5903_v17 = vld [vmem:[%s11587_s23 + $0x4d0] sm:$0xff]  ;;  %v5910_v19 = vld [vmem:[%s11587_s23 + $0x508] sm:$0xff]  ;;  %v5912_v21 = vld [vmem:[%s11587_s23 + $0x518] sm:$0xff] }
  0x20   :  { %v6683_v23 = vpack.c.bf16 %v5903_v17, %v5899_v15  ;;  %v6637_v24 = vpack.c.bf16 %v5910_v19, %v5906_v18  ;;  %v5905_v25 = vld [vmem:[%s11587_s23 + $0x4e0] sm:$0xff]  ;;  %v5907_v27 = vld [vmem:[%s11587_s23 + $0x4f0] sm:$0xff]  ;;  %v6685_v28 = vpack.c.bf16 %v5912_v21, %v5908_v20  ;;  %v5914_v30 = vld [vmem:[%s11587_s23 + $0x528] sm:$0xff] }
  0x21   :  { %6628 = vmatpush1.bf16.msra.mxu0 %v6627_v62  ;;  %v5909_v26 = vld [vmem:[%s11587_s23 + $0x500] sm:$0xff]  ;;  %v5911_v29 = vld [vmem:[%s11587_s23 + $0x510] sm:$0xff]  ;;  %v5918_v31 = vld [vmem:[%s11587_s23 + $0x548] sm:$0xff] }
  0x22   :  { %6676 = vmatpush1.bf16.msra.mxu1 %v6675_v63  ;;  %6630 = vmatprep.subr.bf16.mxu0 %v6629_v0  ;;  %v5916_v32 = vld [vmem:[%s11587_s23 + $0x538] sm:$0xff]  ;;  %v6639_v34 = vpack.c.bf16 %v5909_v26, %v5905_v25  ;;  %v6687_v35 = vpack.c.bf16 %v5911_v29, %v5907_v27  ;;  %v6641_v36 = vpack.c.bf16 %v5918_v31, %v5914_v30  ;;  %v5913_v37 = vld [vmem:[%s11587_s23 + $0x520] sm:$0xff]  ;;  %v5915_v39 = vld [vmem:[%s11587_s23 + $0x530] sm:$0xff] }
  0x23   :  { %6678 = vmatprep.subr.bf16.mxu1 %v6677_v4  ;;  %v5920_v33 = vld [vmem:[%s11587_s23 + $0x558] sm:$0xff]  ;;  %v5917_v38 = vld [vmem:[%s11587_s23 + $0x540] sm:$0xff]  ;;  %v5919_v41 = vld [vmem:[%s11587_s23 + $0x550] sm:$0xff] }
  0x24   :  { %v6689_v40 = vpack.c.bf16 %v5920_v33, %v5916_v32  ;;  %v5922_v42 = vld [vmem:[%s11587_s23 + $0x568] sm:$0xff]  ;;  %v5924_v44 = vld [vmem:[%s11587_s23 + $0x578] sm:$0xff]  ;;  %v6643_v46 = vpack.c.bf16 %v5917_v38, %v5913_v37  ;;  %v5921_v47 = vld [vmem:[%s11587_s23 + $0x560] sm:$0xff]  ;;  %v6691_v50 = vpack.c.bf16 %v5919_v41, %v5915_v39  ;;  %v7776_v32 = vmov 0.0  }
  0x25   :  { %6632 = vmatpush1.bf16.msra.mxu0 %v6631_v10  ;;  %v5926_v43 = vld [vmem:[%s11587_s23 + $0x588] sm:$0xff]  ;;  %v5928_v45 = vld [vmem:[%s11587_s23 + $0x598] sm:$0xff]  ;;  %v5925_v48 = vld [vmem:[%s11587_s23 + $0x580] sm:$0xff]  ;;  %66 = vst.msk [vmem:[#allocation2 + $0x8] sm:$0xff] %vm65_vm0, %v7776_v32 }
  0x26   :  { %6680 = vmatpush1.bf16.msra.mxu1 %v6679_v11  ;;  %6634 = vmatprep.subr.bf16.mxu0 %v6633_v12  ;;  %v5923_v49 = vld [vmem:[%s11587_s23 + $0x570] sm:$0xff]  ;;  %v6645_v51 = vpack.c.bf16 %v5926_v43, %v5922_v42  ;;  %v68_v53 = vld [vmem:[%s11588_s28 + $0x8] sm:$0xff]  ;;  %v8137_v54 = vld [vmem:[%s11588_s28] sm:$0xff]  ;;  %v6693_v55 = vpack.c.bf16 %v5928_v45, %v5924_v44  ;;  %v6647_v62 = vpack.c.bf16 %v5925_v48, %v5921_v47 }
  0x27   :  { %6682 = vmatprep.subr.bf16.mxu1 %v6681_v16  ;;  %v5927_v52 = vld [vmem:[%s11587_s23 + $0x590] sm:$0xff]  ;;  %v5930_v56 = vld [vmem:[%s11587_s23 + $0x5a8] sm:$0xff]  ;;  %v5932_v58 = vld [vmem:[%s11587_s23 + $0x5b8] sm:$0xff]  ;;  %70 = vst.msk [vmem:[#allocation3 + $0x8] sm:$0xff] %vm65_vm0, %v68_v53 }
  0x28   :  { %v5934_v57 = vld [vmem:[%s11587_s23 + $0x5c8] sm:$0xff]  ;;  %v5936_v59 = vld [vmem:[%s11587_s23 + $0x5d8] sm:$0xff]  ;;  %v5929_v60 = vld [vmem:[%s11587_s23 + $0x5a0] sm:$0xff]  ;;  %v6695_v2 = vpack.c.bf16 %v5927_v52, %v5923_v49  ;;  %64 = vst [vmem:[#allocation2] sm:$0xff] %v7776_v32 }
  0x29   :  { %6636 = vmatpush1.bf16.msra.mxu0 %v6635_v22  ;;  %v5933_v61 = vld [vmem:[%s11587_s23 + $0x5c0] sm:$0xff]  ;;  %v5931_v63 = vld [vmem:[%s11587_s23 + $0x5b0] sm:$0xff]  ;;  %v5730_v1 = vld [vmem:[%s11588_s28 + $0x48] sm:$0xff]  ;;  %v6649_v3 = vpack.c.bf16 %v5934_v57, %v5930_v56  ;;  %v6697_v7 = vpack.c.bf16 %v5936_v59, %v5932_v58 }
  0x2a   :  { %6684 = vmatpush1.bf16.msra.mxu1 %v6683_v23  ;;  %6638 = vmatprep.subr.bf16.mxu0 %v6637_v24  ;;  %v5935_v0 = vld [vmem:[%s11587_s23 + $0x5d0] sm:$0xff]  ;;  %94 = vst.msk [vmem:[#allocation3 + $0x18] sm:$0xff] %vm65_vm0, %v5730_v1  ;;  %v8171_v4 = vld [vmem:[%s11588_s28 + $0x40] sm:$0xff]  ;;  %v5738_v5 = vld [vmem:[%s11588_s28 + $0x88] sm:$0xff]  ;;  %v6651_v14 = vpack.c.bf16 %v5933_v61, %v5929_v60 }
  0x2b   :  { %6686 = vmatprep.subr.bf16.mxu1 %v6685_v28  ;;  %v8179_v6 = vld [vmem:[%s11588_s28 + $0x80] sm:$0xff]  ;;  %v5938_v8 = vld [vmem:[%s11587_s23 + $0x5e8] sm:$0xff]  ;;  %v5940_v10 = vld [vmem:[%s11587_s23 + $0x5f8] sm:$0xff]  ;;  %118 = vst.msk [vmem:[#allocation3 + $0x28] sm:$0xff] %vm65_vm0, %v5738_v5  ;;  %v6699_v18 = vpack.c.bf16 %v5935_v0, %v5931_v63 }
  0x2c   :  { %v5942_v9 = vld [vmem:[%s11587_s23 + $0x608] sm:$0xff]  ;;  %v5944_v11 = vld [vmem:[%s11587_s23 + $0x618] sm:$0xff]  ;;  %v5937_v12 = vld [vmem:[%s11587_s23 + $0x5e0] sm:$0xff] }
  0x2d   :  { %6640 = vmatpush1.bf16.msra.mxu0 %v6639_v34  ;;  %v5746_v13 = vld [vmem:[%s11588_s28 + $0xc8] sm:$0xff]  ;;  %v5941_v15 = vld [vmem:[%s11587_s23 + $0x600] sm:$0xff]  ;;  %v5939_v16 = vld [vmem:[%s11587_s23 + $0x5f0] sm:$0xff]  ;;  %v6653_v19 = vpack.c.bf16 %v5942_v9, %v5938_v8  ;;  %v6701_v23 = vpack.c.bf16 %v5944_v11, %v5940_v10 }
  0x2e   :  { %6688 = vmatpush1.bf16.msra.mxu1 %v6687_v35  ;;  %6642 = vmatprep.subr.bf16.mxu0 %v6641_v36  ;;  %v5943_v17 = vld [vmem:[%s11587_s23 + $0x610] sm:$0xff]  ;;  %142 = vst.msk [vmem:[#allocation3 + $0x38] sm:$0xff] %vm65_vm0, %v5746_v13  ;;  %v613_v20 = vld [vmem:[#allocation3 + $0x8] sm:$0xff]  ;;  %v8213_v21 = vld [vmem:[%s11588_s28 + $0xc0] sm:$0xff]  ;;  %v6655_v27 = vpack.c.bf16 %v5941_v15, %v5937_v12 }
  0x2f   :  { %6690 = vmatprep.subr.bf16.mxu1 %v6689_v40  ;;  %v5754_v22 = vld [vmem:[%s11588_s28 + $0x108] sm:$0xff]  ;;  %5951 = vmatprep.mubr.msk.f32.mxu0 %vm65_vm0, %v613_v20  ;;  %v8223_v24 = vld [vmem:[%s11588_s28 + $0x100] sm:$0xff]  ;;  %v6703_v28 = vpack.c.bf16 %v5943_v17, %v5939_v16  ;;  %v5948_v30 = vld [vmem:[%s11587_s23 + $0x638] sm:$0x3f] }
  0x30   :  { %166 = vst.msk [vmem:[#allocation3 + $0x48] sm:$0xff] %vm65_vm0, %v5754_v22  ;;  %v5762_v25 = vld [vmem:[%s11588_s28 + $0x148] sm:$0xff]  ;;  %v8231_v26 = vld [vmem:[%s11588_s28 + $0x140] sm:$0xff]  ;;  %5985 = vmatprep.mubr.msk.f32.mxu1 %vm65_vm0, %v613_v20  ;;  %v515_v37 = vld [vmem:[%s11587_s23 + $0x18] sm:$0xff] }
  0x31   :  { %6644 = vmatpush1.bf16.msra.mxu0 %v6643_v46  ;;  %190 = vst.msk [vmem:[#allocation3 + $0x58] sm:$0xff] %vm65_vm0, %v5762_v25  ;;  %v5946_v29 = vld [vmem:[%s11587_s23 + $0x628] sm:$0x3f]  ;;  %v8254_v35 = vld [vmem:[%s11588_s28 + $0x180] sm:$0xff]  ;;  %v519_v40 = vld [vmem:[%s11587_s23 + $0x38] sm:$0xff] }
  0x32   :  { %6692 = vmatpush1.bf16.msra.mxu1 %v6691_v50  ;;  %6646 = vmatprep.subr.bf16.mxu0 %v6645_v51  ;;  %v513_v31 = vld [vmem:[%s11587_s23 + $0x8] sm:$0xff]  ;;  %v5945_v36 = vld [vmem:[%s11587_s23 + $0x620] sm:$0x3f]  ;;  %v514_v43 = vld [vmem:[%s11587_s23 + $0x10] sm:$0xff]  ;;  %v6753_v50 = vpack.c.bf16 %v519_v40, %v515_v37 }
  0x33   :  { %6694 = vmatprep.subr.bf16.mxu1 %v6693_v55  ;;  %v517_v33 = vld [vmem:[%s11587_s23 + $0x28] sm:$0xff]  ;;  %v8269_v39 = vld [vmem:[%s11588_s28 + $0x1c0] sm:$0xff]  ;;  %v518_v44 = vld [vmem:[%s11587_s23 + $0x30] sm:$0xff] }
  0x34   :  { %v5770_v34 = vld [vmem:[%s11588_s28 + $0x188] sm:$0xff]  ;;  %v512_v41 = vld [vmem:[%s11587_s23] sm:$0xff]  ;;  %v5947_v46 = vld [vmem:[%s11587_s23 + $0x630] sm:$0x3f]  ;;  %v6705_v47 = vpack.c.bf16 %v517_v33, %v513_v31  ;;  %v6755_v58 = vpack.c.bf16 %v518_v44, %v514_v43 }
  0x35   :  { %6648 = vmatpush1.bf16.msra.mxu0 %v6647_v62  ;;  %214 = vst.msk [vmem:[#allocation3 + $0x68] sm:$0xff] %vm65_vm0, %v5770_v34  ;;  %v5778_v38 = vld [vmem:[%s11588_s28 + $0x1c8] sm:$0xff]  ;;  %v516_v42 = vld [vmem:[%s11587_s23 + $0x20] sm:$0xff]  ;;  %v523_v52 = vld [vmem:[%s11587_s23 + $0x58] sm:$0xff] }
  0x36   :  { %6696 = vmatpush1.bf16.msra.mxu1 %v6695_v2  ;;  %6650 = vmatprep.subr.bf16.mxu0 %v6649_v3  ;;  %238 = vst.msk [vmem:[#allocation3 + $0x78] sm:$0xff] %vm65_vm0, %v5778_v38  ;;  %v5786_v45 = vld [vmem:[%s11588_s28 + $0x208] sm:$0xff]  ;;  %v6707_v51 = vpack.c.bf16 %v516_v42, %v512_v41  ;;  %v527_v53 = vld [vmem:[%s11587_s23 + $0x78] sm:$0xff]  ;;  %v520_v55 = vld [vmem:[%s11587_s23 + $0x40] sm:$0xff] }
  0x37   :  { %6698 = vmatprep.subr.bf16.mxu1 %v6697_v7  ;;  %v521_v48 = vld [vmem:[%s11587_s23 + $0x48] sm:$0xff]  ;;  %262 = vst.msk [vmem:[#allocation3 + $0x88] sm:$0xff] %vm65_vm0, %v5786_v45  ;;  %v524_v56 = vld [vmem:[%s11587_s23 + $0x60] sm:$0xff]  ;;  %v615_v62 = vld [vmem:[#allocation3 + $0x18] sm:$0xff]  ;;  %v6757_v9 = vpack.c.bf16 %v527_v53, %v523_v52 }
  0x38   :  { %v525_v49 = vld [vmem:[%s11587_s23 + $0x68] sm:$0xff]  ;;  %v8317_v57 = vld [vmem:[%s11588_s28 + $0x200] sm:$0xff]  ;;  %v522_v63 = vld [vmem:[%s11587_s23 + $0x50] sm:$0xff]  ;;  %v6711_v10 = vpack.c.bf16 %v524_v56, %v520_v55 }
  0x39   :  { %6652 = vmatpush1.bf16.msra.mxu0 %v6651_v14  ;;  %v5794_v59 = vld [vmem:[%s11588_s28 + $0x248] sm:$0xff]  ;;  %v8326_v60 = vld [vmem:[%s11588_s28 + $0x240] sm:$0xff]  ;;  %v526_v1 = vld [vmem:[%s11587_s23 + $0x70] sm:$0xff]  ;;  %v6709_v7 = vpack.c.bf16 %v525_v49, %v521_v48 }
  0x3a   :  { %6700 = vmatpush1.bf16.msra.mxu1 %v6699_v18  ;;  %6654 = vmatprep.subr.bf16.mxu0 %v6653_v19  ;;  %v5802_v61 = vld [vmem:[%s11588_s28 + $0x288] sm:$0xff]  ;;  %286 = vst.msk [vmem:[#allocation3 + $0x98] sm:$0xff] %vm65_vm0, %v5794_v59  ;;  %v8341_v0 = vld [vmem:[%s11588_s28 + $0x280] sm:$0xff]  ;;  %v535_v8 = vld [vmem:[%s11587_s23 + $0xb8] sm:$0xff]  ;;  %v6759_v14 = vpack.c.bf16 %v526_v1, %v522_v63 }
  0x3b   :  { %6702 = vmatprep.subr.bf16.mxu1 %v6701_v23  ;;  %310 = vst.msk [vmem:[#allocation3 + $0xa8] sm:$0xff] %vm65_vm0, %v5802_v61  ;;  %v529_v2 = vld [vmem:[%s11587_s23 + $0x88] sm:$0xff]  ;;  %v528_v11 = vld [vmem:[%s11587_s23 + $0x80] sm:$0xff]  ;;  %v530_v15 = vld [vmem:[%s11587_s23 + $0x90] sm:$0xff] }
  0x3c   :  { %v533_v3 = vld [vmem:[%s11587_s23 + $0xa8] sm:$0xff]  ;;  %v532_v12 = vld [vmem:[%s11587_s23 + $0xa0] sm:$0xff]  ;;  %v619_v18 = vld [vmem:[#allocation3 + $0x38] sm:$0xff] }
  0x3d   :  { %6656 = vmatpush1.bf16.msra.mxu0 %v6655_v27  ;;  %v617_v5 = vld [vmem:[#allocation3 + $0x28] sm:$0xff]  ;;  %v8378_v16 = vld [vmem:[%s11588_s28 + $0x2c0] sm:$0xff]  ;;  %v534_v19 = vld [vmem:[%s11587_s23 + $0xb0] sm:$0xff]  ;;  %v6713_v22 = vpack.c.bf16 %v533_v3, %v529_v2 }
  0x3e   :  { %6704 = vmatpush1.bf16.msra.mxu1 %v6703_v28  ;;  %5949 = vmatprep.subr.msk.mxu0 %vm873_vm1, %v5946_v29  ;;  %v5810_v13 = vld [vmem:[%s11588_s28 + $0x2c8] sm:$0xff]  ;;  %v8392_v20 = vld [vmem:[%s11588_s28 + $0x300] sm:$0xff]  ;;  %v6715_v28 = vpack.c.bf16 %v532_v12, %v528_v11  ;;  %v539_v29 = vld [vmem:[%s11587_s23 + $0xd8] sm:$0xff]  ;;  %v6763_v33 = vpack.c.bf16 %v534_v19, %v530_v15 }
  0x3f   :  { %5983 = vmatprep.subr.msk.mxu1 %vm873_vm1, %v5948_v30  ;;  %334 = vst.msk [vmem:[#allocation3 + $0xb8] sm:$0xff] %vm65_vm0, %v5810_v13  ;;  %v5818_v17 = vld [vmem:[%s11588_s28 + $0x308] sm:$0xff]  ;;  %v543_v30 = vld [vmem:[%s11587_s23 + $0xf8] sm:$0xff]  ;;  %v536_v31 = vld [vmem:[%s11587_s23 + $0xc0] sm:$0xff] }
  0x40   :  { %358 = vst.msk [vmem:[#allocation3 + $0xc8] sm:$0xff] %vm65_vm0, %v5818_v17  ;;  %v541_v23 = vld [vmem:[%s11587_s23 + $0xe8] sm:$0xff]  ;;  %v540_v34 = vld [vmem:[%s11587_s23 + $0xe0] sm:$0xff]  ;;  %v542_v37 = vld [vmem:[%s11587_s23 + $0xf0] sm:$0xff]  ;;  %v6765_v45 = vpack.c.bf16 %v543_v30, %v539_v29 }
  0x41   :  { %5950 = vmatpush1.msk.msra.mxu0 %vm873_vm1, %v5945_v36  ;;  %v5826_v25 = vld [vmem:[%s11588_s28 + $0x348] sm:$0xff]  ;;  %v538_v36 = vld [vmem:[%s11587_s23 + $0xd0] sm:$0xff]  ;;  %v8429_v38 = vld [vmem:[%s11588_s28 + $0x340] sm:$0xff] }
  0x42   :  { %5984 = vmatpush1.msk.msra.mxu1 %vm873_vm1, %v5947_v46  ;;  %951 = vmatmul.mubr.f32.vlgmr.msra.gmra.mrb[0].mxu0 %v8137_v54  ;;  %382 = vst.msk [vmem:[#allocation3 + $0xd8] sm:$0xff] %vm65_vm0, %v5826_v25  ;;  %v621_v32 = vld [vmem:[#allocation3 + $0x48] sm:$0xff]  ;;  %v8437_v41 = vld [vmem:[%s11588_s28 + $0x380] sm:$0xff]  ;;  %v6719_v46 = vpack.c.bf16 %v540_v34, %v536_v31  ;;  %v547_v48 = vld [vmem:[%s11587_s23 + $0x118] sm:$0xff] }
  0x43   :  { %1208 = vmatmul.mubr.f32.vlgmr.msra.gmra.mrb[0].mxu1 %v8137_v54  ;;  %6706 = vmatprep.subr.bf16.mxu0 %v6705_v47  ;;  %v531_v54 = vld [vmem:[%s11587_s23 + $0x98] sm:$0xff]  ;;  %v5834_v40 = vld [vmem:[%s11588_s28 + $0x388] sm:$0xff]  ;;  %v8450_v44 = vld [vmem:[%s11588_s28 + $0x3c0] sm:$0xff] }
  0x44   :  { %6754 = vmatprep.subr.bf16.mxu1 %v6753_v50  ;;  %6708 = vmatpush1.bf16.msra.mxu0 %v6707_v51  ;;  %v6761_v27 = vpack.c.bf16 %v535_v8, %v531_v54  ;;  %v545_v42 = vld [vmem:[%s11587_s23 + $0x108] sm:$0xff]  ;;  %406 = vst.msk [vmem:[#allocation3 + $0xe8] sm:$0xff] %vm65_vm0, %v5834_v40  ;;  %v551_v49 = vld [vmem:[%s11587_s23 + $0x138] sm:$0xff]  ;;  %v6767_v51 = vpack.c.bf16 %v542_v37, %v538_v36  ;;  %v544_v52 = vld [vmem:[%s11587_s23 + $0x100] sm:$0xff] }
  0x45   :  { %6756 = vmatpush1.bf16.msra.mxu1 %v6755_v58  ;;  %5952 = vmatprep.mubr.msk.f32.mxu0 %vm65_vm0, %v615_v62  ;;  %v5842_v43 = vld [vmem:[%s11588_s28 + $0x3c8] sm:$0xff]  ;;  %v623_v50 = vld [vmem:[#allocation3 + $0x58] sm:$0xff]  ;;  %v548_v53 = vld [vmem:[%s11587_s23 + $0x120] sm:$0xff]  ;;  %v6769_v1 = vpack.c.bf16 %v551_v49, %v547_v48 }
  0x46   :  { %5986 = vmatprep.mubr.msk.f32.mxu1 %vm65_vm0, %v615_v62  ;;  %957 = vmatmul.mubr.f32.gmra.mrb[2].mxu0 %v8171_v4  ;;  %v549_v47 = vld [vmem:[%s11587_s23 + $0x128] sm:$0xff]  ;;  %430 = vst.msk [vmem:[#allocation3 + $0xf8] sm:$0xff] %vm65_vm0, %v5842_v43  ;;  %v546_v55 = vld [vmem:[%s11587_s23 + $0x110] sm:$0xff]  ;;  %v8493_v63 = vld [vmem:[%s11588_s28 + $0x20] sm:$0xff]  ;;  %v6723_v2 = vpack.c.bf16 %v548_v53, %v544_v52 }
  0x47   :  { %1214 = vmatmul.mubr.f32.gmra.mrb[2].mxu1 %v8171_v4  ;;  %5953 = vmatprep.mubr.msk.f32.mxu0 %vm65_vm0, %v617_v5  ;;  %v537_v4 = vld [vmem:[%s11587_s23 + $0xc8] sm:$0xff]  ;;  %v550_v56 = vld [vmem:[%s11587_s23 + $0x130] sm:$0xff]  ;;  %v6721_v61 = vpack.c.bf16 %v549_v47, %v545_v42  ;;  %v559_v3 = vld [vmem:[%s11587_s23 + $0x178] sm:$0xff] }
  0x48   :  { %5987 = vmatprep.mubr.msk.f32.mxu1 %vm65_vm0, %v617_v5  ;;  %6710 = vmatprep.subr.bf16.mxu0 %v6709_v7  ;;  %v553_v58 = vld [vmem:[%s11587_s23 + $0x148] sm:$0xff]  ;;  %v8505_v7 = vld [vmem:[%s11588_s28 + $0x60] sm:$0xff]  ;;  %v6771_v8 = vpack.c.bf16 %v550_v56, %v546_v55  ;;  %v554_v11 = vld [vmem:[%s11587_s23 + $0x150] sm:$0xff] }
  0x49   :  { %6758 = vmatprep.subr.bf16.mxu1 %v6757_v9  ;;  %6712 = vmatpush1.bf16.msra.mxu0 %v6711_v10  ;;  %v557_v59 = vld [vmem:[%s11587_s23 + $0x168] sm:$0xff]  ;;  %v552_v9 = vld [vmem:[%s11587_s23 + $0x140] sm:$0xff]  ;;  %v558_v12 = vld [vmem:[%s11587_s23 + $0x170] sm:$0xff] }
  0x4a   :  { %963 = vmatmul.mubr.f32.gmra.mrb[4].mxu0 %v8179_v6  ;;  %6760 = vmatpush1.bf16.msra.mxu1 %v6759_v14  ;;  %v5726_v62 = vld [vmem:[%s11588_s28 + $0x28] sm:$0xff]  ;;  %v556_v10 = vld [vmem:[%s11587_s23 + $0x160] sm:$0xff]  ;;  %v6725_v15 = vpack.c.bf16 %v557_v59, %v553_v58  ;;  %v567_v17 = vld [vmem:[%s11587_s23 + $0x1b8] sm:$0xff] }
  0x4b   :  { %1220 = vmatmul.mubr.f32.gmra.mrb[4].mxu1 %v8179_v6  ;;  %5954 = vmatprep.mubr.msk.f32.mxu0 %vm65_vm0, %v619_v18  ;;  %v6717_v6 = vpack.c.bf16 %v541_v23, %v537_v4  ;;  %82 = vst.msk [vmem:[#allocation3 + $0x108] sm:$0xff] %vm65_vm0, %v5726_v62  ;;  %v5734_v5 = vld [vmem:[%s11588_s28 + $0x68] sm:$0xff]  ;;  %v8545_v23 = vld [vmem:[%s11588_s28 + $0xa0] sm:$0xff]  ;;  %v571_v37 = vld [vmem:[%s11587_s23 + $0x1d8] sm:$0xff] }
  0x4c   :  { %5988 = vmatprep.mubr.msk.f32.mxu1 %vm65_vm0, %v619_v18  ;;  %6714 = vmatprep.subr.bf16.mxu0 %v6713_v22  ;;  %v625_v54 = vld [vmem:[#allocation3 + $0x68] sm:$0xff]  ;;  %106 = vst.msk [vmem:[#allocation3 + $0x118] sm:$0xff] %vm65_vm0, %v5734_v5  ;;  %v560_v18 = vld [vmem:[%s11587_s23 + $0x180] sm:$0xff]  ;;  %v6727_v22 = vpack.c.bf16 %v556_v10, %v552_v9  ;;  %v575_v43 = vld [vmem:[%s11587_s23 + $0x1f8] sm:$0xff] }
  0x4d   :  { %6762 = vmatprep.subr.bf16.mxu1 %v6761_v27  ;;  %6716 = vmatpush1.bf16.msra.mxu0 %v6715_v28  ;;  %v561_v13 = vld [vmem:[%s11587_s23 + $0x188] sm:$0xff]  ;;  %v627_v27 = vld [vmem:[#allocation3 + $0x78] sm:$0xff]  ;;  %v6775_v28 = vpack.c.bf16 %v558_v12, %v554_v11  ;;  %v564_v29 = vld [vmem:[%s11587_s23 + $0x1a0] sm:$0xff]  ;;  %v6781_v59 = vpack.c.bf16 %v575_v43, %v571_v37 }
  0x4e   :  { %969 = vmatmul.mubr.f32.gmra.mrb[6].mxu0 %v8213_v21  ;;  %6764 = vmatpush1.bf16.msra.mxu1 %v6763_v33  ;;  %v565_v14 = vld [vmem:[%s11587_s23 + $0x1a8] sm:$0xff]  ;;  %v8559_v30 = vld [vmem:[%s11588_s28 + $0xe0] sm:$0xff]  ;;  %v566_v33 = vld [vmem:[%s11587_s23 + $0x1b0] sm:$0xff]  ;;  %v6731_v42 = vpack.c.bf16 %v564_v29, %v560_v18 }
  0x4f   :  { %1226 = vmatmul.mubr.f32.gmra.mrb[6].mxu1 %v8213_v21  ;;  %5955 = vmatprep.mubr.msk.f32.mxu0 %vm65_vm0, %v621_v32  ;;  %v555_v21 = vld [vmem:[%s11587_s23 + $0x158] sm:$0xff]  ;;  %v5742_v4 = vld [vmem:[%s11588_s28 + $0xa8] sm:$0xff]  ;;  %v8586_v40 = vld [vmem:[%s11588_s28 + $0x120] sm:$0xff] }
  0x50   :  { %5989 = vmatprep.mubr.msk.f32.mxu1 %vm65_vm0, %v621_v32  ;;  %6718 = vmatprep.subr.bf16.mxu0 %v6717_v6  ;;  %v6773_v19 = vpack.c.bf16 %v559_v3, %v555_v21  ;;  %v5750_v25 = vld [vmem:[%s11588_s28 + $0xe8] sm:$0xff]  ;;  %130 = vst.msk [vmem:[#allocation3 + $0x128] sm:$0xff] %vm65_vm0, %v5742_v4  ;;  %v562_v32 = vld [vmem:[%s11587_s23 + $0x190] sm:$0xff]  ;;  %v8621_v53 = vld [vmem:[%s11588_s28 + $0x1a0] sm:$0xff] }
  0x51   :  { %6766 = vmatprep.subr.bf16.mxu1 %v6765_v45  ;;  %6720 = vmatpush1.bf16.msra.mxu0 %v6719_v46  ;;  %154 = vst.msk [vmem:[#allocation3 + $0x138] sm:$0xff] %vm65_vm0, %v5750_v25  ;;  %v5758_v31 = vld [vmem:[%s11588_s28 + $0x128] sm:$0xff]  ;;  %v568_v45 = vld [vmem:[%s11587_s23 + $0x1c0] sm:$0xff]  ;;  %v6779_v47 = vpack.c.bf16 %v566_v33, %v562_v32  ;;  %v570_v48 = vld [vmem:[%s11587_s23 + $0x1d0] sm:$0xff] }
  0x52   :  { %975 = vmatmul.mubr.f32.gmra.mrb[8].mxu0 %v8223_v24  ;;  %6768 = vmatpush1.bf16.msra.mxu1 %v6767_v51  ;;  %v569_v34 = vld [vmem:[%s11587_s23 + $0x1c8] sm:$0xff]  ;;  %178 = vst.msk [vmem:[#allocation3 + $0x148] sm:$0xff] %vm65_vm0, %v5758_v31  ;;  %v572_v46 = vld [vmem:[%s11587_s23 + $0x1e0] sm:$0xff]  ;;  %v574_v51 = vld [vmem:[%s11587_s23 + $0x1f0] sm:$0xff] }
  0x53   :  { %1232 = vmatmul.mubr.f32.gmra.mrb[8].mxu1 %v8223_v24  ;;  %5956 = vmatprep.mubr.msk.f32.mxu0 %vm65_vm0, %v623_v50  ;;  %v563_v24 = vld [vmem:[%s11587_s23 + $0x198] sm:$0xff]  ;;  %v573_v36 = vld [vmem:[%s11587_s23 + $0x1e8] sm:$0xff]  ;;  %v6783_v3 = vpack.c.bf16 %v574_v51, %v570_v48  ;;  %v580_v5 = vld [vmem:[%s11587_s23 + $0x220] sm:$0xff] }
  0x54   :  { %5990 = vmatprep.mubr.msk.f32.mxu1 %vm65_vm0, %v623_v50  ;;  %6722 = vmatprep.subr.bf16.mxu0 %v6721_v61  ;;  %v6777_v6 = vpack.c.bf16 %v567_v17, %v563_v24  ;;  %v5766_v49 = vld [vmem:[%s11588_s28 + $0x168] sm:$0xff]  ;;  %v8607_v50 = vld [vmem:[%s11588_s28 + $0x160] sm:$0xff]  ;;  %v6733_v55 = vpack.c.bf16 %v573_v36, %v569_v34  ;;  %v6735_v61 = vpack.c.bf16 %v572_v46, %v568_v45  ;;  %v579_v21 = vld [vmem:[%s11587_s23 + $0x218] sm:$0xff] }
  0x55   :  { %6770 = vmatprep.subr.bf16.mxu1 %v6769_v1  ;;  %6724 = vmatpush1.bf16.msra.mxu0 %v6723_v2  ;;  %202 = vst.msk [vmem:[#allocation3 + $0x158] sm:$0xff] %vm65_vm0, %v5766_v49  ;;  %v5774_v52 = vld [vmem:[%s11588_s28 + $0x1a8] sm:$0xff]  ;;  %v583_v62 = vld [vmem:[%s11587_s23 + $0x238] sm:$0xff]  ;;  %v576_v1 = vld [vmem:[%s11587_s23 + $0x200] sm:$0xff] }
  0x56   :  { %981 = vmatmul.mubr.f32.gmra.mrb[10].mxu0 %v8231_v26  ;;  %6772 = vmatpush1.bf16.msra.mxu1 %v6771_v8  ;;  %v577_v56 = vld [vmem:[%s11587_s23 + $0x208] sm:$0xff]  ;;  %226 = vst.msk [vmem:[#allocation3 + $0x168] sm:$0xff] %vm65_vm0, %v5774_v52  ;;  %v631_v2 = vld [vmem:[#allocation3 + $0x98] sm:$0xff]  ;;  %v582_v8 = vld [vmem:[%s11587_s23 + $0x230] sm:$0xff]  ;;  %v6739_v24 = vpack.c.bf16 %v580_v5, %v576_v1 }
  0x57   :  { %1238 = vmatmul.mubr.f32.gmra.mrb[10].mxu1 %v8231_v26  ;;  %5957 = vmatprep.mubr.msk.f32.mxu0 %vm65_vm0, %v625_v54  ;;  %v6729_v26 = vpack.c.bf16 %v565_v14, %v561_v13  ;;  %v581_v58 = vld [vmem:[%s11587_s23 + $0x228] sm:$0xff]  ;;  %v8661_v11 = vld [vmem:[%s11588_s28 + $0x1e0] sm:$0xff]  ;;  %v587_v18 = vld [vmem:[%s11587_s23 + $0x258] sm:$0xff] }
  0x58   :  { %5991 = vmatprep.mubr.msk.f32.mxu1 %vm65_vm0, %v625_v54  ;;  %6726 = vmatprep.subr.bf16.mxu0 %v6725_v15  ;;  %v578_v54 = vld [vmem:[%s11587_s23 + $0x210] sm:$0xff]  ;;  %v585_v9 = vld [vmem:[%s11587_s23 + $0x248] sm:$0xff]  ;;  %v6737_v12 = vpack.c.bf16 %v581_v58, %v577_v56  ;;  %v8671_v13 = vld [vmem:[%s11588_s28 + $0x220] sm:$0xff]  ;;  %v6785_v15 = vpack.c.bf16 %v583_v62, %v579_v21 }
  0x59   :  { %6774 = vmatprep.subr.bf16.mxu1 %v6773_v19  ;;  %6728 = vmatpush1.bf16.msra.mxu0 %v6727_v22  ;;  %v5782_v10 = vld [vmem:[%s11588_s28 + $0x1e8] sm:$0xff]  ;;  %v591_v19 = vld [vmem:[%s11587_s23 + $0x278] sm:$0xff]  ;;  %v6787_v4 = vpack.c.bf16 %v582_v8, %v578_v54  ;;  %v584_v25 = vld [vmem:[%s11587_s23 + $0x240] sm:$0xff] }
  0x5a   :  { %987 = vmatmul.mubr.f32.gmra.mrb[12].mxu0 %v8254_v35  ;;  %6776 = vmatpush1.bf16.msra.mxu1 %v6775_v28  ;;  %250 = vst.msk [vmem:[#allocation3 + $0x178] sm:$0xff] %vm65_vm0, %v5782_v10  ;;  %v5798_v14 = vld [vmem:[%s11588_s28 + $0x268] sm:$0xff]  ;;  %v8697_v28 = vld [vmem:[%s11588_s28 + $0x260] sm:$0xff]  ;;  %v586_v29 = vld [vmem:[%s11587_s23 + $0x250] sm:$0xff]  ;;  %v6789_v36 = vpack.c.bf16 %v591_v19, %v587_v18 }
  0x5b   :  { %1244 = vmatmul.mubr.f32.gmra.mrb[12].mxu1 %v8254_v35  ;;  %5958 = vmatprep.mubr.msk.f32.mxu0 %vm65_vm0, %v627_v27  ;;  %v629_v35 = vld [vmem:[#allocation3 + $0x88] sm:$0xff]  ;;  %298 = vst.msk [vmem:[#allocation3 + $0x198] sm:$0xff] %vm65_vm0, %v5798_v14  ;;  %v590_v31 = vld [vmem:[%s11587_s23 + $0x270] sm:$0xff]  ;;  %v595_v34 = vld [vmem:[%s11587_s23 + $0x298] sm:$0xff] }
  0x5c   :  { %5992 = vmatprep.mubr.msk.f32.mxu1 %vm65_vm0, %v627_v27  ;;  %6730 = vmatprep.subr.bf16.mxu0 %v6729_v26  ;;  %v589_v17 = vld [vmem:[%s11587_s23 + $0x268] sm:$0xff]  ;;  %v588_v27 = vld [vmem:[%s11587_s23 + $0x260] sm:$0xff]  ;;  %v635_v45 = vld [vmem:[#allocation3 + $0xb8] sm:$0xff]  ;;  %v6791_v46 = vpack.c.bf16 %v590_v31, %v586_v29 }
  0x5d   :  { %6778 = vmatprep.subr.bf16.mxu1 %v6777_v6  ;;  %6732 = vmatpush1.bf16.msra.mxu0 %v6731_v42  ;;  %v633_v22 = vld [vmem:[#allocation3 + $0xa8] sm:$0xff]  ;;  %v6741_v33 = vpack.c.bf16 %v589_v17, %v585_v9  ;;  %v6743_v37 = vpack.c.bf16 %v588_v27, %v584_v25  ;;  %v8724_v6 = vld [vmem:[%s11588_s28 + $0x2a0] sm:$0xff]  ;;  %v594_v51 = vld [vmem:[%s11587_s23 + $0x290] sm:$0xff] }
  0x5e   :  { %993 = vmatmul.mubr.f32.gmra.mrb[14].mxu0 %v8269_v39  ;;  %6780 = vmatpush1.bf16.msra.mxu1 %v6779_v47  ;;  %v593_v32 = vld [vmem:[%s11587_s23 + $0x288] sm:$0xff]  ;;  %v8732_v43 = vld [vmem:[%s11588_s28 + $0x2e0] sm:$0xff]  ;;  %v599_v47 = vld [vmem:[%s11587_s23 + $0x2b8] sm:$0xff] }
  0x5f   :  { %1250 = vmatmul.mubr.f32.gmra.mrb[14].mxu1 %v8269_v39  ;;  %5959 = vmatprep.mubr.msk.f32.mxu0 %vm65_vm0, %v629_v35  ;;  %v5790_v39 = vld [vmem:[%s11588_s28 + $0x228] sm:$0xff]  ;;  %v592_v48 = vld [vmem:[%s11587_s23 + $0x280] sm:$0xff]  ;;  %v598_v52 = vld [vmem:[%s11587_s23 + $0x2b0] sm:$0xff] }
  0x60   :  { %5993 = vmatprep.mubr.msk.f32.mxu1 %vm65_vm0, %v629_v35  ;;  %6734 = vmatprep.subr.bf16.mxu0 %v6733_v55  ;;  %274 = vst.msk [vmem:[#allocation3 + $0x188] sm:$0xff] %vm65_vm0, %v5790_v39  ;;  %v5806_v26 = vld [vmem:[%s11588_s28 + $0x2a8] sm:$0xff]  ;;  %v596_v49 = vld [vmem:[%s11587_s23 + $0x2a0] sm:$0xff]  ;;  %v603_v56 = vld [vmem:[%s11587_s23 + $0x2d8] sm:$0xff] }
  0x61   :  { %6782 = vmatprep.subr.bf16.mxu1 %v6781_v59  ;;  %6736 = vmatpush1.bf16.msra.mxu0 %v6735_v61  ;;  %322 = vst.msk [vmem:[#allocation3 + $0x1a8] sm:$0xff] %vm65_vm0, %v5806_v26  ;;  %v5814_v42 = vld [vmem:[%s11588_s28 + $0x2e8] sm:$0xff]  ;;  %v607_v58 = vld [vmem:[%s11587_s23 + $0x2f8] sm:$0xff]  ;;  %v6793_v59 = vpack.c.bf16 %v599_v47, %v595_v34  ;;  %v6747_v61 = vpack.c.bf16 %v596_v49, %v592_v48  ;;  %v600_v21 = vld [vmem:[%s11587_s23 + $0x2c0] sm:$0xff] }
  0x62   :  { %999 = vmatmul.mubr.f32.gmra.mrb[16].mxu0 %v8317_v57  ;;  %6784 = vmatpush1.bf16.msra.mxu1 %v6783_v3  ;;  %346 = vst.msk [vmem:[#allocation3 + $0x1b8] sm:$0xff] %vm65_vm0, %v5814_v42  ;;  %v601_v35 = vld [vmem:[%s11587_s23 + $0x2c8] sm:$0xff]  ;;  %v604_v62 = vld [vmem:[%s11587_s23 + $0x2e0] sm:$0xff]  ;;  %v602_v8 = vld [vmem:[%s11587_s23 + $0x2d0] sm:$0xff]  ;;  %v6797_v14 = vpack.c.bf16 %v607_v58, %v603_v56 }
  0x63   :  { %1256 = vmatmul.mubr.f32.gmra.mrb[16].mxu1 %v8317_v57  ;;  %5960 = vmatprep.mubr.msk.f32.mxu0 %vm65_vm0, %v631_v2  ;;  %v597_v57 = vld [vmem:[%s11587_s23 + $0x2a8] sm:$0xff]  ;;  %v8780_v3 = vld [vmem:[%s11588_s28 + $0x320] sm:$0xff]  ;;  %v606_v9 = vld [vmem:[%s11587_s23 + $0x2f0] sm:$0xff] }
  0x64   :  { %5994 = vmatprep.mubr.msk.f32.mxu1 %vm65_vm0, %v631_v2  ;;  %6738 = vmatprep.subr.bf16.mxu0 %v6737_v12  ;;  %v6745_v55 = vpack.c.bf16 %v597_v57, %v593_v32  ;;  %v5822_v1 = vld [vmem:[%s11588_s28 + $0x328] sm:$0xff]  ;;  %v6795_v2 = vpack.c.bf16 %v598_v52, %v594_v51  ;;  %v8788_v54 = vld [vmem:[%s11588_s28 + $0x360] sm:$0xff]  ;;  %v6799_v17 = vpack.c.bf16 %v606_v9, %v602_v8  ;;  %v639_v19 = vld [vmem:[#allocation3 + $0xd8] sm:$0xff] }
  0x65   :  { %6786 = vmatprep.subr.bf16.mxu1 %v6785_v15  ;;  %6740 = vmatpush1.bf16.msra.mxu0 %v6739_v24  ;;  %370 = vst.msk [vmem:[#allocation3 + $0x1c8] sm:$0xff] %vm65_vm0, %v5822_v1  ;;  %v5830_v5 = vld [vmem:[%s11588_s28 + $0x368] sm:$0xff]  ;;  %v8807_v39 = vld [vmem:[%s11588_s28 + $0x3a0] sm:$0xff]  ;;  %v6751_v15 = vpack.c.bf16 %v604_v62, %v600_v21  ;;  %v6088_v29 = vld [vmem:[%s11587_s23 + $0x658] sm:$0xff] }
  0x66   :  { %1005 = vmatmul.mubr.f32.gmra.mrb[18].mxu0 %v8326_v60  ;;  %6788 = vmatpush1.bf16.msra.mxu1 %v6787_v4  ;;  %394 = vst.msk [vmem:[#allocation3 + $0x1d8] sm:$0xff] %vm65_vm0, %v5830_v5  ;;  %v5838_v10 = vld [vmem:[%s11588_s28 + $0x3a8] sm:$0xff]  ;;  %v8817_v18 = vld [vmem:[%s11588_s28 + $0x3e0] sm:$0xff]  ;;  %v611_v4 = vld [vmem:[%s11587_s23 + $0x318] sm:$0x3f] }
  0x67   :  { %1262 = vmatmul.mubr.f32.gmra.mrb[18].mxu1 %v8326_v60  ;;  %5961 = vmatprep.mubr.msk.f32.mxu0 %vm65_vm0, %v633_v22  ;;  %v605_v60 = vld [vmem:[%s11587_s23 + $0x2e8] sm:$0xff]  ;;  %418 = vst.msk [vmem:[#allocation3 + $0x1e8] sm:$0xff] %vm65_vm0, %v5838_v10  ;;  %v608_v25 = vld [vmem:[%s11587_s23 + $0x300] sm:$0x3f]  ;;  %v5728_v31 = vld [vmem:[%s11588_s28 + $0x38] sm:$0xff] }
  0x68   :  { %5995 = vmatprep.mubr.msk.f32.mxu1 %vm65_vm0, %v633_v22  ;;  %6742 = vmatprep.subr.bf16.mxu0 %v6741_v33  ;;  %v637_v12 = vld [vmem:[#allocation3 + $0xc8] sm:$0xff]  ;;  %v6092_v32 = vld [vmem:[%s11587_s23 + $0x678] sm:$0xff]  ;;  %87 = vst.msk [vmem:[#allocation2 + $0x18] sm:$0xff] %vm65_vm0, %v5728_v31  ;;  %89 = vst.msk [vmem:[#allocation4 + $0x108] sm:$0xff] %vm65_vm0, %v5728_v31 }
  0x69   :  { %6790 = vmatprep.subr.bf16.mxu1 %v6789_v36  ;;  %6744 = vmatpush1.bf16.msra.mxu0 %v6743_v37  ;;  %v5846_v24 = vld [vmem:[%s11588_s28 + $0x3e8] sm:$0xff]  ;;  %v8852_v33 = vld [vmem:[%s11588_s28 + $0x30] sm:$0xff]  ;;  %v5736_v57 = vld [vmem:[%s11588_s28 + $0x78] sm:$0xff]  ;;  %v6849_v37 = vpack.c.bf16 %v6092_v32, %v6088_v29 }
  0x6a   :  { %1011 = vmatmul.mubr.f32.gmra.mrb[20].mxu0 %v8341_v0  ;;  %6792 = vmatpush1.bf16.msra.mxu1 %v6791_v46  ;;  %442 = vst.msk [vmem:[#allocation3 + $0x1f8] sm:$0xff] %vm65_vm0, %v5846_v24  ;;  %v609_v22 = vld [vmem:[%s11587_s23 + $0x308] sm:$0x3f]  ;;  %v610_v34 = vld [vmem:[%s11587_s23 + $0x310] sm:$0x3f]  ;;  %88 = vst [vmem:[#allocation4 + $0x100] sm:$0xff] %v8852_v33 }
  0x6b   :  { %1268 = vmatmul.mubr.f32.gmra.mrb[20].mxu1 %v8341_v0  ;;  %5962 = vmatprep.mubr.msk.f32.mxu0 %vm65_vm0, %v635_v45  ;;  %v6749_v0 = vpack.c.bf16 %v605_v60, %v601_v35  ;;  %v6090_v27 = vld [vmem:[%s11587_s23 + $0x668] sm:$0xff]  ;;  %111 = vst.msk [vmem:[#allocation2 + $0x28] sm:$0xff] %vm65_vm0, %v5736_v57  ;;  %113 = vst.msk [vmem:[#allocation4 + $0x118] sm:$0xff] %vm65_vm0, %v5736_v57  ;;  %v8868_v26 = vld [vmem:[%s11588_s28 + $0x70] sm:$0xff] }
  0x6c   :  { %5996 = vmatprep.mubr.msk.f32.mxu1 %vm65_vm0, %v635_v45  ;;  %6746 = vmatprep.subr.bf16.mxu0 %v6745_v55  ;;  %112 = vst [vmem:[#allocation4 + $0x110] sm:$0xff] %v8868_v26  ;;  %v5744_v42 = vld [vmem:[%s11588_s28 + $0xb8] sm:$0xff]  ;;  %v8887_v45 = vld [vmem:[%s11588_s28 + $0xb0] sm:$0xff]  ;;  %v645_v51 = vld [vmem:[#allocation3 + $0x108] sm:$0xff] }
  0x6d   :  { %6794 = vmatprep.subr.bf16.mxu1 %v6793_v59  ;;  %6748 = vmatpush1.bf16.msra.mxu0 %v6747_v61  ;;  %135 = vst.msk [vmem:[#allocation2 + $0x38] sm:$0xff] %vm65_vm0, %v5744_v42  ;;  %137 = vst.msk [vmem:[#allocation4 + $0x128] sm:$0xff] %vm65_vm0, %v5744_v42  ;;  %v5752_v46 = vld [vmem:[%s11588_s28 + $0xf8] sm:$0xff]  ;;  %v8895_v47 = vld [vmem:[%s11588_s28 + $0xf0] sm:$0xff] }
  0x6e   :  { %1017 = vmatmul.mubr.f32.gmra.mrb[22].mxu0 %v8378_v16  ;;  %6796 = vmatpush1.bf16.msra.mxu1 %v6795_v2  ;;  %v643_v48 = vld [vmem:[#allocation3 + $0xf8] sm:$0xff]  ;;  %136 = vst [vmem:[#allocation4 + $0x120] sm:$0xff] %v8887_v45  ;;  %159 = vst.msk [vmem:[#allocation2 + $0x48] sm:$0xff] %vm65_vm0, %v5752_v46  ;;  %v8908_v49 = vld [vmem:[%s11588_s28 + $0x130] sm:$0xff] }
  0x6f   :  { %1274 = vmatmul.mubr.f32.gmra.mrb[22].mxu1 %v8378_v16  ;;  %5963 = vmatprep.mubr.msk.f32.mxu0 %vm65_vm0, %v637_v12  ;;  %v6086_v16 = vld [vmem:[%s11587_s23 + $0x648] sm:$0xff]  ;;  %161 = vst.msk [vmem:[#allocation4 + $0x138] sm:$0xff] %vm65_vm0, %v5752_v46  ;;  %160 = vst [vmem:[#allocation4 + $0x130] sm:$0xff] %v8895_v47  ;;  %v5768_v52 = vld [vmem:[%s11588_s28 + $0x178] sm:$0xff] }
  0x70   :  { %5997 = vmatprep.mubr.msk.f32.mxu1 %vm65_vm0, %v637_v12  ;;  %6750 = vmatprep.subr.bf16.mxu0 %v6749_v0  ;;  %v6801_v36 = vpack.c.bf16 %v6090_v27, %v6086_v16  ;;  %184 = vst [vmem:[#allocation4 + $0x140] sm:$0xff] %v8908_v49  ;;  %v8923_v35 = vld [vmem:[%s11588_s28 + $0x170] sm:$0xff]  ;;  %v5776_v55 = vld [vmem:[%s11588_s28 + $0x1b8] sm:$0xff]  ;;  %207 = vst.msk [vmem:[#allocation2 + $0x68] sm:$0xff] %vm65_vm0, %v5768_v52 }
  0x71   :  { %6798 = vmatprep.subr.bf16.mxu1 %v6797_v14  ;;  %6752 = vmatpush1.bf16.msra.mxu0 %v6751_v15  ;;  %209 = vst.msk [vmem:[#allocation4 + $0x158] sm:$0xff] %vm65_vm0, %v5768_v52  ;;  %208 = vst [vmem:[#allocation4 + $0x150] sm:$0xff] %v8923_v35  ;;  %v5784_v60 = vld [vmem:[%s11588_s28 + $0x1f8] sm:$0xff]  ;;  %v8951_v58 = vld [vmem:[%s11588_s28 + $0x1f0] sm:$0xff] }
  0x72   :  { %1023 = vmatmul.mubr.f32.gmra.mrb[24].mxu0 %v8392_v20  ;;  %6800 = vmatpush1.bf16.msra.mxu1 %v6799_v17  ;;  %231 = vst.msk [vmem:[#allocation2 + $0x78] sm:$0xff] %vm65_vm0, %v5776_v55  ;;  %233 = vst.msk [vmem:[#allocation4 + $0x168] sm:$0xff] %vm65_vm0, %v5776_v55  ;;  %v647_v56 = vld [vmem:[#allocation3 + $0x118] sm:$0xff]  ;;  %v8963_v59 = vld [vmem:[%s11588_s28 + $0x230] sm:$0xff] }
  0x73   :  { %1280 = vmatmul.mubr.f32.gmra.mrb[24].mxu1 %v8392_v20  ;;  %5964 = vmatprep.mubr.msk.f32.mxu0 %vm65_vm0, %v639_v19  ;;  %v641_v20 = vld [vmem:[#allocation3 + $0xe8] sm:$0xff]  ;;  %255 = vst.msk [vmem:[#allocation2 + $0x88] sm:$0xff] %vm65_vm0, %v5784_v60  ;;  %257 = vst.msk [vmem:[#allocation4 + $0x178] sm:$0xff] %vm65_vm0, %v5784_v60  ;;  %v5800_v61 = vld [vmem:[%s11588_s28 + $0x278] sm:$0xff] }
  0x74   :  { %5998 = vmatprep.mubr.msk.f32.mxu1 %vm65_vm0, %v639_v19  ;;  %6017 = vmatprep.subr.msk.mxu0 %vm873_vm1, %v609_v22  ;;  %256 = vst [vmem:[#allocation4 + $0x170] sm:$0xff] %v8951_v58  ;;  %v8971_v21 = vld [vmem:[%s11588_s28 + $0x270] sm:$0xff]  ;;  %280 = vst [vmem:[#allocation4 + $0x180] sm:$0xff] %v8963_v59  ;;  %v649_v62 = vld [vmem:[#allocation3 + $0x128] sm:$0xff] }
  0x75   :  { %6051 = vmatprep.subr.msk.mxu1 %vm873_vm1, %v611_v4  ;;  %6018 = vmatpush1.msk.msra.mxu0 %vm873_vm1, %v608_v25  ;;  %303 = vst.msk [vmem:[#allocation2 + $0xa8] sm:$0xff] %vm65_vm0, %v5800_v61  ;;  %305 = vst.msk [vmem:[#allocation4 + $0x198] sm:$0xff] %vm65_vm0, %v5800_v61  ;;  %v5808_v1 = vld [vmem:[%s11588_s28 + $0x2b8] sm:$0xff]  ;;  %v9000_v5 = vld [vmem:[%s11588_s28 + $0x2f0] sm:$0xff] }
  0x76   :  { %1029 = vmatmul.mubr.f32.gmra.mrb[26].mxu0 %v8429_v38  ;;  %6052 = vmatpush1.msk.msra.mxu1 %vm873_vm1, %v610_v34  ;;  %304 = vst [vmem:[#allocation4 + $0x190] sm:$0xff] %v8971_v21  ;;  %327 = vst.msk [vmem:[#allocation2 + $0xb8] sm:$0xff] %vm65_vm0, %v5808_v1  ;;  %v5816_v2 = vld [vmem:[%s11588_s28 + $0x2f8] sm:$0xff]  ;;  %v653_v9 = vld [vmem:[#allocation3 + $0x148] sm:$0xff] }
  0x77   :  { %1286 = vmatmul.mubr.f32.gmra.mrb[26].mxu1 %v8429_v38  ;;  %5965 = vmatprep.mubr.msk.f32.mxu0 %vm65_vm0, %v641_v20  ;;  %v5760_v38 = vld [vmem:[%s11588_s28 + $0x138] sm:$0xff]  ;;  %329 = vst.msk [vmem:[#allocation4 + $0x1a8] sm:$0xff] %vm65_vm0, %v5808_v1  ;;  %351 = vst.msk [vmem:[#allocation2 + $0xc8] sm:$0xff] %vm65_vm0, %v5816_v2  ;;  %v9017_v10 = vld [vmem:[%s11588_s28 + $0x330] sm:$0xff] }
  0x78   :  { %5999 = vmatprep.mubr.msk.f32.mxu1 %vm65_vm0, %v641_v20  ;;  %6802 = vmatprep.subr.bf16.mxu0 %v6801_v36  ;;  %183 = vst.msk [vmem:[#allocation2 + $0x58] sm:$0xff] %vm65_vm0, %v5760_v38  ;;  %185 = vst.msk [vmem:[#allocation4 + $0x148] sm:$0xff] %vm65_vm0, %v5760_v38  ;;  %v5824_v8 = vld [vmem:[%s11588_s28 + $0x338] sm:$0xff]  ;;  %v9040_v14 = vld [vmem:[%s11588_s28 + $0x3b0] sm:$0xff] }
  0x79   :  { %6850 = vmatprep.subr.bf16.mxu1 %v6849_v37  ;;  %353 = vst.msk [vmem:[#allocation4 + $0x1b8] sm:$0xff] %vm65_vm0, %v5816_v2  ;;  %352 = vst [vmem:[#allocation4 + $0x1b0] sm:$0xff] %v9000_v5  ;;  %v5832_v12 = vld [vmem:[%s11588_s28 + $0x378] sm:$0xff]  ;;  %v9055_v17 = vld [vmem:[%s11588_s28 + $0x10] sm:$0xff] }
  0x7a   :  { %1035 = vmatmul.mubr.f32.gmra.mrb[28].mxu0 %v8437_v41  ;;  %375 = vst.msk [vmem:[#allocation2 + $0xd8] sm:$0xff] %vm65_vm0, %v5824_v8  ;;  %377 = vst.msk [vmem:[#allocation4 + $0x1c8] sm:$0xff] %vm65_vm0, %v5824_v8  ;;  %v5840_v0 = vld [vmem:[%s11588_s28 + $0x3b8] sm:$0xff]  ;;  %v9066_v19 = vld [vmem:[%s11588_s28 + $0x50] sm:$0xff] }
  0x7b   :  { %1292 = vmatmul.mubr.f32.gmra.mrb[28].mxu1 %v8437_v41  ;;  %5966 = vmatprep.mubr.msk.f32.mxu0 %vm65_vm0, %v643_v48  ;;  %v8936_v41 = vld [vmem:[%s11588_s28 + $0x1b0] sm:$0xff]  ;;  %374 = vst [vmem:[#allocation2 + $0xd0] sm:$0xff] %v9017_v10  ;;  %399 = vst.msk [vmem:[#allocation2 + $0xe8] sm:$0xff] %vm65_vm0, %v5832_v12  ;;  %v655_v15 = vld [vmem:[#allocation3 + $0x158] sm:$0xff] }
  0x7c   :  { %6000 = vmatprep.mubr.msk.f32.mxu1 %vm65_vm0, %v643_v48  ;;  %232 = vst [vmem:[#allocation4 + $0x160] sm:$0xff] %v8936_v41  ;;  %401 = vst.msk [vmem:[#allocation4 + $0x1d8] sm:$0xff] %vm65_vm0, %v5832_v12  ;;  %v5724_v24 = vld [vmem:[%s11588_s28 + $0x18] sm:$0xff]  ;;  %v657_v22 = vld [vmem:[#allocation3 + $0x168] sm:$0xff] }
  0x7d   :  { %423 = vst.msk [vmem:[#allocation2 + $0xf8] sm:$0xff] %vm65_vm0, %v5840_v0  ;;  %425 = vst.msk [vmem:[#allocation4 + $0x1e8] sm:$0xff] %vm65_vm0, %v5840_v0  ;;  %v5740_v4 = vld [vmem:[%s11588_s28 + $0x98] sm:$0xff]  ;;  %v9080_v25 = vld [vmem:[%s11588_s28 + $0x90] sm:$0xff] }
  0x7e   :  { %1041 = vmatmul.mubr.f32.gmra.mrb[30].mxu0 %v8450_v44  ;;  %422 = vst [vmem:[#allocation2 + $0xf0] sm:$0xff] %v9040_v14  ;;  %77 = vst.msk [vmem:[#allocation2 + $0x108] sm:$0xff] %vm65_vm0, %v5724_v24  ;;  %v9088_v16 = vld [vmem:[%s11588_s28 + $0xd0] sm:$0xff]  ;;  %v5756_v27 = vld [vmem:[%s11588_s28 + $0x118] sm:$0xff] }
  0x7f   :  { %1298 = vmatmul.mubr.f32.gmra.mrb[30].mxu1 %v8450_v44  ;;  %5967 = vmatprep.mubr.msk.f32.mxu0 %vm65_vm0, %v645_v51  ;;  %v5792_v44 = vld [vmem:[%s11588_s28 + $0x238] sm:$0xff]  ;;  %75 = vst.msk [vmem:[#allocation4 + $0x8] sm:$0xff] %vm65_vm0, %v5724_v24  ;;  %125 = vst.msk [vmem:[#allocation2 + $0x128] sm:$0xff] %vm65_vm0, %v5740_v4  ;;  %v9114_v32 = vld [vmem:[%s11588_s28 + $0x150] sm:$0xff] }
  0x80   :  { %6001 = vmatprep.mubr.msk.f32.mxu1 %vm65_vm0, %v645_v51  ;;  %279 = vst.msk [vmem:[#allocation2 + $0x98] sm:$0xff] %vm65_vm0, %v5792_v44  ;;  %281 = vst.msk [vmem:[#allocation4 + $0x188] sm:$0xff] %vm65_vm0, %v5792_v44  ;;  %v659_v29 = vld [vmem:[#allocation3 + $0x178] sm:$0xff]  ;;  %v661_v34 = vld [vmem:[#allocation3 + $0x188] sm:$0xff] }
  0x81   :  { %123 = vst.msk [vmem:[#allocation4 + $0x28] sm:$0xff] %vm65_vm0, %v5740_v4  ;;  %173 = vst.msk [vmem:[#allocation2 + $0x148] sm:$0xff] %vm65_vm0, %v5756_v27  ;;  %v5764_v31 = vld [vmem:[%s11588_s28 + $0x158] sm:$0xff]  ;;  %v9139_v37 = vld [vmem:[%s11588_s28 + $0x1d0] sm:$0xff] }
  0x82   :  { %1047 = vmatmul.mubr.f32.gmra.mrb[32].mxu0 %v8493_v63  ;;  %171 = vst.msk [vmem:[#allocation4 + $0x48] sm:$0xff] %vm65_vm0, %v5756_v27  ;;  %v5772_v57 = vld [vmem:[%s11588_s28 + $0x198] sm:$0xff]  ;;  %197 = vst.msk [vmem:[#allocation2 + $0x158] sm:$0xff] %vm65_vm0, %v5764_v31 }
  0x83   :  { %1304 = vmatmul.mubr.f32.gmra.mrb[32].mxu1 %v8493_v63  ;;  %5968 = vmatprep.mubr.msk.f32.mxu0 %vm65_vm0, %v647_v56  ;;  %v8987_v63 = vld [vmem:[%s11588_s28 + $0x2b0] sm:$0xff]  ;;  %195 = vst.msk [vmem:[#allocation4 + $0x58] sm:$0xff] %vm65_vm0, %v5764_v31  ;;  %221 = vst.msk [vmem:[#allocation2 + $0x168] sm:$0xff] %vm65_vm0, %v5772_v57  ;;  %v663_v20 = vld [vmem:[#allocation3 + $0x198] sm:$0xff] }
  0x84   :  { %6002 = vmatprep.mubr.msk.f32.mxu1 %vm65_vm0, %v647_v56  ;;  %328 = vst [vmem:[#allocation4 + $0x1a0] sm:$0xff] %v8987_v63  ;;  %219 = vst.msk [vmem:[#allocation4 + $0x68] sm:$0xff] %vm65_vm0, %v5772_v57  ;;  %v5780_v36 = vld [vmem:[%s11588_s28 + $0x1d8] sm:$0xff] }
  0x85   :  { %v5788_v42 = vld [vmem:[%s11588_s28 + $0x218] sm:$0xff]  ;;  %245 = vst.msk [vmem:[#allocation2 + $0x178] sm:$0xff] %vm65_vm0, %v5780_v36  ;;  %243 = vst.msk [vmem:[#allocation4 + $0x78] sm:$0xff] %vm65_vm0, %v5780_v36 }
  0x86   :  { %1053 = vmatmul.mubr.f32.gmra.mrb[34].mxu0 %v8505_v7  ;;  %269 = vst.msk [vmem:[#allocation2 + $0x188] sm:$0xff] %vm65_vm0, %v5788_v42  ;;  %267 = vst.msk [vmem:[#allocation4 + $0x88] sm:$0xff] %vm65_vm0, %v5788_v42  ;;  %v5796_v46 = vld [vmem:[%s11588_s28 + $0x258] sm:$0xff] }
  0x87   :  { %1310 = vmatmul.mubr.f32.gmra.mrb[34].mxu1 %v8505_v7  ;;  %5969 = vmatprep.mubr.msk.f32.mxu0 %vm65_vm0, %v649_v62  ;;  %v651_v7 = vld [vmem:[#allocation3 + $0x138] sm:$0xff]  ;;  %293 = vst.msk [vmem:[#allocation2 + $0x198] sm:$0xff] %vm65_vm0, %v5796_v46  ;;  %291 = vst.msk [vmem:[#allocation4 + $0x98] sm:$0xff] %vm65_vm0, %v5796_v46 }
  0x88   :  { %6003 = vmatprep.mubr.msk.f32.mxu1 %vm65_vm0, %v649_v62  ;;  %v5804_v48 = vld [vmem:[%s11588_s28 + $0x298] sm:$0xff] }
  0x89   :  { %317 = vst.msk [vmem:[#allocation2 + $0x1a8] sm:$0xff] %vm65_vm0, %v5804_v48  ;;  %315 = vst.msk [vmem:[#allocation4 + $0xa8] sm:$0xff] %vm65_vm0, %v5804_v48 }
  0x8a   :  { %1059 = vmatmul.mubr.f32.gmra.mrb[36].mxu0 %v8545_v23 }
  0x8b   :  { %1316 = vmatmul.mubr.f32.gmra.mrb[36].mxu1 %v8545_v23  ;;  %5970 = vmatprep.mubr.msk.f32.mxu0 %vm65_vm0, %v651_v7  ;;  %v9027_v23 = vld [vmem:[%s11588_s28 + $0x370] sm:$0xff] }
  0x8c   :  { %6004 = vmatprep.mubr.msk.f32.mxu1 %vm65_vm0, %v651_v7  ;;  %398 = vst [vmem:[#allocation2 + $0xe0] sm:$0xff] %v9027_v23 }
  0x8e   :  { %1065 = vmatmul.mubr.f32.gmra.mrb[38].mxu0 %v8559_v30 }
  0x8f   :  { %1322 = vmatmul.mubr.f32.gmra.mrb[38].mxu1 %v8559_v30  ;;  %5971 = vmatprep.mubr.msk.f32.mxu0 %vm65_vm0, %v653_v9  ;;  %v5732_v30 = vld [vmem:[%s11588_s28 + $0x58] sm:$0xff] }
  0x90   :  { %6005 = vmatprep.mubr.msk.f32.mxu1 %vm65_vm0, %v653_v9  ;;  %101 = vst.msk [vmem:[#allocation2 + $0x118] sm:$0xff] %vm65_vm0, %v5732_v30  ;;  %99 = vst.msk [vmem:[#allocation4 + $0x18] sm:$0xff] %vm65_vm0, %v5732_v30 }
  0x92   :  { %1071 = vmatmul.mubr.f32.gmra.mrb[40].mxu0 %v8586_v40 }
  0x93   :  { %1328 = vmatmul.mubr.f32.gmra.mrb[40].mxu1 %v8586_v40  ;;  %5972 = vmatprep.mubr.msk.f32.mxu0 %vm65_vm0, %v655_v15  ;;  %v5748_v40 = vld [vmem:[%s11588_s28 + $0xd8] sm:$0xff] }
  0x94   :  { %6006 = vmatprep.mubr.msk.f32.mxu1 %vm65_vm0, %v655_v15  ;;  %149 = vst.msk [vmem:[#allocation2 + $0x138] sm:$0xff] %vm65_vm0, %v5748_v40  ;;  %147 = vst.msk [vmem:[#allocation4 + $0x38] sm:$0xff] %vm65_vm0, %v5748_v40 }
  0x96   :  { %1077 = vmatmul.mubr.f32.gmra.mrb[42].mxu0 %v8607_v50 }
  0x97   :  { %1334 = vmatmul.mubr.f32.gmra.mrb[42].mxu1 %v8607_v50  ;;  %5973 = vmatprep.mubr.msk.f32.mxu0 %vm65_vm0, %v657_v22  ;;  %v9103_v50 = vld [vmem:[%s11588_s28 + $0x110] sm:$0xff] }
  0x98   :  { %6007 = vmatprep.mubr.msk.f32.mxu1 %vm65_vm0, %v657_v22 }
  0x9a   :  { %1083 = vmatmul.mubr.f32.gmra.mrb[44].mxu0 %v8621_v53 }
  0x9b   :  { %1340 = vmatmul.mubr.f32.gmra.mrb[44].mxu1 %v8621_v53  ;;  %5974 = vmatprep.mubr.msk.f32.mxu0 %vm65_vm0, %v659_v29  ;;  %v9127_v53 = vld [vmem:[%s11588_s28 + $0x190] sm:$0xff] }
  0x9c   :  { %6008 = vmatprep.mubr.msk.f32.mxu1 %vm65_vm0, %v659_v29 }
  0x9e   :  { %1089 = vmatmul.mubr.f32.gmra.mrb[46].mxu0 %v8661_v11 }
  0x9f   :  { %1346 = vmatmul.mubr.f32.gmra.mrb[46].mxu1 %v8661_v11  ;;  %5975 = vmatprep.mubr.msk.f32.mxu0 %vm65_vm0, %v661_v34  ;;  %v9151_v11 = vld [vmem:[%s11588_s28 + $0x210] sm:$0xff] }
  0xa0   :  { %6009 = vmatprep.mubr.msk.f32.mxu1 %vm65_vm0, %v661_v34 }
  0xa2   :  { %1095 = vmatmul.mubr.f32.gmra.mrb[48].mxu0 %v8671_v13 }
  0xa3   :  { %27 = vsyncpa [#allocation16], 0  ;;  %1352 = vmatmul.mubr.f32.gmra.mrb[48].mxu1 %v8671_v13  ;;  %5976 = vmatprep.mubr.msk.f32.mxu0 %vm65_vm0, %v663_v20  ;;  %v665_v38 = vld [vmem:[#allocation3 + $0x1a8] sm:$0xff]  ;;  %v9170_v51 = vld [vmem:[%s11588_s28 + $0x250] sm:$0xff]  ;;  %s11589_s1 = sld [smem:[#allocation42_spill]]  ;;  %vm3304_vm2 = vcmask 261120  }
  0xa4   :  { %6010 = vmatprep.mubr.msk.f32.mxu1 %vm65_vm0, %v663_v20  ;;  %v5812_v52 = vld [vmem:[%s11588_s28 + $0x2d8] sm:$0xff]  ;;  %v9184_v55 = vld [vmem:[%s11588_s28 + $0x290] sm:$0xff]  ;;  %v449_v8 = vld [vmem:[#allocation2 + $0x8] sm:$0xff]  ;;  %s11608_s2 = sld [smem:[#allocation41_spill]]  ;;  %s7777_s29 = smov 16   ;;  %vm3205_vm3 = vcmask 130048  }
  0xa5   :  { %341 = vst.msk [vmem:[#allocation2 + $0x1b8] sm:$0xff] %vm65_vm0, %v5812_v52  ;;  %339 = vst.msk [vmem:[#allocation4 + $0xb8] sm:$0xff] %vm65_vm0, %v5812_v52  ;;  %v667_v13 = vld [vmem:[#allocation3 + $0x1b8] sm:$0xff]  ;;  %v9198_v56 = vld [vmem:[%s11588_s28 + $0x2d0] sm:$0xff]  ;;  %vm4579_vm5 = vcmask 523264   ;;  %s11631_s26 = sld [smem:[#allocation43_spill]] }
  0xa6   :  { %1101 = vmatmul.mubr.f32.gmra.mrb[50].mxu0 %v8697_v28  ;;  %v5820_v60 = vld [vmem:[%s11588_s28 + $0x318] sm:$0xff]  ;;  %v9212_v61 = vld [vmem:[%s11588_s28 + $0x310] sm:$0xff]  ;;  %v6089_v9 = vld [vmem:[%s11587_s23 + $0x660] sm:$0xff]  ;;  %s7779_s21 = smov 32   ;;  %vm7780_vm7 = vmmov 0   ;;  %vm5587_vm8 = vcmask 261126  }
  0xa7   :  { %1358 = vmatmul.mubr.f32.gmra.mrb[50].mxu1 %v8697_v28  ;;  %5977 = vmatprep.mubr.msk.f32.mxu0 %vm65_vm0, %v665_v38  ;;  %365 = vst.msk [vmem:[#allocation2 + $0x1c8] sm:$0xff] %vm65_vm0, %v5820_v60  ;;  %363 = vst.msk [vmem:[#allocation4 + $0xc8] sm:$0xff] %vm65_vm0, %v5820_v60  ;;  %v669_v28 = vld [vmem:[#allocation3 + $0x1c8] sm:$0xff]  ;;  %v5828_v44 = vld [vmem:[%s11588_s28 + $0x358] sm:$0xff] }
  0xa8   :  { %6011 = vmatprep.mubr.msk.f32.mxu1 %vm65_vm0, %v665_v38  ;;  %389 = vst.msk [vmem:[#allocation2 + $0x1d8] sm:$0xff] %vm65_vm0, %v5828_v44  ;;  %387 = vst.msk [vmem:[#allocation4 + $0xd8] sm:$0xff] %vm65_vm0, %v5828_v44  ;;  %v5836_v62 = vld [vmem:[%s11588_s28 + $0x398] sm:$0xff]  ;;  %v9226_v1 = vld [vmem:[%s11588_s28 + $0x350] sm:$0xff] }
  0xa9   :  { %413 = vst.msk [vmem:[#allocation2 + $0x1e8] sm:$0xff] %vm65_vm0, %v5836_v62  ;;  %411 = vst.msk [vmem:[#allocation4 + $0xe8] sm:$0xff] %vm65_vm0, %v5836_v62  ;;  %v5844_v2 = vld [vmem:[%s11588_s28 + $0x3d8] sm:$0xff]  ;;  %v9240_v7 = vld [vmem:[%s11588_s28 + $0x390] sm:$0xff] }
  0xaa   :  { %1107 = vmatmul.mubr.f32.gmra.mrb[52].mxu0 %v8724_v6  ;;  %437 = vst.msk [vmem:[#allocation2 + $0x1f8] sm:$0xff] %vm65_vm0, %v5844_v2  ;;  %435 = vst.msk [vmem:[#allocation4 + $0xf8] sm:$0xff] %vm65_vm0, %v5844_v2  ;;  %v9255_v12 = vld [vmem:[%s11588_s28 + $0x3d0] sm:$0xff]  ;;  %v6094_v15 = vld [vmem:[%s11587_s23 + $0x688] sm:$0xff] }
  0xab   :  { %1364 = vmatmul.mubr.f32.gmra.mrb[52].mxu1 %v8724_v6  ;;  %5978 = vmatprep.mubr.msk.f32.mxu0 %vm65_vm0, %v667_v13  ;;  %v671_v6 = vld [vmem:[#allocation3 + $0x1d8] sm:$0xff]  ;;  %v6091_v0 = vld [vmem:[%s11587_s23 + $0x670] sm:$0xff]  ;;  %v6098_v24 = vld [vmem:[%s11587_s23 + $0x6a8] sm:$0xff] }
  0xac   :  { %6012 = vmatprep.mubr.msk.f32.mxu1 %vm65_vm0, %v667_v13  ;;  %v6096_v22 = vld [vmem:[%s11587_s23 + $0x698] sm:$0xff]  ;;  %v6093_v27 = vld [vmem:[%s11587_s23 + $0x680] sm:$0xff]  ;;  %v6095_v57 = vld [vmem:[%s11587_s23 + $0x690] sm:$0xff] }
  0xad   :  { %v6100_v4 = vld [vmem:[%s11587_s23 + $0x6b8] sm:$0xff]  ;;  %v6097_v31 = vld [vmem:[%s11587_s23 + $0x6a0] sm:$0xff]  ;;  %v6099_v36 = vld [vmem:[%s11587_s23 + $0x6b0] sm:$0xff] }
  0xae   :  { %1113 = vmatmul.mubr.f32.gmra.mrb[54].mxu0 %v8732_v43  ;;  %v451_v29 = vld [vmem:[#allocation2 + $0x18] sm:$0xff]  ;;  %v9288_v34 = vld [vmem:[#allocation2] sm:$0xff]  ;;  %v6853_v20 = vpack.c.bf16 %v6100_v4, %v6096_v22  ;;  %v6102_v42 = vld [vmem:[%s11587_s23 + $0x6c8] sm:$0xff]  ;;  %v6807_v13 = vpack.c.bf16 %v6097_v31, %v6093_v27  ;;  %v6855_v60 = vpack.c.bf16 %v6099_v36, %v6095_v57 }
  0xaf   :  { %1370 = vmatmul.mubr.f32.gmra.mrb[54].mxu1 %v8732_v43  ;;  %5979 = vmatprep.mubr.msk.f32.mxu0 %vm65_vm0, %v669_v28  ;;  %v673_v43 = vld [vmem:[#allocation3 + $0x1e8] sm:$0xff]  ;;  %v6104_v48 = vld [vmem:[%s11587_s23 + $0x6d8] sm:$0xff]  ;;  %v6101_v44 = vld [vmem:[%s11587_s23 + $0x6c0] sm:$0xff] }
  0xb0   :  { %6013 = vmatprep.mubr.msk.f32.mxu1 %vm65_vm0, %v669_v28  ;;  %v6106_v46 = vld [vmem:[%s11587_s23 + $0x6e8] sm:$0xff]  ;;  %v6108_v38 = vld [vmem:[%s11587_s23 + $0x6f8] sm:$0xff]  ;;  %v6103_v62 = vld [vmem:[%s11587_s23 + $0x6d0] sm:$0xff] }
  0xb1   :  { %v453_v52 = vld [vmem:[#allocation2 + $0x28] sm:$0xff]  ;;  %v6809_v28 = vpack.c.bf16 %v6106_v46, %v6102_v42  ;;  %v6107_v2 = vld [vmem:[%s11587_s23 + $0x6f0] sm:$0xff]  ;;  %v6124_v31 = vld [vmem:[%s11587_s23 + $0x778] sm:$0xff] }
  0xb2   :  { %1119 = vmatmul.mubr.f32.gmra.mrb[56].mxu0 %v8780_v3  ;;  %v6111_v22 = vld [vmem:[%s11587_s23 + $0x710] sm:$0xff]  ;;  %v6118_v27 = vld [vmem:[%s11587_s23 + $0x748] sm:$0xff]  ;;  %v6121_v46 = vld [vmem:[%s11587_s23 + $0x760] sm:$0xff] }
  0xb3   :  { %1376 = vmatmul.mubr.f32.gmra.mrb[56].mxu1 %v8780_v3  ;;  %5980 = vmatprep.mubr.msk.f32.mxu0 %vm65_vm0, %v671_v6  ;;  %v675_v3 = vld [vmem:[#allocation3 + $0x1f8] sm:$0xff]  ;;  %v457_v57 = vld [vmem:[#allocation2 + $0x48] sm:$0xff]  ;;  %vm10529_vm4 = vmneg %vm3205_vm3 }
  0xb4   :  { %6014 = vmatprep.mubr.msk.f32.mxu1 %vm65_vm0, %v671_v6  ;;  %v6105_v6 = vld [vmem:[%s11587_s23 + $0x6e0] sm:$0xff]  ;;  %vm11194_vm6 = vmneg %vm3304_vm2 }
  0xb6   :  { %1125 = vmatmul.mubr.f32.gmra.mrb[58].mxu0 %v8788_v54 }
  0xb7   :  { %1382 = vmatmul.mubr.f32.gmra.mrb[58].mxu1 %v8788_v54  ;;  %5981 = vmatprep.mubr.msk.f32.mxu0 %vm65_vm0, %v673_v43  ;;  %v6085_v54 = vld [vmem:[%s11587_s23 + $0x640] sm:$0xff] }
  0xb8   :  { %6015 = vmatprep.mubr.msk.f32.mxu1 %vm65_vm0, %v673_v43  ;;  %v6803_v30 = vpack.c.bf16 %v6089_v9, %v6085_v54  ;;  %v6857_v43 = vpack.c.bf16 %v6108_v38, %v6104_v48  ;;  %v6112_v54 = vld [vmem:[%s11587_s23 + $0x718] sm:$0xff]  ;;  %v6119_v48 = vld [vmem:[%s11587_s23 + $0x750] sm:$0xff] }
  0xb9   :  { %v6116_v9 = vld [vmem:[%s11587_s23 + $0x738] sm:$0xff] }
  0xba   :  { %1131 = vmatmul.mubr.f32.gmra.mrb[60].mxu0 %v8807_v39  ;;  %v6861_v4 = vpack.c.bf16 %v6116_v9, %v6112_v54  ;;  %v6131_v9 = vld [vmem:[%s11587_s23 + $0x7b0] sm:$0xff] }
  0xbb   :  { %1388 = vmatmul.mubr.f32.gmra.mrb[60].mxu1 %v8807_v39  ;;  %5982 = vmatprep.mubr.msk.f32.mxu0 %vm65_vm0, %v675_v3  ;;  %v6087_v39 = vld [vmem:[%s11587_s23 + $0x650] sm:$0xff] }
  0xbc   :  { %6016 = vmatprep.mubr.msk.f32.mxu1 %vm65_vm0, %v675_v3  ;;  %v6851_v40 = vpack.c.bf16 %v6091_v0, %v6087_v39  ;;  %v6110_v3 = vld [vmem:[%s11587_s23 + $0x708] sm:$0xff]  ;;  %v455_v39 = vld [vmem:[#allocation2 + $0x38] sm:$0xff]  ;;  %v6811_v0 = vpack.c.bf16 %v6105_v6, %v6101_v44 }
  0xbd   :  { %v6132_v44 = vld [vmem:[%s11587_s23 + $0x7b8] sm:$0xff] }
  0xbe   :  { %1137 = vmatmul.mubr.f32.gmra.mrb[62].mxu0 %v8817_v18  ;;  %v459_v6 = vld [vmem:[#allocation2 + $0x58] sm:$0xff] }
  0xbf   :  { %1394 = vmatmul.mubr.f32.gmra.mrb[62].mxu1 %v8817_v18  ;;  %6019 = vmatprep.mubr.msk.f32.mxu0 %vm65_vm0, %v449_v8  ;;  %v6805_v18 = vpack.c.bf16 %v6098_v24, %v6094_v15  ;;  %v6859_v15 = vpack.c.bf16 %v6107_v2, %v6103_v62 }
  0xc0   :  { %6053 = vmatprep.mubr.msk.f32.mxu1 %vm65_vm0, %v449_v8  ;;  %v6114_v8 = vld [vmem:[%s11587_s23 + $0x728] sm:$0xff] }
  0xc1   :  { %v6813_v24 = vpack.c.bf16 %v6114_v8, %v6110_v3  ;;  %v6129_v3 = vld [vmem:[%s11587_s23 + $0x7a0] sm:$0xff]  ;;  %v6127_v8 = vld [vmem:[%s11587_s23 + $0x790] sm:$0xff] }
  0xc2   :  { %1573 = vmatmul.mubr.f32.vlgmr.msra.gmra.mrb[0].mxu0 %v9288_v34 }
  0xc3   :  { %1830 = vmatmul.mubr.f32.vlgmr.msra.gmra.mrb[0].mxu1 %v9288_v34  ;;  %6804 = vmatpush1.bf16.msra.mxu0 %v6803_v30  ;;  %v6113_v30 = vld [vmem:[%s11587_s23 + $0x720] sm:$0xff] }
  0xc4   :  { %6852 = vmatpush1.bf16.msra.mxu1 %v6851_v40  ;;  %6020 = vmatprep.mubr.msk.f32.mxu0 %vm65_vm0, %v451_v29  ;;  %v6115_v40 = vld [vmem:[%s11587_s23 + $0x730] sm:$0xff] }
  0xc5   :  { %6054 = vmatprep.mubr.msk.f32.mxu1 %vm65_vm0, %v451_v29  ;;  %6806 = vmatprep.subr.bf16.mxu0 %v6805_v18  ;;  %v6122_v29 = vld [vmem:[%s11587_s23 + $0x768] sm:$0xff]  ;;  %v6120_v18 = vld [vmem:[%s11587_s23 + $0x758] sm:$0xff]  ;;  %v6863_v36 = vpack.c.bf16 %v6115_v40, %v6111_v22  ;;  %v6871_v22 = vpack.c.bf16 %v6131_v9, %v6127_v8  ;;  %v6137_v40 = vld [vmem:[%s11587_s23 + $0x7e0] sm:$0xff] }
  0xc6   :  { %1579 = vmatmul.mubr.f32.gmra.mrb[2].mxu0 %v8852_v33  ;;  %6854 = vmatprep.subr.bf16.mxu1 %v6853_v20  ;;  %v6817_v42 = vpack.c.bf16 %v6122_v29, %v6118_v27  ;;  %v6865_v38 = vpack.c.bf16 %v6124_v31, %v6120_v18  ;;  %v6135_v27 = vld [vmem:[%s11587_s23 + $0x7d0] sm:$0xff]  ;;  %v6142_v31 = vld [vmem:[%s11587_s23 + $0x808] sm:$0xff]  ;;  %v6153_v8 = vld [vmem:[%s11587_s23 + $0x860] sm:$0xff] }
  0xc7   :  { %1836 = vmatmul.mubr.f32.gmra.mrb[2].mxu1 %v8852_v33  ;;  %6021 = vmatprep.mubr.msk.f32.mxu0 %vm65_vm0, %v453_v52  ;;  %v6109_v33 = vld [vmem:[%s11587_s23 + $0x700] sm:$0xff]  ;;  %v6139_v18 = vld [vmem:[%s11587_s23 + $0x7f0] sm:$0xff] }
  0xc8   :  { %6055 = vmatprep.mubr.msk.f32.mxu1 %vm65_vm0, %v453_v52  ;;  %6808 = vmatpush1.bf16.msra.mxu0 %v6807_v13  ;;  %v6815_v20 = vpack.c.bf16 %v6113_v30, %v6109_v33  ;;  %v6123_v52 = vld [vmem:[%s11587_s23 + $0x770] sm:$0xff]  ;;  %v6126_v13 = vld [vmem:[%s11587_s23 + $0x788] sm:$0xff] }
  0xc9   :  { %6856 = vmatpush1.bf16.msra.mxu1 %v6855_v60  ;;  %6810 = vmatprep.subr.bf16.mxu0 %v6809_v28  ;;  %v6130_v60 = vld [vmem:[%s11587_s23 + $0x7a8] sm:$0xff]  ;;  %v6128_v28 = vld [vmem:[%s11587_s23 + $0x798] sm:$0xff] }
  0xca   :  { %1585 = vmatmul.mubr.f32.gmra.mrb[4].mxu0 %v8868_v26  ;;  %6858 = vmatprep.subr.bf16.mxu1 %v6857_v43  ;;  %v6867_v43 = vpack.c.bf16 %v6123_v52, %v6119_v48  ;;  %v6821_v2 = vpack.c.bf16 %v6130_v60, %v6126_v13  ;;  %v6869_v54 = vpack.c.bf16 %v6132_v44, %v6128_v28  ;;  %v461_v33 = vld [vmem:[#allocation2 + $0x68] sm:$0xff]  ;;  %v6143_v52 = vld [vmem:[%s11587_s23 + $0x810] sm:$0xff] }
  0xcb   :  { %1842 = vmatmul.mubr.f32.gmra.mrb[4].mxu1 %v8868_v26  ;;  %6022 = vmatprep.mubr.msk.f32.mxu0 %vm65_vm0, %v455_v39  ;;  %v6117_v26 = vld [vmem:[%s11587_s23 + $0x740] sm:$0xff]  ;;  %v6147_v60 = vld [vmem:[%s11587_s23 + $0x830] sm:$0xff]  ;;  %v6150_v28 = vld [vmem:[%s11587_s23 + $0x848] sm:$0xff] }
  0xcc   :  { %6056 = vmatprep.mubr.msk.f32.mxu1 %vm65_vm0, %v455_v39  ;;  %6812 = vmatpush1.bf16.msra.mxu0 %v6811_v0  ;;  %v6819_v62 = vpack.c.bf16 %v6121_v46, %v6117_v26  ;;  %v6134_v39 = vld [vmem:[%s11587_s23 + $0x7c8] sm:$0xff]  ;;  %v6875_v46 = vpack.c.bf16 %v6139_v18, %v6135_v27  ;;  %v6159_v27 = vld [vmem:[%s11587_s23 + $0x890] sm:$0xff] }
  0xcd   :  { %6860 = vmatpush1.bf16.msra.mxu1 %v6859_v15  ;;  %6814 = vmatprep.subr.bf16.mxu0 %v6813_v24  ;;  %v6138_v0 = vld [vmem:[%s11587_s23 + $0x7e8] sm:$0xff]  ;;  %v6136_v15 = vld [vmem:[%s11587_s23 + $0x7d8] sm:$0xff]  ;;  %v6163_v18 = vld [vmem:[%s11587_s23 + $0x8b0] sm:$0xff] }
  0xce   :  { %1591 = vmatmul.mubr.f32.gmra.mrb[6].mxu0 %v8887_v45  ;;  %6862 = vmatprep.subr.bf16.mxu1 %v6861_v4  ;;  %v6140_v24 = vld [vmem:[%s11587_s23 + $0x7f8] sm:$0xff]  ;;  %v6825_v4 = vpack.c.bf16 %v6138_v0, %v6134_v39  ;;  %v6154_v44 = vld [vmem:[%s11587_s23 + $0x868] sm:$0xff]  ;;  %v6155_v39 = vld [vmem:[%s11587_s23 + $0x870] sm:$0xff] }
  0xcf   :  { %1848 = vmatmul.mubr.f32.gmra.mrb[6].mxu1 %v8887_v45  ;;  %6023 = vmatprep.mubr.msk.f32.mxu0 %vm65_vm0, %v457_v57  ;;  %v6125_v45 = vld [vmem:[%s11587_s23 + $0x780] sm:$0xff]  ;;  %v6873_v29 = vpack.c.bf16 %v6140_v24, %v6136_v15  ;;  %v6158_v0 = vld [vmem:[%s11587_s23 + $0x888] sm:$0xff]  ;;  %v6160_v24 = vld [vmem:[%s11587_s23 + $0x898] sm:$0xff] }
  0xd0   :  { %6057 = vmatprep.mubr.msk.f32.mxu1 %vm65_vm0, %v457_v57  ;;  %6816 = vmatpush1.bf16.msra.mxu0 %v6815_v20  ;;  %v6823_v30 = vpack.c.bf16 %v6129_v3, %v6125_v45  ;;  %v6146_v57 = vld [vmem:[%s11587_s23 + $0x828] sm:$0xff]  ;;  %v6144_v20 = vld [vmem:[%s11587_s23 + $0x818] sm:$0xff]  ;;  %v6879_v45 = vpack.c.bf16 %v6147_v60, %v6143_v52  ;;  %v6833_v3 = vpack.c.bf16 %v6154_v44, %v6150_v28 }
  0xd1   :  { %6864 = vmatpush1.bf16.msra.mxu1 %v6863_v36  ;;  %6818 = vmatprep.subr.bf16.mxu0 %v6817_v42  ;;  %v6148_v36 = vld [vmem:[%s11587_s23 + $0x838] sm:$0xff]  ;;  %v6829_v48 = vpack.c.bf16 %v6146_v57, %v6142_v31  ;;  %v6162_v15 = vld [vmem:[%s11587_s23 + $0x8a8] sm:$0xff] }
  0xd2   :  { %1597 = vmatmul.mubr.f32.gmra.mrb[8].mxu0 %v8895_v47  ;;  %6866 = vmatprep.subr.bf16.mxu1 %v6865_v38  ;;  %v463_v42 = vld [vmem:[#allocation2 + $0x78] sm:$0xff]  ;;  %v6145_v38 = vld [vmem:[%s11587_s23 + $0x820] sm:$0xff]  ;;  %v6877_v13 = vpack.c.bf16 %v6148_v36, %v6144_v20  ;;  %v6166_v31 = vld [vmem:[%s11587_s23 + $0x8c8] sm:$0xff] }
  0xd3   :  { %1854 = vmatmul.mubr.f32.gmra.mrb[8].mxu1 %v8895_v47  ;;  %6024 = vmatprep.mubr.msk.f32.mxu0 %vm65_vm0, %v459_v6  ;;  %v6133_v47 = vld [vmem:[%s11587_s23 + $0x7c0] sm:$0xff]  ;;  %v6170_v57 = vld [vmem:[%s11587_s23 + $0x8e8] sm:$0xff]  ;;  %v6168_v20 = vld [vmem:[%s11587_s23 + $0x8d8] sm:$0xff] }
  0xd4   :  { %6058 = vmatprep.mubr.msk.f32.mxu1 %vm65_vm0, %v459_v6  ;;  %6820 = vmatpush1.bf16.msra.mxu0 %v6819_v62  ;;  %v6827_v26 = vpack.c.bf16 %v6137_v40, %v6133_v47  ;;  %v6152_v6 = vld [vmem:[%s11587_s23 + $0x858] sm:$0xff]  ;;  %v6837_v47 = vpack.c.bf16 %v6162_v15, %v6158_v0  ;;  %v6161_v40 = vld [vmem:[%s11587_s23 + $0x8a0] sm:$0xff]  ;;  %v6174_v60 = vld [vmem:[%s11587_s23 + $0x908] sm:$0xff] }
  0xd5   :  { %6868 = vmatpush1.bf16.msra.mxu1 %v6867_v43  ;;  %6822 = vmatprep.subr.bf16.mxu0 %v6821_v2  ;;  %v6156_v62 = vld [vmem:[%s11587_s23 + $0x878] sm:$0xff]  ;;  %v465_v43 = vld [vmem:[#allocation2 + $0x88] sm:$0xff] }
  0xd6   :  { %1603 = vmatmul.mubr.f32.gmra.mrb[10].mxu0 %v8908_v49  ;;  %6870 = vmatprep.subr.bf16.mxu1 %v6869_v54  ;;  %v6151_v54 = vld [vmem:[%s11587_s23 + $0x850] sm:$0xff]  ;;  %v6881_v9 = vpack.c.bf16 %v6156_v62, %v6152_v6  ;;  %v6172_v36 = vld [vmem:[%s11587_s23 + $0x8f8] sm:$0xff]  ;;  %v6178_v28 = vld [vmem:[%s11587_s23 + $0x928] sm:$0xff] }
  0xd7   :  { %1860 = vmatmul.mubr.f32.gmra.mrb[10].mxu1 %v8908_v49  ;;  %6025 = vmatprep.mubr.msk.f32.mxu0 %vm65_vm0, %v461_v33  ;;  %v6141_v49 = vld [vmem:[%s11587_s23 + $0x800] sm:$0xff]  ;;  %v6889_v52 = vpack.c.bf16 %v6172_v36, %v6168_v20  ;;  %v6176_v44 = vld [vmem:[%s11587_s23 + $0x918] sm:$0xff]  ;;  %v6182_v15 = vld [vmem:[%s11587_s23 + $0x948] sm:$0x3f] }
  0xd8   :  { %6059 = vmatprep.mubr.msk.f32.mxu1 %vm65_vm0, %v461_v33  ;;  %6824 = vmatpush1.bf16.msra.mxu0 %v6823_v30  ;;  %v6831_v2 = vpack.c.bf16 %v6145_v38, %v6141_v49  ;;  %v6164_v33 = vld [vmem:[%s11587_s23 + $0x8b8] sm:$0xff]  ;;  %v6169_v49 = vld [vmem:[%s11587_s23 + $0x8e0] sm:$0xff]  ;;  %v6167_v38 = vld [vmem:[%s11587_s23 + $0x8d0] sm:$0xff] }
  0xd9   :  { %6872 = vmatpush1.bf16.msra.mxu1 %v6871_v22  ;;  %6826 = vmatprep.subr.bf16.mxu0 %v6825_v4  ;;  %v467_v30 = vld [vmem:[#allocation2 + $0x98] sm:$0xff]  ;;  %v6883_v4 = vpack.c.bf16 %v6155_v39, %v6151_v54  ;;  %v6179_v54 = vld [vmem:[%s11587_s23 + $0x930] sm:$0xff]  ;;  %v509_v36 = vld [vmem:[#allocation2 + $0x1e8] sm:$0xff] }
  0xda   :  { %1609 = vmatmul.mubr.f32.gmra.mrb[12].mxu0 %v8923_v35  ;;  %6874 = vmatprep.subr.bf16.mxu1 %v6873_v29  ;;  %v6885_v29 = vpack.c.bf16 %v6164_v33, %v6160_v24  ;;  %v6180_v6 = vld [vmem:[%s11587_s23 + $0x938] sm:$0xff]  ;;  %v6181_v33 = vld [vmem:[%s11587_s23 + $0x940] sm:$0x3f] }
  0xdb   :  { %1866 = vmatmul.mubr.f32.gmra.mrb[12].mxu1 %v8923_v35  ;;  %6026 = vmatprep.mubr.msk.f32.mxu0 %vm65_vm0, %v463_v42  ;;  %v6149_v35 = vld [vmem:[%s11587_s23 + $0x840] sm:$0xff]  ;;  %v471_v62 = vld [vmem:[#allocation2 + $0xb8] sm:$0xff] }
  0xdc   :  { %6060 = vmatprep.mubr.msk.f32.mxu1 %vm65_vm0, %v463_v42  ;;  %6828 = vmatpush1.bf16.msra.mxu0 %v6827_v26  ;;  %v6835_v22 = vpack.c.bf16 %v6153_v8, %v6149_v35  ;;  %v469_v42 = vld [vmem:[#allocation2 + $0xa8] sm:$0xff]  ;;  %v6893_v35 = vpack.c.bf16 %v6180_v6, %v6176_v44  ;;  %v6175_v8 = vld [vmem:[%s11587_s23 + $0x910] sm:$0xff]  ;;  %v475_v24 = vld [vmem:[#allocation2 + $0xd8] sm:$0xff] }
  0xdd   :  { %6876 = vmatpush1.bf16.msra.mxu1 %v6875_v46  ;;  %6830 = vmatprep.subr.bf16.mxu0 %v6829_v48  ;;  %v6887_v46 = vpack.c.bf16 %v6163_v18, %v6159_v27  ;;  %v6841_v48 = vpack.c.bf16 %v6170_v57, %v6166_v31  ;;  %v6895_v0 = vpack.c.bf16 %v6179_v54, %v6175_v8  ;;  %v497_v27 = vld [vmem:[#allocation2 + $0x188] sm:$0xff]  ;;  %v503_v31 = vld [vmem:[#allocation2 + $0x1b8] sm:$0xff]  ;;  %v2062_v6 = vld [vmem:[#allocation4 + $0x140] sm:$0xff] }
  0xde   :  { %1615 = vmatmul.mubr.f32.gmra.mrb[14].mxu0 %v8936_v41  ;;  %6878 = vmatprep.subr.bf16.mxu1 %v6877_v13  ;;  %v6171_v13 = vld [vmem:[%s11587_s23 + $0x8f0] sm:$0xff]  ;;  %v501_v18 = vld [vmem:[#allocation2 + $0x1a8] sm:$0xff]  ;;  %v507_v20 = vld [vmem:[#allocation2 + $0x1d8] sm:$0xff] }
  0xdf   :  { %1872 = vmatmul.mubr.f32.gmra.mrb[14].mxu1 %v8936_v41  ;;  %6027 = vmatprep.mubr.msk.f32.mxu0 %vm65_vm0, %v465_v43  ;;  %v6157_v41 = vld [vmem:[%s11587_s23 + $0x880] sm:$0xff]  ;;  %v505_v57 = vld [vmem:[#allocation2 + $0x1c8] sm:$0xff]  ;;  %v2073_v54 = vld [vmem:[#allocation4 + $0x198] sm:$0xff] }
  0xe0   :  { %6061 = vmatprep.mubr.msk.f32.mxu1 %vm65_vm0, %v465_v43  ;;  %6832 = vmatpush1.bf16.msra.mxu0 %v6831_v2  ;;  %v6839_v26 = vpack.c.bf16 %v6161_v40, %v6157_v41  ;;  %v6891_v2 = vpack.c.bf16 %v6171_v13, %v6167_v38  ;;  %v493_v41 = vld [vmem:[#allocation2 + $0x168] sm:$0xff]  ;;  %v495_v40 = vld [vmem:[#allocation2 + $0x178] sm:$0xff]  ;;  %v2070_v8 = vld [vmem:[#allocation4 + $0x180] sm:$0xff] }
  0xe1   :  { %6880 = vmatpush1.bf16.msra.mxu1 %v6879_v45  ;;  %6834 = vmatprep.subr.bf16.mxu0 %v6833_v3  ;;  %v6845_v45 = vpack.c.bf16 %v6178_v28, %v6174_v60  ;;  %v6177_v3 = vld [vmem:[%s11587_s23 + $0x920] sm:$0xff]  ;;  %v2029_v38 = vld [vmem:[#allocation4 + $0x38] sm:$0xff]  ;;  %v2059_v13 = vld [vmem:[#allocation4 + $0x128] sm:$0xff] }
  0xe2   :  { %1621 = vmatmul.mubr.f32.gmra.mrb[16].mxu0 %v8951_v58  ;;  %6882 = vmatprep.subr.bf16.mxu1 %v6881_v9  ;;  %v473_v9 = vld [vmem:[#allocation2 + $0xc8] sm:$0xff]  ;;  %v2058_v60 = vld [vmem:[#allocation4 + $0x120] sm:$0xff]  ;;  %v2060_v28 = vld [vmem:[#allocation4 + $0x130] sm:$0xff] }
  0xe3   :  { %1878 = vmatmul.mubr.f32.gmra.mrb[16].mxu1 %v8951_v58  ;;  %6028 = vmatprep.mubr.msk.f32.mxu0 %vm65_vm0, %v467_v30  ;;  %v6165_v58 = vld [vmem:[%s11587_s23 + $0x8c0] sm:$0xff]  ;;  %v2063_v44 = vld [vmem:[#allocation4 + $0x148] sm:$0xff] }
  0xe4   :  { %6062 = vmatprep.mubr.msk.f32.mxu1 %vm65_vm0, %v467_v30  ;;  %6836 = vmatpush1.bf16.msra.mxu0 %v6835_v22  ;;  %v6843_v43 = vpack.c.bf16 %v6169_v49, %v6165_v58  ;;  %v477_v30 = vld [vmem:[#allocation2 + $0xe8] sm:$0xff]  ;;  %v479_v22 = vld [vmem:[#allocation2 + $0xf8] sm:$0xff] }
  0xe5   :  { %6884 = vmatpush1.bf16.msra.mxu1 %v6883_v4  ;;  %6838 = vmatprep.subr.bf16.mxu0 %v6837_v47  ;;  %v489_v4 = vld [vmem:[#allocation2 + $0x148] sm:$0xff]  ;;  %v491_v47 = vld [vmem:[#allocation2 + $0x158] sm:$0xff] }
  0xe6   :  { %1627 = vmatmul.mubr.f32.gmra.mrb[18].mxu0 %v8963_v59  ;;  %6886 = vmatprep.subr.bf16.mxu1 %v6885_v29  ;;  %v499_v29 = vld [vmem:[#allocation2 + $0x198] sm:$0xff]  ;;  %v2027_v49 = vld [vmem:[#allocation4 + $0x28] sm:$0xff] }
  0xe7   :  { %1884 = vmatmul.mubr.f32.gmra.mrb[18].mxu1 %v8963_v59  ;;  %6029 = vmatprep.mubr.msk.f32.mxu0 %vm65_vm0, %v469_v42  ;;  %v6173_v59 = vld [vmem:[%s11587_s23 + $0x900] sm:$0xff]  ;;  %v2025_v58 = vld [vmem:[#allocation4 + $0x18] sm:$0xff] }
  0xe8   :  { %6063 = vmatprep.mubr.msk.f32.mxu1 %vm65_vm0, %v469_v42  ;;  %6840 = vmatpush1.bf16.msra.mxu0 %v6839_v26  ;;  %v6847_v39 = vpack.c.bf16 %v6177_v3, %v6173_v59  ;;  %v5848_v42 = vld [vmem:[%s11588_s28 + $0x3f8] sm:$0xff]  ;;  %v2068_v3 = vld [vmem:[#allocation4 + $0x170] sm:$0xff] }
  0xe9   :  { %6888 = vmatpush1.bf16.msra.mxu1 %v6887_v46  ;;  %6842 = vmatprep.subr.bf16.mxu0 %v6841_v48  ;;  %447 = vst.msk [vmem:[#allocation4 + $0x1f8] sm:$0xff] %vm65_vm0, %v5848_v42  ;;  %v511_v26 = vld [vmem:[#allocation2 + $0x1f8] sm:$0xff]  ;;  %v2023_v46 = vld [vmem:[#allocation4 + $0x8] sm:$0xff]  ;;  %v9680_v48 = vld [vmem:[%s11588_s28 + $0x3f0] sm:$0xff] }
  0xea   :  { %1633 = vmatmul.mubr.f32.gmra.mrb[20].mxu0 %v8971_v21  ;;  %6890 = vmatprep.subr.bf16.mxu1 %v6889_v52  ;;  %v2057_v52 = vld [vmem:[#allocation4 + $0x118] sm:$0xff] }
  0xeb   :  { %1890 = vmatmul.mubr.f32.gmra.mrb[20].mxu1 %v8971_v21  ;;  %6030 = vmatprep.mubr.msk.f32.mxu0 %vm65_vm0, %v471_v62  ;;  %v6184_v21 = vld [vmem:[%s11587_s23 + $0x958] sm:$0x3f] }
  0xec   :  { %6064 = vmatprep.mubr.msk.f32.mxu1 %vm65_vm0, %v471_v62  ;;  %6844 = vmatpush1.bf16.msra.mxu0 %v6843_v43  ;;  %v2065_v62 = vld [vmem:[#allocation4 + $0x158] sm:$0xff]  ;;  %v2064_v43 = vld [vmem:[#allocation4 + $0x150] sm:$0xff] }
  0xed   :  { %6892 = vmatpush1.bf16.msra.mxu1 %v6891_v2  ;;  %6846 = vmatprep.subr.bf16.mxu0 %v6845_v45  ;;  %v2067_v2 = vld [vmem:[#allocation4 + $0x168] sm:$0xff]  ;;  %v2066_v45 = vld [vmem:[#allocation4 + $0x160] sm:$0xff]  ;;  %v2069_v59 = vld [vmem:[#allocation4 + $0x178] sm:$0xff] }
  0xee   :  { %1639 = vmatmul.mubr.f32.gmra.mrb[22].mxu0 %v8987_v63  ;;  %6894 = vmatprep.subr.bf16.mxu1 %v6893_v35  ;;  %v2071_v35 = vld [vmem:[#allocation4 + $0x188] sm:$0xff] }
  0xef   :  { %1896 = vmatmul.mubr.f32.gmra.mrb[22].mxu1 %v8987_v63  ;;  %6031 = vmatprep.mubr.msk.f32.mxu0 %vm65_vm0, %v473_v9  ;;  %v6183_v63 = vld [vmem:[%s11587_s23 + $0x950] sm:$0x3f] }
  0xf0   :  { %6065 = vmatprep.mubr.msk.f32.mxu1 %vm65_vm0, %v473_v9  ;;  %6848 = vmatpush1.bf16.msra.mxu0 %v6847_v39  ;;  %v2072_v9 = vld [vmem:[#allocation4 + $0x190] sm:$0xff]  ;;  %v2075_v39 = vld [vmem:[#allocation4 + $0x1a8] sm:$0xff] }
  0xf1   :  { %6896 = vmatpush1.bf16.msra.mxu1 %v6895_v0  ;;  %6185 = vmatprep.subr.msk.mxu0 %vm873_vm1, %v6182_v15  ;;  %v2074_v0 = vld [vmem:[#allocation4 + $0x1a0] sm:$0xff]  ;;  %v2077_v15 = vld [vmem:[#allocation4 + $0x1b8] sm:$0xff] }
  0xf2   :  { %1645 = vmatmul.mubr.f32.gmra.mrb[24].mxu0 %v9000_v5  ;;  %6219 = vmatprep.subr.msk.mxu1 %vm873_vm1, %v6184_v21  ;;  %v2076_v21 = vld [vmem:[#allocation4 + $0x1b0] sm:$0xff] }
  0xf3   :  { %1902 = vmatmul.mubr.f32.gmra.mrb[24].mxu1 %v9000_v5  ;;  %6032 = vmatprep.mubr.msk.f32.mxu0 %vm65_vm0, %v475_v24  ;;  %v481_v5 = vld [vmem:[#allocation2 + $0x108] sm:$0xff] }
  0xf4   :  { %6066 = vmatprep.mubr.msk.f32.mxu1 %vm65_vm0, %v475_v24  ;;  %6186 = vmatpush1.msk.msra.mxu0 %vm873_vm1, %v6181_v33  ;;  %v2079_v24 = vld [vmem:[#allocation4 + $0x1c8] sm:$0xff]  ;;  %v2081_v33 = vld [vmem:[#allocation4 + $0x1d8] sm:$0xff] }
  0xf5   :  { %6220 = vmatpush1.msk.msra.mxu1 %vm873_vm1, %v6183_v63  ;;  %v7644_v63 = vld [vmem:[#allocation2 + $0xd0] sm:$0xff] }
  0xf6   :  { %1651 = vmatmul.mubr.f32.gmra.mrb[26].mxu0 %v9017_v10 }
  0xf7   :  { %1908 = vmatmul.mubr.f32.gmra.mrb[26].mxu1 %v9017_v10  ;;  %6033 = vmatprep.mubr.msk.f32.mxu0 %vm65_vm0, %v477_v30  ;;  %v483_v10 = vld [vmem:[#allocation2 + $0x118] sm:$0xff] }
  0xf8   :  { %6067 = vmatprep.mubr.msk.f32.mxu1 %vm65_vm0, %v477_v30  ;;  %v2083_v30 = vld [vmem:[#allocation4 + $0x1e8] sm:$0xff] }
  0xfa   :  { %1657 = vmatmul.mubr.f32.gmra.mrb[28].mxu0 %v9027_v23 }
  0xfb   :  { %1914 = vmatmul.mubr.f32.gmra.mrb[28].mxu1 %v9027_v23  ;;  %6034 = vmatprep.mubr.msk.f32.mxu0 %vm65_vm0, %v479_v22  ;;  %v485_v23 = vld [vmem:[#allocation2 + $0x128] sm:$0xff] }
  0xfc   :  { %6068 = vmatprep.mubr.msk.f32.mxu1 %vm65_vm0, %v479_v22  ;;  %v7645_v22 = vld [vmem:[#allocation2 + $0xe0] sm:$0xff] }
  0xfe   :  { %1663 = vmatmul.mubr.f32.gmra.mrb[30].mxu0 %v9040_v14 }
  0xff   :  { %1920 = vmatmul.mubr.f32.gmra.mrb[30].mxu1 %v9040_v14  ;;  %6035 = vmatprep.mubr.msk.f32.mxu0 %vm65_vm0, %v481_v5  ;;  %v487_v14 = vld [vmem:[#allocation2 + $0x138] sm:$0xff] }
 0x100   :  { %6069 = vmatprep.mubr.msk.f32.mxu1 %vm65_vm0, %v481_v5  ;;  %v2085_v5 = vld [vmem:[#allocation4 + $0x1f8] sm:$0xff] }
 0x102   :  { %1669 = vmatmul.mubr.f32.gmra.mrb[32].mxu0 %v9055_v17 }
 0x103   :  { %1926 = vmatmul.mubr.f32.gmra.mrb[32].mxu1 %v9055_v17  ;;  %6036 = vmatprep.mubr.msk.f32.mxu0 %vm65_vm0, %v483_v10 }
 0x104   :  { %6070 = vmatprep.mubr.msk.f32.mxu1 %vm65_vm0, %v483_v10  ;;  %v7646_v10 = vld [vmem:[#allocation2 + $0xf0] sm:$0xff] }
 0x106   :  { %1675 = vmatmul.mubr.f32.gmra.mrb[34].mxu0 %v9066_v19 }
 0x107   :  { %1932 = vmatmul.mubr.f32.gmra.mrb[34].mxu1 %v9066_v19  ;;  %6037 = vmatprep.mubr.msk.f32.mxu0 %vm65_vm0, %v485_v23 }
 0x108   :  { %6071 = vmatprep.mubr.msk.f32.mxu1 %vm65_vm0, %v485_v23  ;;  %v6254_v23 = vld [vmem:[%s11589_s1 + $0x248] sm:$0xff] }
 0x10a   :  { %1681 = vmatmul.mubr.f32.gmra.mrb[36].mxu0 %v9080_v25 }
 0x10b   :  { %1938 = vmatmul.mubr.f32.gmra.mrb[36].mxu1 %v9080_v25  ;;  %6038 = vmatprep.mubr.msk.f32.mxu0 %vm65_vm0, %v487_v14 }
 0x10c   :  { %6072 = vmatprep.mubr.msk.f32.mxu1 %vm65_vm0, %v487_v14  ;;  %v6256_v14 = vld [vmem:[%s11589_s1 + $0x258] sm:$0xff] }
 0x10e   :  { %1687 = vmatmul.mubr.f32.gmra.mrb[38].mxu0 %v9088_v16 }
 0x10f   :  { %1944 = vmatmul.mubr.f32.gmra.mrb[38].mxu1 %v9088_v16  ;;  %6039 = vmatprep.mubr.msk.f32.mxu0 %vm65_vm0, %v489_v4 }
 0x110   :  { %6073 = vmatprep.mubr.msk.f32.mxu1 %vm65_vm0, %v489_v4  ;;  %v6897_v4 = vpack.c.bf16 %v6256_v14, %v6254_v23 }
 0x112   :  { %1693 = vmatmul.mubr.f32.gmra.mrb[40].mxu0 %v9103_v50  ;;  %6898 = vmatprep.subr.bf16.mxu0 %v6897_v4  ;;  %v6277_v4 = vld [vmem:[%s11589_s1 + $0x300] sm:$0xff] }
 0x113   :  { %1950 = vmatmul.mubr.f32.gmra.mrb[40].mxu1 %v9103_v50  ;;  %6040 = vmatprep.mubr.msk.f32.mxu0 %vm65_vm0, %v491_v47 }
 0x114   :  { %6074 = vmatprep.mubr.msk.f32.mxu1 %vm65_vm0, %v491_v47  ;;  %v6253_v47 = vld [vmem:[%s11589_s1 + $0x240] sm:$0xff] }
 0x116   :  { %1699 = vmatmul.mubr.f32.gmra.mrb[42].mxu0 %v9114_v32 }
 0x117   :  { %1956 = vmatmul.mubr.f32.gmra.mrb[42].mxu1 %v9114_v32  ;;  %6041 = vmatprep.mubr.msk.f32.mxu0 %vm65_vm0, %v493_v41 }
 0x118   :  { %6075 = vmatprep.mubr.msk.f32.mxu1 %vm65_vm0, %v493_v41  ;;  %v6255_v41 = vld [vmem:[%s11589_s1 + $0x250] sm:$0xff] }
 0x11a   :  { %1705 = vmatmul.mubr.f32.gmra.mrb[44].mxu0 %v9127_v53 }
 0x11b   :  { %1962 = vmatmul.mubr.f32.gmra.mrb[44].mxu1 %v9127_v53  ;;  %6042 = vmatprep.mubr.msk.f32.mxu0 %vm65_vm0, %v495_v40 }
 0x11c   :  { %6076 = vmatprep.mubr.msk.f32.mxu1 %vm65_vm0, %v495_v40  ;;  %v6899_v40 = vpack.c.bf16 %v6255_v41, %v6253_v47  ;;  %v6279_v47 = vld [vmem:[%s11589_s1 + $0x310] sm:$0xff] }
 0x11e   :  { %1711 = vmatmul.mubr.f32.gmra.mrb[46].mxu0 %v9139_v37 }
 0x11f   :  { %1968 = vmatmul.mubr.f32.gmra.mrb[46].mxu1 %v9139_v37  ;;  %6043 = vmatprep.mubr.msk.f32.mxu0 %vm65_vm0, %v497_v27 }
 0x120   :  { %6077 = vmatprep.mubr.msk.f32.mxu1 %vm65_vm0, %v497_v27  ;;  %v6260_v27 = vld [vmem:[%s11589_s1 + $0x278] sm:$0xff] }
 0x122   :  { %1717 = vmatmul.mubr.f32.gmra.mrb[48].mxu0 %v9151_v11 }
 0x123   :  { %1974 = vmatmul.mubr.f32.gmra.mrb[48].mxu1 %v9151_v11  ;;  %6044 = vmatprep.mubr.msk.f32.mxu0 %vm65_vm0, %v499_v29 }
 0x124   :  { %6078 = vmatprep.mubr.msk.f32.mxu1 %vm65_vm0, %v499_v29 }
 0x126   :  { %1723 = vmatmul.mubr.f32.gmra.mrb[50].mxu0 %v9170_v51 }
 0x127   :  { %1980 = vmatmul.mubr.f32.gmra.mrb[50].mxu1 %v9170_v51  ;;  %6045 = vmatprep.mubr.msk.f32.mxu0 %vm65_vm0, %v501_v18 }
 0x128   :  { %6079 = vmatprep.mubr.msk.f32.mxu1 %vm65_vm0, %v501_v18 }
 0x12a   :  { %1729 = vmatmul.mubr.f32.gmra.mrb[52].mxu0 %v9184_v55 }
 0x12b   :  { %1986 = vmatmul.mubr.f32.gmra.mrb[52].mxu1 %v9184_v55  ;;  %6046 = vmatprep.mubr.msk.f32.mxu0 %vm65_vm0, %v503_v31 }
 0x12c   :  { %6080 = vmatprep.mubr.msk.f32.mxu1 %vm65_vm0, %v503_v31  ;;  %v6257_v31 = vld [vmem:[%s11589_s1 + $0x260] sm:$0xff] }
 0x12e   :  { %1735 = vmatmul.mubr.f32.gmra.mrb[54].mxu0 %v9198_v56 }
 0x12f   :  { %1992 = vmatmul.mubr.f32.gmra.mrb[54].mxu1 %v9198_v56  ;;  %6047 = vmatprep.mubr.msk.f32.mxu0 %vm65_vm0, %v505_v57 }
 0x130   :  { %6081 = vmatprep.mubr.msk.f32.mxu1 %vm65_vm0, %v505_v57  ;;  %v6259_v57 = vld [vmem:[%s11589_s1 + $0x270] sm:$0xff] }
 0x131   :  { %v6903_v42 = vpack.c.bf16 %v6259_v57, %v6257_v31 }
 0x132   :  { %1741 = vmatmul.mubr.f32.gmra.mrb[56].mxu0 %v9212_v61 }
 0x133   :  { %1998 = vmatmul.mubr.f32.gmra.mrb[56].mxu1 %v9212_v61  ;;  %6048 = vmatprep.mubr.msk.f32.mxu0 %vm65_vm0, %v507_v20 }
 0x134   :  { %6082 = vmatprep.mubr.msk.f32.mxu1 %vm65_vm0, %v507_v20 }
 0x136   :  { %1747 = vmatmul.mubr.f32.gmra.mrb[58].mxu0 %v9226_v1 }
 0x137   :  { %2004 = vmatmul.mubr.f32.gmra.mrb[58].mxu1 %v9226_v1  ;;  %6049 = vmatprep.mubr.msk.f32.mxu0 %vm65_vm0, %v509_v36 }
 0x138   :  { %6083 = vmatprep.mubr.msk.f32.mxu1 %vm65_vm0, %v509_v36 }
 0x13a   :  { %1753 = vmatmul.mubr.f32.gmra.mrb[60].mxu0 %v9240_v7 }
 0x13b   :  { %2010 = vmatmul.mubr.f32.gmra.mrb[60].mxu1 %v9240_v7  ;;  %6050 = vmatprep.mubr.msk.f32.mxu0 %vm65_vm0, %v511_v26 }
 0x13c   :  { %6084 = vmatprep.mubr.msk.f32.mxu1 %vm65_vm0, %v511_v26 }
 0x13e   :  { %1759 = vmatmul.mubr.f32.gmra.mrb[62].mxu0 %v9255_v12 }
 0x13f   :  { %2016 = vmatmul.mubr.f32.gmra.mrb[62].mxu1 %v9255_v12  ;;  %6187 = vmatprep.mubr.msk.f32.mxu0 %vm65_vm0, %v2023_v46 }
 0x140   :  { %6221 = vmatprep.mubr.msk.f32.mxu1 %vm65_vm0, %v2023_v46  ;;  %v6262_v46 = vld [vmem:[%s11589_s1 + $0x288] sm:$0xff] }
 0x142   :  { %2360 = vmatmul.mubr.f32.vlgmr.msra.gmra.mrb[0].mxu0 %v9055_v17 }
 0x143   :  { %2617 = vmatmul.mubr.f32.vlgmr.msra.gmra.mrb[0].mxu1 %v9055_v17  ;;  %6188 = vmatprep.mubr.msk.f32.mxu0 %vm65_vm0, %v2025_v58  ;;  %v2031_v17 = vld [vmem:[#allocation4 + $0x48] sm:$0xff] }
 0x144   :  { %6222 = vmatprep.mubr.msk.f32.mxu1 %vm65_vm0, %v2025_v58  ;;  %6900 = vmatpush1.bf16.msra.mxu0 %v6899_v40  ;;  %v6261_v58 = vld [vmem:[%s11589_s1 + $0x280] sm:$0xff]  ;;  %v6923_v40 = vpack.c.bf16 %v6279_v47, %v6277_v4 }
 0x146   :  { %2366 = vmatmul.mubr.f32.gmra.mrb[2].mxu0 %v9066_v19 }
 0x147   :  { %2623 = vmatmul.mubr.f32.gmra.mrb[2].mxu1 %v9066_v19  ;;  %6189 = vmatprep.mubr.msk.f32.mxu0 %vm65_vm0, %v2027_v49  ;;  %v2033_v19 = vld [vmem:[#allocation4 + $0x58] sm:$0xff] }
 0x148   :  { %6223 = vmatprep.mubr.msk.f32.mxu1 %vm65_vm0, %v2027_v49 }
 0x14a   :  { %2372 = vmatmul.mubr.f32.gmra.mrb[4].mxu0 %v9080_v25 }
 0x14b   :  { %2629 = vmatmul.mubr.f32.gmra.mrb[4].mxu1 %v9080_v25  ;;  %6190 = vmatprep.mubr.msk.f32.mxu0 %vm65_vm0, %v2029_v38  ;;  %v2035_v25 = vld [vmem:[#allocation4 + $0x68] sm:$0xff] }
 0x14c   :  { %6224 = vmatprep.mubr.msk.f32.mxu1 %vm65_vm0, %v2029_v38 }
 0x14e   :  { %2378 = vmatmul.mubr.f32.gmra.mrb[6].mxu0 %v9088_v16 }
 0x14f   :  { %2635 = vmatmul.mubr.f32.gmra.mrb[6].mxu1 %v9088_v16  ;;  %6191 = vmatprep.mubr.msk.f32.mxu0 %vm65_vm0, %v2031_v17  ;;  %v2037_v16 = vld [vmem:[#allocation4 + $0x78] sm:$0xff] }
 0x150   :  { %6225 = vmatprep.mubr.msk.f32.mxu1 %vm65_vm0, %v2031_v17  ;;  %v6263_v17 = vld [vmem:[%s11589_s1 + $0x290] sm:$0xff] }
 0x152   :  { %2384 = vmatmul.mubr.f32.gmra.mrb[8].mxu0 %v9103_v50 }
 0x153   :  { %2641 = vmatmul.mubr.f32.gmra.mrb[8].mxu1 %v9103_v50  ;;  %6192 = vmatprep.mubr.msk.f32.mxu0 %vm65_vm0, %v2033_v19  ;;  %v2039_v50 = vld [vmem:[#allocation4 + $0x88] sm:$0xff] }
 0x154   :  { %6226 = vmatprep.mubr.msk.f32.mxu1 %vm65_vm0, %v2033_v19 }
 0x156   :  { %2390 = vmatmul.mubr.f32.gmra.mrb[10].mxu0 %v9114_v32 }
 0x157   :  { %2647 = vmatmul.mubr.f32.gmra.mrb[10].mxu1 %v9114_v32  ;;  %6193 = vmatprep.mubr.msk.f32.mxu0 %vm65_vm0, %v2035_v25  ;;  %v2041_v32 = vld [vmem:[#allocation4 + $0x98] sm:$0xff] }
 0x158   :  { %6227 = vmatprep.mubr.msk.f32.mxu1 %vm65_vm0, %v2035_v25 }
 0x15a   :  { %2396 = vmatmul.mubr.f32.gmra.mrb[12].mxu0 %v9127_v53 }
 0x15b   :  { %2653 = vmatmul.mubr.f32.gmra.mrb[12].mxu1 %v9127_v53  ;;  %6194 = vmatprep.mubr.msk.f32.mxu0 %vm65_vm0, %v2037_v16  ;;  %v2043_v53 = vld [vmem:[#allocation4 + $0xa8] sm:$0xff] }
 0x15c   :  { %6228 = vmatprep.mubr.msk.f32.mxu1 %vm65_vm0, %v2037_v16  ;;  %v6907_v16 = vpack.c.bf16 %v6263_v17, %v6261_v58 }
 0x15e   :  { %2402 = vmatmul.mubr.f32.gmra.mrb[14].mxu0 %v9139_v37 }
 0x15f   :  { %2659 = vmatmul.mubr.f32.gmra.mrb[14].mxu1 %v9139_v37  ;;  %6195 = vmatprep.mubr.msk.f32.mxu0 %vm65_vm0, %v2039_v50  ;;  %v2045_v37 = vld [vmem:[#allocation4 + $0xb8] sm:$0xff] }
 0x160   :  { %6229 = vmatprep.mubr.msk.f32.mxu1 %vm65_vm0, %v2039_v50 }
 0x162   :  { %2408 = vmatmul.mubr.f32.gmra.mrb[16].mxu0 %v9151_v11 }
 0x163   :  { %2665 = vmatmul.mubr.f32.gmra.mrb[16].mxu1 %v9151_v11  ;;  %6196 = vmatprep.mubr.msk.f32.mxu0 %vm65_vm0, %v2041_v32  ;;  %v2047_v11 = vld [vmem:[#allocation4 + $0xc8] sm:$0xff] }
 0x164   :  { %6230 = vmatprep.mubr.msk.f32.mxu1 %vm65_vm0, %v2041_v32 }
 0x166   :  { %2414 = vmatmul.mubr.f32.gmra.mrb[18].mxu0 %v9170_v51 }
 0x167   :  { %2671 = vmatmul.mubr.f32.gmra.mrb[18].mxu1 %v9170_v51  ;;  %6197 = vmatprep.mubr.msk.f32.mxu0 %vm65_vm0, %v2043_v53  ;;  %v2049_v51 = vld [vmem:[#allocation4 + $0xd8] sm:$0xff] }
 0x168   :  { %6231 = vmatprep.mubr.msk.f32.mxu1 %vm65_vm0, %v2043_v53 }
 0x16a   :  { %2420 = vmatmul.mubr.f32.gmra.mrb[20].mxu0 %v9184_v55 }
 0x16b   :  { %2677 = vmatmul.mubr.f32.gmra.mrb[20].mxu1 %v9184_v55  ;;  %6198 = vmatprep.mubr.msk.f32.mxu0 %vm65_vm0, %v2045_v37  ;;  %v2051_v55 = vld [vmem:[#allocation4 + $0xe8] sm:$0xff] }
 0x16c   :  { %6232 = vmatprep.mubr.msk.f32.mxu1 %vm65_vm0, %v2045_v37 }
 0x16e   :  { %2426 = vmatmul.mubr.f32.gmra.mrb[22].mxu0 %v9198_v56 }
 0x16f   :  { %2683 = vmatmul.mubr.f32.gmra.mrb[22].mxu1 %v9198_v56  ;;  %6199 = vmatprep.mubr.msk.f32.mxu0 %vm65_vm0, %v2047_v11  ;;  %v2053_v56 = vld [vmem:[#allocation4 + $0xf8] sm:$0xff] }
 0x170   :  { %6233 = vmatprep.mubr.msk.f32.mxu1 %vm65_vm0, %v2047_v11 }
 0x172   :  { %2432 = vmatmul.mubr.f32.gmra.mrb[24].mxu0 %v9212_v61 }
 0x173   :  { %2689 = vmatmul.mubr.f32.gmra.mrb[24].mxu1 %v9212_v61  ;;  %6200 = vmatprep.mubr.msk.f32.mxu0 %vm65_vm0, %v2049_v51  ;;  %v2055_v61 = vld [vmem:[#allocation4 + $0x108] sm:$0xff] }
 0x174   :  { %6234 = vmatprep.mubr.msk.f32.mxu1 %vm65_vm0, %v2049_v51  ;;  %v6266_v51 = vld [vmem:[%s11589_s1 + $0x2a8] sm:$0xff] }
 0x176   :  { %2438 = vmatmul.mubr.f32.gmra.mrb[26].mxu0 %v9226_v1 }
 0x177   :  { %2695 = vmatmul.mubr.f32.gmra.mrb[26].mxu1 %v9226_v1  ;;  %6201 = vmatprep.mubr.msk.f32.mxu0 %vm65_vm0, %v2051_v55  ;;  %v2054_v1 = vld [vmem:[#allocation4 + $0x100] sm:$0xff] }
 0x178   :  { %6235 = vmatprep.mubr.msk.f32.mxu1 %vm65_vm0, %v2051_v55  ;;  %v6268_v55 = vld [vmem:[%s11589_s1 + $0x2b8] sm:$0xff] }
 0x17a   :  { %2444 = vmatmul.mubr.f32.gmra.mrb[28].mxu0 %v9240_v7 }
 0x17b   :  { %2701 = vmatmul.mubr.f32.gmra.mrb[28].mxu1 %v9240_v7  ;;  %6202 = vmatprep.mubr.msk.f32.mxu0 %vm65_vm0, %v2053_v56  ;;  %v2056_v7 = vld [vmem:[#allocation4 + $0x110] sm:$0xff] }
 0x17c   :  { %6236 = vmatprep.mubr.msk.f32.mxu1 %vm65_vm0, %v2053_v56  ;;  %v6265_v56 = vld [vmem:[%s11589_s1 + $0x2a0] sm:$0xff] }
 0x17e   :  { %2450 = vmatmul.mubr.f32.gmra.mrb[30].mxu0 %v9255_v12 }
 0x17f   :  { %2707 = vmatmul.mubr.f32.gmra.mrb[30].mxu1 %v9255_v12  ;;  %6203 = vmatprep.mubr.msk.f32.mxu0 %vm65_vm0, %v2055_v61  ;;  %v2061_v12 = vld [vmem:[#allocation4 + $0x138] sm:$0xff] }
 0x180   :  { %6237 = vmatprep.mubr.msk.f32.mxu1 %vm65_vm0, %v2055_v61 }
 0x182   :  { %2456 = vmatmul.mubr.f32.gmra.mrb[32].mxu0 %v2054_v1 }
 0x183   :  { %2713 = vmatmul.mubr.f32.gmra.mrb[32].mxu1 %v2054_v1  ;;  %6204 = vmatprep.mubr.msk.f32.mxu0 %vm65_vm0, %v2057_v52  ;;  %v6909_v1 = vpack.c.bf16 %v6268_v55, %v6266_v51  ;;  %v6288_v51 = vld [vmem:[%s11589_s1 + $0x358] sm:$0xff] }
 0x184   :  { %6238 = vmatprep.mubr.msk.f32.mxu1 %vm65_vm0, %v2057_v52  ;;  %v6267_v52 = vld [vmem:[%s11589_s1 + $0x2b0] sm:$0xff] }
 0x186   :  { %2462 = vmatmul.mubr.f32.gmra.mrb[34].mxu0 %v2056_v7 }
 0x187   :  { %2719 = vmatmul.mubr.f32.gmra.mrb[34].mxu1 %v2056_v7  ;;  %6205 = vmatprep.mubr.msk.f32.mxu0 %vm65_vm0, %v2059_v13 }
 0x188   :  { %6239 = vmatprep.mubr.msk.f32.mxu1 %vm65_vm0, %v2059_v13 }
 0x18a   :  { %2468 = vmatmul.mubr.f32.gmra.mrb[36].mxu0 %v2058_v60 }
 0x18b   :  { %2725 = vmatmul.mubr.f32.gmra.mrb[36].mxu1 %v2058_v60  ;;  %6206 = vmatprep.mubr.msk.f32.mxu0 %vm65_vm0, %v2061_v12  ;;  %v6911_v60 = vpack.c.bf16 %v6267_v52, %v6265_v56  ;;  %v6285_v52 = vld [vmem:[%s11589_s1 + $0x340] sm:$0xff] }
 0x18c   :  { %6240 = vmatprep.mubr.msk.f32.mxu1 %vm65_vm0, %v2061_v12 }
 0x18e   :  { %2474 = vmatmul.mubr.f32.gmra.mrb[38].mxu0 %v2060_v28 }
 0x18f   :  { %2731 = vmatmul.mubr.f32.gmra.mrb[38].mxu1 %v2060_v28  ;;  %6207 = vmatprep.mubr.msk.f32.mxu0 %vm65_vm0, %v2063_v44 }
 0x190   :  { %6241 = vmatprep.mubr.msk.f32.mxu1 %vm65_vm0, %v2063_v44  ;;  %v6270_v44 = vld [vmem:[%s11589_s1 + $0x2c8] sm:$0xff] }
 0x192   :  { %2480 = vmatmul.mubr.f32.gmra.mrb[40].mxu0 %v2062_v6 }
 0x193   :  { %2737 = vmatmul.mubr.f32.gmra.mrb[40].mxu1 %v2062_v6  ;;  %6208 = vmatprep.mubr.msk.f32.mxu0 %vm65_vm0, %v2065_v62  ;;  %v6272_v6 = vld [vmem:[%s11589_s1 + $0x2d8] sm:$0xff] }
 0x194   :  { %6242 = vmatprep.mubr.msk.f32.mxu1 %vm65_vm0, %v2065_v62 }
 0x196   :  { %2486 = vmatmul.mubr.f32.gmra.mrb[42].mxu0 %v2064_v43 }
 0x197   :  { %2743 = vmatmul.mubr.f32.gmra.mrb[42].mxu1 %v2064_v43  ;;  %6209 = vmatprep.mubr.msk.f32.mxu0 %vm65_vm0, %v2067_v2 }
 0x198   :  { %6243 = vmatprep.mubr.msk.f32.mxu1 %vm65_vm0, %v2067_v2  ;;  %v6913_v2 = vpack.c.bf16 %v6272_v6, %v6270_v44 }
 0x19a   :  { %2492 = vmatmul.mubr.f32.gmra.mrb[44].mxu0 %v2066_v45 }
 0x19b   :  { %2749 = vmatmul.mubr.f32.gmra.mrb[44].mxu1 %v2066_v45  ;;  %6210 = vmatprep.mubr.msk.f32.mxu0 %vm65_vm0, %v2069_v59  ;;  %v6269_v45 = vld [vmem:[%s11589_s1 + $0x2c0] sm:$0xff] }
 0x19c   :  { %6244 = vmatprep.mubr.msk.f32.mxu1 %vm65_vm0, %v2069_v59  ;;  %v6271_v59 = vld [vmem:[%s11589_s1 + $0x2d0] sm:$0xff] }
 0x19e   :  { %2498 = vmatmul.mubr.f32.gmra.mrb[46].mxu0 %v2068_v3 }
 0x19f   :  { %2755 = vmatmul.mubr.f32.gmra.mrb[46].mxu1 %v2068_v3  ;;  %6211 = vmatprep.mubr.msk.f32.mxu0 %vm65_vm0, %v2071_v35 }
 0x1a0   :  { %6245 = vmatprep.mubr.msk.f32.mxu1 %vm65_vm0, %v2071_v35  ;;  %v6915_v35 = vpack.c.bf16 %v6271_v59, %v6269_v45  ;;  %v6290_v45 = vld [vmem:[%s11589_s1 + $0x368] sm:$0xff]  ;;  %v6292_v59 = vld [vmem:[%s11589_s1 + $0x378] sm:$0xff] }
 0x1a2   :  { %2504 = vmatmul.mubr.f32.gmra.mrb[48].mxu0 %v2070_v8 }
 0x1a3   :  { %2761 = vmatmul.mubr.f32.gmra.mrb[48].mxu1 %v2070_v8  ;;  %6212 = vmatprep.mubr.msk.f32.mxu0 %vm65_vm0, %v2073_v54 }
 0x1a4   :  { %6246 = vmatprep.mubr.msk.f32.mxu1 %vm65_vm0, %v2073_v54  ;;  %v6274_v54 = vld [vmem:[%s11589_s1 + $0x2e8] sm:$0xff] }
 0x1a6   :  { %2510 = vmatmul.mubr.f32.gmra.mrb[50].mxu0 %v2072_v9 }
 0x1a7   :  { %2767 = vmatmul.mubr.f32.gmra.mrb[50].mxu1 %v2072_v9  ;;  %6213 = vmatprep.mubr.msk.f32.mxu0 %vm65_vm0, %v2075_v39  ;;  %v6276_v9 = vld [vmem:[%s11589_s1 + $0x2f8] sm:$0xff] }
 0x1a8   :  { %6247 = vmatprep.mubr.msk.f32.mxu1 %vm65_vm0, %v2075_v39 }
 0x1aa   :  { %2516 = vmatmul.mubr.f32.gmra.mrb[52].mxu0 %v2074_v0 }
 0x1ab   :  { %2773 = vmatmul.mubr.f32.gmra.mrb[52].mxu1 %v2074_v0  ;;  %6214 = vmatprep.mubr.msk.f32.mxu0 %vm65_vm0, %v2077_v15 }
 0x1ac   :  { %6248 = vmatprep.mubr.msk.f32.mxu1 %vm65_vm0, %v2077_v15  ;;  %v6917_v15 = vpack.c.bf16 %v6276_v9, %v6274_v54  ;;  %v6933_v9 = vpack.c.bf16 %v6292_v59, %v6290_v45 }
 0x1ae   :  { %2522 = vmatmul.mubr.f32.gmra.mrb[54].mxu0 %v2076_v21 }
 0x1af   :  { %2779 = vmatmul.mubr.f32.gmra.mrb[54].mxu1 %v2076_v21  ;;  %6215 = vmatprep.mubr.msk.f32.mxu0 %vm65_vm0, %v2079_v24  ;;  %v6273_v21 = vld [vmem:[%s11589_s1 + $0x2e0] sm:$0xff] }
 0x1b0   :  { %6249 = vmatprep.mubr.msk.f32.mxu1 %vm65_vm0, %v2079_v24  ;;  %v6275_v24 = vld [vmem:[%s11589_s1 + $0x2f0] sm:$0xff] }
 0x1b2   :  { %2528 = vmatmul.mubr.f32.gmra.mrb[56].mxu0 %v7644_v63 }
 0x1b3   :  { %2785 = vmatmul.mubr.f32.gmra.mrb[56].mxu1 %v7644_v63  ;;  %6216 = vmatprep.mubr.msk.f32.mxu0 %vm65_vm0, %v2081_v33  ;;  %v6919_v63 = vpack.c.bf16 %v6275_v24, %v6273_v21  ;;  %v6291_v21 = vld [vmem:[%s11589_s1 + $0x370] sm:$0xff] }
 0x1b4   :  { %6250 = vmatprep.mubr.msk.f32.mxu1 %vm65_vm0, %v2081_v33 }
 0x1b6   :  { %2534 = vmatmul.mubr.f32.gmra.mrb[58].mxu0 %v7645_v22 }
 0x1b7   :  { %2791 = vmatmul.mubr.f32.gmra.mrb[58].mxu1 %v7645_v22  ;;  %6217 = vmatprep.mubr.msk.f32.mxu0 %vm65_vm0, %v2083_v30  ;;  %v6278_v22 = vld [vmem:[%s11589_s1 + $0x308] sm:$0xff] }
 0x1b8   :  { %6251 = vmatprep.mubr.msk.f32.mxu1 %vm65_vm0, %v2083_v30 }
 0x1ba   :  { %2540 = vmatmul.mubr.f32.gmra.mrb[60].mxu0 %v7646_v10 }
 0x1bb   :  { %2797 = vmatmul.mubr.f32.gmra.mrb[60].mxu1 %v7646_v10  ;;  %6218 = vmatprep.mubr.msk.f32.mxu0 %vm65_vm0, %v2085_v5 }
 0x1bc   :  { %6252 = vmatprep.mubr.msk.f32.mxu1 %vm65_vm0, %v2085_v5  ;;  %v6280_v5 = vld [vmem:[%s11589_s1 + $0x318] sm:$0xff] }
 0x1bd   :  { %v6921_v14 = vpack.c.bf16 %v6280_v5, %v6278_v22  ;;  %v6294_v5 = vld [vmem:[%s11589_s1 + $0x388] sm:$0xff] }
 0x1be   :  { %2546 = vmatmul.mubr.f32.gmra.mrb[62].mxu0 %v9680_v48 }
 0x1bf   :  { %2803 = vmatmul.mubr.f32.gmra.mrb[62].mxu1 %v9680_v48  ;;  %v6264_v48 = vld [vmem:[%s11589_s1 + $0x298] sm:$0xff] }
 0x1c0   :  { %4002 = vmatprep.mubr.f32.mxu1 %v9288_v34  ;;  %v6258_v34 = vld [vmem:[%s11589_s1 + $0x268] sm:$0xff]  ;;  %v6905_v38 = vpack.c.bf16 %v6264_v48, %v6262_v46  ;;  %v6281_v46 = vld [vmem:[%s11589_s1 + $0x320] sm:$0xff]  ;;  %v6283_v48 = vld [vmem:[%s11589_s1 + $0x330] sm:$0xff] }
 0x1c1   :  { %v6901_v29 = vpack.c.bf16 %v6260_v27, %v6258_v34  ;;  %v6282_v27 = vld [vmem:[%s11589_s1 + $0x328] sm:$0xff] }
 0x1c3   :  { %6902 = vmatprep.subr.bf16.mxu0 %v6901_v29  ;;  %v6284_v29 = vld [vmem:[%s11589_s1 + $0x338] sm:$0xff] }
 0x1c4   :  { %6904 = vmatpush1.bf16.msra.mxu0 %v6903_v42  ;;  %v6925_v42 = vpack.c.bf16 %v6284_v29, %v6282_v27  ;;  %v6293_v27 = vld [vmem:[%s11589_s1 + $0x380] sm:$0xff]  ;;  %v6295_v29 = vld [vmem:[%s11589_s1 + $0x390] sm:$0xff] }
 0x1c5   :  { %6906 = vmatprep.subr.bf16.mxu0 %v6905_v38  ;;  %v6927_v38 = vpack.c.bf16 %v6283_v48, %v6281_v46  ;;  %v6939_v46 = vpack.c.bf16 %v6295_v29, %v6293_v27  ;;  %v6303_v27 = vld [vmem:[%s11589_s1 + $0x3d0] sm:$0xff] }
 0x1c8   :  { %6908 = vmatpush1.bf16.msra.mxu0 %v6907_v16  ;;  %v6286_v16 = vld [vmem:[%s11589_s1 + $0x348] sm:$0xff] }
 0x1c9   :  { %6910 = vmatprep.subr.bf16.mxu0 %v6909_v1  ;;  %v6929_v1 = vpack.c.bf16 %v6288_v51, %v6286_v16  ;;  %v6300_v16 = vld [vmem:[%s11589_s1 + $0x3b8] sm:$0xff] }
 0x1cc   :  { %6912 = vmatpush1.bf16.msra.mxu0 %v6911_v60  ;;  %v6287_v60 = vld [vmem:[%s11589_s1 + $0x350] sm:$0xff] }
 0x1cd   :  { %6914 = vmatprep.subr.bf16.mxu0 %v6913_v2  ;;  %v6931_v6 = vpack.c.bf16 %v6287_v60, %v6285_v52  ;;  %v6297_v60 = vld [vmem:[%s11589_s1 + $0x3a0] sm:$0xff] }
 0x1d0   :  { %6916 = vmatpush1.bf16.msra.mxu0 %v6915_v35 }
 0x1d1   :  { %6918 = vmatprep.subr.bf16.mxu0 %v6917_v15  ;;  %v6289_v15 = vld [vmem:[%s11589_s1 + $0x360] sm:$0xff] }
 0x1d4   :  { %6920 = vmatpush1.bf16.msra.mxu0 %v6919_v63  ;;  %v6935_v63 = vpack.c.bf16 %v6291_v21, %v6289_v15  ;;  %v6302_v15 = vld [vmem:[%s11589_s1 + $0x3c8] sm:$0xff]  ;;  %v6304_v21 = vld [vmem:[%s11589_s1 + $0x3d8] sm:$0xff] }
 0x1d5   :  { %6922 = vmatprep.subr.bf16.mxu0 %v6921_v14  ;;  %v6296_v14 = vld [vmem:[%s11589_s1 + $0x398] sm:$0xff] }
 0x1d8   :  { %6924 = vmatpush1.bf16.msra.mxu0 %v6923_v40  ;;  %v6937_v40 = vpack.c.bf16 %v6296_v14, %v6294_v5  ;;  %v6945_v14 = vpack.c.bf16 %v6304_v21, %v6302_v15  ;;  %v6305_v15 = vld [vmem:[%s11589_s1 + $0x3e0] sm:$0xff]  ;;  %v6307_v21 = vld [vmem:[%s11589_s1 + $0x3f0] sm:$0xff] }
 0x1d9   :  { %6926 = vmatprep.subr.bf16.mxu0 %v6925_v42 }
 0x1dc   :  { %6928 = vmatpush1.bf16.msra.mxu0 %v6927_v38  ;;  %v6298_v38 = vld [vmem:[%s11589_s1 + $0x3a8] sm:$0xff] }
 0x1dd   :  { %6930 = vmatprep.subr.bf16.mxu0 %v6929_v1  ;;  %v6941_v52 = vpack.c.bf16 %v6300_v16, %v6298_v38  ;;  %v6306_v16 = vld [vmem:[%s11589_s1 + $0x3e8] sm:$0xff] }
 0x1e0   :  { %6932 = vmatpush1.bf16.msra.mxu0 %v6931_v6  ;;  %v6299_v6 = vld [vmem:[%s11589_s1 + $0x3b0] sm:$0xff] }
 0x1e1   :  { %6934 = vmatprep.subr.bf16.mxu0 %v6933_v9  ;;  %v6943_v59 = vpack.c.bf16 %v6299_v6, %v6297_v60 }
 0x1e4   :  { %6936 = vmatpush1.bf16.msra.mxu0 %v6935_v63 }
 0x1e5   :  { %6938 = vmatprep.subr.bf16.mxu0 %v6937_v40  ;;  %v6301_v40 = vld [vmem:[%s11589_s1 + $0x3c0] sm:$0xff] }
 0x1e8   :  { %6940 = vmatpush1.bf16.msra.mxu0 %v6939_v46  ;;  %v6947_v46 = vpack.c.bf16 %v6303_v27, %v6301_v40  ;;  %v3035_v40 = vlaneseq  ;;  %v6951_v27 = vpack.c.bf16 %v6307_v21, %v6305_v15  ;;  %v6311_v15 = vld [vmem:[%s11589_s1 + $0x410] sm:$0xff] }
 0x1e9   :  { %6942 = vmatprep.subr.bf16.mxu0 %v6941_v52  ;;  %v6308_v52 = vld [vmem:[%s11589_s1 + $0x3f8] sm:$0xff] }
 0x1ec   :  { %6944 = vmatpush1.bf16.msra.mxu0 %v6943_v59  ;;  %v6949_v59 = vpack.c.bf16 %v6308_v52, %v6306_v16  ;;  %v6310_v16 = vld [vmem:[%s11589_s1 + $0x408] sm:$0xff]  ;;  %v6312_v52 = vld [vmem:[%s11589_s1 + $0x418] sm:$0xff] }
 0x1ed   :  { %6946 = vmatprep.subr.bf16.mxu0 %v6945_v14 }
 0x1f0   :  { %6948 = vmatpush1.bf16.msra.mxu0 %v6947_v46 }
 0x1f1   :  { %6950 = vmatprep.subr.bf16.mxu0 %v6949_v59  ;;  %v6309_v59 = vld [vmem:[%s11589_s1 + $0x400] sm:$0xff] }
 0x1f4   :  { %6952 = vmatpush1.bf16.msra.mxu0 %v6951_v27  ;;  %v3036_v27 = vshrl.u32 %v3035_v40, 7  ;;  %v6315_v40 = vld [vmem:[%s11589_s1 + $0x430] sm:$0xff] }
 0x215   :  { %v9801_v18 = vpop.f32.mrb[0].mxu0 }
 0x216   :  { %v9809_v20 = vpop.f32.mrb[0].mxu1  ;;  %v9811_v36 = vpop.f32.mrb[1].mxu0 }
 0x217   :  { %v9813_v26 = vpop.f32.mrb[1].mxu1 }
 0x219   :  { %v9824_v49 = vpop.f32.mrb[2].mxu0 }
 0x21a   :  { %v9829_v19 = vpop.f32.mrb[2].mxu1  ;;  %v9831_v25 = vpop.f32.mrb[3].mxu0 }
 0x21b   :  { %v9833_v50 = vpop.f32.mrb[3].mxu1 }
 0x21d   :  { %v9835_v32 = vpop.f32.mrb[4].mxu0 }
 0x21e   :  { %v9837_v53 = vpop.f32.mrb[4].mxu1  ;;  %v9839_v37 = vpop.f32.mrb[5].mxu0 }
 0x21f   :  { %v9841_v11 = vpop.f32.mrb[5].mxu1 }
 0x221   :  { %v9852_v61 = vpop.f32.mrb[6].mxu0 }
 0x222   :  { %v9857_v7 = vpop.f32.mrb[6].mxu1  ;;  %v9859_v13 = vpop.f32.mrb[7].mxu0 }
 0x223   :  { %v9861_v12 = vpop.f32.mrb[7].mxu1 }
 0x225   :  { %v9863_v28 = vpop.f32.mrb[8].mxu0 }
 0x226   :  { %v9871_v62 = vpop.f32.mrb[8].mxu1  ;;  %v9873_v43 = vpop.f32.mrb[9].mxu0 }
 0x227   :  { %v9881_v3 = vpop.f32.mrb[9].mxu1 }
 0x229   :  { %v9883_v8 = vpop.f32.mrb[10].mxu0 }
 0x22a   :  { %v9891_v39 = vpop.f32.mrb[10].mxu1  ;;  %v9893_v0 = vpop.f32.mrb[11].mxu0 }
 0x22b   :  { %v9901_v33 = vpop.f32.mrb[11].mxu1 }
 0x22d   :  { %v9903_v30 = vpop.f32.mrb[12].mxu0 }
 0x22e   :  { %v9911_v10 = vpop.f32.mrb[12].mxu1  ;;  %v9913_v23 = vpop.f32.mrb[13].mxu0 }
 0x22f   :  { %v9921_v41 = vpop.f32.mrb[13].mxu1 }
 0x231   :  { %v9923_v34 = vpop.f32.mrb[14].mxu0 }
 0x232   :  { %v9931_v31 = vpop.f32.mrb[14].mxu1  ;;  %v9933_v57 = vpop.f32.mrb[15].mxu0 }
 0x233   :  { %v9941_v58 = vpop.f32.mrb[15].mxu1 }
 0x235   :  { %v9943_v17 = vpop.f32.mrb[16].mxu0 }
 0x236   :  { %v9951_v55 = vpop.f32.mrb[16].mxu1  ;;  %v9953_v56 = vpop.f32.mrb[17].mxu0 }
 0x237   :  { %v9961_v44 = vpop.f32.mrb[17].mxu1 }
 0x239   :  { %v9963_v2 = vpop.f32.mrb[18].mxu0 }
 0x23a   :  { %v9971_v35 = vpop.f32.mrb[18].mxu1  ;;  %v9973_v54 = vpop.f32.mrb[19].mxu0 }
 0x23b   :  { %v9981_v24 = vpop.f32.mrb[19].mxu1 }
 0x23d   :  { %v9983_v22 = vpop.f32.mrb[20].mxu0 }
 0x23e   :  { %v9991_v4 = vpop.f32.mrb[20].mxu1  ;;  %v9993_v47 = vpop.f32.mrb[21].mxu0 }
 0x23f   :  { %v10001_v42 = vpop.f32.mrb[21].mxu1 }
 0x241   :  { %v10003_v48 = vpop.f32.mrb[22].mxu0 }
 0x242   :  { %v10011_v51 = vpop.f32.mrb[22].mxu1  ;;  %v10013_v1 = vpop.f32.mrb[23].mxu0 }
 0x243   :  { %11590 = vst [vmem:[#allocation20_spill] sm:$0xff] %v10013_v1  ;;  %v10021_v45 = vpop.f32.mrb[23].mxu1 }
 0x244   :  { %11591 = vst [vmem:[#allocation21_spill] sm:$0xff] %v10021_v45 }
 0x245   :  { %v10023_v9 = vpop.f32.mrb[24].mxu0 }
 0x246   :  { %11592 = vst [vmem:[#allocation22_spill] sm:$0xff] %v10023_v9  ;;  %v10031_v63 = vpop.f32.mrb[24].mxu1  ;;  %v10033_v5 = vpop.f32.mrb[25].mxu0 }
 0x247   :  { %11593 = vst [vmem:[#allocation23_spill] sm:$0xff] %v10031_v63  ;;  %11594 = vst [vmem:[#allocation24_spill] sm:$0xff] %v10033_v5  ;;  %v10041_v29 = vpop.f32.mrb[25].mxu1 }
 0x248   :  { %11595 = vst [vmem:[#allocation25_spill] sm:$0xff] %v10041_v29 }
 0x249   :  { %v10043_v38 = vpop.f32.mrb[26].mxu0 }
 0x24a   :  { %11596 = vst [vmem:[#allocation26_spill] sm:$0xff] %v10043_v38  ;;  %v10051_v60 = vpop.f32.mrb[26].mxu1  ;;  %v10053_v6 = vpop.f32.mrb[27].mxu0  ;;  %v6953_v38 = vpack.c.bf16 %v6312_v52, %v6310_v16  ;;  %v6314_v16 = vld [vmem:[%s11589_s1 + $0x428] sm:$0xff]  ;;  %v6316_v52 = vld [vmem:[%s11589_s1 + $0x438] sm:$0xff] }
 0x24b   :  { %11597 = vst [vmem:[#allocation27_spill] sm:$0xff] %v10051_v60  ;;  %11598 = vst [vmem:[#allocation28_spill] sm:$0xff] %v10053_v6  ;;  %v10061_v14 = vpop.f32.mrb[27].mxu1  ;;  %v6957_v29 = vpack.c.bf16 %v6316_v52, %v6314_v16  ;;  %v3041_v52 = vsub.s32 1, %v3036_v27 }
 0x24c   :  { %11599 = vst [vmem:[#allocation29_spill] sm:$0xff] %v10061_v14  ;;  %6954 = vmatprep.subr.bf16.mxu0 %v6953_v38  ;;  %v6313_v38 = vld [vmem:[%s11589_s1 + $0x420] sm:$0xff] }
 0x24d   :  { %v10063_v46 = vpop.f32.mrb[28].mxu0 }
 0x24e   :  { %11600 = vst [vmem:[#allocation30_spill] sm:$0xff] %v10063_v46  ;;  %v10071_v6 = vpop.f32.mrb[28].mxu1  ;;  %v10073_v60 = vpop.f32.mrb[29].mxu0  ;;  %v6955_v46 = vpack.c.bf16 %v6311_v15, %v6309_v59  ;;  %v3037_v59 = vsub.s32 0, %v3036_v27  ;;  %v6959_v15 = vpack.c.bf16 %v6315_v40, %v6313_v38  ;;  %v3496_v38 = vld [vmem:[%s11589_s1 + $0x8] sm:$0xff]  ;;  %v3498_v40 = vld [vmem:[%s11589_s1 + $0x18] sm:$0xff] }
 0x24f   :  { %11601 = vst [vmem:[#allocation31_spill] sm:$0xff] %v10071_v6  ;;  %11602 = vst [vmem:[#allocation32_spill] sm:$0xff] %v10073_v60  ;;  %v10081_v21 = vpop.f32.mrb[29].mxu1  ;;  %v6969_v27 = vpack.c.bf16 %v3498_v40, %v3496_v38  ;;  %v3500_v38 = vld [vmem:[%s11589_s1 + $0x28] sm:$0xff] }
 0x250   :  { %11603 = vst [vmem:[#allocation33_spill] sm:$0xff] %v10081_v21  ;;  %6956 = vmatpush1.bf16.msra.mxu0 %v6955_v46 }
 0x251   :  { %v10083_v14 = vpop.f32.mrb[30].mxu0  ;;  %6958 = vmatprep.subr.bf16.mxu0 %v6957_v29  ;;  %6970 = vmatprep.subr.bf16.mxu1 %v6969_v27 }
 0x252   :  { %11604 = vst [vmem:[#allocation34_spill] sm:$0xff] %v10083_v14  ;;  %v10091_v60 = vpop.f32.mrb[30].mxu1  ;;  %v10093_v6 = vpop.f32.mrb[31].mxu0  ;;  %v10106_v14 = vld [vmem:[#allocation2] sm:$0xff] }
 0x253   :  { %11605 = vst [vmem:[#allocation35_spill] sm:$0xff] %v10091_v60  ;;  %11606 = vst [vmem:[#allocation36_spill] sm:$0xff] %v10093_v6  ;;  %v10101_v46 = vpop.f32.mrb[31].mxu1  ;;  %v3033_v60 = vld [vmem:[%s11608_s2] sm:$0x3] }
 0x254   :  { %11607 = vst [vmem:[#allocation37_spill] sm:$0xff] %v10101_v46  ;;  %11609 = vst [vmem:[#allocation38_spill] sm:$0xff] %v10106_v14  ;;  %6960 = vmatpush1.bf16.msra.mxu0 %v6959_v15  ;;  %v10119_v63 = vrot.slane %v3033_v60, %v3037_v59  ;;  %v3497_v15 = vld [vmem:[%s11589_s1 + $0x10] sm:$0xff] }
 0x255   :  { %3353 = vst.msk [vmem:[#allocation6 + $0x10] sm:$0xff] %vm3304_vm2, %v10106_v14  ;;  %v2457_v16 = vpop.f32.mrb[32].mxu0 }
 0x256   :  { %v2937_v6 = vmax.f32 %v9801_v18, %v2457_v16  ;;  %v2714_v21 = vpop.f32.mrb[32].mxu1  ;;  %v2459_v46 = vpop.f32.mrb[33].mxu0  ;;  %v3495_v18 = vld [vmem:[%s11589_s1] sm:$0xff] }
 0x257   :  { %v2939_v5 = vmax.f32 %v9809_v20, %v2714_v21  ;;  %v2938_v14 = vmax.f32 %v9811_v36, %v2459_v46  ;;  %v2716_v29 = vpop.f32.mrb[33].mxu1  ;;  %v6971_v9 = vpack.c.bf16 %v3497_v15, %v3495_v18  ;;  %v10128_v20 = vrot.slane %v3033_v60, %v3041_v52 }
 0x258   :  { %v2940_v16 = vmax.f32 %v9813_v26, %v2716_v29  ;;  %v3502_v26 = vld [vmem:[%s11589_s1 + $0x38] sm:$0xff] }
 0x259   :  { %v3001_v45 = vmax.f32 %v2937_v6, %v2939_v5  ;;  %v2463_v1 = vpop.f32.mrb[34].mxu0  ;;  %6972 = vmatpush1.bf16.msra.mxu1 %v6971_v9  ;;  %v6973_v52 = vpack.c.bf16 %v3502_v26, %v3500_v38  ;;  %v3503_v26 = vld [vmem:[%s11589_s1 + $0x40] sm:$0xff] }
 0x25a   :  { %v3002_v36 = vmax.f32 %v2938_v14, %v2940_v16  ;;  %v2941_v21 = vmax.f32 %v9824_v49, %v2463_v1  ;;  %v2720_v46 = vpop.f32.mrb[34].mxu1  ;;  %v2465_v59 = vpop.f32.mrb[35].mxu0  ;;  %v3499_v49 = vld [vmem:[%s11589_s1 + $0x20] sm:$0xff]  ;;  %v3501_v1 = vld [vmem:[%s11589_s1 + $0x30] sm:$0xff] }
 0x25b   :  { %v2943_v5 = vmax.f32 %v9829_v19, %v2720_v46  ;;  %v2942_v60 = vmax.f32 %v9831_v25, %v2465_v59  ;;  %v2722_v6 = vpop.f32.mrb[35].mxu1  ;;  %v3045_v14 = vadd.f32 %v10119_v63, %v3001_v45  ;;  %v6975_v40 = vpack.c.bf16 %v3501_v1, %v3499_v49  ;;  %6974 = vmatprep.subr.bf16.mxu1 %v6973_v52  ;;  %v3504_v46 = vld [vmem:[%s11589_s1 + $0x48] sm:$0xff] }
 0x25c   :  { %v2944_v9 = vmax.f32 %v9833_v50, %v2722_v6  ;;  %v3046_v25 = vadd.f32 %v10128_v20, %v3002_v36  ;;  %v3506_v50 = vld [vmem:[%s11589_s1 + $0x58] sm:$0xff] }
 0x25d   :  { %v3003_v29 = vmax.f32 %v2941_v21, %v2943_v5  ;;  %v2469_v27 = vpop.f32.mrb[36].mxu0  ;;  %v3077_v19 = vmax.f32 %v3045_v14, 0.0  ;;  %6976 = vmatpush1.bf16.msra.mxu1 %v6975_v40  ;;  %v6977_v38 = vpack.c.bf16 %v3506_v50, %v3504_v46  ;;  %v3505_v5 = vld [vmem:[%s11589_s1 + $0x50] sm:$0xff] }
 0x25e   :  { %v3004_v18 = vmax.f32 %v2942_v60, %v2944_v9  ;;  %v2945_v45 = vmax.f32 %v9835_v32, %v2469_v27  ;;  %v2726_v15 = vpop.f32.mrb[36].mxu1  ;;  %v2471_v16 = vpop.f32.mrb[37].mxu0  ;;  %v6979_v6 = vpack.c.bf16 %v3505_v5, %v3503_v26  ;;  %v3078_v52 = vmax.f32 %v3046_v25, 0.0 }
 0x25f   :  { %v2947_v21 = vmax.f32 %v9837_v53, %v2726_v15  ;;  %v2728_v59 = vpop.f32.mrb[37].mxu1  ;;  %3141 = vrot.lane.b32.xlu0 %v3077_v19, %s7777_s29  ;;  %v2946_v36 = vmax.f32 %v9839_v37, %v2471_v16  ;;  %v10159_v32 = vadd.f32 %v10119_v63, %v3003_v29  ;;  %6978 = vmatprep.subr.bf16.mxu1 %v6977_v38  ;;  %v3510_v29 = vld [vmem:[%s11589_s1 + $0x78] sm:$0xff] }
 0x260   :  { %v2948_v53 = vmax.f32 %v9841_v11, %v2728_v59  ;;  %v10169_v60 = vadd.f32 %v10128_v20, %v3004_v18  ;;  %v3508_v11 = vld [vmem:[%s11589_s1 + $0x68] sm:$0xff]  ;;  %v3514_v38 = vld [vmem:[%s11589_s1 + $0x98] sm:$0xff] }
 0x261   :  { %v10171_v14 = vmax.f32 %v2945_v45, %v2947_v21  ;;  %v2475_v37 = vpop.f32.mrb[38].mxu0  ;;  %6980 = vmatpush1.bf16.msra.mxu1 %v6979_v6  ;;  %v6981_v18 = vpack.c.bf16 %v3510_v29, %v3508_v11  ;;  %v3509_v45 = vld [vmem:[%s11589_s1 + $0x70] sm:$0xff]  ;;  %v3511_v6 = vld [vmem:[%s11589_s1 + $0x80] sm:$0xff] }
 0x262   :  { %v10173_v49 = vmax.f32 %v2946_v36, %v2948_v53  ;;  %v2949_v1 = vmax.f32 %v9852_v61, %v2475_v37  ;;  %v2732_v9 = vpop.f32.mrb[38].mxu1  ;;  %v2477_v40 = vpop.f32.mrb[39].mxu0  ;;  %v3507_v61 = vld [vmem:[%s11589_s1 + $0x60] sm:$0xff]  ;;  %v3512_v36 = vld [vmem:[%s11589_s1 + $0x88] sm:$0xff]  ;;  %v3513_v37 = vld [vmem:[%s11589_s1 + $0x90] sm:$0xff] }
 0x263   :  { %v2951_v27 = vmax.f32 %v9857_v7, %v2732_v9  ;;  %v2734_v19 = vpop.f32.mrb[39].mxu1  ;;  %3143 = vrot.lane.b32.xlu0 %v3078_v52, %s7777_s29  ;;  %v2950_v25 = vmax.f32 %v9859_v13, %v2477_v40  ;;  %v6983_v16 = vpack.c.bf16 %v3509_v45, %v3507_v61  ;;  %6982 = vmatprep.subr.bf16.mxu1 %v6981_v18 }
 0x264   :  { %v2952_v15 = vmax.f32 %v9861_v12, %v2734_v19  ;;  %v3516_v19 = vld [vmem:[%s11589_s1 + $0xa8] sm:$0xff] }
 0x265   :  { %v3007_v46 = vmax.f32 %v2949_v1, %v2951_v27  ;;  %v2481_v50 = vpop.f32.mrb[40].mxu0  ;;  %6984 = vmatpush1.bf16.msra.mxu1 %v6983_v16  ;;  %v3517_v16 = vld [vmem:[%s11589_s1 + $0xb0] sm:$0xff] }
 0x266   :  { %v3008_v7 = vmax.f32 %v2950_v25, %v2952_v15  ;;  %v2953_v21 = vmax.f32 %v9863_v28, %v2481_v50  ;;  %v2738_v59 = vpop.f32.mrb[40].mxu1  ;;  %v2483_v13 = vpop.f32.mrb[41].mxu0  ;;  %v6985_v28 = vpack.c.bf16 %v3514_v38, %v3512_v36 }
 0x267   :  { %v2955_v12 = vmax.f32 %v9871_v62, %v2738_v59  ;;  %v2954_v26 = vmax.f32 %v9873_v43, %v2483_v13  ;;  %v2740_v5 = vpop.f32.mrb[41].mxu1  ;;  %v10202_v53 = vadd.f32 %v10119_v63, %v3007_v46  ;;  %v6987_v62 = vpack.c.bf16 %v3513_v37, %v3511_v6  ;;  %v3519_v37 = vld [vmem:[%s11589_s1 + $0xc0] sm:$0xff] }
 0x268   :  { %v2956_v52 = vmax.f32 %v9881_v3, %v2740_v5  ;;  %v10212_v1 = vadd.f32 %v10128_v20, %v3008_v7  ;;  %6986 = vmatprep.subr.bf16.mxu1 %v6985_v28  ;;  %v3518_v3 = vld [vmem:[%s11589_s1 + $0xb8] sm:$0xff] }
 0x269   :  { %v3009_v43 = vmax.f32 %v2953_v21, %v2955_v12  ;;  %v2487_v9 = vpop.f32.mrb[42].mxu0  ;;  %6988 = vmatpush1.bf16.msra.mxu1 %v6987_v62  ;;  %v6989_v15 = vpack.c.bf16 %v3518_v3, %v3516_v19  ;;  %v3520_v12 = vld [vmem:[%s11589_s1 + $0xc8] sm:$0xff]  ;;  %v3526_v3 = vld [vmem:[%s11589_s1 + $0xf8] sm:$0xff] }
 0x26a   :  { %v3010_v40 = vmax.f32 %v2954_v26, %v2956_v52  ;;  %v2957_v11 = vmax.f32 %v9883_v8, %v2487_v9  ;;  %v2744_v29 = vpop.f32.mrb[42].mxu1  ;;  %v2489_v27 = vpop.f32.mrb[43].mxu0  ;;  %v3515_v8 = vld [vmem:[%s11589_s1 + $0xa0] sm:$0xff]  ;;  %v3521_v52 = vld [vmem:[%s11589_s1 + $0xd0] sm:$0xff] }
 0x26b   :  { %v2959_v25 = vmax.f32 %v9891_v39, %v2744_v29  ;;  %v2958_v18 = vmax.f32 %v9893_v0, %v2489_v27  ;;  %v2746_v61 = vpop.f32.mrb[43].mxu1  ;;  %v3053_v45 = vadd.f32 %v10119_v63, %v3009_v43  ;;  %v6991_v50 = vpack.c.bf16 %v3517_v16, %v3515_v8  ;;  %6990 = vmatprep.subr.bf16.mxu1 %v6989_v15  ;;  %v3525_v15 = vld [vmem:[%s11589_s1 + $0xf0] sm:$0xff] }
 0x26c   :  { %v2960_v46 = vmax.f32 %v9901_v33, %v2746_v61  ;;  %v3054_v0 = vadd.f32 %v10128_v20, %v3010_v40  ;;  %v3522_v33 = vld [vmem:[%s11589_s1 + $0xd8] sm:$0xff]  ;;  %v6995_v43 = vpack.c.bf16 %v3521_v52, %v3519_v37 }
 0x26d   :  { %v3011_v7 = vmax.f32 %v2957_v11, %v2959_v25  ;;  %v2493_v21 = vpop.f32.mrb[44].mxu0  ;;  %v3085_v39 = vmax.f32 %v3053_v45, 0.0  ;;  %6992 = vmatpush1.bf16.msra.mxu1 %v6991_v50  ;;  %v6993_v6 = vpack.c.bf16 %v3522_v33, %v3520_v12  ;;  %v3529_v12 = vld [vmem:[%s11589_s1 + $0x110] sm:$0xff] }
 0x26e   :  { %v3012_v59 = vmax.f32 %v2958_v18, %v2960_v46  ;;  %v2961_v13 = vmax.f32 %v9903_v30, %v2493_v21  ;;  %v2750_v36 = vpop.f32.mrb[44].mxu1  ;;  %v2495_v38 = vpop.f32.mrb[45].mxu0  ;;  %v3086_v40 = vmax.f32 %v3054_v0, 0.0  ;;  %v3530_v0 = vld [vmem:[%s11589_s1 + $0x118] sm:$0xff] }
 0x26f   :  { %v2963_v26 = vmax.f32 %v9911_v10, %v2750_v36  ;;  %v2752_v5 = vpop.f32.mrb[45].mxu1  ;;  %3157 = vrot.lane.b32.xlu1 %v3085_v39, %s7777_s29  ;;  %v2962_v28 = vmax.f32 %v9913_v23, %v2495_v38  ;;  %v10243_v30 = vadd.f32 %v10119_v63, %v3011_v7  ;;  %6994 = vmatprep.subr.bf16.mxu1 %v6993_v6  ;;  %v3528_v39 = vld [vmem:[%s11589_s1 + $0x108] sm:$0xff]  ;;  %v3527_v38 = vld [vmem:[%s11589_s1 + $0x100] sm:$0xff] }
 0x270   :  { %v2964_v62 = vmax.f32 %v9921_v41, %v2752_v5  ;;  %v10253_v10 = vadd.f32 %v10128_v20, %v3012_v59  ;;  %v3524_v41 = vld [vmem:[%s11589_s1 + $0xe8] sm:$0xff] }
 0x271   :  { %v10255_v9 = vmax.f32 %v2961_v13, %v2963_v26  ;;  %v2499_v23 = vpop.f32.mrb[46].mxu0  ;;  %6996 = vmatpush1.bf16.msra.mxu1 %v6995_v43  ;;  %v6997_v45 = vpack.c.bf16 %v3526_v3, %v3524_v41 }
 0x272   :  { %v10257_v11 = vmax.f32 %v2962_v28, %v2964_v62  ;;  %v2965_v29 = vmax.f32 %v9923_v34, %v2499_v23  ;;  %v2756_v27 = vpop.f32.mrb[46].mxu1  ;;  %v2501_v19 = vpop.f32.mrb[47].mxu0  ;;  %v3523_v34 = vld [vmem:[%s11589_s1 + $0xe0] sm:$0xff]  ;;  %v3532_v62 = vld [vmem:[%s11589_s1 + $0x128] sm:$0xff] }
 0x273   :  { %v2967_v25 = vmax.f32 %v9931_v31, %v2756_v27  ;;  %v2758_v18 = vpop.f32.mrb[47].mxu1  ;;  %3159 = vrot.lane.b32.xlu1 %v3086_v40, %s7777_s29  ;;  %v2966_v61 = vmax.f32 %v9933_v57, %v2501_v19  ;;  %v6999_v16 = vpack.c.bf16 %v3525_v15, %v3523_v34  ;;  %6998 = vmatprep.subr.bf16.mxu1 %v6997_v45  ;;  %v3533_v19 = vld [vmem:[%s11589_s1 + $0x130] sm:$0xff] }
 0x274   :  { %v2968_v8 = vmax.f32 %v9941_v58, %v2758_v18 }
 0x275   :  { %v3015_v46 = vmax.f32 %v2965_v29, %v2967_v25  ;;  %v2505_v50 = vpop.f32.mrb[48].mxu0  ;;  %7000 = vmatpush1.bf16.msra.mxu1 %v6999_v16  ;;  %v3536_v16 = vld [vmem:[%s11589_s1 + $0x148] sm:$0xff] }
 0x276   :  { %v3016_v31 = vmax.f32 %v2966_v61, %v2968_v8  ;;  %v2969_v7 = vmax.f32 %v9943_v17, %v2505_v50  ;;  %v2762_v21 = vpop.f32.mrb[48].mxu1  ;;  %v2507_v57 = vpop.f32.mrb[49].mxu0  ;;  %v7001_v17 = vpack.c.bf16 %v3530_v0, %v3528_v39 }
 0x277   :  { %v2971_v58 = vmax.f32 %v9951_v55, %v2762_v21  ;;  %v2970_v59 = vmax.f32 %v9953_v56, %v2507_v57  ;;  %v2764_v13 = vpop.f32.mrb[49].mxu1  ;;  %v10286_v36 = vadd.f32 %v10119_v63, %v3015_v46  ;;  %v7003_v55 = vpack.c.bf16 %v3529_v12, %v3527_v38  ;;  %v3535_v21 = vld [vmem:[%s11589_s1 + $0x140] sm:$0xff]  ;;  %v3537_v57 = vld [vmem:[%s11589_s1 + $0x150] sm:$0xff]  ;;  %v3542_v12 = vld [vmem:[%s11589_s1 + $0x178] sm:$0xff] }
 0x278   :  { %v2972_v33 = vmax.f32 %v9961_v44, %v2764_v13  ;;  %v10296_v26 = vadd.f32 %v10128_v20, %v3016_v31  ;;  %7002 = vmatprep.subr.bf16.mxu1 %v7001_v17  ;;  %v3534_v44 = vld [vmem:[%s11589_s1 + $0x138] sm:$0xff] }
 0x279   :  { %v3017_v56 = vmax.f32 %v2969_v7, %v2971_v58  ;;  %v2511_v5 = vpop.f32.mrb[50].mxu0  ;;  %7004 = vmatpush1.bf16.msra.mxu1 %v7003_v55  ;;  %v7005_v27 = vpack.c.bf16 %v3534_v44, %v3532_v62  ;;  %v11610_v55 = vld [vmem:[#allocation20_spill] sm:$0xff] }
 0x27a   :  { %v3018_v28 = vmax.f32 %v2970_v59, %v2972_v33  ;;  %v2973_v6 = vmax.f32 %v9963_v2, %v2511_v5  ;;  %v2768_v37 = vpop.f32.mrb[50].mxu1  ;;  %v2513_v52 = vpop.f32.mrb[51].mxu0  ;;  %v3531_v2 = vld [vmem:[%s11589_s1 + $0x120] sm:$0xff] }
 0x27b   :  { %v2975_v43 = vmax.f32 %v9971_v35, %v2768_v37  ;;  %v2974_v23 = vmax.f32 %v9973_v54, %v2513_v52  ;;  %v2770_v40 = vpop.f32.mrb[51].mxu1  ;;  %v3061_v29 = vadd.f32 %v10119_v63, %v3017_v56  ;;  %v7007_v25 = vpack.c.bf16 %v3533_v19, %v3531_v2  ;;  %7006 = vmatprep.subr.bf16.mxu1 %v7005_v27  ;;  %v11611_v37 = vld [vmem:[#allocation21_spill] sm:$0xff]  ;;  %v3546_v19 = vld [vmem:[%s11589_s1 + $0x198] sm:$0xff] }
 0x27c   :  { %v2976_v41 = vmax.f32 %v9981_v24, %v2770_v40  ;;  %v3062_v3 = vadd.f32 %v10128_v20, %v3018_v28  ;;  %v3538_v24 = vld [vmem:[%s11589_s1 + $0x158] sm:$0xff]  ;;  %v3544_v2 = vld [vmem:[%s11589_s1 + $0x188] sm:$0xff] }
 0x27d   :  { %v3019_v35 = vmax.f32 %v2973_v6, %v2975_v43  ;;  %v2517_v18 = vpop.f32.mrb[52].mxu0  ;;  %v3093_v54 = vmax.f32 %v3061_v29, 0.0  ;;  %7008 = vmatpush1.bf16.msra.mxu1 %v7007_v25  ;;  %v7009_v7 = vpack.c.bf16 %v3538_v24, %v3536_v16  ;;  %v3541_v6 = vld [vmem:[%s11589_s1 + $0x170] sm:$0xff]  ;;  %v11614_v25 = vld [vmem:[#allocation24_spill] sm:$0xff] }
 0x27e   :  { %v3020_v61 = vmax.f32 %v2974_v23, %v2976_v41  ;;  %v2977_v45 = vmax.f32 %v9983_v22, %v2517_v18  ;;  %v2774_v34 = vpop.f32.mrb[52].mxu1  ;;  %v2519_v15 = vpop.f32.mrb[53].mxu0  ;;  %v3094_v8 = vmax.f32 %v3062_v3, 0.0  ;;  %v11613_v41 = vld [vmem:[#allocation23_spill] sm:$0xff] }
 0x27f   :  { %v2979_v46 = vmax.f32 %v9991_v4, %v2774_v34  ;;  %v2776_v50 = vpop.f32.mrb[53].mxu1  ;;  %3173 = vrot.lane.b32.xlu0 %v3093_v54, %s7777_s29  ;;  %v2978_v31 = vmax.f32 %v9993_v47, %v2519_v15  ;;  %v10327_v22 = vadd.f32 %v10119_v63, %v3019_v35  ;;  %v7011_v47 = vpack.c.bf16 %v3537_v57, %v3535_v21  ;;  %v3545_v34 = vld [vmem:[%s11589_s1 + $0x190] sm:$0xff] }
 0x280   :  { %v2980_v39 = vmax.f32 %v10001_v42, %v2776_v50  ;;  %3175 = vrot.lane.b32.xlu1 %v3094_v8, %s7777_s29  ;;  %v10338_v4 = vadd.f32 %v10128_v20, %v3020_v61  ;;  %7010 = vmatprep.subr.bf16.mxu1 %v7009_v7  ;;  %v3540_v42 = vld [vmem:[%s11589_s1 + $0x168] sm:$0xff]  ;;  %v7017_v61 = vpack.c.bf16 %v3546_v19, %v3544_v2  ;;  %v11616_v7 = vld [vmem:[#allocation26_spill] sm:$0xff] }
 0x281   :  { %v10340_v0 = vmax.f32 %v2977_v45, %v2979_v46  ;;  %v2523_v58 = vpop.f32.mrb[54].mxu0  ;;  %7012 = vmatpush1.bf16.msra.mxu1 %v7011_v47  ;;  %v7013_v28 = vpack.c.bf16 %v3542_v12, %v3540_v42  ;;  %v3543_v45 = vld [vmem:[%s11589_s1 + $0x180] sm:$0xff]  ;;  %v11615_v15 = vld [vmem:[#allocation25_spill] sm:$0xff]  ;;  %v3050_v19 = vadd.f32 %v10128_v20, %v10173_v49 }
 0x282   :  { %v10342_v59 = vmax.f32 %v2978_v31, %v2980_v39  ;;  %v2981_v13 = vmax.f32 %v10003_v48, %v2523_v58  ;;  %v2780_v17 = vpop.f32.mrb[54].mxu1  ;;  %v2525_v38 = vpop.f32.mrb[55].mxu0  ;;  %v3539_v48 = vld [vmem:[%s11589_s1 + $0x160] sm:$0xff]  ;;  %v7019_v24 = vpack.c.bf16 %v3545_v34, %v3543_v45  ;;  %v3548_v47 = vld [vmem:[%s11589_s1 + $0x1a8] sm:$0xff]  ;;  %v3550_v58 = vld [vmem:[%s11589_s1 + $0x1b8] sm:$0xff] }
 0x283   :  { %v2983_v33 = vmax.f32 %v10011_v51, %v2780_v17  ;;  %v2982_v56 = vmax.f32 %v11610_v55, %v2525_v38  ;;  %v2782_v5 = vpop.f32.mrb[55].mxu1  ;;  %v7015_v62 = vpack.c.bf16 %v3541_v6, %v3539_v48  ;;  %7014 = vmatprep.subr.bf16.mxu1 %v7013_v28  ;;  %v11612_v51 = vld [vmem:[#allocation22_spill] sm:$0xff]  ;;  %v11618_v38 = vld [vmem:[#allocation28_spill] sm:$0xff]  ;;  %v7021_v55 = vpack.c.bf16 %v3550_v58, %v3548_v47  ;;  %v11619_v28 = vld [vmem:[#allocation29_spill] sm:$0xff] }
 0x284   :  { %v2984_v52 = vmax.f32 %v11611_v37, %v2782_v5  ;;  %v3549_v5 = vld [vmem:[%s11589_s1 + $0x1b0] sm:$0xff] }
 0x285   :  { %v3023_v44 = vmax.f32 %v2981_v13, %v2983_v33  ;;  %v2529_v43 = vpop.f32.mrb[56].mxu0  ;;  %7016 = vmatpush1.bf16.msra.mxu1 %v7015_v62  ;;  %v11617_v13 = vld [vmem:[#allocation27_spill] sm:$0xff] }
 0x286   :  { %v3024_v23 = vmax.f32 %v2982_v56, %v2984_v52  ;;  %v2985_v40 = vmax.f32 %v11612_v51, %v2529_v43  ;;  %v2786_v29 = vpop.f32.mrb[56].mxu1  ;;  %v2531_v27 = vpop.f32.mrb[57].mxu0  ;;  %7018 = vmatprep.subr.bf16.mxu1 %v7017_v61  ;;  %v3547_v56 = vld [vmem:[%s11589_s1 + $0x1a0] sm:$0xff]  ;;  %v3049_v43 = vadd.f32 %v10119_v63, %v10171_v14  ;;  %v11620_v51 = vld [vmem:[#allocation30_spill] sm:$0xff]  ;;  %v3552_v14 = vld [vmem:[%s11589_s1 + $0x1c8] sm:$0xff] }
 0x287   :  { %v2987_v3 = vmax.f32 %v11613_v41, %v2786_v29  ;;  %v2986_v35 = vmax.f32 %v11614_v25, %v2531_v27  ;;  %v2788_v18 = vpop.f32.mrb[57].mxu1  ;;  %v10370_v54 = vadd.f32 %v10119_v63, %v3023_v44  ;;  %v7023_v37 = vpack.c.bf16 %v3549_v5, %v3547_v56  ;;  %v6318_v41 = vld [vmem:[%s11589_s1 + $0x448] sm:$0xff]  ;;  %v11621_v25 = vld [vmem:[#allocation31_spill] sm:$0xff] }
 0x288   :  { %v2988_v8 = vmax.f32 %v11615_v15, %v2788_v18  ;;  %v10380_v16 = vadd.f32 %v10128_v20, %v3024_v23  ;;  %v11622_v61 = vld [vmem:[#allocation32_spill] sm:$0xff]  ;;  %v3554_v15 = vld [vmem:[%s11589_s1 + $0x1d8] sm:$0xff]  ;;  %v3081_v47 = vmax.f32 %v3049_v43, 0.0 }
 0x289   :  { %v3025_v46 = vmax.f32 %v2985_v40, %v2987_v3  ;;  %v2535_v50 = vpop.f32.mrb[58].mxu0  ;;  %7020 = vmatpush1.bf16.msra.mxu1 %v7019_v24  ;;  %v6320_v3 = vld [vmem:[%s11589_s1 + $0x458] sm:$0xff]  ;;  %v3555_v43 = vld [vmem:[%s11589_s1 + $0x1e0] sm:$0xff] }
 0x28a   :  { %v3026_v31 = vmax.f32 %v2986_v35, %v2988_v8  ;;  %v2989_v21 = vmax.f32 %v11616_v7, %v2535_v50  ;;  %v2792_v57 = vpop.f32.mrb[58].mxu1  ;;  %v2537_v39 = vpop.f32.mrb[59].mxu0  ;;  %7022 = vmatprep.subr.bf16.mxu1 %v7021_v55  ;;  %v6961_v34 = vpack.c.bf16 %v6320_v3, %v6318_v41  ;;  %v11623_v8 = vld [vmem:[#allocation33_spill] sm:$0xff]  ;;  %v3551_v7 = vld [vmem:[%s11589_s1 + $0x1c0] sm:$0xff]  ;;  %v3066_v41 = vadd.f32 %v10128_v20, %v10342_v59 }
 0x28b   :  { %v2991_v17 = vmax.f32 %v11617_v13, %v2792_v57  ;;  %v2990_v42 = vmax.f32 %v11618_v38, %v2537_v39  ;;  %v2794_v12 = vpop.f32.mrb[59].mxu1  ;;  %v3069_v33 = vadd.f32 %v10119_v63, %v3025_v46  ;;  %v3057_v46 = vadd.f32 %v10119_v63, %v10255_v9  ;;  %v3556_v55 = vld [vmem:[%s11589_s1 + $0x1e8] sm:$0xff]  ;;  %v11625_v56 = vld [vmem:[#allocation35_spill] sm:$0xff] }
 0x28c   :  { %v2992_v48 = vmax.f32 %v11619_v28, %v2794_v12  ;;  %v3070_v6 = vadd.f32 %v10128_v20, %v3026_v31  ;;  %v7025_v31 = vpack.c.bf16 %v3554_v15, %v3552_v14  ;;  %6962 = vmatprep.subr.bf16.mxu0 %v6961_v34  ;;  %v3082_v12 = vmax.f32 %v3050_v19, 0.0 }
 0x28d   :  { %v3027_v52 = vmax.f32 %v2989_v21, %v2991_v17  ;;  %v2541_v62 = vpop.f32.mrb[60].mxu0  ;;  %v3101_v44 = vmax.f32 %v3069_v33, 0.0  ;;  %7024 = vmatpush1.bf16.msra.mxu1 %v7023_v37  ;;  %v3553_v21 = vld [vmem:[%s11589_s1 + $0x1d0] sm:$0xff]  ;;  %v3058_v33 = vadd.f32 %v10128_v20, %v10257_v11  ;;  %v3080_v34 = vmax.f32 %v10169_v60, 0.0 }
 0x28e   :  { %v3028_v23 = vmax.f32 %v2990_v42, %v2992_v48  ;;  %v2993_v40 = vmax.f32 %v11620_v51, %v2541_v62  ;;  %v2798_v29 = vpop.f32.mrb[60].mxu1  ;;  %v2543_v27 = vpop.f32.mrb[61].mxu0  ;;  %v3102_v2 = vmax.f32 %v3070_v6, 0.0  ;;  %v7027_v58 = vpack.c.bf16 %v3553_v21, %v3551_v7  ;;  %v11624_v17 = vld [vmem:[#allocation34_spill] sm:$0xff]  ;;  %7026 = vmatprep.subr.bf16.mxu1 %v7025_v31  ;;  %v11626_v48 = vld [vmem:[#allocation36_spill] sm:$0xff]  ;;  %v11627_v62 = vld [vmem:[#allocation37_spill] sm:$0xff] }
 0x28f   :  { %v2995_v35 = vmax.f32 %v11621_v25, %v2798_v29  ;;  %v2800_v18 = vpop.f32.mrb[61].mxu1  ;;  %3189 = vrot.lane.b32.xlu0 %v3101_v44, %s7777_s29  ;;  %v2994_v49 = vmax.f32 %v11622_v61, %v2543_v27  ;;  %v10418_v45 = vadd.f32 %v10119_v63, %v3027_v52  ;;  %v3558_v52 = vld [vmem:[%s11589_s1 + $0x1f8] sm:$0xff]  ;;  %v3089_v44 = vmax.f32 %v3057_v46, 0.0 }
 0x290   :  { %v2996_v24 = vmax.f32 %v11623_v8, %v2800_v18  ;;  %3191 = vrot.lane.b32.xlu1 %v3102_v2, %s7777_s29  ;;  %v10428_v50 = vadd.f32 %v10128_v20, %v3028_v23  ;;  %v3557_v23 = vld [vmem:[%s11589_s1 + $0x1f0] sm:$0xff]  ;;  %v7029_v29 = vpack.c.bf16 %v3558_v52, %v3556_v55  ;;  %v3090_v19 = vmax.f32 %v3058_v33, 0.0  ;;  %v6324_v46 = vld [vmem:[%s11589_s1 + $0x478] sm:$0xff] }
 0x291   :  { %v3029_v57 = vmax.f32 %v2993_v40, %v2995_v35  ;;  %v2547_v39 = vpop.f32.mrb[62].mxu0  ;;  %7028 = vmatpush1.bf16.msra.mxu1 %v7027_v58  ;;  %v3065_v40 = vadd.f32 %v10119_v63, %v10340_v0  ;;  %v7031_v27 = vpack.c.bf16 %v3557_v23, %v3555_v43  ;;  %v3098_v35 = vmax.f32 %v3066_v41, 0.0  ;;  %v11628_v18 = vld [vmem:[#allocation38_spill] sm:$0xff]  ;;  %v3560_v58 = vld [vmem:[%s11589_s1 + $0x208] sm:$0xff] }
 0x292   :  { %v3030_v13 = vmax.f32 %v2994_v49, %v2996_v24  ;;  %v2997_v9 = vmax.f32 %v11624_v17, %v2547_v39  ;;  %v2804_v38 = vpop.f32.mrb[62].mxu1  ;;  %v2549_v42 = vpop.f32.mrb[63].mxu0  ;;  %7030 = vmatprep.subr.bf16.mxu1 %v7029_v29  ;;  %v3092_v49 = vmax.f32 %v10296_v26, 0.0  ;;  %v3088_v15 = vmax.f32 %v10253_v10, 0.0  ;;  %v6321_v39 = vld [vmem:[%s11589_s1 + $0x460] sm:$0xff] }
 0x293   :  { %v2999_v5 = vmax.f32 %v11625_v56, %v2804_v38  ;;  %v2806_v28 = vpop.f32.mrb[63].mxu1  ;;  %3149 = vrot.lane.b32.xlu0 %v3081_v47, %s7777_s29  ;;  %v2998_v6 = vmax.f32 %v11626_v48, %v2549_v42  ;;  %v3073_v37 = vadd.f32 %v10119_v63, %v3029_v57  ;;  %v3097_v25 = vmax.f32 %v3065_v40, 0.0  ;;  %v6323_v47 = vld [vmem:[%s11589_s1 + $0x470] sm:$0xff] }
 0x294   :  { %v3000_v11 = vmax.f32 %v11627_v62, %v2806_v28  ;;  %3151 = vrot.lane.b32.xlu1 %v3082_v12, %s7777_s29  ;;  %v3074_v0 = vadd.f32 %v10128_v20, %v3030_v13  ;;  %v3096_v8 = vmax.f32 %v10338_v4, 0.0  ;;  %v3079_v26 = vmax.f32 %v10159_v32, 0.0  ;;  %v3562_v13 = vld [vmem:[%s11589_s1 + $0x218] sm:$0xff] }
 0x295   :  { %v3031_v51 = vmax.f32 %v2997_v9, %v2999_v5  ;;  %7032 = vmatpush1.bf16.msra.mxu1 %v7031_v27  ;;  %v3105_v59 = vmax.f32 %v3073_v37, 0.0  ;;  %v3087_v60 = vmax.f32 %v10243_v30, 0.0  ;;  %v3103_v10 = vmax.f32 %v10418_v45, 0.0  ;;  %v6317_v45 = vld [vmem:[%s11589_s1 + $0x440] sm:$0xff] }
 0x296   :  { %v3032_v2 = vmax.f32 %v2998_v6, %v3000_v11  ;;  %v3106_v61 = vmax.f32 %v3074_v0, 0.0  ;;  %v3083_v4 = vmax.f32 %v10202_v53, 0.0  ;;  %v3091_v32 = vmax.f32 %v10286_v36, 0.0  ;;  %v6319_v36 = vld [vmem:[%s11589_s1 + $0x450] sm:$0xff] }
 0x297   :  { %3165 = vrot.lane.b32.xlu0 %v3089_v44, %s7777_s29  ;;  %v3075_v3 = vadd.f32 %v10119_v63, %v3031_v51  ;;  %v3084_v63 = vmax.f32 %v10212_v1, 0.0  ;;  %v3104_v1 = vmax.f32 %v10428_v50, 0.0  ;;  %v3099_v24 = vmax.f32 %v10370_v54, 0.0  ;;  %v6322_v54 = vld [vmem:[%s11589_s1 + $0x468] sm:$0xff] }
 0x298   :  { %3167 = vrot.lane.b32.xlu1 %v3090_v19, %s7777_s29  ;;  %v3076_v14 = vadd.f32 %v10128_v20, %v3032_v2  ;;  %4003 = vmatmul.mubr.f32.vlgmr.msra.gmra.mrb[64].mxu1 %v11628_v18  ;;  %v3100_v20 = vmax.f32 %v10380_v16, 0.0  ;;  %v3095_v16 = vmax.f32 %v10327_v22, 0.0  ;;  %v6963_v31 = vpack.c.bf16 %v6319_v36, %v6317_v45  ;;  %v6342_v36 = vld [vmem:[%s11589_s1 + $0x488] sm:$0xff] }
 0x299   :  { %v3107_v30 = vmax.f32 %v3075_v3, 0.0  ;;  %v6965_v57 = vpack.c.bf16 %v6324_v46, %v6322_v54  ;;  %v6967_v9 = vpack.c.bf16 %v6323_v47, %v6321_v39  ;;  %v7033_v38 = vpack.c.bf16 %v3562_v13, %v3560_v58  ;;  %v6344_v54 = vld [vmem:[%s11589_s1 + $0x498] sm:$0xff] }
 0x29a   :  { %v3108_v22 = vmax.f32 %v3076_v14, 0.0  ;;  %v7041_v39 = vpack.c.bf16 %v6344_v54, %v6342_v36  ;;  %v6351_v36 = vld [vmem:[%s11589_s1 + $0x4d0] sm:$0xff] }
 0x29b   :  { %3181 = vrot.lane.b32.xlu0 %v3097_v25, %s7777_s29 }
 0x29c   :  { %3183 = vrot.lane.b32.xlu1 %v3098_v35, %s7777_s29 }
 0x29f   :  { %3197 = vrot.lane.b32.xlu0 %v3105_v59, %s7777_s29 }
 0x2a0   :  { %3199 = vrot.lane.b32.xlu1 %v3106_v61, %s7777_s29 }
 0x2a3   :  { %3155 = vrot.lane.b32.xlu0 %v3084_v63, %s7777_s29 }
 0x2a4   :  { %3171 = vrot.lane.b32.xlu1 %v3092_v49, %s7777_s29 }
 0x2a7   :  { %3187 = vrot.lane.b32.xlu0 %v3100_v20, %s7777_s29 }
 0x2a8   :  { %3147 = vrot.lane.b32.xlu1 %v3080_v34, %s7777_s29  ;;  %v3559_v34 = vld [vmem:[%s11589_s1 + $0x200] sm:$0xff] }
 0x2ab   :  { %3163 = vrot.lane.b32.xlu0 %v3088_v15, %s7777_s29  ;;  %v3561_v15 = vld [vmem:[%s11589_s1 + $0x210] sm:$0xff] }
 0x2ac   :  { %3179 = vrot.lane.b32.xlu1 %v3096_v8, %s7777_s29  ;;  %v3564_v8 = vld [vmem:[%s11589_s1 + $0x228] sm:$0xff] }
 0x2af   :  { %3195 = vrot.lane.b32.xlu0 %v3104_v1, %s7777_s29  ;;  %v3566_v1 = vld [vmem:[%s11589_s1 + $0x238] sm:$0xff] }
 0x2b0   :  { %3145 = vrot.lane.b32.xlu1 %v3079_v26, %s7777_s29 }
 0x2b3   :  { %3161 = vrot.lane.b32.xlu0 %v3087_v60, %s7777_s29 }
 0x2b4   :  { %3177 = vrot.lane.b32.xlu1 %v3095_v16, %s7777_s29 }
 0x2b7   :  { %3193 = vrot.lane.b32.xlu0 %v3103_v10, %s7777_s29  ;;  %v10594_v10 = vld [vmem:[#allocation2] sm:$0xff] }
 0x2b8   :  { %3153 = vrot.lane.b32.xlu1 %v3083_v4, %s7777_s29  ;;  %v7035_v4 = vpack.c.bf16 %v3561_v15, %v3559_v34  ;;  %v6346_v15 = vld [vmem:[%s11589_s1 + $0x4a8] sm:$0xff]  ;;  %4588 = vst.msk [vmem:[#allocation10 + $0x8] sm:$0xff] %vm4579_vm5, %v10594_v10 }
 0x2bb   :  { %3169 = vrot.lane.b32.xlu0 %v3091_v32, %s7777_s29 }
 0x2bc   :  { %3185 = vrot.lane.b32.xlu1 %v3099_v24, %s7777_s29 }
 0x2bf   :  { %3201 = vrot.lane.b32.xlu0 %v3107_v30, %s7777_s29  ;;  %v7037_v30 = vpack.c.bf16 %v3566_v1, %v3564_v8  ;;  %v6348_v8 = vld [vmem:[%s11589_s1 + $0x4b8] sm:$0xff]  ;;  %v3473_v1 = vld [vmem:[#allocation6 + $0x10] sm:$0xff] }
 0x2c0   :  { %3203 = vrot.lane.b32.xlu1 %v3108_v22, %s7777_s29  ;;  %v3563_v22 = vld [vmem:[%s11589_s1 + $0x220] sm:$0xff] }
 0x2d1   :  { %v3142_v53 = vpop.permute.xlu0 %3141 }
 0x2d5   :  { %v3144_v50 = vpop.permute.xlu0 %3143 }
 0x2d6   :  { %v3206_v7 = vsel %vm3205_vm3, %v3142_v53, %v3144_v50  ;;  %v3286_v21 = vsel %vm3205_vm3, %v3144_v50, 0.0 }
 0x2d7   :  { %3305 = vst.msk [vmem:[#allocation5 + $0x10] sm:$0xff] %vm3304_vm2, %v3286_v21  ;;  %3752 = vmatprep.mubr.f32.mxu0 %v3206_v7 }
 0x2d8   :  { %7651 = vmatmul.mubr.msk.f32.vlgmr.msra.gmra.mrb[64].mxu0 %vm10529_vm4, %v3142_v53  ;;  %v3565_v53 = vld [vmem:[%s11589_s1 + $0x230] sm:$0xff] }
 0x2d9   :  { %6964 = vmatpush1.bf16.msra.mxu0 %v6963_v31  ;;  %v7039_v7 = vpack.c.bf16 %v3565_v53, %v3563_v22 }
 0x2da   :  { %6966 = vmatprep.subr.bf16.mxu0 %v6965_v57 }
 0x2dd   :  { %6968 = vmatpush1.bf16.msra.mxu0 %v6967_v9 }
 0x2de   :  { %v3356_v42 = vld [vmem:[#allocation5 + $0x10] sm:$0xff]  ;;  %7034 = vmatprep.subr.bf16.mxu0 %v7033_v38 }
 0x2df   :  { %3359 = vst.msk [vmem:[#allocation7 + $0x10] sm:$0xff] %vm3304_vm2, %v3356_v42 }
 0x2e1   :  { %v3158_v12 = vpop.permute.xlu1 %3157 }
 0x2e5   :  { %v3160_v33 = vpop.permute.xlu1 %3159 }
 0x2e6   :  { %v3210_v55 = vsel %vm3205_vm3, %v3158_v12, %v3160_v33  ;;  %v3290_v56 = vsel %vm3205_vm3, %v3160_v33, 0.0  ;;  %v3569_v45 = vld [vmem:[#allocation7 + $0x10] sm:$0xff] }
 0x2e7   :  { %3317 = vst.msk [vmem:[#allocation5 + $0x70] sm:$0xff] %vm3304_vm2, %v3290_v56  ;;  %3758 = vmatprep.mubr.f32.mxu0 %v3210_v55 }
 0x2e8   :  { %7653 = vmatmul.mubr.msk.f32.gmra.mrb[66].mxu0 %vm10529_vm4, %v3158_v12 }
 0x2ee   :  { %v3386_v5 = vld [vmem:[#allocation5 + $0x70] sm:$0xff] }
 0x2ef   :  { %3389 = vst.msk [vmem:[#allocation7 + $0x28] sm:$0xff] %vm3304_vm2, %v3386_v5 }
 0x2f1   :  { %v3174_v28 = vpop.permute.xlu0 %3173 }
 0x2f2   :  { %v3176_v48 = vpop.permute.xlu1 %3175 }
 0x2f3   :  { %v3214_v6 = vsel %vm3205_vm3, %v3174_v28, %v3176_v48  ;;  %v3294_v37 = vsel %vm3205_vm3, %v3176_v48, 0.0 }
 0x2f4   :  { %3329 = vst.msk [vmem:[#allocation5 + $0xd0] sm:$0xff] %vm3304_vm2, %v3294_v37  ;;  %3764 = vmatprep.mubr.f32.mxu0 %v3214_v6 }
 0x2f5   :  { %7655 = vmatmul.mubr.msk.f32.gmra.mrb[68].mxu0 %vm10529_vm4, %v3174_v28 }
 0x2f6   :  { %v3572_v47 = vld [vmem:[#allocation7 + $0x28] sm:$0xff] }
 0x2fb   :  { %v3416_v52 = vld [vmem:[#allocation5 + $0xd0] sm:$0xff] }
 0x2fc   :  { %3419 = vst.msk [vmem:[#allocation7 + $0x40] sm:$0xff] %vm3304_vm2, %v3416_v52 }
 0x301   :  { %v3190_v62 = vpop.permute.xlu0 %3189 }
 0x302   :  { %v3192_v11 = vpop.permute.xlu1 %3191 }
 0x303   :  { %v3218_v44 = vsel %vm3205_vm3, %v3190_v62, %v3192_v11  ;;  %v3298_v43 = vsel %vm3205_vm3, %v3192_v11, 0.0  ;;  %v3575_v33 = vld [vmem:[#allocation7 + $0x40] sm:$0xff] }
 0x304   :  { %3341 = vst.msk [vmem:[#allocation5 + $0x130] sm:$0xff] %vm3304_vm2, %v3298_v43  ;;  %3770 = vmatprep.mubr.f32.mxu0 %v3218_v44 }
 0x305   :  { %v3150_v23 = vpop.permute.xlu0 %3149  ;;  %7657 = vmatmul.mubr.msk.f32.gmra.mrb[70].mxu0 %vm10529_vm4, %v3190_v62 }
 0x306   :  { %v3152_v51 = vpop.permute.xlu1 %3151 }
 0x307   :  { %v3208_v40 = vsel %vm3205_vm3, %v3150_v23, %v3152_v51  ;;  %v3288_v29 = vsel %vm3205_vm3, %v3152_v51, 0.0 }
 0x308   :  { %3311 = vst.msk [vmem:[#allocation5 + $0x40] sm:$0xff] %vm3304_vm2, %v3288_v29  ;;  %3776 = vmatprep.mubr.f32.mxu0 %v3208_v40 }
 0x309   :  { %v3166_v27 = vpop.permute.xlu0 %3165  ;;  %7659 = vmatmul.mubr.msk.f32.gmra.mrb[72].mxu0 %vm10529_vm4, %v3150_v23 }
 0x30a   :  { %v3168_v2 = vpop.permute.xlu1 %3167 }
 0x30b   :  { %v3446_v19 = vld [vmem:[#allocation5 + $0x130] sm:$0xff]  ;;  %v3212_v41 = vsel %vm3205_vm3, %v3166_v27, %v3168_v2  ;;  %v3292_v3 = vsel %vm3205_vm3, %v3168_v2, 0.0 }
 0x30c   :  { %3449 = vst.msk [vmem:[#allocation7 + $0x58] sm:$0xff] %vm3304_vm2, %v3446_v19  ;;  %3323 = vst.msk [vmem:[#allocation5 + $0xa0] sm:$0xff] %vm3304_vm2, %v3292_v3  ;;  %3782 = vmatprep.mubr.f32.mxu0 %v3212_v41 }
 0x30d   :  { %v3182_v14 = vpop.permute.xlu0 %3181  ;;  %7661 = vmatmul.mubr.msk.f32.gmra.mrb[74].mxu0 %vm10529_vm4, %v3166_v27 }
 0x30e   :  { %v3184_v25 = vpop.permute.xlu1 %3183 }
 0x30f   :  { %v3371_v35 = vld [vmem:[#allocation5 + $0x40] sm:$0xff]  ;;  %v3216_v0 = vsel %vm3205_vm3, %v3182_v14, %v3184_v25  ;;  %v3296_v18 = vsel %vm3205_vm3, %v3184_v25, 0.0 }
 0x310   :  { %3374 = vst.msk [vmem:[#allocation7 + $0x70] sm:$0xff] %vm3304_vm2, %v3371_v35  ;;  %3335 = vst.msk [vmem:[#allocation5 + $0x100] sm:$0xff] %vm3304_vm2, %v3296_v18  ;;  %3788 = vmatprep.mubr.f32.mxu0 %v3216_v0 }
 0x311   :  { %v3198_v59 = vpop.permute.xlu0 %3197  ;;  %7663 = vmatmul.mubr.msk.f32.gmra.mrb[76].mxu0 %vm10529_vm4, %v3182_v14 }
 0x312   :  { %v3200_v61 = vpop.permute.xlu1 %3199 }
 0x313   :  { %v3401_v63 = vld [vmem:[#allocation5 + $0xa0] sm:$0xff]  ;;  %v3220_v49 = vsel %vm3205_vm3, %v3198_v59, %v3200_v61  ;;  %v3300_v20 = vsel %vm3205_vm3, %v3200_v61, 0.0  ;;  %v3578_v37 = vld [vmem:[#allocation7 + $0x58] sm:$0xff] }
 0x314   :  { %3404 = vst.msk [vmem:[#allocation7 + $0x88] sm:$0xff] %vm3304_vm2, %v3401_v63  ;;  %3347 = vst.msk [vmem:[#allocation5 + $0x160] sm:$0xff] %vm3304_vm2, %v3300_v20  ;;  %3794 = vmatprep.mubr.f32.mxu0 %v3220_v49  ;;  %v6341_v49 = vld [vmem:[%s11589_s1 + $0x480] sm:$0xff]  ;;  %v6343_v20 = vld [vmem:[%s11589_s1 + $0x490] sm:$0xff] }
 0x315   :  { %v10586_v26 = vpop.permute.xlu0 %3155  ;;  %7665 = vmatmul.mubr.msk.f32.gmra.mrb[78].mxu0 %vm10529_vm4, %v3198_v59 }
 0x316   :  { %v3289_v60 = vsel %vm3205_vm3, %v10586_v26, 0.0  ;;  %v10592_v16 = vpop.permute.xlu1 %3171  ;;  %3865 = vmatprep.mubr.f32.mxu0 %v10594_v10 }
 0x317   :  { %v3431_v32 = vld [vmem:[#allocation5 + $0x100] sm:$0xff]  ;;  %3314 = vst.msk [vmem:[#allocation5 + $0x58] sm:$0xff] %vm3304_vm2, %v3289_v60  ;;  %v3293_v24 = vsel %vm3205_vm3, %v10592_v16, 0.0  ;;  %v3581_v51 = vld [vmem:[#allocation7 + $0x70] sm:$0xff]  ;;  %v7045_v60 = vpack.c.bf16 %v6348_v8, %v6346_v15 }
 0x318   :  { %3434 = vst.msk [vmem:[#allocation7 + $0xa0] sm:$0xff] %vm3304_vm2, %v3431_v32  ;;  %3326 = vst.msk [vmem:[#allocation5 + $0xb8] sm:$0xff] %vm3304_vm2, %v3293_v24  ;;  %v6350_v32 = vld [vmem:[%s11589_s1 + $0x4c8] sm:$0xff]  ;;  %v6352_v24 = vld [vmem:[%s11589_s1 + $0x4d8] sm:$0xff] }
 0x319   :  { %v10614_v46 = vpop.permute.xlu0 %3187  ;;  %6325 = vmatmul.mubr.msk.f32.vlgmr.msra.gmra.mrb[64].mxu0 %vm3304_vm2, %v3569_v45  ;;  %v7049_v53 = vpack.c.bf16 %v6352_v24, %v6350_v32  ;;  %v6349_v45 = vld [vmem:[%s11589_s1 + $0x4c0] sm:$0xff] }
 0x31a   :  { %v3297_v50 = vsel %vm3205_vm3, %v10614_v46, 0.0  ;;  %v3148_v31 = vpop.permute.xlu1 %3147  ;;  %7036 = vmatpush1.bf16.msra.mxu0 %v7035_v4  ;;  %3871 = vmatprep.mubr.f32.mxu0 %v10594_v10  ;;  %v6347_v4 = vld [vmem:[%s11589_s1 + $0x4b0] sm:$0xff]  ;;  %v6369_v8 = vld [vmem:[%s11589_s1 + $0x560] sm:$0xff] }
 0x31b   :  { %v3461_v21 = vld [vmem:[#allocation5 + $0x160] sm:$0xff]  ;;  %3338 = vst.msk [vmem:[#allocation5 + $0x118] sm:$0xff] %vm3304_vm2, %v3297_v50  ;;  %v3287_v57 = vsel %vm3205_vm3, %v3148_v31, 0.0  ;;  %7038 = vmatprep.subr.bf16.mxu0 %v7037_v30  ;;  %v3584_v41 = vld [vmem:[#allocation7 + $0x88] sm:$0xff]  ;;  %v6356_v50 = vld [vmem:[%s11589_s1 + $0x4f8] sm:$0xff] }
 0x31c   :  { %3464 = vst.msk [vmem:[#allocation7 + $0xb8] sm:$0xff] %vm3304_vm2, %v3461_v21  ;;  %3308 = vst.msk [vmem:[#allocation5 + $0x28] sm:$0xff] %vm3304_vm2, %v3287_v57  ;;  %v6353_v21 = vld [vmem:[%s11589_s1 + $0x4e0] sm:$0xff]  ;;  %v6355_v57 = vld [vmem:[%s11589_s1 + $0x4f0] sm:$0xff] }
 0x31d   :  { %v3164_v58 = vpop.permute.xlu0 %3163  ;;  %6326 = vmatmul.mubr.msk.f32.gmra.mrb[66].mxu0 %vm3304_vm2, %v3572_v47  ;;  %v6358_v47 = vld [vmem:[%s11589_s1 + $0x508] sm:$0xff]  ;;  %v6373_v24 = vld [vmem:[%s11589_s1 + $0x580] sm:$0xff] }
 0x31e   :  { %v3377_v13 = vld [vmem:[#allocation5 + $0x58] sm:$0xff]  ;;  %v3291_v9 = vsel %vm3205_vm3, %v3164_v58, 0.0  ;;  %v3180_v38 = vpop.permute.xlu1 %3179  ;;  %3877 = vmatprep.mubr.f32.mxu0 %v10594_v10  ;;  %7040 = vmatpush1.bf16.msra.mxu0 %v7039_v7 }
 0x31f   :  { %3380 = vst.msk [vmem:[#allocation6 + $0x28] sm:$0xff] %vm3304_vm2, %v3377_v13  ;;  %3383 = vst.msk [vmem:[#allocation8 + $0x70] sm:$0xff] %vm3304_vm2, %v3377_v13  ;;  %v3407_v42 = vld [vmem:[#allocation5 + $0xb8] sm:$0xff]  ;;  %v3295_v12 = vsel %vm3205_vm3, %v3180_v38, 0.0  ;;  %7042 = vmatprep.subr.bf16.mxu0 %v7041_v39  ;;  %v3587_v0 = vld [vmem:[#allocation7 + $0xa0] sm:$0xff]  ;;  %v7055_v13 = vpack.c.bf16 %v6355_v57, %v6353_v21 }
 0x320   :  { %3320 = vst.msk [vmem:[#allocation5 + $0x88] sm:$0xff] %vm3304_vm2, %v3291_v9  ;;  %3410 = vst.msk [vmem:[#allocation6 + $0x40] sm:$0xff] %vm3304_vm2, %v3407_v42  ;;  %v6381_v57 = vld [vmem:[%s11589_s1 + $0x5c0] sm:$0xff] }
 0x321   :  { %3413 = vst.msk [vmem:[#allocation8 + $0x88] sm:$0xff] %vm3304_vm2, %v3407_v42  ;;  %3332 = vst.msk [vmem:[#allocation5 + $0xe8] sm:$0xff] %vm3304_vm2, %v3295_v12  ;;  %v3196_v55 = vpop.permute.xlu0 %3195  ;;  %6327 = vmatmul.mubr.msk.f32.gmra.mrb[68].mxu0 %vm3304_vm2, %v3575_v33  ;;  %v6359_v42 = vld [vmem:[%s11589_s1 + $0x510] sm:$0xff]  ;;  %v6362_v33 = vld [vmem:[%s11589_s1 + $0x528] sm:$0xff] }
 0x322   :  { %v3437_v56 = vld [vmem:[#allocation5 + $0x118] sm:$0xff]  ;;  %v3299_v5 = vsel %vm3205_vm3, %v3196_v55, 0.0  ;;  %v10636_v28 = vpop.permute.xlu1 %3145  ;;  %3883 = vmatprep.mubr.f32.mxu0 %v10594_v10 }
 0x323   :  { %3440 = vst.msk [vmem:[#allocation6 + $0x58] sm:$0xff] %vm3304_vm2, %v3437_v56  ;;  %3443 = vst.msk [vmem:[#allocation8 + $0xa0] sm:$0xff] %vm3304_vm2, %v3437_v56  ;;  %v3362_v48 = vld [vmem:[#allocation5 + $0x28] sm:$0xff]  ;;  %v10644_v6 = vsel %vm3205_vm3, %v10636_v28, %v3148_v31  ;;  %v3590_v34 = vld [vmem:[#allocation7 + $0xb8] sm:$0xff]  ;;  %v7051_v31 = vpack.c.bf16 %v6351_v36, %v6349_v45 }
 0x324   :  { %3344 = vst.msk [vmem:[#allocation5 + $0x148] sm:$0xff] %vm3304_vm2, %v3299_v5  ;;  %3365 = vst.msk [vmem:[#allocation8 + $0x10] sm:$0xff] %vm3304_vm2, %v3362_v48  ;;  %v6380_v45 = vld [vmem:[%s11589_s1 + $0x5b8] sm:$0xff] }
 0x325   :  { %3368 = vst.msk [vmem:[#allocation6 + $0x70] sm:$0xff] %vm3304_vm2, %v3362_v48  ;;  %v10648_v52 = vpop.permute.xlu0 %3161  ;;  %6328 = vmatmul.mubr.msk.f32.gmra.mrb[70].mxu0 %vm3304_vm2, %v3578_v37  ;;  %v6361_v48 = vld [vmem:[%s11589_s1 + $0x520] sm:$0xff]  ;;  %v6363_v37 = vld [vmem:[%s11589_s1 + $0x530] sm:$0xff] }
 0x326   :  { %v10653_v11 = vsel %vm3205_vm3, %v10648_v52, %v3164_v58  ;;  %v10655_v44 = vpop.permute.xlu1 %3177  ;;  %3889 = vmatprep.mubr.f32.mxu0 %v10594_v10  ;;  %v3476_v54 = vld [vmem:[#allocation6 + $0x28] sm:$0xff]  ;;  %v6360_v58 = vld [vmem:[%s11589_s1 + $0x518] sm:$0xff]  ;;  %v4178_v17 = vld [vmem:[#allocation8 + $0x70] sm:$0xff] }
 0x327   :  { %v3392_v62 = vld [vmem:[#allocation5 + $0x88] sm:$0xff]  ;;  %v10662_v23 = vsel %vm3205_vm3, %v10655_v44, %v3180_v38  ;;  %v3479_v39 = vld [vmem:[#allocation6 + $0x40] sm:$0xff]  ;;  %v7057_v9 = vpack.c.bf16 %v6360_v58, %v6358_v47  ;;  %v6388_v58 = vld [vmem:[%s11589_s1 + $0x5f8] sm:$0xff] }
 0x328   :  { %3395 = vst.msk [vmem:[#allocation8 + $0x28] sm:$0xff] %vm3304_vm2, %v3392_v62  ;;  %3398 = vst.msk [vmem:[#allocation6 + $0x88] sm:$0xff] %vm3304_vm2, %v3392_v62  ;;  %v3422_v43 = vld [vmem:[#allocation5 + $0xe8] sm:$0xff]  ;;  %v6357_v38 = vld [vmem:[%s11589_s1 + $0x500] sm:$0xff] }
 0x329   :  { %3425 = vst.msk [vmem:[#allocation8 + $0x40] sm:$0xff] %vm3304_vm2, %v3422_v43  ;;  %3428 = vst.msk [vmem:[#allocation6 + $0xa0] sm:$0xff] %vm3304_vm2, %v3422_v43  ;;  %v10666_v40 = vpop.permute.xlu0 %3193  ;;  %6329 = vmatmul.mubr.msk.f32.gmra.mrb[72].mxu0 %vm3304_vm2, %v3581_v51  ;;  %v7059_v56 = vpack.c.bf16 %v6359_v42, %v6357_v38  ;;  %v6366_v43 = vld [vmem:[%s11589_s1 + $0x548] sm:$0xff]  ;;  %v6368_v51 = vld [vmem:[%s11589_s1 + $0x558] sm:$0xff] }
 0x32a   :  { %v10671_v27 = vsel %vm3205_vm3, %v10666_v40, %v3196_v55  ;;  %v10673_v2 = vpop.permute.xlu1 %3153  ;;  %3895 = vmatprep.mubr.f32.mxu0 %v10594_v10  ;;  %v3482_v12 = vld [vmem:[#allocation6 + $0x58] sm:$0xff]  ;;  %v6386_v47 = vld [vmem:[%s11589_s1 + $0x5e8] sm:$0xff]  ;;  %v6385_v38 = vld [vmem:[%s11589_s1 + $0x5e0] sm:$0xff] }
 0x32b   :  { %v3452_v29 = vld [vmem:[#allocation5 + $0x148] sm:$0xff]  ;;  %v10681_v19 = vsel %vm3205_vm3, %v10673_v2, %v10586_v26  ;;  %v7043_v26 = vpack.c.bf16 %v6343_v20, %v6341_v49  ;;  %v6364_v55 = vld [vmem:[%s11589_s1 + $0x538] sm:$0xff]  ;;  %v6387_v42 = vld [vmem:[%s11589_s1 + $0x5f0] sm:$0xff] }
 0x32c   :  { %3455 = vst.msk [vmem:[#allocation8 + $0x58] sm:$0xff] %vm3304_vm2, %v3452_v29  ;;  %3458 = vst.msk [vmem:[#allocation6 + $0xb8] sm:$0xff] %vm3304_vm2, %v3452_v29  ;;  %4008 = vmatprep.mubr.f32.mxu1 %v10681_v19  ;;  %v7061_v5 = vpack.c.bf16 %v6364_v55, %v6362_v33  ;;  %v3485_v62 = vld [vmem:[#allocation6 + $0x70] sm:$0xff]  ;;  %v7063_v29 = vpack.c.bf16 %v6363_v37, %v6361_v48  ;;  %v6370_v49 = vld [vmem:[%s11589_s1 + $0x568] sm:$0xff]  ;;  %v7087_v55 = vpack.c.bf16 %v6387_v42, %v6385_v38 }
 0x32d   :  { %v10684_v3 = vpop.permute.xlu0 %3169  ;;  %6330 = vmatmul.mubr.msk.f32.gmra.mrb[74].mxu0 %vm3304_vm2, %v3584_v41  ;;  %7667 = vmatmul.mubr.msk.f32.gmra.mrb[66].mxu1 %vm10529_vm4, %v10673_v2  ;;  %v7065_v41 = vpack.c.bf16 %v6368_v51, %v6366_v43  ;;  %v6372_v20 = vld [vmem:[%s11589_s1 + $0x578] sm:$0xff]  ;;  %v6391_v48 = vld [vmem:[%s11589_s1 + $0x610] sm:$0xff]  ;;  %v6394_v37 = vld [vmem:[%s11589_s1 + $0x628] sm:$0xff] }
 0x32e   :  { %v10693_v14 = vsel %vm3205_vm3, %v10684_v3, %v10592_v16  ;;  %v10695_v25 = vpop.permute.xlu1 %3185  ;;  %3901 = vmatprep.mubr.f32.mxu0 %v10594_v10  ;;  %v6345_v16 = vld [vmem:[%s11589_s1 + $0x4a0] sm:$0xff]  ;;  %v7069_v15 = vpack.c.bf16 %v6372_v20, %v6370_v49  ;;  %v6392_v33 = vld [vmem:[%s11589_s1 + $0x618] sm:$0xff] }
 0x32f   :  { %v10701_v35 = vsel %vm3205_vm3, %v10695_v25, %v10614_v46  ;;  %4014 = vmatprep.mubr.f32.mxu1 %v10693_v14  ;;  %v7047_v30 = vpack.c.bf16 %v6347_v4, %v6345_v16  ;;  %v6354_v46 = vld [vmem:[%s11589_s1 + $0x4e8] sm:$0xff]  ;;  %v6376_v16 = vld [vmem:[%s11589_s1 + $0x598] sm:$0xff]  ;;  %v6397_v20 = vld [vmem:[%s11589_s1 + $0x640] sm:$0xff] }
 0x330   :  { %v7053_v7 = vpack.c.bf16 %v6356_v50, %v6354_v46  ;;  %v6377_v46 = vld [vmem:[%s11589_s1 + $0x5a0] sm:$0xff]  ;;  %v6379_v50 = vld [vmem:[%s11589_s1 + $0x5b0] sm:$0xff] }
 0x331   :  { %v10704_v18 = vpop.permute.xlu0 %3201  ;;  %6331 = vmatmul.mubr.msk.f32.gmra.mrb[76].mxu0 %vm3304_vm2, %v3587_v0  ;;  %7669 = vmatmul.mubr.msk.f32.gmra.mrb[68].mxu1 %vm10529_vm4, %v10684_v3  ;;  %v6365_v0 = vld [vmem:[%s11589_s1 + $0x540] sm:$0xff] }
 0x332   :  { %v3204_v59 = vpop.permute.xlu1 %3203  ;;  %4020 = vmatprep.mubr.f32.mxu1 %v10701_v35  ;;  %3907 = vmatprep.mubr.f32.mxu0 %v10594_v10 }
 0x333   :  { %v10714_v61 = vsel %vm3205_vm3, %v10704_v18, %v3204_v59  ;;  %v3301_v63 = vsel %vm3205_vm3, %v3204_v59, 0.0  ;;  %v6367_v59 = vld [vmem:[%s11589_s1 + $0x550] sm:$0xff] }
 0x334   :  { %3350 = vst.msk [vmem:[#allocation5 + $0x178] sm:$0xff] %vm3304_vm2, %v3301_v63  ;;  %v3488_v63 = vld [vmem:[#allocation6 + $0x88] sm:$0xff] }
 0x335   :  { %6332 = vmatmul.mubr.msk.f32.gmra.mrb[78].mxu0 %vm3304_vm2, %v3590_v34  ;;  %7671 = vmatmul.mubr.msk.f32.gmra.mrb[70].mxu1 %vm10529_vm4, %v10695_v25  ;;  %v7067_v34 = vpack.c.bf16 %v6367_v59, %v6365_v0  ;;  %v6398_v0 = vld [vmem:[%s11589_s1 + $0x648] sm:$0xff]  ;;  %v6400_v59 = vld [vmem:[%s11589_s1 + $0x658] sm:$0xff] }
 0x336   :  { %4026 = vmatprep.mubr.f32.mxu1 %v10644_v6  ;;  %4115 = vmatprep.mubr.f32.mxu0 %v10594_v10  ;;  %v7097_v49 = vpack.c.bf16 %v6400_v59, %v6398_v0 }
 0x339   :  { %7673 = vmatmul.mubr.msk.f32.gmra.mrb[72].mxu1 %vm10529_vm4, %v10636_v28  ;;  %6333 = vmatmul.mubr.msk.f32.vlgmr.msra.gmra.mrb[80].mxu0 %vm3304_vm2, %v3473_v1  ;;  %v6371_v1 = vld [vmem:[%s11589_s1 + $0x570] sm:$0xff] }
 0x33a   :  { %7044 = vmatpush1.bf16.msra.mxu0 %v7043_v26  ;;  %4032 = vmatprep.mubr.f32.mxu1 %v10653_v11  ;;  %v3491_v26 = vld [vmem:[#allocation6 + $0xa0] sm:$0xff]  ;;  %v7071_v4 = vpack.c.bf16 %v6371_v1, %v6369_v8  ;;  %v6404_v8 = vld [vmem:[%s11589_s1 + $0x678] sm:$0xff] }
 0x33b   :  { %v3467_v22 = vld [vmem:[#allocation5 + $0x178] sm:$0xff]  ;;  %4121 = vmatprep.mubr.f32.mxu0 %v10594_v10  ;;  %7046 = vmatprep.subr.bf16.mxu0 %v7045_v60  ;;  %v6374_v60 = vld [vmem:[%s11589_s1 + $0x588] sm:$0xff] }
 0x33c   :  { %3470 = vst.msk [vmem:[#allocation8 + $0xb8] sm:$0xff] %vm3304_vm2, %v3467_v22  ;;  %v7073_v32 = vpack.c.bf16 %v6376_v16, %v6374_v60  ;;  %v3494_v22 = vld [vmem:[#allocation6 + $0xb8] sm:$0xff]  ;;  %v6401_v16 = vld [vmem:[%s11589_s1 + $0x660] sm:$0xff] }
 0x33d   :  { %7675 = vmatmul.mubr.msk.f32.gmra.mrb[74].mxu1 %vm10529_vm4, %v10648_v52  ;;  %6334 = vmatmul.mubr.msk.f32.gmra.mrb[82].mxu0 %vm3304_vm2, %v3476_v54 }
 0x33e   :  { %7048 = vmatpush1.bf16.msra.mxu0 %v7047_v30  ;;  %4038 = vmatprep.mubr.f32.mxu1 %v10662_v23  ;;  %v6375_v30 = vld [vmem:[%s11589_s1 + $0x590] sm:$0xff] }
 0x33f   :  { %4127 = vmatprep.mubr.f32.mxu0 %v10594_v10  ;;  %7050 = vmatprep.subr.bf16.mxu0 %v7049_v53  ;;  %v6378_v53 = vld [vmem:[%s11589_s1 + $0x5a8] sm:$0xff]  ;;  %v7075_v36 = vpack.c.bf16 %v6375_v30, %v6373_v24  ;;  %v6408_v30 = vld [vmem:[%s11589_s1 + $0x698] sm:$0xff] }
 0x340   :  { %v7077_v54 = vpack.c.bf16 %v6380_v45, %v6378_v53  ;;  %v6406_v24 = vld [vmem:[%s11589_s1 + $0x688] sm:$0xff]  ;;  %v6405_v45 = vld [vmem:[%s11589_s1 + $0x680] sm:$0xff] }
 0x341   :  { %7677 = vmatmul.mubr.msk.f32.gmra.mrb[76].mxu1 %vm10529_vm4, %v10655_v44  ;;  %6335 = vmatmul.mubr.msk.f32.gmra.mrb[84].mxu0 %vm3304_vm2, %v3479_v39  ;;  %v6383_v39 = vld [vmem:[%s11589_s1 + $0x5d0] sm:$0xff]  ;;  %v7105_v53 = vpack.c.bf16 %v6408_v30, %v6406_v24 }
 0x342   :  { %7052 = vmatpush1.bf16.msra.mxu0 %v7051_v31  ;;  %4044 = vmatprep.mubr.f32.mxu1 %v10671_v27  ;;  %v6382_v31 = vld [vmem:[%s11589_s1 + $0x5c8] sm:$0xff] }
 0x343   :  { %4133 = vmatprep.mubr.f32.mxu0 %v10594_v10  ;;  %7054 = vmatprep.subr.bf16.mxu0 %v7053_v7  ;;  %v6384_v7 = vld [vmem:[%s11589_s1 + $0x5d8] sm:$0xff] }
 0x344   :  { %v7081_v21 = vpack.c.bf16 %v6384_v7, %v6382_v31  ;;  %v6409_v7 = vld [vmem:[%s11589_s1 + $0x6a0] sm:$0xff] }
 0x345   :  { %7679 = vmatmul.mubr.msk.f32.gmra.mrb[78].mxu1 %vm10529_vm4, %v10666_v40  ;;  %6336 = vmatmul.mubr.msk.f32.gmra.mrb[86].mxu0 %vm3304_vm2, %v3482_v12  ;;  %v6390_v12 = vld [vmem:[%s11589_s1 + $0x608] sm:$0xff] }
 0x346   :  { %7056 = vmatpush1.bf16.msra.mxu0 %v7055_v13  ;;  %4139 = vmatprep.mubr.f32.mxu0 %v10594_v10  ;;  %v7083_v13 = vpack.c.bf16 %v6383_v39, %v6381_v57 }
 0x347   :  { %7058 = vmatprep.subr.bf16.mxu0 %v7057_v9  ;;  %v7085_v9 = vpack.c.bf16 %v6388_v58, %v6386_v47 }
 0x349   :  { %6337 = vmatmul.mubr.msk.f32.gmra.mrb[88].mxu0 %vm3304_vm2, %v3485_v62  ;;  %v6396_v62 = vld [vmem:[%s11589_s1 + $0x638] sm:$0xff] }
 0x34a   :  { %7060 = vmatpush1.bf16.msra.mxu0 %v7059_v56  ;;  %4145 = vmatprep.mubr.f32.mxu0 %v10594_v10  ;;  %v7089_v56 = vpack.c.bf16 %v6392_v33, %v6390_v12  ;;  %v7093_v51 = vpack.c.bf16 %v6396_v62, %v6394_v37 }
 0x34b   :  { %7062 = vmatprep.subr.bf16.mxu0 %v7061_v5  ;;  %v6389_v5 = vld [vmem:[%s11589_s1 + $0x600] sm:$0xff] }
 0x34c   :  { %v7091_v43 = vpack.c.bf16 %v6391_v48, %v6389_v5 }
 0x34d   :  { %6338 = vmatmul.mubr.msk.f32.gmra.mrb[90].mxu0 %vm3304_vm2, %v3488_v63 }
 0x34e   :  { %7064 = vmatpush1.bf16.msra.mxu0 %v7063_v29  ;;  %4151 = vmatprep.mubr.f32.mxu0 %v10594_v10  ;;  %v6393_v29 = vld [vmem:[%s11589_s1 + $0x620] sm:$0xff] }
 0x34f   :  { %7066 = vmatprep.subr.bf16.mxu0 %v7065_v41  ;;  %v6395_v41 = vld [vmem:[%s11589_s1 + $0x630] sm:$0xff] }
 0x350   :  { %v7095_v63 = vpack.c.bf16 %v6395_v41, %v6393_v29 }
 0x351   :  { %6339 = vmatmul.mubr.msk.f32.gmra.mrb[92].mxu0 %vm3304_vm2, %v3491_v26 }
 0x352   :  { %7068 = vmatpush1.bf16.msra.mxu0 %v7067_v34  ;;  %4157 = vmatprep.mubr.f32.mxu0 %v10594_v10  ;;  %v6399_v34 = vld [vmem:[%s11589_s1 + $0x650] sm:$0xff] }
 0x353   :  { %7070 = vmatprep.subr.bf16.mxu0 %v7069_v15  ;;  %v6402_v15 = vld [vmem:[%s11589_s1 + $0x668] sm:$0xff]  ;;  %v7099_v1 = vpack.c.bf16 %v6399_v34, %v6397_v20 }
 0x354   :  { %v7101_v60 = vpack.c.bf16 %v6404_v8, %v6402_v15 }
 0x355   :  { %6340 = vmatmul.mubr.msk.f32.gmra.mrb[94].mxu0 %vm3304_vm2, %v3494_v22 }
 0x356   :  { %7072 = vmatpush1.bf16.msra.mxu0 %v7071_v4  ;;  %4349 = vmatprep.mubr.f32.mxu0 %v10644_v6  ;;  %v7079_v6 = vpack.c.bf16 %v6379_v50, %v6377_v46  ;;  %v6403_v4 = vld [vmem:[%s11589_s1 + $0x670] sm:$0xff]  ;;  %v6412_v46 = vld [vmem:[%s11589_s1 + $0x6b8] sm:$0xff] }
 0x357   :  { %7074 = vmatprep.subr.bf16.mxu0 %v7073_v32  ;;  %v7103_v22 = vpack.c.bf16 %v6403_v4, %v6401_v16  ;;  %v6422_v16 = vld [vmem:[%s11562_s5 + $0xc0] sm:$0xff]  ;;  %v6423_v4 = vld [vmem:[%s11562_s5 + $0xc8] sm:$0xff] }
 0x35a   :  { %7076 = vmatpush1.bf16.msra.mxu0 %v7075_v36  ;;  %v6407_v36 = vld [vmem:[%s11589_s1 + $0x690] sm:$0xff] }
 0x35b   :  { %7078 = vmatprep.subr.bf16.mxu0 %v7077_v54  ;;  %v6410_v54 = vld [vmem:[%s11589_s1 + $0x6a8] sm:$0xff]  ;;  %v7107_v50 = vpack.c.bf16 %v6407_v36, %v6405_v45  ;;  %v6425_v45 = vld [vmem:[%s11562_s5 + $0xd8] sm:$0xff] }
 0x35c   :  { %v7109_v31 = vpack.c.bf16 %v6412_v46, %v6410_v54 }
 0x35e   :  { %7080 = vmatpush1.bf16.msra.mxu0 %v7079_v6  ;;  %v6411_v6 = vld [vmem:[%s11589_s1 + $0x6b0] sm:$0xff] }
 0x35f   :  { %7082 = vmatprep.subr.bf16.mxu0 %v7081_v21  ;;  %v7111_v21 = vpack.c.bf16 %v6411_v6, %v6409_v7 }
 0x362   :  { %7084 = vmatpush1.bf16.msra.mxu0 %v7083_v13 }
 0x363   :  { %7086 = vmatprep.subr.bf16.mxu0 %v7085_v9 }
 0x366   :  { %7088 = vmatpush1.bf16.msra.mxu0 %v7087_v55 }
 0x367   :  { %7090 = vmatprep.subr.bf16.mxu0 %v7089_v56 }
 0x36a   :  { %7092 = vmatpush1.bf16.msra.mxu0 %v7091_v43 }
 0x36b   :  { %7094 = vmatprep.subr.bf16.mxu0 %v7093_v51  ;;  %v10936_v26 = vpop.f32.mrb[64].mxu1 }
 0x36c   :  { %v10944_v32 = vpop.f32.mrb[65].mxu1 }
 0x36e   :  { %7096 = vmatpush1.bf16.msra.mxu0 %v7095_v63 }
 0x36f   :  { %7098 = vmatprep.subr.bf16.mxu0 %v7097_v49 }
 0x372   :  { %7100 = vmatpush1.bf16.msra.mxu0 %v7099_v1 }
 0x373   :  { %7102 = vmatprep.subr.bf16.mxu0 %v7101_v60 }
 0x376   :  { %7104 = vmatpush1.bf16.msra.mxu0 %v7103_v22  ;;  %v7778_v22 = vmov 0.0|0.0  }
 0x377   :  { %7106 = vmatprep.subr.bf16.mxu0 %v7105_v53  ;;  %7113 = vmatprep.subr.bf16.mxu1 %v7778_v22  ;;  %v7114_v53 = vpack.c.bf16 %v6423_v4, %v6422_v16 }
 0x379   :  { %7681 = vmatmul.mubr.msk.f32.vlgmr.msra.gmra.mrb[80].mxu0 %vm10529_vm4, %v10636_v28  ;;  %v4166_v28 = vld [vmem:[#allocation8 + $0x10] sm:$0xff]  ;;  %7115 = vmatpush1.bf16.msra.mxu1 %v7114_v53  ;;  %v6442_v53 = vld [vmem:[%s11562_s5 + $0x160] sm:$0xff] }
 0x37a   :  { %4355 = vmatprep.mubr.f32.mxu0 %v10653_v11  ;;  %7108 = vmatpush1.bf16.msra.mxu0 %v7107_v50  ;;  %v4172_v11 = vld [vmem:[#allocation8 + $0x40] sm:$0xff] }
 0x37b   :  { %7110 = vmatprep.subr.bf16.mxu0 %v7109_v31  ;;  %7116 = vmatprep.subr.bf16.mxu1 %v7778_v22  ;;  %v6426_v50 = vld [vmem:[%s11562_s5 + $0xe0] sm:$0xff]  ;;  %v6427_v31 = vld [vmem:[%s11562_s5 + $0xe8] sm:$0xff] }
 0x37d   :  { %7683 = vmatmul.mubr.msk.f32.gmra.mrb[82].mxu0 %vm10529_vm4, %v10648_v52  ;;  %v4169_v52 = vld [vmem:[#allocation8 + $0x28] sm:$0xff] }
 0x37e   :  { %4361 = vmatprep.mubr.f32.mxu0 %v10662_v23  ;;  %7112 = vmatpush1.bf16.msra.mxu0 %v7111_v21  ;;  %v4181_v23 = vld [vmem:[#allocation8 + $0x88] sm:$0xff]  ;;  %v7120_v21 = vpack.c.bf16 %v6427_v31, %v6426_v50 }
 0x37f   :  { %7221 = vmatprep.subr.bf16.mxu0 %v7778_v22 }
 0x381   :  { %7685 = vmatmul.mubr.msk.f32.gmra.mrb[84].mxu0 %vm10529_vm4, %v10655_v44  ;;  %v4175_v44 = vld [vmem:[#allocation8 + $0x58] sm:$0xff] }
 0x382   :  { %4367 = vmatprep.mubr.f32.mxu0 %v10671_v27  ;;  %v4187_v27 = vld [vmem:[#allocation8 + $0xb8] sm:$0xff] }
 0x385   :  { %7687 = vmatmul.mubr.msk.f32.gmra.mrb[86].mxu0 %vm10529_vm4, %v10666_v40  ;;  %v4184_v40 = vld [vmem:[#allocation8 + $0xa0] sm:$0xff] }
 0x386   :  { %4373 = vmatprep.mubr.f32.mxu0 %v10681_v19 }
 0x389   :  { %7689 = vmatmul.mubr.msk.f32.gmra.mrb[88].mxu0 %vm10529_vm4, %v10673_v2 }
 0x38a   :  { %4379 = vmatprep.mubr.f32.mxu0 %v10693_v14 }
 0x38d   :  { %7691 = vmatmul.mubr.msk.f32.gmra.mrb[90].mxu0 %vm10529_vm4, %v10684_v3 }
 0x38e   :  { %4385 = vmatprep.mubr.f32.mxu0 %v10701_v35 }
 0x391   :  { %7693 = vmatmul.mubr.msk.f32.gmra.mrb[92].mxu0 %vm10529_vm4, %v10695_v25 }
 0x392   :  { %4391 = vmatprep.mubr.f32.mxu0 %v10714_v61 }
 0x395   :  { %7695 = vmatmul.mubr.msk.f32.gmra.mrb[94].mxu0 %vm10529_vm4, %v10704_v18 }
 0x396   :  { %4462 = vmatprep.mubr.f32.mxu0 %v10594_v10 }
 0x399   :  { %6413 = vmatmul.mubr.msk.f32.vlgmr.msra.gmra.mrb[80].mxu0 %vm3304_vm2, %v4166_v28  ;;  %v6428_v28 = vld [vmem:[%s11562_s5 + $0xf0] sm:$0xff] }
 0x39a   :  { %4468 = vmatprep.mubr.f32.mxu0 %v10594_v10 }
 0x39d   :  { %6414 = vmatmul.mubr.msk.f32.gmra.mrb[82].mxu0 %vm3304_vm2, %v4169_v52  ;;  %v6429_v52 = vld [vmem:[%s11562_s5 + $0xf8] sm:$0xff] }
 0x39e   :  { %4474 = vmatprep.mubr.f32.mxu0 %v10594_v10 }
 0x3a1   :  { %6415 = vmatmul.mubr.msk.f32.gmra.mrb[84].mxu0 %vm3304_vm2, %v4172_v11  ;;  %v7123_v11 = vpack.c.bf16 %v6429_v52, %v6428_v28 }
 0x3a2   :  { %4480 = vmatprep.mubr.f32.mxu0 %v10594_v10 }
 0x3a5   :  { %6416 = vmatmul.mubr.msk.f32.gmra.mrb[86].mxu0 %vm3304_vm2, %v4175_v44  ;;  %v6430_v44 = vld [vmem:[%s11562_s5 + $0x100] sm:$0xff] }
 0x3a6   :  { %4486 = vmatprep.mubr.f32.mxu0 %v10594_v10 }
 0x3a9   :  { %6417 = vmatmul.mubr.msk.f32.gmra.mrb[88].mxu0 %vm3304_vm2, %v4178_v17  ;;  %v6431_v17 = vld [vmem:[%s11562_s5 + $0x108] sm:$0xff] }
 0x3aa   :  { %4492 = vmatprep.mubr.f32.mxu0 %v10594_v10 }
 0x3ad   :  { %6418 = vmatmul.mubr.msk.f32.gmra.mrb[90].mxu0 %vm3304_vm2, %v4181_v23  ;;  %v7126_v23 = vpack.c.bf16 %v6431_v17, %v6430_v44  ;;  %v6445_v44 = vld [vmem:[%s11562_s5 + $0x178] sm:$0xff] }
 0x3ae   :  { %4498 = vmatprep.mubr.f32.mxu0 %v10594_v10 }
 0x3b1   :  { %6419 = vmatmul.mubr.msk.f32.gmra.mrb[92].mxu0 %vm3304_vm2, %v4184_v40  ;;  %v6432_v40 = vld [vmem:[%s11562_s5 + $0x110] sm:$0xff] }
 0x3b2   :  { %4504 = vmatprep.mubr.f32.mxu0 %v10594_v10 }
 0x3b5   :  { %6420 = vmatmul.mubr.msk.f32.gmra.mrb[94].mxu0 %vm3304_vm2, %v4187_v27  ;;  %v6433_v27 = vld [vmem:[%s11562_s5 + $0x118] sm:$0xff] }
 0x3ec   :  { %v3867_v2 = vpop.f32.mrb[64].mxu0 }
 0x3ed   :  { %v11018_v19 = vadd.f32 %v10936_v26, %v3867_v2  ;;  %v3869_v3 = vpop.f32.mrb[65].mxu0  ;;  %v7129_v2 = vpack.c.bf16 %v6433_v27, %v6432_v40 }
 0x3ee   :  { %v11021_v14 = vadd.f32 %v10944_v32, %v3869_v3  ;;  %v6424_v32 = vld [vmem:[%s11562_s5 + $0xd0] sm:$0xff]  ;;  %v6434_v3 = vld [vmem:[%s11562_s5 + $0x120] sm:$0xff] }
 0x3ef   :  { %v7117_v54 = vpack.c.bf16 %v6425_v45, %v6424_v32  ;;  %v6443_v45 = vld [vmem:[%s11562_s5 + $0x168] sm:$0xff] }
 0x3f0   :  { %v3873_v25 = vpop.f32.mrb[66].mxu0 }
 0x3f1   :  { %v3875_v35 = vpop.f32.mrb[67].mxu0  ;;  %7118 = vmatpush1.bf16.msra.mxu1 %v7117_v54  ;;  %v7144_v54 = vpack.c.bf16 %v6443_v45, %v6442_v53  ;;  %v4622_v53 = vld [vmem:[%s11562_s5 + $0x58] sm:$0xff] }
 0x3f2   :  { %7119 = vmatprep.subr.bf16.mxu1 %v7778_v22 }
 0x3f4   :  { %v3879_v18 = vpop.f32.mrb[68].mxu0 }
 0x3f5   :  { %v3881_v61 = vpop.f32.mrb[69].mxu0  ;;  %7121 = vmatpush1.bf16.msra.mxu1 %v7120_v21 }
 0x3f6   :  { %7122 = vmatprep.subr.bf16.mxu1 %v7778_v22 }
 0x3f8   :  { %v3885_v57 = vpop.f32.mrb[70].mxu0 }
 0x3f9   :  { %v3887_v39 = vpop.f32.mrb[71].mxu0  ;;  %7124 = vmatpush1.bf16.msra.mxu1 %v7123_v11  ;;  %v6444_v11 = vld [vmem:[%s11562_s5 + $0x170] sm:$0xff] }
 0x3fa   :  { %7125 = vmatprep.subr.bf16.mxu1 %v7778_v22 }
 0x3fc   :  { %v3891_v47 = vpop.f32.mrb[72].mxu0 }
 0x3fd   :  { %v3893_v58 = vpop.f32.mrb[73].mxu0  ;;  %7127 = vmatpush1.bf16.msra.mxu1 %v7126_v23  ;;  %v7147_v23 = vpack.c.bf16 %v6445_v44, %v6444_v11  ;;  %v4630_v11 = vld [vmem:[%s11562_s5 + $0x98] sm:$0xff] }
 0x3fe   :  { %7128 = vmatprep.subr.bf16.mxu1 %v7778_v22 }
 0x400   :  { %v3897_v13 = vpop.f32.mrb[74].mxu0  ;;  %v4010_v9 = vpop.f32.mrb[66].mxu1 }
 0x401   :  { %v11023_v38 = vadd.f32 %v4010_v9, %v3873_v25  ;;  %v3899_v42 = vpop.f32.mrb[75].mxu0  ;;  %v4012_v12 = vpop.f32.mrb[67].mxu1  ;;  %v6435_v25 = vld [vmem:[%s11562_s5 + $0x128] sm:$0xff]  ;;  %7130 = vmatpush1.bf16.msra.mxu1 %v7129_v2 }
 0x402   :  { %v11025_v33 = vadd.f32 %v4012_v12, %v3875_v35  ;;  %v7132_v35 = vpack.c.bf16 %v6435_v25, %v6434_v3  ;;  %7131 = vmatprep.subr.bf16.mxu1 %v7778_v22 }
 0x404   :  { %v3903_v55 = vpop.f32.mrb[76].mxu0  ;;  %v4016_v56 = vpop.f32.mrb[68].mxu1 }
 0x405   :  { %v11027_v5 = vadd.f32 %v4016_v56, %v3879_v18  ;;  %v3905_v48 = vpop.f32.mrb[77].mxu0  ;;  %v4018_v37 = vpop.f32.mrb[69].mxu1  ;;  %v6436_v18 = vld [vmem:[%s11562_s5 + $0x130] sm:$0xff]  ;;  %7133 = vmatpush1.bf16.msra.mxu1 %v7132_v35 }
 0x406   :  { %v11029_v62 = vadd.f32 %v4018_v37, %v3881_v61  ;;  %v6437_v61 = vld [vmem:[%s11562_s5 + $0x138] sm:$0xff]  ;;  %7134 = vmatprep.subr.bf16.mxu1 %v7778_v22 }
 0x408   :  { %v3909_v43 = vpop.f32.mrb[78].mxu0  ;;  %v4022_v51 = vpop.f32.mrb[70].mxu1 }
 0x409   :  { %v11031_v29 = vadd.f32 %v4022_v51, %v3885_v57  ;;  %v3911_v41 = vpop.f32.mrb[79].mxu0  ;;  %v4024_v0 = vpop.f32.mrb[71].mxu1  ;;  %v7135_v57 = vpack.c.bf16 %v6437_v61, %v6436_v18 }
 0x40a   :  { %v11033_v59 = vadd.f32 %v4024_v0, %v3887_v39 }
 0x40b   :  { %7136 = vmatpush1.bf16.msra.mxu1 %v7135_v57 }
 0x40c   :  { %v4028_v63 = vpop.f32.mrb[72].mxu1  ;;  %7137 = vmatprep.subr.bf16.mxu1 %v7778_v22 }
 0x40d   :  { %v11035_v49 = vadd.f32 %v4028_v63, %v3891_v47  ;;  %v4030_v20 = vpop.f32.mrb[73].mxu1 }
 0x40e   :  { %v11037_v34 = vadd.f32 %v4030_v20, %v3893_v58 }
 0x410   :  { %v4034_v15 = vpop.f32.mrb[74].mxu1 }
 0x411   :  { %v11039_v8 = vadd.f32 %v4034_v15, %v3897_v13  ;;  %v4036_v1 = vpop.f32.mrb[75].mxu1 }
 0x412   :  { %v11041_v26 = vadd.f32 %v4036_v1, %v3899_v42 }
 0x414   :  { %v4040_v60 = vpop.f32.mrb[76].mxu1 }
 0x415   :  { %v11052_v24 = vadd.f32 %v4040_v60, %v3903_v55  ;;  %v4042_v30 = vpop.f32.mrb[77].mxu1 }
 0x416   :  { %v11061_v36 = vadd.f32 %v4042_v30, %v3905_v48 }
 0x418   :  { %v4046_v46 = vpop.f32.mrb[78].mxu1 }
 0x419   :  { %v11070_v7 = vadd.f32 %v4046_v46, %v3909_v43  ;;  %v4048_v10 = vpop.f32.mrb[79].mxu1 }
 0x41a   :  { %v11072_v6 = vadd.f32 %v4048_v10, %v3911_v41 }
 0x46c   :  { %v4464_v39 = vpop.f32.mrb[80].mxu0 }
 0x46d   :  { %v7264_v47 = vadd.f32 %v11018_v19, %v4464_v39  ;;  %v4466_v58 = vpop.f32.mrb[81].mxu0 }
 0x46e   :  { %v7266_v13 = vadd.f32 %v11021_v14, %v4466_v58  ;;  %v6438_v14 = vld [vmem:[%s11562_s5 + $0x140] sm:$0xff] }
 0x470   :  { %v4470_v9 = vpop.f32.mrb[82].mxu0 }
 0x471   :  { %v7268_v42 = vadd.f32 %v11023_v38, %v4470_v9  ;;  %v4472_v12 = vpop.f32.mrb[83].mxu0  ;;  %v6439_v38 = vld [vmem:[%s11562_s5 + $0x148] sm:$0xff] }
 0x472   :  { %v7270_v55 = vadd.f32 %v11025_v33, %v4472_v12  ;;  %v7138_v33 = vpack.c.bf16 %v6439_v38, %v6438_v14 }
 0x474   :  { %v4476_v56 = vpop.f32.mrb[84].mxu0  ;;  %7139 = vmatpush1.bf16.msra.mxu1 %v7138_v33  ;;  %v4614_v33 = vld [vmem:[%s11562_s5 + $0x18] sm:$0xff] }
 0x475   :  { %v7272_v48 = vadd.f32 %v11027_v5, %v4476_v56  ;;  %v4478_v37 = vpop.f32.mrb[85].mxu0  ;;  %7140 = vmatprep.subr.bf16.mxu1 %v7778_v22 }
 0x476   :  { %v7274_v43 = vadd.f32 %v11029_v62, %v4478_v37 }
 0x478   :  { %v4482_v51 = vpop.f32.mrb[86].mxu0 }
 0x479   :  { %v7276_v41 = vadd.f32 %v11031_v29, %v4482_v51  ;;  %v4484_v0 = vpop.f32.mrb[87].mxu0  ;;  %v6440_v29 = vld [vmem:[%s11562_s5 + $0x150] sm:$0xff]  ;;  %v4611_v51 = vld [vmem:[%s11562_s5] sm:$0xff] }
 0x47a   :  { %v7278_v19 = vadd.f32 %v11033_v59, %v4484_v0  ;;  %v6441_v59 = vld [vmem:[%s11562_s5 + $0x158] sm:$0xff] }
 0x47b   :  { %v7141_v1 = vpack.c.bf16 %v6441_v59, %v6440_v29  ;;  %v4616_v29 = vld [vmem:[%s11562_s5 + $0x28] sm:$0xff] }
 0x47c   :  { %v4488_v63 = vpop.f32.mrb[88].mxu0 }
 0x47d   :  { %v7280_v5 = vadd.f32 %v11035_v49, %v4488_v63  ;;  %v4490_v20 = vpop.f32.mrb[89].mxu0  ;;  %7142 = vmatpush1.bf16.msra.mxu1 %v7141_v1 }
 0x47e   :  { %v7282_v62 = vadd.f32 %v11037_v34, %v4490_v20  ;;  %v6421_v34 = vld [vmem:[%s11631_s26] ss:$0 sm:$0xff]  ;;  %7143 = vmatprep.subr.bf16.mxu1 %v7778_v22  ;;  %s7781_s26 = smov 96  }
 0x47f   :  { %v4527_v15 = vmax.f32 %v7264_v47, %v7280_v5 }
 0x480   :  { %v4528_v60 = vmax.f32 %v7266_v13, %v7282_v62  ;;  %v4494_v16 = vpop.f32.mrb[90].mxu0  ;;  %v4615_v62 = vld [vmem:[%s11562_s5 + $0x20] sm:$0xff] }
 0x481   :  { %v7284_v49 = vadd.f32 %v11039_v8, %v4494_v16  ;;  %v4496_v4 = vpop.f32.mrb[91].mxu0  ;;  %7145 = vmatpush1.bf16.msra.mxu1 %v7144_v54  ;;  %v7156_v59 = vpack.c.bf16 %v4616_v29, %v4615_v62  ;;  %v4608_v16 = vld [vmem:[#allocation10 + $0x8] sm:$0xff] }
 0x482   :  { %v4535_v32 = vmax.f32 %v4527_v15, %v4528_v60  ;;  %v7286_v30 = vadd.f32 %v11041_v26, %v4496_v4  ;;  %7146 = vmatprep.subr.bf16.mxu1 %v7778_v22  ;;  %v4617_v15 = vld [vmem:[%s11562_s5 + $0x30] sm:$0xff]  ;;  %v4618_v60 = vld [vmem:[%s11562_s5 + $0x38] sm:$0xff]  ;;  %v4619_v4 = vld [vmem:[%s11562_s5 + $0x40] sm:$0xff] }
 0x483   :  { %v4529_v8 = vmax.f32 %v7268_v42, %v7284_v49  ;;  %v7159_v49 = vpack.c.bf16 %v4618_v60, %v4617_v15  ;;  %v4624_v54 = vld [vmem:[%s11562_s5 + $0x68] sm:$0xff]  ;;  %v6469_v15 = vld [vmem:[%s11562_s5 + $0x218] sm:$0xff]  ;;  %v6470_v60 = vld [vmem:[%s11562_s5 + $0x220] sm:$0xff] }
 0x484   :  { %v4530_v46 = vmax.f32 %v7270_v55, %v7286_v30  ;;  %v4500_v50 = vpop.f32.mrb[92].mxu0  ;;  %v4546_v31 = vadd.f32 %v6421_v34, %v4535_v32  ;;  %v4621_v30 = vld [vmem:[%s11562_s5 + $0x50] sm:$0xff]  ;;  %v6467_v62 = vld [vmem:[%s11562_s5 + $0x208] sm:$0xff] }
 0x485   :  { %v7288_v10 = vadd.f32 %v11052_v24, %v4500_v50  ;;  %v4502_v21 = vpop.f32.mrb[93].mxu0  ;;  %7148 = vmatpush1.bf16.msra.mxu1 %v7147_v23  ;;  %v7165_v45 = vpack.c.bf16 %v4622_v53, %v4621_v30  ;;  %v4625_v50 = vld [vmem:[%s11562_s5 + $0x70] sm:$0xff]  ;;  %v4632_v23 = vld [vmem:[%s11562_s5 + $0xa8] sm:$0xff]  ;;  %v4953_v53 = vld [vmem:[%s11564_s7] sm:$0xff] }
 0x486   :  { %v4536_v26 = vmax.f32 %v4529_v8, %v4530_v46  ;;  %v7290_v28 = vadd.f32 %v11061_v36, %v4502_v21  ;;  %v4550_v52 = vmax.f32 %v4546_v31, 0.0  ;;  %7149 = vmatprep.subr.bf16.mxu1 %v7778_v22  ;;  %v4623_v8 = vld [vmem:[%s11562_s5 + $0x60] sm:$0xff]  ;;  %v4626_v31 = vld [vmem:[%s11562_s5 + $0x78] sm:$0xff] }
 0x487   :  { %v4531_v17 = vmax.f32 %v7272_v48, %v7288_v10  ;;  %v7168_v46 = vpack.c.bf16 %v4624_v54, %v4623_v8  ;;  %v7171_v10 = vpack.c.bf16 %v4626_v31, %v4625_v50  ;;  %v4627_v21 = vld [vmem:[%s11562_s5 + $0x80] sm:$0xff]  ;;  %v4955_v8 = vld [vmem:[%s11564_s7 + $0x10] sm:$0xff]  ;;  %v4956_v54 = vld [vmem:[%s11564_s7 + $0x18] sm:$0xff] }
 0x488   :  { %v4532_v40 = vmax.f32 %v7274_v43, %v7290_v28  ;;  %4558 = vrot.lane.b32.xlu0 %v4550_v52, %s7779_s21  ;;  %v4506_v24 = vpop.f32.mrb[94].mxu0  ;;  %v4547_v27 = vadd.f32 %v6421_v34, %v4536_v26  ;;  %v4628_v26 = vld [vmem:[%s11562_s5 + $0x88] sm:$0xff]  ;;  %v4629_v52 = vld [vmem:[%s11562_s5 + $0x90] sm:$0xff]  ;;  %v7225_v63 = vpack.c.bf16 %v4956_v54, %v4955_v8 }
 0x489   :  { %v7292_v36 = vadd.f32 %v11070_v7, %v4506_v24  ;;  %v4508_v2 = vpop.f32.mrb[95].mxu0  ;;  %v7174_v28 = vpack.c.bf16 %v4628_v26, %v4627_v21  ;;  %v7177_v44 = vpack.c.bf16 %v4630_v11, %v4629_v52  ;;  %v4633_v24 = vld [vmem:[%s11562_s5 + $0xb0] sm:$0xff]  ;;  %v6476_v21 = vld [vmem:[%s11563_s6] ss:$0 sm:$0xff] }
 0x48a   :  { %v4537_v3 = vmax.f32 %v4531_v17, %v4532_v40  ;;  %v7294_v25 = vadd.f32 %v11072_v6, %v4508_v2  ;;  %v4551_v35 = vmax.f32 %v4547_v27, 0.0  ;;  %v4631_v17 = vld [vmem:[%s11562_s5 + $0xa0] sm:$0xff]  ;;  %v4634_v27 = vld [vmem:[%s11562_s5 + $0xb8] sm:$0xff] }
 0x48b   :  { %v4533_v18 = vmax.f32 %v7276_v41, %v7292_v36  ;;  %v4612_v41 = vld [vmem:[%s11562_s5 + $0x8] sm:$0xff]  ;;  %v7180_v40 = vpack.c.bf16 %v4632_v23, %v4631_v17  ;;  %v7183_v36 = vpack.c.bf16 %v4634_v27, %v4633_v24  ;;  %v6450_v2 = vld [vmem:[%s11562_s5 + $0x180] sm:$0xff] }
 0x48c   :  { %v4534_v61 = vmax.f32 %v7278_v19, %v7294_v25  ;;  %4560 = vrot.lane.b32.xlu0 %v4551_v35, %s7779_s21  ;;  %v4548_v57 = vadd.f32 %v6421_v34, %v4537_v3  ;;  %v7150_v0 = vpack.c.bf16 %v4612_v41, %v4611_v51  ;;  %v4613_v19 = vld [vmem:[%s11562_s5 + $0x10] sm:$0xff]  ;;  %v6451_v3 = vld [vmem:[%s11562_s5 + $0x188] sm:$0xff]  ;;  %v6461_v51 = vld [vmem:[%s11562_s5 + $0x1d8] sm:$0xff] }
 0x48d   :  { %v7153_v5 = vpack.c.bf16 %v4614_v33, %v4613_v19  ;;  %v7186_v25 = vpack.c.bf16 %v6451_v3, %v6450_v2  ;;  %v6452_v35 = vld [vmem:[%s11562_s5 + $0x190] sm:$0xff]  ;;  %v6463_v19 = vld [vmem:[%s11562_s5 + $0x1e8] sm:$0xff]  ;;  %v6465_v33 = vld [vmem:[%s11562_s5 + $0x1f8] sm:$0xff] }
 0x48e   :  { %v4538_v39 = vmax.f32 %v4533_v18, %v4534_v61  ;;  %v4552_v47 = vmax.f32 %v4548_v57, 0.0  ;;  %v6453_v18 = vld [vmem:[%s11562_s5 + $0x198] sm:$0xff]  ;;  %v11289_v61 = vld [vmem:[#allocation2] sm:$0xff] }
 0x48f   :  { %6540 = vmatprep.mubr.msk.f32.mxu0 %vm7780_vm7, %v11289_v61 }
 0x490   :  { %4562 = vrot.lane.b32.xlu1 %v4552_v47, %s7779_s21  ;;  %v4549_v58 = vadd.f32 %v6421_v34, %v4538_v39  ;;  %v4620_v34 = vld [vmem:[%s11562_s5 + $0x48] sm:$0xff]  ;;  %v7189_v39 = vpack.c.bf16 %v6453_v18, %v6452_v35  ;;  %v6454_v47 = vld [vmem:[%s11562_s5 + $0x1a0] sm:$0xff] }
 0x491   :  { %v7162_v32 = vpack.c.bf16 %v4620_v34, %v4619_v4  ;;  %v6472_v4 = vld [vmem:[%s11562_s5 + $0x230] sm:$0xff]  ;;  %v6473_v34 = vld [vmem:[%s11562_s5 + $0x238] sm:$0xff]  ;;  %v5067_v35 = vld [vmem:[%s11568_s11] sm:$0xff] }
 0x492   :  { %v4553_v13 = vmax.f32 %v4549_v58, 0.0  ;;  %v6455_v58 = vld [vmem:[%s11562_s5 + $0x1a8] sm:$0xff] }
 0x493   :  { %v5068_v18 = vld [vmem:[%s11568_s11 + $0x8] sm:$0xff] }
 0x494   :  { %4564 = vrot.lane.b32.xlu1 %v4553_v13, %s7779_s21 }
 0x4fa   :  { %v4559_v7 = vpop.permute.xlu0 %4558 }
 0x4fb   :  { %v4574_v9 = vsel %vm3304_vm2, %v4559_v7, 0.0 }
 0x4fc   :  { %4580 = vst.msk [vmem:[#allocation9 + $0x8] sm:$0xff] %vm4579_vm5, %v4574_v9  ;;  %v6456_v9 = vld [vmem:[%s11562_s5 + $0x1b0] sm:$0xff] }
 0x4fe   :  { %v11164_v6 = vpop.permute.xlu0 %4560 }
 0x4ff   :  { %v4575_v42 = vsel %vm3304_vm2, %v11164_v6, 0.0 }
 0x500   :  { %4582 = vst.msk [vmem:[#allocation9 + $0x18] sm:$0xff] %vm4579_vm5, %v4575_v42  ;;  %v6457_v42 = vld [vmem:[%s11562_s5 + $0x1b8] sm:$0xff] }
 0x502   :  { %v4563_v12 = vpop.permute.xlu1 %4562 }
 0x503   :  { %v4590_v55 = vld [vmem:[#allocation9 + $0x8] sm:$0xff]  ;;  %v4576_v56 = vsel %vm3304_vm2, %v4563_v12, 0.0 }
 0x504   :  { %4592 = vst.msk [vmem:[#allocation11 + $0x8] sm:$0xff] %vm4579_vm5, %v4590_v55  ;;  %4584 = vst.msk [vmem:[#allocation9 + $0x28] sm:$0xff] %vm4579_vm5, %v4576_v56  ;;  %v6458_v55 = vld [vmem:[%s11562_s5 + $0x1c0] sm:$0xff]  ;;  %v6459_v56 = vld [vmem:[%s11562_s5 + $0x1c8] sm:$0xff] }
 0x506   :  { %v11172_v48 = vpop.permute.xlu1 %4564 }
 0x507   :  { %v4594_v37 = vld [vmem:[#allocation9 + $0x18] sm:$0xff]  ;;  %v4577_v43 = vsel %vm3304_vm2, %v11172_v48, 0.0 }
 0x508   :  { %4596 = vst.msk [vmem:[#allocation12 + $0x8] sm:$0xff] %vm4579_vm5, %v4594_v37  ;;  %4598 = vst.msk [vmem:[#allocation10 + $0x18] sm:$0xff] %vm4579_vm5, %v4594_v37  ;;  %v7198_v37 = vpack.c.bf16 %v6459_v56, %v6458_v55  ;;  %v6479_v55 = vld [vmem:[%s11566_s9] ss:$0 sm:$0xff] }
 0x509   :  { %4586 = vst.msk [vmem:[#allocation9 + $0x38] sm:$0xff] %vm4579_vm5, %v4577_v43  ;;  %v6460_v43 = vld [vmem:[%s11562_s5 + $0x1d0] sm:$0xff] }
 0x50a   :  { %v7201_v41 = vpack.c.bf16 %v6461_v51, %v6460_v43  ;;  %v5154_v43 = vld [vmem:[%s11570_s13 + $0x8] sm:$0xff]  ;;  %v6480_v51 = vld [vmem:[%s11567_s10] ss:$0 sm:$0xff] }
 0x50b   :  { %v4600_v14 = vld [vmem:[#allocation9 + $0x28] sm:$0xff] }
 0x50c   :  { %v4636_v38 = vld [vmem:[#allocation11 + $0x8] sm:$0xff]  ;;  %4602 = vst.msk [vmem:[#allocation11 + $0x18] sm:$0xff] %vm4579_vm5, %v4600_v14 }
 0x50d   :  { %6446 = vmatprep.mubr.msk.f32.mxu1 %vm4579_vm5, %v4636_v38  ;;  %v6464_v38 = vld [vmem:[%s11562_s5 + $0x1f0] sm:$0xff] }
 0x50e   :  { %7697 = vmatmul.mubr.msk.f32.vlgmr.msra.gmra.mrb[80].mxu1 %vm11194_vm6, %v4559_v7  ;;  %v7192_v7 = vpack.c.bf16 %v6455_v58, %v6454_v47  ;;  %v5070_v47 = vld [vmem:[%s11568_s11 + $0x18] sm:$0xff] }
 0x50f   :  { %7151 = vmatpush1.bf16.msra.mxu1 %v7150_v0  ;;  %v4610_v57 = vld [vmem:[#allocation10 + $0x18] sm:$0xff]  ;;  %v4827_v13 = vld [vmem:[#allocation12 + $0x8] sm:$0xff]  ;;  %v6462_v0 = vld [vmem:[%s11562_s5 + $0x1e0] sm:$0xff] }
 0x510   :  { %v4604_v20 = vld [vmem:[#allocation9 + $0x38] sm:$0xff]  ;;  %7152 = vmatprep.subr.bf16.mxu1 %v7778_v22  ;;  %v7204_v14 = vpack.c.bf16 %v6463_v19, %v6462_v0 }
 0x511   :  { %4606 = vst.msk [vmem:[#allocation12 + $0x18] sm:$0xff] %vm4579_vm5, %v4604_v20  ;;  %v6466_v20 = vld [vmem:[%s11562_s5 + $0x200] sm:$0xff] }
 0x512   :  { %v7210_v29 = vpack.c.bf16 %v6467_v62, %v6466_v20 }
 0x513   :  { %7154 = vmatpush1.bf16.msra.mxu1 %v7153_v5  ;;  %v4638_v1 = vld [vmem:[#allocation11 + $0x18] sm:$0xff]  ;;  %v7207_v5 = vpack.c.bf16 %v6465_v33, %v6464_v38 }
 0x514   :  { %7155 = vmatprep.subr.bf16.mxu1 %v7778_v22  ;;  %6447 = vmatprep.mubr.msk.f32.mxu1 %vm4579_vm5, %v4638_v1  ;;  %v5156_v38 = vld [vmem:[%s11570_s13 + $0x18] sm:$0xff] }
 0x515   :  { %7699 = vmatmul.mubr.msk.f32.gmra.mrb[82].mxu1 %vm11194_vm6, %v4563_v12  ;;  %v7195_v12 = vpack.c.bf16 %v6457_v42, %v6456_v9 }
 0x516   :  { %6448 = vmatprep.mubr.msk.f32.mxu1 %vm4579_vm5, %v4608_v16  ;;  %v6471_v16 = vld [vmem:[%s11562_s5 + $0x228] sm:$0xff] }
 0x517   :  { %7157 = vmatpush1.bf16.msra.mxu1 %v7156_v59  ;;  %v6468_v59 = vld [vmem:[%s11562_s5 + $0x210] sm:$0xff] }
 0x518   :  { %7158 = vmatprep.subr.bf16.mxu1 %v7778_v22  ;;  %v7213_v1 = vpack.c.bf16 %v6469_v15, %v6468_v59  ;;  %v4829_v30 = vld [vmem:[#allocation12 + $0x18] sm:$0xff] }
 0x51b   :  { %7160 = vmatpush1.bf16.msra.mxu1 %v7159_v49  ;;  %v7216_v49 = vpack.c.bf16 %v6471_v16, %v6470_v60 }
 0x51c   :  { %7161 = vmatprep.subr.bf16.mxu1 %v7778_v22 }
 0x51f   :  { %7163 = vmatpush1.bf16.msra.mxu1 %v7162_v32  ;;  %v7219_v32 = vpack.c.bf16 %v6473_v34, %v6472_v4 }
 0x520   :  { %7164 = vmatprep.subr.bf16.mxu1 %v7778_v22 }
 0x523   :  { %7166 = vmatpush1.bf16.msra.mxu1 %v7165_v45  ;;  %v4954_v45 = vld [vmem:[%s11564_s7 + $0x8] sm:$0xff] }
 0x524   :  { %7167 = vmatprep.subr.bf16.mxu1 %v7778_v22 }
 0x527   :  { %7169 = vmatpush1.bf16.msra.mxu1 %v7168_v46 }
 0x528   :  { %7170 = vmatprep.subr.bf16.mxu1 %v7778_v22 }
 0x52b   :  { %7172 = vmatpush1.bf16.msra.mxu1 %v7171_v10 }
 0x52c   :  { %7173 = vmatprep.subr.bf16.mxu1 %v7778_v22 }
 0x52f   :  { %7175 = vmatpush1.bf16.msra.mxu1 %v7174_v28 }
 0x530   :  { %7176 = vmatprep.subr.bf16.mxu1 %v7778_v22 }
 0x533   :  { %7178 = vmatpush1.bf16.msra.mxu1 %v7177_v44  ;;  %v6477_v44 = vld [vmem:[%s11565_s8] ss:$0 sm:$0xff] }
 0x534   :  { %7179 = vmatprep.subr.bf16.mxu1 %v7778_v22 }
 0x537   :  { %7181 = vmatpush1.bf16.msra.mxu1 %v7180_v40 }
 0x538   :  { %7182 = vmatprep.subr.bf16.mxu1 %v7778_v22 }
 0x53b   :  { %7184 = vmatpush1.bf16.msra.mxu1 %v7183_v36 }
 0x53c   :  { %7185 = vmatprep.subr.bf16.mxu1 %v7778_v22 }
 0x53e   :  { %4816 = vmatmul.mubr.f32.vlgmr.msra.gmra.mrb[80].mxu1 %v11289_v61 }
 0x53f   :  { %6449 = vmatprep.mubr.msk.f32.mxu1 %vm4579_vm5, %v4610_v57  ;;  %7187 = vmatpush1.bf16.msra.mxu1 %v7186_v25  ;;  %v7228_v57 = vpack.c.bf16 %v5068_v18, %v5067_v35 }
 0x540   :  { %7188 = vmatprep.subr.bf16.mxu1 %v7778_v22 }
 0x542   :  { %7701 = vmatmul.mubr.msk.f32.gmra.mrb[82].mxu1 %vm11194_vm6, %v11164_v6 }
 0x543   :  { %7190 = vmatpush1.bf16.msra.mxu1 %v7189_v39  ;;  %6474 = vmatprep.mubr.msk.f32.mxu1 %vm4579_vm5, %v4827_v13  ;;  %v5069_v39 = vld [vmem:[%s11568_s11 + $0x10] sm:$0xff]  ;;  %v5152_v13 = vld [vmem:[%s11574_s17] sm:$0x3] }
 0x544   :  { %7191 = vmatprep.subr.bf16.mxu1 %v7778_v22  ;;  %v7231_v58 = vpack.c.bf16 %v5070_v47, %v5069_v39 }
 0x547   :  { %7193 = vmatpush1.bf16.msra.mxu1 %v7192_v7 }
 0x548   :  { %7194 = vmatprep.subr.bf16.mxu1 %v7778_v22 }
 0x54b   :  { %7196 = vmatpush1.bf16.msra.mxu1 %v7195_v12 }
 0x54c   :  { %7197 = vmatprep.subr.bf16.mxu1 %v7778_v22 }
 0x54f   :  { %7199 = vmatpush1.bf16.msra.mxu1 %v7198_v37  ;;  %v5153_v37 = vld [vmem:[%s11570_s13] sm:$0xff] }
 0x550   :  { %7200 = vmatprep.subr.bf16.mxu1 %v7778_v22  ;;  %v11433_v0 = vpack.c.bf16 %v5154_v43, %v5153_v37 }
 0x553   :  { %7202 = vmatpush1.bf16.msra.mxu1 %v7201_v41 }
 0x554   :  { %7203 = vmatprep.subr.bf16.mxu1 %v7778_v22 }
 0x557   :  { %7205 = vmatpush1.bf16.msra.mxu1 %v7204_v14  ;;  %v5155_v14 = vld [vmem:[%s11570_s13 + $0x10] sm:$0xff] }
 0x558   :  { %7206 = vmatprep.subr.bf16.mxu1 %v7778_v22  ;;  %v11443_v33 = vpack.c.bf16 %v5156_v38, %v5155_v14 }
 0x55b   :  { %7208 = vmatpush1.bf16.msra.mxu1 %v7207_v5  ;;  %v5151_v5 = vld [vmem:[%s11573_s16] sm:$0x3]  ;;  %s7782_s16 = smov 64  }
 0x55c   :  { %7209 = vmatprep.subr.bf16.mxu1 %v7778_v22 }
 0x55f   :  { %7211 = vmatpush1.bf16.msra.mxu1 %v7210_v29  ;;  %v6481_v29 = vld [vmem:[%s11569_s12] ss:$0 sm:$0xff] }
 0x560   :  { %7212 = vmatprep.subr.bf16.mxu1 %v7778_v22 }
 0x563   :  { %7214 = vmatpush1.bf16.msra.mxu1 %v7213_v1 }
 0x564   :  { %7215 = vmatprep.subr.bf16.mxu1 %v7778_v22 }
 0x567   :  { %7217 = vmatpush1.bf16.msra.mxu1 %v7216_v49 }
 0x568   :  { %7218 = vmatprep.subr.bf16.mxu1 %v7778_v22 }
 0x56b   :  { %7220 = vmatpush1.bf16.msra.mxu1 %v7219_v32 }
 0x56c   :  { %7227 = vmatprep.subr.bf16.mxu1 %v7778_v22 }
 0x56e   :  { %7703 = vmatmul.mubr.msk.f32.vlgmr.msra.gmra.mrb[80].mxu1 %vm11194_vm6, %v11164_v6  ;;  %v7222_v6 = vpack.c.bf16 %v4954_v45, %v4953_v53 }
 0x56f   :  { %6475 = vmatprep.mubr.msk.f32.mxu1 %vm4579_vm5, %v4829_v30  ;;  %7229 = vmatpush3.bf16.msra.mxu1 %v7228_v57 }
 0x570   :  { %7223 = vmatpush3.bf16.msra.mxu0 %v7222_v6  ;;  %7230 = vmatprep.subr.bf16.mxu1 %v7778_v22 }
 0x571   :  { %7224 = vmatprep.subr.bf16.mxu0 %v7778_v22 }
 0x572   :  { %7705 = vmatmul.mubr.msk.f32.gmra.mrb[82].mxu1 %vm11194_vm6, %v11172_v48 }
 0x573   :  { %6551 = vmatprep.mubr.msk.f32.mxu1 %vm7780_vm7, %v11289_v61  ;;  %7232 = vmatpush3.bf16.msra.mxu1 %v7231_v58 }
 0x574   :  { %7226 = vmatpush3.bf16.msra.mxu0 %v7225_v63  ;;  %7233 = vmatprep.subr.bf16.mxu1 %v7778_v22 }
 0x641   :  { %v4927_v48 = vpop.f32.mrb[80].mxu1 }
 0x642   :  { %v4929_v46 = vpop.f32.mrb[81].mxu1 }
 0x645   :  { %v4932_v50 = vpop.f32.mrb[82].mxu1 }
 0x646   :  { %v4938_v31 = vmax.f32 %v4927_v48, %v4932_v50  ;;  %v4934_v10 = vpop.f32.mrb[83].mxu1 }
 0x648   :  { %4940 = vrot.lane.b32.xlu0 %v4938_v31, %s7781_s26 }
 0x6ba   :  { %v4941_v26 = vpop.permute.xlu0 %4940 }
 0x6bb   :  { %v4943_v28 = vmax.f32 %v4938_v31, %v4941_v26 }
 0x6bd   :  { %v4951_v52 = vadd.f32 %v6476_v21, %v4943_v28 }
 0x6bf   :  { %v4952_v11 = vmax.f32 %v4951_v52, 0.0 }
 0x6c1   :  { %6541 = vmatmul.mubr.msk.f32.vlgmr.msra.gmra.mrb[96].mxu0 %vm3304_vm2, %v4952_v11 }
 0x794   :  { %v5033_v17 = vpop.f32.mrb[96].mxu0 }
 0x795   :  { %v5034_v23 = vadd.f32 %v6477_v44, %v5033_v17  ;;  %v6542_v40 = vpop.f32.mrb[97].mxu0 }
 0x797   :  { %v5037_v24 = vsel %vm3304_vm2, %v5034_v23, 0.0 }
 0x798   :  { %5038 = vadd.xlane.f32.xlu1 %v5037_v24 }
 0x7a9   :  { %5240 = vrot.lane.b32.xlu1 %v5152_v13, %s7779_s21 }
 0x825   :  { %v5039_v27 = vpop.xlane.xlu1 %5038 }
 0x826   :  { %v5041_v36 = vmul.f32 0.03125, %v5039_v27 }
 0x828   :  { %v5042_v2 = vsub.f32 %v5034_v23, %v5041_v36 }
 0x829   :  { %v5241_v8 = vpop.permute.xlu1 %5240 }
 0x82a   :  { %v5043_v3 = vmul.f32 %v5042_v2, %v5042_v2 }
 0x82c   :  { %v5044_v25 = vsel %vm3304_vm2, %v5043_v3, 0.0 }
 0x82d   :  { %5045 = vadd.xlane.f32.xlu0 %v5044_v25 }
 0x8ba   :  { %v5046_v7 = vpop.xlane.xlu0 %5045 }
 0x8bb   :  { %v5047_v9 = vmul.f32 0.03125, %v5046_v7 }
 0x8bd   :  { %v5048_v42 = vadd.f32 1e-05, %v5047_v9 }
 0x8bf   :  { %7617 = vrsqrt.f32 %v5048_v42 }
 0x8c9   :  { %v7618_v12 = vpop.eup %7617 }
 0x8ca   :  { %v5050_v56 = vmul.f32 %v7618_v12, %v5042_v2 }
 0x8cc   :  { %v5058_v41 = vmul.f32 %v6479_v55, %v5050_v56 }
 0x8ce   :  { %v5066_v19 = vadd.f32 %v6480_v51, %v5058_v41 }
 0x8d0   :  { %6552 = vmatmul.mubr.msk.f32.vlgmr.msra.gmra.mrb[84].mxu1 %vm3304_vm2, %v5066_v19 }
 0x8d1   :  { %7235 = vmatpush3.bf16.msra.mxu1 %v11433_v0  ;;  %6562 = vmatprep.mubr.msk.f32.mxu1 %vm7780_vm7, %v11289_v61 }
 0x8d2   :  { %7236 = vmatprep.subr.bf16.mxu1 %v7778_v22 }
 0x8d5   :  { %7238 = vmatpush3.bf16.msra.mxu1 %v11443_v33 }
 0x8d6   :  { %7239 = vmatprep.subr.bf16.mxu1 %v7778_v22 }
 0x8d8   :  { %6563 = vmatmul.mubr.msk.f32.vlgmr.msra.gmra.mrb[86].mxu1 %vm3304_vm2, %v5151_v5 }
 0x8d9   :  { %7241 = vmatpush3.bf16.msra.mxu1 %v11433_v0  ;;  %6573 = vmatprep.mubr.msk.f32.mxu1 %vm7780_vm7, %v11289_v61 }
 0x8da   :  { %7242 = vmatprep.subr.bf16.mxu1 %v7778_v22 }
 0x8dd   :  { %7244 = vmatpush3.bf16.msra.mxu1 %v11443_v33 }
 0x8de   :  { %7245 = vmatprep.subr.bf16.mxu1 %v7778_v22 }
 0x9a3   :  { %v5147_v20 = vpop.f32.mrb[84].mxu1 }
 0x9a4   :  { %v6553_v62 = vpop.f32.mrb[85].mxu1  ;;  %v11463_v59 = vadd.f32 %v6481_v29, %v5147_v20 }
 0x9ab   :  { %v5226_v15 = vpop.f32.mrb[86].mxu1 }
 0x9ac   :  { %v5230_v1 = vadd.f32 %v5226_v15, %v11463_v59  ;;  %v6564_v60 = vpop.f32.mrb[87].mxu1 }
 0x9ae   :  { %v6484_v16 = vmul.f32 -1.442695, %v5230_v1 }
 0x9b0   :  { %7619 = vpow2.f32 %v6484_v16 }
 0x9ba   :  { %v7620_v49 = vpop.eup %7619 }
 0x9bb   :  { %v5234_v4 = vadd.f32 1.0, %v7620_v49 }
 0x9bd   :  { %7621 = vrcp.f32 %v5234_v4 }
 0x9c7   :  { %v7622_v34 = vpop.eup %7621 }
 0x9c8   :  { %v5237_v32 = vmul.f32 2.0, %v7622_v34  ;;  %v5243_v6 = vmul.f32 %v7622_v34, %v5241_v8 }
 0x9ca   :  { %v6485_v30 = vadd.f32 -1.0, %v5237_v32 }
 0x9cc   :  { %5245 = vrot.lane.b32.xlu0 %v6485_v30, %s7782_s16 }
 0xa3e   :  { %v5246_v53 = vpop.permute.xlu0 %5245 }
 0xa3f   :  { %v5248_v45 = vmul.f32 %v7622_v34, %v5246_v53 }
 0xa41   :  { %5250 = vrot.lane.b32.xlu1 %v5248_v45, %s7779_s21 }
 0xab3   :  { %v5251_v54 = vpop.permute.xlu1 %5250 }
 0xab4   :  { %v5253_v63 = vadd.f32 %v5251_v54, %v5243_v6 }
 0xab6   :  { %7623 = vtanh.f32 %v5253_v63  ;;  %v5348_v36 = vrot.slane %v5253_v63, 6 }
 0xac0   :  { %v7624_v48 = vpop.eup %7623 }
 0xac1   :  { %5256 = vrot.lane.b32.xlu0 %v7624_v48, %s7782_s16  ;;  %v5595_v48 = vld [vmem:[%s11571_s14 + $0x8] sm:$0xff] }
 0xb33   :  { %v5257_v46 = vpop.permute.xlu0 %5256 }
 0xb34   :  { %v5259_v50 = vmul.f32 %v7622_v34, %v5257_v46  ;;  %v5596_v46 = vld [vmem:[%s11571_s14 + $0x10] sm:$0xff] }
 0xb36   :  { %5261 = vrot.lane.b32.xlu1 %v5259_v50, %s7779_s21 }
 0xba8   :  { %v5262_v31 = vpop.permute.xlu1 %5261 }
 0xba9   :  { %6574 = vmatmul.mubr.msk.f32.vlgmr.msra.gmra.mrb[88].mxu1 %vm3304_vm2, %v5262_v31  ;;  %v5597_v31 = vld [vmem:[%s11571_s14 + $0x18] sm:$0xff] }
 0xbaa   :  { %7247 = vmatpush3.bf16.msra.mxu1 %v11433_v0  ;;  %6584 = vmatprep.mubr.msk.f32.mxu1 %vm7780_vm7, %v11289_v61 }
 0xbab   :  { %7248 = vmatprep.subr.bf16.mxu1 %v7778_v22 }
 0xbae   :  { %7250 = vmatpush3.bf16.msra.mxu1 %v11443_v33 }
 0xbaf   :  { %7251 = vmatprep.subr.bf16.mxu1 %v7778_v22 }
 0xc7c   :  { %v5331_v10 = vpop.f32.mrb[88].mxu1 }
 0xc7d   :  { %v5336_v21 = vrot.slane %v5331_v10, 6  ;;  %v6575_v26 = vpop.f32.mrb[89].mxu1  ;;  %v7261_v10 = vpack.c.bf16 %v5597_v31, %v5596_v46 }
 0xc7f   :  { %v5338_v28 = vadd.f32 %v5336_v21, %v11463_v59 }
 0xc81   :  { %v6487_v52 = vmul.f32 -1.442695, %v5338_v28 }
 0xc83   :  { %7625 = vpow2.f32 %v6487_v52 }
 0xc8d   :  { %v7626_v11 = vpop.eup %7625 }
 0xc8e   :  { %v5342_v44 = vadd.f32 1.0, %v7626_v11 }
 0xc90   :  { %7627 = vrcp.f32 %v5342_v44 }
 0xc9a   :  { %v7628_v17 = vpop.eup %7627 }
 0xc9b   :  { %v5345_v23 = vmul.f32 2.0, %v7628_v17  ;;  %v5350_v2 = vmul.f32 %v7628_v17, %v5348_v36 }
 0xc9d   :  { %v6488_v40 = vadd.f32 -1.0, %v5345_v23 }
 0xc9f   :  { %5352 = vrot.lane.b32.xlu0 %v6488_v40, %s7782_s16 }
 0xd11   :  { %v5353_v24 = vpop.permute.xlu0 %5352 }
 0xd12   :  { %v5355_v27 = vmul.f32 %v7628_v17, %v5353_v24 }
 0xd14   :  { %5357 = vrot.lane.b32.xlu1 %v5355_v27, %s7779_s21 }
 0xd86   :  { %v5358_v3 = vpop.permute.xlu1 %5357 }
 0xd87   :  { %v5360_v25 = vadd.f32 %v5358_v3, %v5350_v2 }
 0xd89   :  { %7629 = vtanh.f32 %v5360_v25 }
 0xd93   :  { %v7630_v35 = vpop.eup %7629 }
 0xd94   :  { %5363 = vrot.lane.b32.xlu0 %v7630_v35, %s7782_s16 }
 0xe06   :  { %v5364_v18 = vpop.permute.xlu0 %5363 }
 0xe07   :  { %v5366_v57 = vmul.f32 %v7628_v17, %v5364_v18 }
 0xe09   :  { %v5368_v39 = vrot.slane %v5366_v57, 2 }
 0xe0b   :  { %5369 = vrot.lane.b32.xlu1 %v5368_v39, %s7779_s21 }
 0xe7d   :  { %v5370_v47 = vpop.permute.xlu1 %5369 }
 0xe7e   :  { %6585 = vmatmul.mubr.msk.f32.vlgmr.msra.gmra.mrb[90].mxu1 %vm3304_vm2, %v5370_v47 }
 0xe7f   :  { %7253 = vmatpush3.bf16.msra.mxu1 %v11433_v0  ;;  %6595 = vmatprep.mubr.msk.f32.mxu1 %vm7780_vm7, %v11289_v61  ;;  %v5456_v0 = vrot.slane %v5360_v25, 6 }
 0xe80   :  { %7254 = vmatprep.subr.bf16.mxu1 %v7778_v22 }
 0xe83   :  { %7256 = vmatpush3.bf16.msra.mxu1 %v11443_v33 }
 0xe84   :  { %7257 = vmatprep.subr.bf16.mxu1 %v7778_v22 }
 0xf51   :  { %v5439_v58 = vpop.f32.mrb[90].mxu1 }
 0xf52   :  { %v5444_v13 = vrot.slane %v5439_v58, 4  ;;  %v6586_v7 = vpop.f32.mrb[91].mxu1 }
 0xf54   :  { %v5446_v9 = vadd.f32 %v5444_v13, %v11463_v59 }
 0xf56   :  { %v6490_v42 = vmul.f32 -1.442695, %v5446_v9 }
 0xf58   :  { %7631 = vpow2.f32 %v6490_v42 }
 0xf62   :  { %v7632_v12 = vpop.eup %7631 }
 0xf63   :  { %v5450_v55 = vadd.f32 1.0, %v7632_v12 }
 0xf65   :  { %7633 = vrcp.f32 %v5450_v55 }
 0xf6f   :  { %v7634_v56 = vpop.eup %7633 }
 0xf70   :  { %v5453_v37 = vmul.f32 2.0, %v7634_v56  ;;  %v5458_v19 = vmul.f32 %v7634_v56, %v5456_v0 }
 0xf72   :  { %v6491_v43 = vadd.f32 -1.0, %v5453_v37 }
 0xf74   :  { %5460 = vrot.lane.b32.xlu0 %v6491_v43, %s7782_s16 }
 0xfe6   :  { %v5461_v51 = vpop.permute.xlu0 %5460 }
 0xfe7   :  { %v5463_v41 = vmul.f32 %v7634_v56, %v5461_v51 }
 0xfe9   :  { %5465 = vrot.lane.b32.xlu1 %v5463_v41, %s7779_s21 }
0x105b   :  { %v5466_v14 = vpop.permute.xlu1 %5465 }
0x105c   :  { %v5468_v38 = vadd.f32 %v5466_v14, %v5458_v19 }
0x105e   :  { %7635 = vtanh.f32 %v5468_v38 }
0x1068   :  { %v7636_v33 = vpop.eup %7635 }
0x1069   :  { %5471 = vrot.lane.b32.xlu0 %v7636_v33, %s7782_s16 }
0x10db   :  { %v5472_v5 = vpop.permute.xlu0 %5471 }
0x10dc   :  { %v5474_v20 = vmul.f32 %v7634_v56, %v5472_v5 }
0x10de   :  { %v5476_v62 = vrot.slane %v5474_v20, 4 }
0x10e0   :  { %5477 = vrot.lane.b32.xlu1 %v5476_v62, %s7779_s21 }
0x1152   :  { %v5478_v29 = vpop.permute.xlu1 %5477 }
0x1153   :  { %6596 = vmatmul.mubr.msk.f32.vlgmr.msra.gmra.mrb[92].mxu1 %vm3304_vm2, %v5478_v29 }
0x1154   :  { %6606 = vmatprep.mubr.msk.f32.mxu1 %vm7780_vm7, %v11289_v61  ;;  %v5564_v61 = vrot.slane %v5468_v38, 6 }
0x1226   :  { %v5547_v15 = vpop.f32.mrb[92].mxu1 }
0x1227   :  { %v5552_v1 = vrot.slane %v5547_v15, 2  ;;  %v6597_v60 = vpop.f32.mrb[93].mxu1 }
0x1229   :  { %v5554_v16 = vadd.f32 %v5552_v1, %v11463_v59  ;;  %v5594_v59 = vld [vmem:[%s11571_s14] sm:$0xff]  ;;  %s7783_s14 = smov [#allocation15]  }
0x122a   :  { %v7258_v50 = vpack.c.bf16 %v5595_v48, %v5594_v59  ;;  %s5698_s25 = sshll.u32 %s7783_s14, 4  ;;  %s5699_s25 = int_to_ptr.vmem [resolvable:$true] %s5698_s25 }
0x122b   :  { %v6493_v49 = vmul.f32 -1.442695, %v5554_v16  ;;  %s7706_s11 = scalar_lea.vmem %s5699_s25, 32  ;;  %p7711_p1 = scmp.lt.s32.totalorder %s5699_s25, %s5699_s25 }
0x122c   :  { %7259 = vmatpush3.bf16.msra.mxu1 %v7258_v50  ;;  %p7707_p0 = scmp.ne.s32.totalorder %s5699_s25, %s7706_s11  ;;  %p7712_p2 = scmp.lt.s32.totalorder %s7706_s11, %s7706_s11 }
0x122d   :  { %7637 = vpow2.f32 %v6493_v49  ;;  %7260 = vmatprep.subr.bf16.mxu1 %v7778_v22 }
0x122e   :  { %p7713_p3 = por %p7712_p2, %p7711_p1 }
0x1230   :  { %7262 = vmatpush3.bf16.msra.mxu1 %v7261_v10  ;;  %p7714_p4 = pnand %p7713_p3, %p7707_p0 }
0x1237   :  { %v7638_v4 = vpop.eup %7637 }
0x1238   :  { %v5558_v34 = vadd.f32 1.0, %v7638_v4 }
0x123a   :  { %7639 = vrcp.f32 %v5558_v34 }
0x1244   :  { %v7640_v32 = vpop.eup %7639 }
0x1245   :  { %v5561_v30 = vmul.f32 2.0, %v7640_v32  ;;  %v5566_v6 = vmul.f32 %v7640_v32, %v5564_v61 }
0x1247   :  { %v6494_v53 = vadd.f32 -1.0, %v5561_v30 }
0x1249   :  { %5568 = vrot.lane.b32.xlu0 %v6494_v53, %s7782_s16 }
0x12bb   :  { %v5569_v45 = vpop.permute.xlu0 %5568 }
0x12bc   :  { %v5571_v8 = vmul.f32 %v7640_v32, %v5569_v45 }
0x12be   :  { %5573 = vrot.lane.b32.xlu1 %v5571_v8, %s7779_s21 }
0x1330   :  { %v5574_v54 = vpop.permute.xlu1 %5573 }
0x1331   :  { %v5576_v63 = vadd.f32 %v5574_v54, %v5566_v6 }
0x1333   :  { %7641 = vtanh.f32 %v5576_v63 }
0x133d   :  { %v7642_v21 = vpop.eup %7641 }
0x133e   :  { %5579 = vrot.lane.b32.xlu0 %v7642_v21, %s7782_s16 }
0x13b0   :  { %v5580_v26 = vpop.permute.xlu0 %5579 }
0x13b1   :  { %v5582_v28 = vmul.f32 %v7640_v32, %v5580_v26 }
0x13b3   :  { %v5605_v52 = vrot.slane %v5582_v28, 6  ;;  %5584 = vrot.lane.b32.xlu0 %v5582_v28, %s7779_s21 }
0x13b5   :  { %5606 = vrot.lane.b32.xlu1 %v5605_v52, %s7779_s21 }
0x13b9   :  { %5590 = vrot.lane.b32.xlu1 %v5576_v63, %s7781_s26 }
0x1425   :  { %v5585_v11 = vpop.permute.xlu0 %5584 }
0x1426   :  { %5588 = vst.msk [vmem:[#allocation15 - $0x6] sm:$0xc0] %vm5587_vm8, %v5585_v11 }
0x1427   :  { %v5607_v44 = vpop.permute.xlu1 %5606 }
0x1428   :  { %6607 = vmatmul.mubr.msk.f32.vlgmr.msra.gmra.mrb[94].mxu1 %vm3304_vm2, %v5607_v44 }
0x142b   :  { %v5591_v17 = vpop.permute.xlu1 %5590 }
0x142c   :  { %5593 = vst.msk [vmem:[#allocation17 - $0x6] sm:$0xc0] %vm5587_vm8, %v5591_v17 }
0x142d   :  { %7717 = shalt.err (!%p7714_p4)
}
0x142e   :  { %s7718_s3 = scalar_lea.hbm %s11576_s19, 32 }
0x142f   :  { %p7719_p5 = scmp.ne.s32.totalorder %s11576_s19, %s7718_s3  ;;  %p7722_p6 = scmp.lt.u32.totalorder %s7718_s3, %s11576_s19 }
0x1431   :  { %p7724_p7 = pnand %p7722_p6, %p7719_p5 }
0x1433   :  { %7727 = shalt.err (!%p7724_p7)
}
0x1434   :  { %5701 = dma.vmem_to_hbm [thread:$0]  %s5699_s25, 32, %s11576_s19, [#allocation16]  }
0x1435   :  { %s7784_s9 = smov [#allocation17]  }
0x1436   :  { %s5708_s23 = sshll.u32 %s7784_s9, 4  ;;  %s5709_s23 = int_to_ptr.vmem [resolvable:$true] %s5708_s23 }
0x1437   :  { %s7728_s10 = scalar_lea.vmem %s5709_s23, 32  ;;  %p7733_p9 = scmp.lt.s32.totalorder %s5709_s23, %s5709_s23 }
0x1438   :  { %p7729_p8 = scmp.ne.s32.totalorder %s5709_s23, %s7728_s10  ;;  %p7734_p10 = scmp.lt.s32.totalorder %s7728_s10, %s7728_s10 }
0x143a   :  { %p7735_p11 = por %p7734_p10, %p7733_p9 }
0x143c   :  { %p7736_p12 = pnand %p7735_p11, %p7729_p8 }
0x143e   :  { %7739 = shalt.err (!%p7736_p12)
}
0x143f   :  { %s7740_s0 = scalar_lea.hbm %s11577_s20, 32 }
0x1440   :  { %p7741_p13 = scmp.ne.s32.totalorder %s11577_s20, %s7740_s0  ;;  %p7744_p0 = scmp.lt.u32.totalorder %s7740_s0, %s11577_s20 }
0x1442   :  { %p7746_p1 = pnand %p7744_p0, %p7741_p13 }
0x1444   :  { %7749 = shalt.err (!%p7746_p1)
}
0x1445   :  { %5711 = dma.vmem_to_hbm [thread:$0]  %s5709_s23, 32, %s11577_s20, [#allocation16]   ;;  %v6495_v22 = vld [vmem:[%s11572_s15] ss:$0 sm:$0xff]  ;;  %vm5680_vm9 = vcmask 123904  }
0x1446   :  { %s7785_s24 = smov [#allocation13]  }
0x1447   :  { %s5688_s2 = sshll.u32 %s7785_s24, 4  ;;  %s5689_s2 = int_to_ptr.vmem [resolvable:$true] %s5688_s2 }
0x1448   :  { %s7750_s14 = scalar_lea.vmem %s5689_s2, 32  ;;  %p7755_p3 = scmp.lt.s32.totalorder %s5689_s2, %s5689_s2 }
0x1449   :  { %p7751_p2 = scmp.ne.s32.totalorder %s5689_s2, %s7750_s14  ;;  %p7756_p4 = scmp.lt.s32.totalorder %s7750_s14, %s7750_s14 }
0x144b   :  { %p7757_p5 = por %p7756_p4, %p7755_p3 }
0x144d   :  { %p7758_p6 = pnand %p7757_p5, %p7751_p2 }
0x14fb   :  { %v5676_v23 = vpop.f32.mrb[94].mxu1 }
0x14fc   :  { %v5677_v40 = vadd.f32 %v6495_v22, %v5676_v23  ;;  %v6608_v24 = vpop.f32.mrb[95].mxu1 }
0x14fe   :  { %5681 = vst.msk [vmem:[#allocation13] sm:$0x3] %vm5680_vm9, %v5677_v40 }
0x14ff   :  { %7761 = shalt.err (!%p7758_p6)
}
0x1500   :  { %s7762_s11 = scalar_lea.hbm %s11575_s18, 32 }
0x1501   :  { %p7763_p7 = scmp.ne.s32.totalorder %s11575_s18, %s7762_s11  ;;  %p7766_p8 = scmp.lt.u32.totalorder %s7762_s11, %s11575_s18 }
0x1503   :  { %p7768_p9 = pnand %p7766_p8, %p7763_p7 }
0x1505   :  { %7771 = shalt.err (!%p7768_p9)
}
0x1506   :  { %5691 = dma.vmem_to_hbm [thread:$0]  %s5689_s2, 32, %s11575_s18, [#allocation14]  }
0x1507   :  { %7772 = dma.done.wait [#allocation14], 32  }
0x1508   :  { %7773 = vsyncadd [#allocation14], 4294967264 }
0x1509   :  { %7774 = dma.done.wait [#allocation16], 64  }
0x150a   :  { %7775 = vsyncadd [#allocation16], 4294967232 }
0x150b   :  { %5721 = vsyncpa [#allocation14], 1 }
0x150c   :  { %5722 = vsyncpa [#allocation16], 1 }

</bundles_post_ra>
